<compile_context>
chip_gen: v7x
topology: tpu7x:2x2x1
jax: 0.10.0
libtpu: 0.0.40
codegen_flags: <defaults>
</compile_context>

<pallas_src>
import math
from functools import partial

import jax
import jax.numpy as jnp
from jax.experimental import pallas as pl
from jax.experimental.pallas import tpu as pltpu

VMEM_LIMIT = 64 * 1024 * 1024


# ------------------------------- helpers -------------------------------------

def _softplus(x):
    # matches torch.nn.functional.softplus(threshold=20)
    return jnp.where(x > 20.0, x, jnp.log1p(jnp.exp(jnp.minimum(x, 20.0))))


def _pick_tile(total, target, mults=(16, 8)):
    """Largest divisor of `total` <= target that is a multiple of one of `mults`
    (falls back to the full extent, which always satisfies tiling rules)."""
    if total <= target:
        return total
    for m in mults:
        for d in range(min(target, total), 0, -1):
            if total % d == 0 and d % m == 0:
                return d
    return total


# ----------------------------- Pallas kernels --------------------------------

def _in_x_proj_kernel(x_ref, w_in_ref, wall_ref, kv_ref, proj_ref):
    # x_ref: (Tm, d_model) bf16; w_in: (d_model, 2*Dh) bf16; wall: (Dh, K*(Dh+2N)) bf16
    dh = wall_ref.shape[0]
    x = x_ref[...]
    kv = jnp.dot(x, w_in_ref[...], preferred_element_type=jnp.float32)   # (Tm, 2Dh)
    kv = kv * jax.nn.sigmoid(kv)                                         # SiLU
    kv_ref[...] = kv                                                     # [key | value]
    # folded x_proj + dt_proj for all 4 directions, one wide lane-dense output
    proj_ref[...] = jnp.dot(kv[:, :dh].astype(jnp.bfloat16), wall_ref[...],
                            preferred_element_type=jnp.float32)


def _scan_kernel(u_ref, dr_ref, b_ref, c_ref, a_ref, dv_ref, bias_ref,
                 y_ref, h_ref, da_ref, du_ref, *, unroll):
    # Per (batch, L-chunk) grid step, K=4 directions fused:
    #   u_ref, dr_ref : (Lc, K, Dh)    key / raw delta (direction-ordered)
    #   b_ref, c_ref  : (Lc, K, N)
    #   a_ref         : (K, N, Dh)     A (negative) per direction
    #   dv_ref, bias  : (K, Dh)        skip connection D / dt bias
    #   y_ref         : (Lc, K, Dh)
    # scratch: h (K, N, Dh) carried across chunks; da (Lc, K, N, Dh); du (Lc, K, Dh)
    @pl.when(pl.program_id(1) == 0)
    def _():
        h_ref[...] = jnp.zeros_like(h_ref)

    delta = _softplus(dr_ref[...] + bias_ref[...][None])          # (Lc, K, Dh)
    da_ref[...] = jnp.exp(delta[:, :, None, :] * a_ref[...][None])
    du_ref[...] = delta * u_ref[...]                              # delta * u
    dv = dv_ref[...]                                              # (K, Dh)

    n_blocks = u_ref.shape[0] // unroll

    @pl.loop(0, n_blocks)
    def _(i):
        base = pl.multiple_of(i * unroll, unroll)
        h = h_ref[...]                                            # (K, N, Dh)
        for j in range(unroll):                                   # manual unroll
            l = base + j
            dbu = du_ref[l][:, None, :] * b_ref[l][..., None]     # (K, N, Dh)
            h = da_ref[l] * h + dbu
            y_ref[l] = jnp.sum(h * c_ref[l][..., None], axis=1) + u_ref[l] * dv
        h_ref[...] = h                                            # one store / group


def _norm_out_kernel(y_ref, v_ref, g_ref, b_ref, w_ref, o_ref, *, eps):
    # channels-wise LayerNorm (biased var) over Dh, * value, then out_proj.
    y = y_ref[...]
    mu = jnp.mean(y, axis=-1, keepdims=True)
    var = jnp.mean(jnp.square(y - mu), axis=-1, keepdims=True)
    yn = (y - mu) * jax.lax.rsqrt(var + eps)
    z = (g_ref[...] * yn + b_ref[...]) * v_ref[...]
    o_ref[...] = jnp.dot(z.astype(jnp.bfloat16), w_ref[...],
                         preferred_element_type=jnp.float32)


# ----------------------------- kernel wrappers --------------------------------

def in_and_x_proj(x_flat_bf, w_in_bf, wall_bf, Tm):
    M, d_model = x_flat_bf.shape
    Dh2 = w_in_bf.shape[1]
    Kp = wall_bf.shape[1]
    return pl.pallas_call(
        _in_x_proj_kernel,
        grid=(M // Tm,),
        in_specs=[
            pl.BlockSpec((Tm, d_model), lambda i: (i, 0)),
            pl.BlockSpec((d_model, Dh2), lambda i: (0, 0)),
            pl.BlockSpec((Dh2 // 2, Kp), lambda i: (0, 0)),
        ],
        out_specs=[
            pl.BlockSpec((Tm, Dh2), lambda i: (i, 0)),
            pl.BlockSpec((Tm, Kp), lambda i: (i, 0)),
        ],
        out_shape=[
            jax.ShapeDtypeStruct((M, Dh2), jnp.float32),      # [key | value], SiLU'd
            jax.ShapeDtypeStruct((M, Kp), jnp.float32),       # [dt | B | C] x 4 dirs
        ],
        compiler_params=pltpu.CompilerParams(
            dimension_semantics=("parallel",),
            vmem_limit_bytes=VMEM_LIMIT),
    )(x_flat_bf, w_in_bf, wall_bf)


def selective_scan_fused(u, dr, bs, cs, a_arr, d_arr, bias_arr, Lc, unroll):
    B, L, K, Dh = u.shape
    N = a_arr.shape[1]
    return pl.pallas_call(
        partial(_scan_kernel, unroll=unroll),
        grid=(B, L // Lc),
        in_specs=[
            pl.BlockSpec((None, Lc, K, Dh), lambda b, c: (b, c, 0, 0)),   # u
            pl.BlockSpec((None, Lc, K, Dh), lambda b, c: (b, c, 0, 0)),   # delta raw
            pl.BlockSpec((None, Lc, K, N), lambda b, c: (b, c, 0, 0)),    # B
            pl.BlockSpec((None, Lc, K, N), lambda b, c: (b, c, 0, 0)),    # C
            pl.BlockSpec((K, N, Dh), lambda b, c: (0, 0, 0)),             # A
            pl.BlockSpec((K, Dh), lambda b, c: (0, 0)),                   # D
            pl.BlockSpec((K, Dh), lambda b, c: (0, 0)),                   # dt bias
        ],
        out_specs=pl.BlockSpec((None, Lc, K, Dh), lambda b, c: (b, c, 0, 0)),
        out_shape=jax.ShapeDtypeStruct((B, L, K, Dh), jnp.float32),
        scratch_shapes=[
            pltpu.VMEM((K, N, Dh), jnp.float32),          # h, carried across chunks
            pltpu.VMEM((Lc, K, N, Dh), jnp.float32),      # deltaA (batched exp)
            pltpu.VMEM((Lc, K, Dh), jnp.float32),         # delta * u
        ],
        compiler_params=pltpu.CompilerParams(
            dimension_semantics=("parallel", "arbitrary"),
            vmem_limit_bytes=VMEM_LIMIT),
    )(u, dr, bs, cs, a_arr, d_arr, bias_arr)


def norm_mul_out(y, v, g, b, w_out_t_bf, Tm, eps):
    M, Dh = y.shape
    d_model = w_out_t_bf.shape[1]
    return pl.pallas_call(
        partial(_norm_out_kernel, eps=eps),
        grid=(M // Tm,),
        in_specs=[
            pl.BlockSpec((Tm, Dh), lambda i: (i, 0)),
            pl.BlockSpec((Tm, Dh), lambda i: (i, 0)),
            pl.BlockSpec((1, Dh), lambda i: (0, 0)),
            pl.BlockSpec((1, Dh), lambda i: (0, 0)),
            pl.BlockSpec((Dh, d_model), lambda i: (0, 0)),
        ],
        out_specs=pl.BlockSpec((Tm, d_model), lambda i: (i, 0)),
        out_shape=jax.ShapeDtypeStruct((M, d_model), jnp.float32),
        compiler_params=pltpu.CompilerParams(
            dimension_semantics=("parallel",),
            vmem_limit_bytes=VMEM_LIMIT),
    )(y, v, g, b, w_out_t_bf)


# -------------------------------- SS2D forward --------------------------------

def ss2d_forward(x, params, *, m_tile=512, l_chunk=256):
    B, C, H, W = x.shape            # NCHW, C == d_model
    L = H * W
    K = 4
    Dh = params["d_inner"]
    N = params["d_state"]
    R = params["dt_rank"]
    M = B * L
    P = Dh + 2 * N                  # per-direction projection width
    eps = 1e-6

    Tm = _pick_tile(M, m_tile)
    Lc = _pick_tile(L, l_chunk)
    unroll = next(u for u in (8, 4, 2, 1) if Lc % u == 0)

    # ---- weight preprocessing (tiny; dt_proj folded into x_proj) ------------
    w_in = params["in_proj_weight"]                                  # (2*Dh, d_model)
    w_in_t = jnp.transpose(w_in).astype(jnp.bfloat16)                # (d_model, 2*Dh)
    Wx = params["x_proj_weight"]                                     # (K, R+2N, Dh)
    Wdt = params["dt_projs_weight"]                                  # (K, Dh, R)
    w_dt_eff = jnp.einsum("krd,ker->kde", Wx[:, :R, :], Wdt)         # (K, Dh, Dh)
    w_b = jnp.transpose(Wx[:, R:R + N, :], (0, 2, 1))                # (K, Dh, N)
    w_c = jnp.transpose(Wx[:, R + N:, :], (0, 2, 1))                 # (K, Dh, N)
    w_all = jnp.concatenate([w_dt_eff, w_b, w_c], axis=2)            # (K, Dh, P)
    w_all = jnp.transpose(w_all, (1, 0, 2)).reshape(Dh, K * P).astype(jnp.bfloat16)

    # ---- fused in_proj + SiLU + (x_proj / folded dt_proj), M-tiled ----------
    x_flat = jnp.transpose(x, (0, 2, 3, 1)).reshape(M, C).astype(jnp.bfloat16)
    kv_flat, proj_flat = in_and_x_proj(x_flat, w_in_t, w_all, Tm)
    key_flat = kv_flat[:, :Dh]                                       # (M, Dh)
    value_flat = kv_flat[:, Dh:]                                     # (M, Dh)

    # ---- build per-direction sequences (row permutations / flips; glue) -----
    key_bhwd = key_flat.reshape(B, H, W, Dh)
    proj = proj_flat.reshape(B, H, W, K, P)

    def dirs(t):       # (B, H, W, F) -> (B, L, K, F); same features for all dirs
        d0 = t.reshape(B, L, -1)
        d1 = jnp.transpose(t, (0, 2, 1, 3)).reshape(B, L, -1)
        return jnp.stack([d0, d1, jnp.flip(d0, axis=1), jnp.flip(d1, axis=1)], axis=2)

    def dirs_k(t):     # (B, H, W, K, F) -> (B, L, K, F); dir k uses its own slice k
        d0 = t.reshape(B, L, K, -1)
        d1 = jnp.transpose(t, (0, 2, 1, 3, 4)).reshape(B, L, K, -1)
        return jnp.stack([d0[:, :, 0], d1[:, :, 1],
                          jnp.flip(d0[:, :, 2], axis=1),
                          jnp.flip(d1[:, :, 3], axis=1)], axis=2)

    u_s = dirs(key_bhwd)                               # (B, L, K, Dh)
    dr_s = dirs_k(proj[..., :Dh])                      # (B, L, K, Dh)
    b_s = dirs_k(proj[..., Dh:Dh + N])                 # (B, L, K, N)
    c_s = dirs_k(proj[..., Dh + N:])                   # (B, L, K, N)

    a_arr = jnp.transpose((-jnp.exp(params["A_logs"])).reshape(K, Dh, N), (0, 2, 1))
    d_arr = params["Ds"].reshape(K, Dh)
    bias_arr = params["dt_projs_bias"].reshape(K, Dh)

    # ---- selective scan: K fused in one kernel, chunked over L --------------
    y_dirs = selective_scan_fused(u_s, dr_s, b_s, c_s, a_arr, d_arr, bias_arr,
                                  Lc, unroll)          # (B, L, K, Dh)

    # ---- merge the 4 directional outputs back to (h, w) order (glue) --------
    def wh_to_hw(t):   # (B, L, Dh) with L = w*H + h  ->  L = h*W + w
        return jnp.transpose(t.reshape(B, W, H, Dh), (0, 2, 1, 3)).reshape(B, L, Dh)

    y = (y_dirs[:, :, 0]
         + jnp.flip(y_dirs[:, :, 2], axis=1)
         + wh_to_hw(y_dirs[:, :, 1])
         + wh_to_hw(jnp.flip(y_dirs[:, :, 3], axis=1))).reshape(M, Dh)

    # ---- LayerNorm (channels) * value, then out_proj (Pallas, M-tiled) ------
    out_flat = norm_mul_out(
        y, value_flat,
        params["ln_weight"].reshape(1, Dh),
        params["ln_bias"].reshape(1, Dh),
        jnp.transpose(params["out_proj_weight"]).astype(jnp.bfloat16),
        Tm, eps)                                       # (M, d_model)
    out = jnp.transpose(out_flat.reshape(B, H, W, C), (0, 3, 1, 2))   # back to NCHW
    return out


# ------------------------------- parameter init --------------------------------

def init_params(key, d_model=32, d_state=16, expand=2,
                dt_min=1e-3, dt_max=0.1, dt_scale=1.0, dt_init_floor=1e-4):
    d_inner = int(expand * d_model)
    dt_rank = math.ceil(d_model / 16)
    K = 4
    ks = jax.random.split(key, 6)

    def xavier_normal(k, shape):
        fan_out, fan_in = shape
        std = math.sqrt(2.0 / (fan_in + fan_out))
        return std * jax.random.normal(k, shape, jnp.float32)

    in_proj_weight = xavier_normal(ks[0], (2 * d_inner, d_model))
    out_proj_weight = xavier_normal(ks[1], (d_model, d_inner))

    bound = 1.0 / math.sqrt(d_inner)
    x_proj_weight = jax.random.uniform(
        ks[2], (K, dt_rank + 2 * d_state, d_inner), jnp.float32, -bound, bound)

    dt_std = (dt_rank ** -0.5) * dt_scale
    dt_projs_weight = jax.random.uniform(
        ks[3], (K, d_inner, dt_rank), jnp.float32, -dt_std, dt_std)

    u = jax.random.uniform(ks[4], (K, d_inner), jnp.float32)
    dt = jnp.exp(u * (math.log(dt_max) - math.log(dt_min)) + math.log(dt_min))
    dt = jnp.maximum(dt, dt_init_floor)
    dt_projs_bias = dt + jnp.log(-jnp.expm1(-dt))                       # inverse softplus

    A = jnp.arange(1, d_state + 1, dtype=jnp.float32)
    A_logs = jnp.tile(jnp.log(A)[None, :], (K * d_inner, 1))            # (K*Dh, N)
    Ds = jnp.ones((K * d_inner,), jnp.float32)

    return dict(
        d_inner=d_inner, d_state=d_state, dt_rank=dt_rank,
        in_proj_weight=in_proj_weight, out_proj_weight=out_proj_weight,
        x_proj_weight=x_proj_weight, dt_projs_weight=dt_projs_weight,
        dt_projs_bias=dt_projs_bias, A_logs=A_logs, Ds=Ds,
        ln_weight=jnp.ones((d_inner,), jnp.float32),
        ln_bias=jnp.zeros((d_inner,), jnp.float32),
    )


# ------------------------------------ main --------------------------------------

if __name__ == "__main__":
    key = jax.random.PRNGKey(0)
    pkey, xkey = jax.random.split(key)

    B, d_model, H, W = 2, 32, 8, 8
    params = init_params(pkey, d_model=d_model)
    x = jax.random.normal(xkey, (B, d_model, H, W), jnp.float32)       # NCHW like PyTorch

    fwd = jax.jit(lambda xx: ss2d_forward(xx, params))
    out = jax.block_until_ready(fwd(x))

    assert out.shape == (B, d_model, H, W), out.shape
    assert out.dtype == jnp.float32
    assert bool(jnp.all(jnp.isfinite(out)))
    print("KERNEL_OK")
</pallas_src>

<mosaic_0001>
module attributes {stable_mosaic.version = 11 : i64} {
  func.func @_in_x_proj_kernel(%arg0: i32, %arg1: memref<128x32xbf16, #tpu.memory_space<vmem>>, %arg2: memref<32x128xbf16, #tpu.memory_space<vmem>>, %arg3: memref<64x384xbf16, #tpu.memory_space<vmem>>, %arg4: memref<128x128xf32, #tpu.memory_space<vmem>>, %arg5: memref<128x384xf32, #tpu.memory_space<vmem>>) attributes {dimension_semantics = [#tpu.dimension_semantics<parallel>], iteration_bounds = array<i64: 1>, scalar_prefetch = 0 : i64, scratch_operands = 0 : i64, tpu.core_type = #tpu.core_type<tc>, window_params = [{transform_indices = @transform_0, window_bounds = array<i64: 128, 32>}, {pipeline_mode = #tpu.pipeline_mode<synchronous>, transform_indices = @transform_1, window_bounds = array<i64: 32, 128>}, {pipeline_mode = #tpu.pipeline_mode<synchronous>, transform_indices = @transform_2, window_bounds = array<i64: 64, 384>}, {transform_indices = @transform_3, window_bounds = array<i64: 128, 128>}, {transform_indices = @transform_4, window_bounds = array<i64: 128, 384>}]} {
    %c0 = arith.constant 0 : index
    %c0_0 = arith.constant 0 : index
    %0 = vector.load %arg1[%c0, %c0_0] : memref<128x32xbf16, #tpu.memory_space<vmem>>, vector<128x32xbf16>
    %c0_1 = arith.constant 0 : index
    %c0_2 = arith.constant 0 : index
    %1 = vector.load %arg2[%c0_1, %c0_2] : memref<32x128xbf16, #tpu.memory_space<vmem>>, vector<32x128xbf16>
    %cst = arith.constant dense<0.000000e+00> : vector<128x128xf32>
    %2 = tpu.matmul %0, %1, %cst {dimension_numbers = #tpu.dot_dimension_numbers<[1], [0], [0], [1], [0, 0, 1, 1], [], []>} : vector<128x32xbf16>, vector<32x128xbf16>, vector<128x128xf32> -> vector<128x128xf32>
    %3 = arith.negf %2 : vector<128x128xf32>
    %4 = math.exp %3 : vector<128x128xf32>
    %cst_3 = arith.constant 1.000000e+00 : f32
    %5 = vector.broadcast %cst_3 : f32 to vector<128x128xf32>
    %6 = arith.addf %5, %4 : vector<128x128xf32>
    %7 = arith.divf %5, %6 : vector<128x128xf32>
    %8 = arith.mulf %2, %7 : vector<128x128xf32>
    %c0_4 = arith.constant 0 : index
    %c0_5 = arith.constant 0 : index
    %9 = vector.load %arg4[%c0_4, %c0_5] : memref<128x128xf32, #tpu.memory_space<vmem>>, vector<128x128xf32>
    tpu.vector_store %arg4[%c0_4, %c0_5], %8 {strides = array<i32>} : memref<128x128xf32, #tpu.memory_space<vmem>>, vector<128x128xf32>,
    %10 = vector.extract_strided_slice %8 {offsets = [0, 0], sizes = [128, 64], strides = [1, 1]} : vector<128x128xf32> to vector<128x64xf32>
    %11 = arith.truncf %10 : vector<128x64xf32> to vector<128x64xbf16>
    %c0_6 = arith.constant 0 : index
    %c0_7 = arith.constant 0 : index
    %12 = vector.load %arg3[%c0_6, %c0_7] : memref<64x384xbf16, #tpu.memory_space<vmem>>, vector<64x384xbf16>
    %cst_8 = arith.constant dense<0.000000e+00> : vector<128x384xf32>
    %13 = tpu.matmul %11, %12, %cst_8 {dimension_numbers = #tpu.dot_dimension_numbers<[1], [0], [0], [1], [0, 0, 1, 1], [], []>} : vector<128x64xbf16>, vector<64x384xbf16>, vector<128x384xf32> -> vector<128x384xf32>
    %c0_9 = arith.constant 0 : index
    %c0_10 = arith.constant 0 : index
    %14 = vector.load %arg5[%c0_9, %c0_10] : memref<128x384xf32, #tpu.memory_space<vmem>>, vector<128x384xf32>
    tpu.vector_store %arg5[%c0_9, %c0_10], %13 {strides = array<i32>} : memref<128x384xf32, #tpu.memory_space<vmem>>, vector<128x384xf32>,
    return
  }
  func.func @transform_0(%arg0: i32) -> (i32, i32) {
    %c0_i32 = arith.constant 0 : i32
    %c0_i32_0 = arith.constant 0 : i32
    return %arg0, %c0_i32 : i32, i32
  }
  func.func @transform_1(%arg0: i32) -> (i32, i32) {
    %c0_i32 = arith.constant 0 : i32
    %c0_i32_0 = arith.constant 0 : i32
    %c0_i32_1 = arith.constant 0 : i32
    return %c0_i32, %c0_i32_0 : i32, i32
  }
  func.func @transform_2(%arg0: i32) -> (i32, i32) {
    %c0_i32 = arith.constant 0 : i32
    %c0_i32_0 = arith.constant 0 : i32
    %c0_i32_1 = arith.constant 0 : i32
    return %c0_i32, %c0_i32_0 : i32, i32
  }
  func.func @transform_3(%arg0: i32) -> (i32, i32) {
    %c0_i32 = arith.constant 0 : i32
    %c0_i32_0 = arith.constant 0 : i32
    return %arg0, %c0_i32 : i32, i32
  }
  func.func @transform_4(%arg0: i32) -> (i32, i32) {
    %c0_i32 = arith.constant 0 : i32
    %c0_i32_0 = arith.constant 0 : i32
    return %arg0, %c0_i32 : i32, i32
  }
}

module attributes {stable_mosaic.version = 11 : i64} {
  func.func @_scan_kernel(%arg0: i32, %arg1: i32, %arg2: memref<1x64x4x64xf32, #tpu.memory_space<vmem>>, %arg3: memref<1x64x4x64xf32, #tpu.memory_space<vmem>>, %arg4: memref<1x64x4x16xf32, #tpu.memory_space<vmem>>, %arg5: memref<1x64x4x16xf32, #tpu.memory_space<vmem>>, %arg6: memref<4x16x64xf32, #tpu.memory_space<vmem>>, %arg7: memref<4x64xf32, #tpu.memory_space<vmem>>, %arg8: memref<4x64xf32, #tpu.memory_space<vmem>>, %arg9: memref<1x64x4x64xf32, #tpu.memory_space<vmem>>, %arg10: memref<4x16x64xf32, #tpu.memory_space<vmem>>, %arg11: memref<64x4x16x64xf32, #tpu.memory_space<vmem>>, %arg12: memref<64x4x64xf32, #tpu.memory_space<vmem>>) attributes {dimension_semantics = [#tpu.dimension_semantics<parallel>, #tpu.dimension_semantics<arbitrary>], iteration_bounds = array<i64: 2, 1>, scalar_prefetch = 0 : i64, scratch_operands = 3 : i64, tpu.core_type = #tpu.core_type<tc>, window_params = [{transform_indices = @transform_0, window_bounds = array<i64: 1, 64, 4, 64>}, {transform_indices = @transform_1, window_bounds = array<i64: 1, 64, 4, 64>}, {transform_indices = @transform_2, window_bounds = array<i64: 1, 64, 4, 16>}, {transform_indices = @transform_3, window_bounds = array<i64: 1, 64, 4, 16>}, {pipeline_mode = #tpu.pipeline_mode<synchronous>, transform_indices = @transform_4, window_bounds = array<i64: 4, 16, 64>}, {pipeline_mode = #tpu.pipeline_mode<synchronous>, transform_indices = @transform_5, window_bounds = array<i64: 4, 64>}, {pipeline_mode = #tpu.pipeline_mode<synchronous>, transform_indices = @transform_6, window_bounds = array<i64: 4, 64>}, {transform_indices = @transform_7, window_bounds = array<i64: 1, 64, 4, 64>}]} {
    %c0_i32 = arith.constant 0 : i32
    %0 = arith.cmpi eq, %arg1, %c0_i32 : i32
    %1 = arith.extui %0 : i1 to i32
    %c0_i32_0 = arith.constant 0 : i32
    %2 = arith.cmpi ne, %1, %c0_i32_0 : i32
    scf.if %2 {
      %cst_25 = arith.constant 0.000000e+00 : f32
      %30 = vector.broadcast %cst_25 : f32 to vector<4x16x64xf32>
      %c0_26 = arith.constant 0 : index
      %c0_27 = arith.constant 0 : index
      %c0_28 = arith.constant 0 : index
      %31 = vector.load %arg10[%c0_26, %c0_27, %c0_28] : memref<4x16x64xf32, #tpu.memory_space<vmem>>, vector<4x16x64xf32>
      tpu.vector_store %arg10[%c0_26, %c0_27, %c0_28], %30 {strides = array<i32>} : memref<4x16x64xf32, #tpu.memory_space<vmem>>, vector<4x16x64xf32>,
    } else {
    }
    %c0 = arith.constant 0 : index
    %c0_1 = arith.constant 0 : index
    %c0_2 = arith.constant 0 : index
    %c0_3 = arith.constant 0 : index
    %3 = vector.load %arg3[%c0, %c0_1, %c0_2, %c0_3] : memref<1x64x4x64xf32, #tpu.memory_space<vmem>>, vector<1x64x4x64xf32>
    %4 = vector.shape_cast %3 : vector<1x64x4x64xf32> to vector<64x4x64xf32>
    %c0_4 = arith.constant 0 : index
    %c0_5 = arith.constant 0 : index
    %5 = vector.load %arg8[%c0_4, %c0_5] : memref<4x64xf32, #tpu.memory_space<vmem>>, vector<4x64xf32>
    %6 = vector.shape_cast %5 : vector<4x64xf32> to vector<1x4x64xf32>
    %7 = vector.broadcast %6 : vector<1x4x64xf32> to vector<64x4x64xf32>
    %8 = arith.addf %4, %7 : vector<64x4x64xf32>
    %cst = arith.constant 2.000000e+01 : f32
    %9 = vector.broadcast %cst : f32 to vector<64x4x64xf32>
    %10 = arith.cmpf ogt, %8, %9 : vector<64x4x64xf32>
    %cst_6 = arith.constant 2.000000e+01 : f32
    %11 = vector.broadcast %cst_6 : f32 to vector<64x4x64xf32>
    %12 = arith.minimumf %8, %11 : vector<64x4x64xf32>
    %13 = math.exp %12 : vector<64x4x64xf32>
    %14 = math.log1p %13 : vector<64x4x64xf32>
    %15 = arith.select %10, %8, %14 : vector<64x4x64xi1>, vector<64x4x64xf32>
    %16 = vector.shape_cast %15 : vector<64x4x64xf32> to vector<64x4x1x64xf32>
    %c0_7 = arith.constant 0 : index
    %c0_8 = arith.constant 0 : index
    %c0_9 = arith.constant 0 : index
    %17 = vector.load %arg6[%c0_7, %c0_8, %c0_9] : memref<4x16x64xf32, #tpu.memory_space<vmem>>, vector<4x16x64xf32>
    %18 = vector.shape_cast %17 : vector<4x16x64xf32> to vector<1x4x16x64xf32>
    %19 = vector.broadcast %16 : vector<64x4x1x64xf32> to vector<64x4x16x64xf32>
    %20 = vector.broadcast %18 : vector<1x4x16x64xf32> to vector<64x4x16x64xf32>
    %21 = arith.mulf %19, %20 : vector<64x4x16x64xf32>
    %22 = math.exp %21 : vector<64x4x16x64xf32>
    %c0_10 = arith.constant 0 : index
    %c0_11 = arith.constant 0 : index
    %c0_12 = arith.constant 0 : index
    %c0_13 = arith.constant 0 : index
    %23 = vector.load %arg11[%c0_10, %c0_11, %c0_12, %c0_13] : memref<64x4x16x64xf32, #tpu.memory_space<vmem>>, vector<64x4x16x64xf32>
    tpu.vector_store %arg11[%c0_10, %c0_11, %c0_12, %c0_13], %22 {strides = array<i32>} : memref<64x4x16x64xf32, #tpu.memory_space<vmem>>, vector<64x4x16x64xf32>,
    %c0_14 = arith.constant 0 : index
    %c0_15 = arith.constant 0 : index
    %c0_16 = arith.constant 0 : index
    %c0_17 = arith.constant 0 : index
    %24 = vector.load %arg2[%c0_14, %c0_15, %c0_16, %c0_17] : memref<1x64x4x64xf32, #tpu.memory_space<vmem>>, vector<1x64x4x64xf32>
    %25 = vector.shape_cast %24 : vector<1x64x4x64xf32> to vector<64x4x64xf32>
    %26 = arith.mulf %15, %25 : vector<64x4x64xf32>
    %c0_18 = arith.constant 0 : index
    %c0_19 = arith.constant 0 : index
    %c0_20 = arith.constant 0 : index
    %27 = vector.load %arg12[%c0_18, %c0_19, %c0_20] : memref<64x4x64xf32, #tpu.memory_space<vmem>>, vector<64x4x64xf32>
    tpu.vector_store %arg12[%c0_18, %c0_19, %c0_20], %26 {strides = array<i32>} : memref<64x4x64xf32, #tpu.memory_space<vmem>>, vector<64x4x64xf32>,
    %c0_21 = arith.constant 0 : index
    %c0_22 = arith.constant 0 : index
    %28 = vector.load %arg7[%c0_21, %c0_22] : memref<4x64xf32, #tpu.memory_space<vmem>>, vector<4x64xf32>
    %c0_i32_23 = arith.constant 0 : i32
    %c8_i32 = arith.constant 8 : i32
    %29 = arith.addi %c0_i32_23, %c8_i32 : i32
    %c1_i32 = arith.constant 1 : i32
    scf.for %arg13 = %c0_i32_23 to %29 step %c1_i32  : i32 {
      %c1_i32_25 = arith.constant 1 : i32
      %30 = arith.muli %arg13, %c1_i32_25 : i32
      %c0_i32_26 = arith.constant 0 : i32
      %31 = arith.addi %c0_i32_26, %30 : i32
      %c8_i32_27 = arith.constant 8 : i32
      %32 = arith.muli %31, %c8_i32_27 : i32
      %33 = tpu.assume_multiple %32, 8 : i32
      %c0_28 = arith.constant 0 : index
      %c0_29 = arith.constant 0 : index
      %c0_30 = arith.constant 0 : index
      %34 = vector.load %arg10[%c0_28, %c0_29, %c0_30] : memref<4x16x64xf32, #tpu.memory_space<vmem>>, vector<4x16x64xf32>
      %c0_i32_31 = arith.constant 0 : i32
      %35 = arith.addi %33, %c0_i32_31 : i32
      %36 = arith.index_cast %35 : i32 to index
      %c0_32 = arith.constant 0 : index
      %c0_33 = arith.constant 0 : index
      %37 = vector.load %arg12[%36, %c0_32, %c0_33] : memref<64x4x64xf32, #tpu.memory_space<vmem>>, vector<1x4x64xf32>
      %38 = vector.shape_cast %37 : vector<1x4x64xf32> to vector<4x64xf32>
      %39 = vector.shape_cast %38 : vector<4x64xf32> to vector<4x1x64xf32>
      %c0_34 = arith.constant 0 : index
      %40 = arith.index_cast %35 : i32 to index
      %c0_35 = arith.constant 0 : index
      %c0_36 = arith.constant 0 : index
      %41 = vector.load %arg4[%c0_34, %40, %c0_35, %c0_36] : memref<1x64x4x16xf32, #tpu.memory_space<vmem>>, vector<1x1x4x16xf32>
      %42 = vector.shape_cast %41 : vector<1x1x4x16xf32> to vector<4x16xf32>
      %43 = vector.shape_cast %42 : vector<4x16xf32> to vector<4x16x1xf32>
      %44 = vector.broadcast %39 : vector<4x1x64xf32> to vector<4x16x64xf32>
      %45 = vector.broadcast %43 : vector<4x16x1xf32> to vector<4x16x64xf32>
      %46 = arith.mulf %44, %45 : vector<4x16x64xf32>
      %47 = arith.index_cast %35 : i32 to index
      %c0_37 = arith.constant 0 : index
      %c0_38 = arith.constant 0 : index
      %c0_39 = arith.constant 0 : index
      %48 = vector.load %arg11[%47, %c0_37, %c0_38, %c0_39] : memref<64x4x16x64xf32, #tpu.memory_space<vmem>>, vector<1x4x16x64xf32>
      %49 = vector.shape_cast %48 : vector<1x4x16x64xf32> to vector<4x16x64xf32>
      %50 = arith.mulf %49, %34 : vector<4x16x64xf32>
      %51 = arith.addf %50, %46 : vector<4x16x64xf32>
      %c0_40 = arith.constant 0 : index
      %52 = arith.index_cast %35 : i32 to index
      %c0_41 = arith.constant 0 : index
      %c0_42 = arith.constant 0 : index
      %53 = vector.load %arg5[%c0_40, %52, %c0_41, %c0_42] : memref<1x64x4x16xf32, #tpu.memory_space<vmem>>, vector<1x1x4x16xf32>
      %54 = vector.shape_cast %53 : vector<1x1x4x16xf32> to vector<4x16xf32>
      %55 = vector.shape_cast %54 : vector<4x16xf32> to vector<4x16x1xf32>
      %56 = vector.broadcast %55 : vector<4x16x1xf32> to vector<4x16x64xf32>
      %57 = arith.mulf %51, %56 : vector<4x16x64xf32>
      %cst_43 = arith.constant dense<0.000000e+00> : vector<4x64xf32>
      %58 = vector.multi_reduction <add>, %57, %cst_43 [1] : vector<4x16x64xf32> to vector<4x64xf32>
      %c0_44 = arith.constant 0 : index
      %59 = arith.index_cast %35 : i32 to index
      %c0_45 = arith.constant 0 : index
      %c0_46 = arith.constant 0 : index
      %60 = vector.load %arg2[%c0_44, %59, %c0_45, %c0_46] : memref<1x64x4x64xf32, #tpu.memory_space<vmem>>, vector<1x1x4x64xf32>
      %61 = vector.shape_cast %60 : vector<1x1x4x64xf32> to vector<4x64xf32>
      %62 = arith.mulf %61, %28 : vector<4x64xf32>
      %63 = arith.addf %58, %62 : vector<4x64xf32>
      %c0_47 = arith.constant 0 : index
      %64 = arith.index_cast %35 : i32 to index
      %c0_48 = arith.constant 0 : index
      %c0_49 = arith.constant 0 : index
      %65 = vector.load %arg9[%c0_47, %64, %c0_48, %c0_49] : memref<1x64x4x64xf32, #tpu.memory_space<vmem>>, vector<1x1x4x64xf32>
      %66 = vector.shape_cast %65 : vector<1x1x4x64xf32> to vector<4x64xf32>
      %67 = vector.shape_cast %63 : vector<4x64xf32> to vector<1x1x4x64xf32>
      tpu.vector_store %arg9[%c0_47, %64, %c0_48, %c0_49], %67 {strides = array<i32>} : memref<1x64x4x64xf32, #tpu.memory_space<vmem>>, vector<1x1x4x64xf32>,
      %c1_i32_50 = arith.constant 1 : i32
      %68 = arith.addi %33, %c1_i32_50 : i32
      %69 = arith.index_cast %68 : i32 to index
      %c0_51 = arith.constant 0 : index
      %c0_52 = arith.constant 0 : index
      %70 = vector.load %arg12[%69, %c0_51, %c0_52] : memref<64x4x64xf32, #tpu.memory_space<vmem>>, vector<1x4x64xf32>
      %71 = vector.shape_cast %70 : vector<1x4x64xf32> to vector<4x64xf32>
      %72 = vector.shape_cast %71 : vector<4x64xf32> to vector<4x1x64xf32>
      %c0_53 = arith.constant 0 : index
      %73 = arith.index_cast %68 : i32 to index
      %c0_54 = arith.constant 0 : index
      %c0_55 = arith.constant 0 : index
      %74 = vector.load %arg4[%c0_53, %73, %c0_54, %c0_55] : memref<1x64x4x16xf32, #tpu.memory_space<vmem>>, vector<1x1x4x16xf32>
      %75 = vector.shape_cast %74 : vector<1x1x4x16xf32> to vector<4x16xf32>
      %76 = vector.shape_cast %75 : vector<4x16xf32> to vector<4x16x1xf32>
      %77 = vector.broadcast %72 : vector<4x1x64xf32> to vector<4x16x64xf32>
      %78 = vector.broadcast %76 : vector<4x16x1xf32> to vector<4x16x64xf32>
      %79 = arith.mulf %77, %78 : vector<4x16x64xf32>
      %80 = arith.index_cast %68 : i32 to index
      %c0_56 = arith.constant 0 : index
      %c0_57 = arith.constant 0 : index
      %c0_58 = arith.constant 0 : index
      %81 = vector.load %arg11[%80, %c0_56, %c0_57, %c0_58] : memref<64x4x16x64xf32, #tpu.memory_space<vmem>>, vector<1x4x16x64xf32>
      %82 = vector.shape_cast %81 : vector<1x4x16x64xf32> to vector<4x16x64xf32>
      %83 = arith.mulf %82, %51 : vector<4x16x64xf32>
      %84 = arith.addf %83, %79 : vector<4x16x64xf32>
      %c0_59 = arith.constant 0 : index
      %85 = arith.index_cast %68 : i32 to index
      %c0_60 = arith.constant 0 : index
      %c0_61 = arith.constant 0 : index
      %86 = vector.load %arg5[%c0_59, %85, %c0_60, %c0_61] : memref<1x64x4x16xf32, #tpu.memory_space<vmem>>, vector<1x1x4x16xf32>
      %87 = vector.shape_cast %86 : vector<1x1x4x16xf32> to vector<4x16xf32>
      %88 = vector.shape_cast %87 : vector<4x16xf32> to vector<4x16x1xf32>
      %89 = vector.broadcast %88 : vector<4x16x1xf32> to vector<4x16x64xf32>
      %90 = arith.mulf %84, %89 : vector<4x16x64xf32>
      %cst_62 = arith.constant dense<0.000000e+00> : vector<4x64xf32>
      %91 = vector.multi_reduction <add>, %90, %cst_62 [1] : vector<4x16x64xf32> to vector<4x64xf32>
      %c0_63 = arith.constant 0 : index
      %92 = arith.index_cast %68 : i32 to index
      %c0_64 = arith.constant 0 : index
      %c0_65 = arith.constant 0 : index
      %93 = vector.load %arg2[%c0_63, %92, %c0_64, %c0_65] : memref<1x64x4x64xf32, #tpu.memory_space<vmem>>, vector<1x1x4x64xf32>
      %94 = vector.shape_cast %93 : vector<1x1x4x64xf32> to vector<4x64xf32>
      %95 = arith.mulf %94, %28 : vector<4x64xf32>
      %96 = arith.addf %91, %95 : vector<4x64xf32>
      %c0_66 = arith.constant 0 : index
      %97 = arith.index_cast %68 : i32 to index
      %c0_67 = arith.constant 0 : index
      %c0_68 = arith.constant 0 : index
      %98 = vector.load %arg9[%c0_66, %97, %c0_67, %c0_68] : memref<1x64x4x64xf32, #tpu.memory_space<vmem>>, vector<1x1x4x64xf32>
      %99 = vector.shape_cast %98 : vector<1x1x4x64xf32> to vector<4x64xf32>
      %100 = vector.shape_cast %96 : vector<4x64xf32> to vector<1x1x4x64xf32>
      tpu.vector_store %arg9[%c0_66, %97, %c0_67, %c0_68], %100 {strides = array<i32>} : memref<1x64x4x64xf32, #tpu.memory_space<vmem>>, vector<1x1x4x64xf32>,
      %c2_i32 = arith.constant 2 : i32
      %101 = arith.addi %33, %c2_i32 : i32
      %102 = arith.index_cast %101 : i32 to index
      %c0_69 = arith.constant 0 : index
      %c0_70 = arith.constant 0 : index
      %103 = vector.load %arg12[%102, %c0_69, %c0_70] : memref<64x4x64xf32, #tpu.memory_space<vmem>>, vector<1x4x64xf32>
      %104 = vector.shape_cast %103 : vector<1x4x64xf32> to vector<4x64xf32>
      %105 = vector.shape_cast %104 : vector<4x64xf32> to vector<4x1x64xf32>
      %c0_71 = arith.constant 0 : index
      %106 = arith.index_cast %101 : i32 to index
      %c0_72 = arith.constant 0 : index
      %c0_73 = arith.constant 0 : index
      %107 = vector.load %arg4[%c0_71, %106, %c0_72, %c0_73] : memref<1x64x4x16xf32, #tpu.memory_space<vmem>>, vector<1x1x4x16xf32>
      %108 = vector.shape_cast %107 : vector<1x1x4x16xf32> to vector<4x16xf32>
      %109 = vector.shape_cast %108 : vector<4x16xf32> to vector<4x16x1xf32>
      %110 = vector.broadcast %105 : vector<4x1x64xf32> to vector<4x16x64xf32>
      %111 = vector.broadcast %109 : vector<4x16x1xf32> to vector<4x16x64xf32>
      %112 = arith.mulf %110, %111 : vector<4x16x64xf32>
      %113 = arith.index_cast %101 : i32 to index
      %c0_74 = arith.constant 0 : index
      %c0_75 = arith.constant 0 : index
      %c0_76 = arith.constant 0 : index
      %114 = vector.load %arg11[%113, %c0_74, %c0_75, %c0_76] : memref<64x4x16x64xf32, #tpu.memory_space<vmem>>, vector<1x4x16x64xf32>
      %115 = vector.shape_cast %114 : vector<1x4x16x64xf32> to vector<4x16x64xf32>
      %116 = arith.mulf %115, %84 : vector<4x16x64xf32>
      %117 = arith.addf %116, %112 : vector<4x16x64xf32>
      %c0_77 = arith.constant 0 : index
      %118 = arith.index_cast %101 : i32 to index
      %c0_78 = arith.constant 0 : index
      %c0_79 = arith.constant 0 : index
      %119 = vector.load %arg5[%c0_77, %118, %c0_78, %c0_79] : memref<1x64x4x16xf32, #tpu.memory_space<vmem>>, vector<1x1x4x16xf32>
      %120 = vector.shape_cast %119 : vector<1x1x4x16xf32> to vector<4x16xf32>
      %121 = vector.shape_cast %120 : vector<4x16xf32> to vector<4x16x1xf32>
      %122 = vector.broadcast %121 : vector<4x16x1xf32> to vector<4x16x64xf32>
      %123 = arith.mulf %117, %122 : vector<4x16x64xf32>
      %cst_80 = arith.constant dense<0.000000e+00> : vector<4x64xf32>
      %124 = vector.multi_reduction <add>, %123, %cst_80 [1] : vector<4x16x64xf32> to vector<4x64xf32>
      %c0_81 = arith.constant 0 : index
      %125 = arith.index_cast %101 : i32 to index
      %c0_82 = arith.constant 0 : index
      %c0_83 = arith.constant 0 : index
      %126 = vector.load %arg2[%c0_81, %125, %c0_82, %c0_83] : memref<1x64x4x64xf32, #tpu.memory_space<vmem>>, vector<1x1x4x64xf32>
      %127 = vector.shape_cast %126 : vector<1x1x4x64xf32> to vector<4x64xf32>
      %128 = arith.mulf %127, %28 : vector<4x64xf32>
      %129 = arith.addf %124, %128 : vector<4x64xf32>
      %c0_84 = arith.constant 0 : index
      %130 = arith.index_cast %101 : i32 to index
      %c0_85 = arith.constant 0 : index
      %c0_86 = arith.constant 0 : index
      %131 = vector.load %arg9[%c0_84, %130, %c0_85, %c0_86] : memref<1x64x4x64xf32, #tpu.memory_space<vmem>>, vector<1x1x4x64xf32>
      %132 = vector.shape_cast %131 : vector<1x1x4x64xf32> to vector<4x64xf32>
      %133 = vector.shape_cast %129 : vector<4x64xf32> to vector<1x1x4x64xf32>
      tpu.vector_store %arg9[%c0_84, %130, %c0_85, %c0_86], %133 {strides = array<i32>} : memref<1x64x4x64xf32, #tpu.memory_space<vmem>>, vector<1x1x4x64xf32>,
      %c3_i32 = arith.constant 3 : i32
      %134 = arith.addi %33, %c3_i32 : i32
      %135 = arith.index_cast %134 : i32 to index
      %c0_87 = arith.constant 0 : index
      %c0_88 = arith.constant 0 : index
      %136 = vector.load %arg12[%135, %c0_87, %c0_88] : memref<64x4x64xf32, #tpu.memory_space<vmem>>, vector<1x4x64xf32>
      %137 = vector.shape_cast %136 : vector<1x4x64xf32> to vector<4x64xf32>
      %138 = vector.shape_cast %137 : vector<4x64xf32> to vector<4x1x64xf32>
      %c0_89 = arith.constant 0 : index
      %139 = arith.index_cast %134 : i32 to index
      %c0_90 = arith.constant 0 : index
      %c0_91 = arith.constant 0 : index
      %140 = vector.load %arg4[%c0_89, %139, %c0_90, %c0_91] : memref<1x64x4x16xf32, #tpu.memory_space<vmem>>, vector<1x1x4x16xf32>
      %141 = vector.shape_cast %140 : vector<1x1x4x16xf32> to vector<4x16xf32>
      %142 = vector.shape_cast %141 : vector<4x16xf32> to vector<4x16x1xf32>
      %143 = vector.broadcast %138 : vector<4x1x64xf32> to vector<4x16x64xf32>
      %144 = vector.broadcast %142 : vector<4x16x1xf32> to vector<4x16x64xf32>
      %145 = arith.mulf %143, %144 : vector<4x16x64xf32>
      %146 = arith.index_cast %134 : i32 to index
      %c0_92 = arith.constant 0 : index
      %c0_93 = arith.constant 0 : index
      %c0_94 = arith.constant 0 : index
      %147 = vector.load %arg11[%146, %c0_92, %c0_93, %c0_94] : memref<64x4x16x64xf32, #tpu.memory_space<vmem>>, vector<1x4x16x64xf32>
      %148 = vector.shape_cast %147 : vector<1x4x16x64xf32> to vector<4x16x64xf32>
      %149 = arith.mulf %148, %117 : vector<4x16x64xf32>
      %150 = arith.addf %149, %145 : vector<4x16x64xf32>
      %c0_95 = arith.constant 0 : index
      %151 = arith.index_cast %134 : i32 to index
      %c0_96 = arith.constant 0 : index
      %c0_97 = arith.constant 0 : index
      %152 = vector.load %arg5[%c0_95, %151, %c0_96, %c0_97] : memref<1x64x4x16xf32, #tpu.memory_space<vmem>>, vector<1x1x4x16xf32>
      %153 = vector.shape_cast %152 : vector<1x1x4x16xf32> to vector<4x16xf32>
      %154 = vector.shape_cast %153 : vector<4x16xf32> to vector<4x16x1xf32>
      %155 = vector.broadcast %154 : vector<4x16x1xf32> to vector<4x16x64xf32>
      %156 = arith.mulf %150, %155 : vector<4x16x64xf32>
      %cst_98 = arith.constant dense<0.000000e+00> : vector<4x64xf32>
      %157 = vector.multi_reduction <add>, %156, %cst_98 [1] : vector<4x16x64xf32> to vector<4x64xf32>
      %c0_99 = arith.constant 0 : index
      %158 = arith.index_cast %134 : i32 to index
      %c0_100 = arith.constant 0 : index
      %c0_101 = arith.constant 0 : index
      %159 = vector.load %arg2[%c0_99, %158, %c0_100, %c0_101] : memref<1x64x4x64xf32, #tpu.memory_space<vmem>>, vector<1x1x4x64xf32>
      %160 = vector.shape_cast %159 : vector<1x1x4x64xf32> to vector<4x64xf32>
      %161 = arith.mulf %160, %28 : vector<4x64xf32>
      %162 = arith.addf %157, %161 : vector<4x64xf32>
      %c0_102 = arith.constant 0 : index
      %163 = arith.index_cast %134 : i32 to index
      %c0_103 = arith.constant 0 : index
      %c0_104 = arith.constant 0 : index
      %164 = vector.load %arg9[%c0_102, %163, %c0_103, %c0_104] : memref<1x64x4x64xf32, #tpu.memory_space<vmem>>, vector<1x1x4x64xf32>
      %165 = vector.shape_cast %164 : vector<1x1x4x64xf32> to vector<4x64xf32>
      %166 = vector.shape_cast %162 : vector<4x64xf32> to vector<1x1x4x64xf32>
      tpu.vector_store %arg9[%c0_102, %163, %c0_103, %c0_104], %166 {strides = array<i32>} : memref<1x64x4x64xf32, #tpu.memory_space<vmem>>, vector<1x1x4x64xf32>,
      %c4_i32 = arith.constant 4 : i32
      %167 = arith.addi %33, %c4_i32 : i32
      %168 = arith.index_cast %167 : i32 to index
      %c0_105 = arith.constant 0 : index
      %c0_106 = arith.constant 0 : index
      %169 = vector.load %arg12[%168, %c0_105, %c0_106] : memref<64x4x64xf32, #tpu.memory_space<vmem>>, vector<1x4x64xf32>
      %170 = vector.shape_cast %169 : vector<1x4x64xf32> to vector<4x64xf32>
      %171 = vector.shape_cast %170 : vector<4x64xf32> to vector<4x1x64xf32>
      %c0_107 = arith.constant 0 : index
      %172 = arith.index_cast %167 : i32 to index
      %c0_108 = arith.constant 0 : index
      %c0_109 = arith.constant 0 : index
      %173 = vector.load %arg4[%c0_107, %172, %c0_108, %c0_109] : memref<1x64x4x16xf32, #tpu.memory_space<vmem>>, vector<1x1x4x16xf32>
      %174 = vector.shape_cast %173 : vector<1x1x4x16xf32> to vector<4x16xf32>
      %175 = vector.shape_cast %174 : vector<4x16xf32> to vector<4x16x1xf32>
      %176 = vector.broadcast %171 : vector<4x1x64xf32> to vector<4x16x64xf32>
      %177 = vector.broadcast %175 : vector<4x16x1xf32> to vector<4x16x64xf32>
      %178 = arith.mulf %176, %177 : vector<4x16x64xf32>
      %179 = arith.index_cast %167 : i32 to index
      %c0_110 = arith.constant 0 : index
      %c0_111 = arith.constant 0 : index
      %c0_112 = arith.constant 0 : index
      %180 = vector.load %arg11[%179, %c0_110, %c0_111, %c0_112] : memref<64x4x16x64xf32, #tpu.memory_space<vmem>>, vector<1x4x16x64xf32>
      %181 = vector.shape_cast %180 : vector<1x4x16x64xf32> to vector<4x16x64xf32>
      %182 = arith.mulf %181, %150 : vector<4x16x64xf32>
      %183 = arith.addf %182, %178 : vector<4x16x64xf32>
      %c0_113 = arith.constant 0 : index
      %184 = arith.index_cast %167 : i32 to index
      %c0_114 = arith.constant 0 : index
      %c0_115 = arith.constant 0 : index
      %185 = vector.load %arg5[%c0_113, %184, %c0_114, %c0_115] : memref<1x64x4x16xf32, #tpu.memory_space<vmem>>, vector<1x1x4x16xf32>
      %186 = vector.shape_cast %185 : vector<1x1x4x16xf32> to vector<4x16xf32>
      %187 = vector.shape_cast %186 : vector<4x16xf32> to vector<4x16x1xf32>
      %188 = vector.broadcast %187 : vector<4x16x1xf32> to vector<4x16x64xf32>
      %189 = arith.mulf %183, %188 : vector<4x16x64xf32>
      %cst_116 = arith.constant dense<0.000000e+00> : vector<4x64xf32>
      %190 = vector.multi_reduction <add>, %189, %cst_116 [1] : vector<4x16x64xf32> to vector<4x64xf32>
      %c0_117 = arith.constant 0 : index
      %191 = arith.index_cast %167 : i32 to index
      %c0_118 = arith.constant 0 : index
      %c0_119 = arith.constant 0 : index
      %192 = vector.load %arg2[%c0_117, %191, %c0_118, %c0_119] : memref<1x64x4x64xf32, #tpu.memory_space<vmem>>, vector<1x1x4x64xf32>
      %193 = vector.shape_cast %192 : vector<1x1x4x64xf32> to vector<4x64xf32>
      %194 = arith.mulf %193, %28 : vector<4x64xf32>
      %195 = arith.addf %190, %194 : vector<4x64xf32>
      %c0_120 = arith.constant 0 : index
      %196 = arith.index_cast %167 : i32 to index
      %c0_121 = arith.constant 0 : index
      %c0_122 = arith.constant 0 : index
      %197 = vector.load %arg9[%c0_120, %196, %c0_121, %c0_122] : memref<1x64x4x64xf32, #tpu.memory_space<vmem>>, vector<1x1x4x64xf32>
      %198 = vector.shape_cast %197 : vector<1x1x4x64xf32> to vector<4x64xf32>
      %199 = vector.shape_cast %195 : vector<4x64xf32> to vector<1x1x4x64xf32>
      tpu.vector_store %arg9[%c0_120, %196, %c0_121, %c0_122], %199 {strides = array<i32>} : memref<1x64x4x64xf32, #tpu.memory_space<vmem>>, vector<1x1x4x64xf32>,
      %c5_i32 = arith.constant 5 : i32
      %200 = arith.addi %33, %c5_i32 : i32
      %201 = arith.index_cast %200 : i32 to index
      %c0_123 = arith.constant 0 : index
      %c0_124 = arith.constant 0 : index
      %202 = vector.load %arg12[%201, %c0_123, %c0_124] : memref<64x4x64xf32, #tpu.memory_space<vmem>>, vector<1x4x64xf32>
      %203 = vector.shape_cast %202 : vector<1x4x64xf32> to vector<4x64xf32>
      %204 = vector.shape_cast %203 : vector<4x64xf32> to vector<4x1x64xf32>
      %c0_125 = arith.constant 0 : index
      %205 = arith.index_cast %200 : i32 to index
      %c0_126 = arith.constant 0 : index
      %c0_127 = arith.constant 0 : index
      %206 = vector.load %arg4[%c0_125, %205, %c0_126, %c0_127] : memref<1x64x4x16xf32, #tpu.memory_space<vmem>>, vector<1x1x4x16xf32>
      %207 = vector.shape_cast %206 : vector<1x1x4x16xf32> to vector<4x16xf32>
      %208 = vector.shape_cast %207 : vector<4x16xf32> to vector<4x16x1xf32>
      %209 = vector.broadcast %204 : vector<4x1x64xf32> to vector<4x16x64xf32>
      %210 = vector.broadcast %208 : vector<4x16x1xf32> to vector<4x16x64xf32>
      %211 = arith.mulf %209, %210 : vector<4x16x64xf32>
      %212 = arith.index_cast %200 : i32 to index
      %c0_128 = arith.constant 0 : index
      %c0_129 = arith.constant 0 : index
      %c0_130 = arith.constant 0 : index
      %213 = vector.load %arg11[%212, %c0_128, %c0_129, %c0_130] : memref<64x4x16x64xf32, #tpu.memory_space<vmem>>, vector<1x4x16x64xf32>
      %214 = vector.shape_cast %213 : vector<1x4x16x64xf32> to vector<4x16x64xf32>
      %215 = arith.mulf %214, %183 : vector<4x16x64xf32>
      %216 = arith.addf %215, %211 : vector<4x16x64xf32>
      %c0_131 = arith.constant 0 : index
      %217 = arith.index_cast %200 : i32 to index
      %c0_132 = arith.constant 0 : index
      %c0_133 = arith.constant 0 : index
      %218 = vector.load %arg5[%c0_131, %217, %c0_132, %c0_133] : memref<1x64x4x16xf32, #tpu.memory_space<vmem>>, vector<1x1x4x16xf32>
      %219 = vector.shape_cast %218 : vector<1x1x4x16xf32> to vector<4x16xf32>
      %220 = vector.shape_cast %219 : vector<4x16xf32> to vector<4x16x1xf32>
      %221 = vector.broadcast %220 : vector<4x16x1xf32> to vector<4x16x64xf32>
      %222 = arith.mulf %216, %221 : vector<4x16x64xf32>
      %cst_134 = arith.constant dense<0.000000e+00> : vector<4x64xf32>
      %223 = vector.multi_reduction <add>, %222, %cst_134 [1] : vector<4x16x64xf32> to vector<4x64xf32>
      %c0_135 = arith.constant 0 : index
      %224 = arith.index_cast %200 : i32 to index
      %c0_136 = arith.constant 0 : index
      %c0_137 = arith.constant 0 : index
      %225 = vector.load %arg2[%c0_135, %224, %c0_136, %c0_137] : memref<1x64x4x64xf32, #tpu.memory_space<vmem>>, vector<1x1x4x64xf32>
      %226 = vector.shape_cast %225 : vector<1x1x4x64xf32> to vector<4x64xf32>
      %227 = arith.mulf %226, %28 : vector<4x64xf32>
      %228 = arith.addf %223, %227 : vector<4x64xf32>
      %c0_138 = arith.constant 0 : index
      %229 = arith.index_cast %200 : i32 to index
      %c0_139 = arith.constant 0 : index
      %c0_140 = arith.constant 0 : index
      %230 = vector.load %arg9[%c0_138, %229, %c0_139, %c0_140] : memref<1x64x4x64xf32, #tpu.memory_space<vmem>>, vector<1x1x4x64xf32>
      %231 = vector.shape_cast %230 : vector<1x1x4x64xf32> to vector<4x64xf32>
      %232 = vector.shape_cast %228 : vector<4x64xf32> to vector<1x1x4x64xf32>
      tpu.vector_store %arg9[%c0_138, %229, %c0_139, %c0_140], %232 {strides = array<i32>} : memref<1x64x4x64xf32, #tpu.memory_space<vmem>>, vector<1x1x4x64xf32>,
      %c6_i32 = arith.constant 6 : i32
      %233 = arith.addi %33, %c6_i32 : i32
      %234 = arith.index_cast %233 : i32 to index
      %c0_141 = arith.constant 0 : index
      %c0_142 = arith.constant 0 : index
      %235 = vector.load %arg12[%234, %c0_141, %c0_142] : memref<64x4x64xf32, #tpu.memory_space<vmem>>, vector<1x4x64xf32>
      %236 = vector.shape_cast %235 : vector<1x4x64xf32> to vector<4x64xf32>
      %237 = vector.shape_cast %236 : vector<4x64xf32> to vector<4x1x64xf32>
      %c0_143 = arith.constant 0 : index
      %238 = arith.index_cast %233 : i32 to index
      %c0_144 = arith.constant 0 : index
      %c0_145 = arith.constant 0 : index
      %239 = vector.load %arg4[%c0_143, %238, %c0_144, %c0_145] : memref<1x64x4x16xf32, #tpu.memory_space<vmem>>, vector<1x1x4x16xf32>
      %240 = vector.shape_cast %239 : vector<1x1x4x16xf32> to vector<4x16xf32>
      %241 = vector.shape_cast %240 : vector<4x16xf32> to vector<4x16x1xf32>
      %242 = vector.broadcast %237 : vector<4x1x64xf32> to vector<4x16x64xf32>
      %243 = vector.broadcast %241 : vector<4x16x1xf32> to vector<4x16x64xf32>
      %244 = arith.mulf %242, %243 : vector<4x16x64xf32>
      %245 = arith.index_cast %233 : i32 to index
      %c0_146 = arith.constant 0 : index
      %c0_147 = arith.constant 0 : index
      %c0_148 = arith.constant 0 : index
      %246 = vector.load %arg11[%245, %c0_146, %c0_147, %c0_148] : memref<64x4x16x64xf32, #tpu.memory_space<vmem>>, vector<1x4x16x64xf32>
      %247 = vector.shape_cast %246 : vector<1x4x16x64xf32> to vector<4x16x64xf32>
      %248 = arith.mulf %247, %216 : vector<4x16x64xf32>
      %249 = arith.addf %248, %244 : vector<4x16x64xf32>
      %c0_149 = arith.constant 0 : index
      %250 = arith.index_cast %233 : i32 to index
      %c0_150 = arith.constant 0 : index
      %c0_151 = arith.constant 0 : index
      %251 = vector.load %arg5[%c0_149, %250, %c0_150, %c0_151] : memref<1x64x4x16xf32, #tpu.memory_space<vmem>>, vector<1x1x4x16xf32>
      %252 = vector.shape_cast %251 : vector<1x1x4x16xf32> to vector<4x16xf32>
      %253 = vector.shape_cast %252 : vector<4x16xf32> to vector<4x16x1xf32>
      %254 = vector.broadcast %253 : vector<4x16x1xf32> to vector<4x16x64xf32>
      %255 = arith.mulf %249, %254 : vector<4x16x64xf32>
      %cst_152 = arith.constant dense<0.000000e+00> : vector<4x64xf32>
      %256 = vector.multi_reduction <add>, %255, %cst_152 [1] : vector<4x16x64xf32> to vector<4x64xf32>
      %c0_153 = arith.constant 0 : index
      %257 = arith.index_cast %233 : i32 to index
      %c0_154 = arith.constant 0 : index
      %c0_155 = arith.constant 0 : index
      %258 = vector.load %arg2[%c0_153, %257, %c0_154, %c0_155] : memref<1x64x4x64xf32, #tpu.memory_space<vmem>>, vector<1x1x4x64xf32>
      %259 = vector.shape_cast %258 : vector<1x1x4x64xf32> to vector<4x64xf32>
      %260 = arith.mulf %259, %28 : vector<4x64xf32>
      %261 = arith.addf %256, %260 : vector<4x64xf32>
      %c0_156 = arith.constant 0 : index
      %262 = arith.index_cast %233 : i32 to index
      %c0_157 = arith.constant 0 : index
      %c0_158 = arith.constant 0 : index
      %263 = vector.load %arg9[%c0_156, %262, %c0_157, %c0_158] : memref<1x64x4x64xf32, #tpu.memory_space<vmem>>, vector<1x1x4x64xf32>
      %264 = vector.shape_cast %263 : vector<1x1x4x64xf32> to vector<4x64xf32>
      %265 = vector.shape_cast %261 : vector<4x64xf32> to vector<1x1x4x64xf32>
      tpu.vector_store %arg9[%c0_156, %262, %c0_157, %c0_158], %265 {strides = array<i32>} : memref<1x64x4x64xf32, #tpu.memory_space<vmem>>, vector<1x1x4x64xf32>,
      %c7_i32 = arith.constant 7 : i32
      %266 = arith.addi %33, %c7_i32 : i32
      %267 = arith.index_cast %266 : i32 to index
      %c0_159 = arith.constant 0 : index
      %c0_160 = arith.constant 0 : index
      %268 = vector.load %arg12[%267, %c0_159, %c0_160] : memref<64x4x64xf32, #tpu.memory_space<vmem>>, vector<1x4x64xf32>
      %269 = vector.shape_cast %268 : vector<1x4x64xf32> to vector<4x64xf32>
      %270 = vector.shape_cast %269 : vector<4x64xf32> to vector<4x1x64xf32>
      %c0_161 = arith.constant 0 : index
      %271 = arith.index_cast %266 : i32 to index
      %c0_162 = arith.constant 0 : index
      %c0_163 = arith.constant 0 : index
      %272 = vector.load %arg4[%c0_161, %271, %c0_162, %c0_163] : memref<1x64x4x16xf32, #tpu.memory_space<vmem>>, vector<1x1x4x16xf32>
      %273 = vector.shape_cast %272 : vector<1x1x4x16xf32> to vector<4x16xf32>
      %274 = vector.shape_cast %273 : vector<4x16xf32> to vector<4x16x1xf32>
      %275 = vector.broadcast %270 : vector<4x1x64xf32> to vector<4x16x64xf32>
      %276 = vector.broadcast %274 : vector<4x16x1xf32> to vector<4x16x64xf32>
      %277 = arith.mulf %275, %276 : vector<4x16x64xf32>
      %278 = arith.index_cast %266 : i32 to index
      %c0_164 = arith.constant 0 : index
      %c0_165 = arith.constant 0 : index
      %c0_166 = arith.constant 0 : index
      %279 = vector.load %arg11[%278, %c0_164, %c0_165, %c0_166] : memref<64x4x16x64xf32, #tpu.memory_space<vmem>>, vector<1x4x16x64xf32>
      %280 = vector.shape_cast %279 : vector<1x4x16x64xf32> to vector<4x16x64xf32>
      %281 = arith.mulf %280, %249 : vector<4x16x64xf32>
      %282 = arith.addf %281, %277 : vector<4x16x64xf32>
      %c0_167 = arith.constant 0 : index
      %283 = arith.index_cast %266 : i32 to index
      %c0_168 = arith.constant 0 : index
      %c0_169 = arith.constant 0 : index
      %284 = vector.load %arg5[%c0_167, %283, %c0_168, %c0_169] : memref<1x64x4x16xf32, #tpu.memory_space<vmem>>, vector<1x1x4x16xf32>
      %285 = vector.shape_cast %284 : vector<1x1x4x16xf32> to vector<4x16xf32>
      %286 = vector.shape_cast %285 : vector<4x16xf32> to vector<4x16x1xf32>
      %287 = vector.broadcast %286 : vector<4x16x1xf32> to vector<4x16x64xf32>
      %288 = arith.mulf %282, %287 : vector<4x16x64xf32>
      %cst_170 = arith.constant dense<0.000000e+00> : vector<4x64xf32>
      %289 = vector.multi_reduction <add>, %288, %cst_170 [1] : vector<4x16x64xf32> to vector<4x64xf32>
      %c0_171 = arith.constant 0 : index
      %290 = arith.index_cast %266 : i32 to index
      %c0_172 = arith.constant 0 : index
      %c0_173 = arith.constant 0 : index
      %291 = vector.load %arg2[%c0_171, %290, %c0_172, %c0_173] : memref<1x64x4x64xf32, #tpu.memory_space<vmem>>, vector<1x1x4x64xf32>
      %292 = vector.shape_cast %291 : vector<1x1x4x64xf32> to vector<4x64xf32>
      %293 = arith.mulf %292, %28 : vector<4x64xf32>
      %294 = arith.addf %289, %293 : vector<4x64xf32>
      %c0_174 = arith.constant 0 : index
      %295 = arith.index_cast %266 : i32 to index
      %c0_175 = arith.constant 0 : index
      %c0_176 = arith.constant 0 : index
      %296 = vector.load %arg9[%c0_174, %295, %c0_175, %c0_176] : memref<1x64x4x64xf32, #tpu.memory_space<vmem>>, vector<1x1x4x64xf32>
      %297 = vector.shape_cast %296 : vector<1x1x4x64xf32> to vector<4x64xf32>
      %298 = vector.shape_cast %294 : vector<4x64xf32> to vector<1x1x4x64xf32>
      tpu.vector_store %arg9[%c0_174, %295, %c0_175, %c0_176], %298 {strides = array<i32>} : memref<1x64x4x64xf32, #tpu.memory_space<vmem>>, vector<1x1x4x64xf32>,
      %c0_177 = arith.constant 0 : index
      %c0_178 = arith.constant 0 : index
      %c0_179 = arith.constant 0 : index
      %299 = vector.load %arg10[%c0_177, %c0_178, %c0_179] : memref<4x16x64xf32, #tpu.memory_space<vmem>>, vector<4x16x64xf32>
      tpu.vector_store %arg10[%c0_177, %c0_178, %c0_179], %282 {strides = array<i32>} : memref<4x16x64xf32, #tpu.memory_space<vmem>>, vector<4x16x64xf32>,
    }
    %c8_i32_24 = arith.constant 8 : i32
    return
  }
  func.func @transform_0(%arg0: i32, %arg1: i32) -> (i32, i32, i32, i32) {
    %c0_i32 = arith.constant 0 : i32
    %c0_i32_0 = arith.constant 0 : i32
    %c0_i32_1 = arith.constant 0 : i32
    return %arg0, %arg1, %c0_i32, %c0_i32_0 : i32, i32, i32, i32
  }
  func.func @transform_1(%arg0: i32, %arg1: i32) -> (i32, i32, i32, i32) {
    %c0_i32 = arith.constant 0 : i32
    %c0_i32_0 = arith.constant 0 : i32
    %c0_i32_1 = arith.constant 0 : i32
    return %arg0, %arg1, %c0_i32, %c0_i32_0 : i32, i32, i32, i32
  }
  func.func @transform_2(%arg0: i32, %arg1: i32) -> (i32, i32, i32, i32) {
    %c0_i32 = arith.constant 0 : i32
    %c0_i32_0 = arith.constant 0 : i32
    %c0_i32_1 = arith.constant 0 : i32
    return %arg0, %arg1, %c0_i32, %c0_i32_0 : i32, i32, i32, i32
  }
  func.func @transform_3(%arg0: i32, %arg1: i32) -> (i32, i32, i32, i32) {
    %c0_i32 = arith.constant 0 : i32
    %c0_i32_0 = arith.constant 0 : i32
    %c0_i32_1 = arith.constant 0 : i32
    return %arg0, %arg1, %c0_i32, %c0_i32_0 : i32, i32, i32, i32
  }
  func.func @transform_4(%arg0: i32, %arg1: i32) -> (i32, i32, i32) {
    %c0_i32 = arith.constant 0 : i32
    %c0_i32_0 = arith.constant 0 : i32
    %c0_i32_1 = arith.constant 0 : i32
    %c0_i32_2 = arith.constant 0 : i32
    return %c0_i32, %c0_i32_0, %c0_i32_1 : i32, i32, i32
  }
  func.func @transform_5(%arg0: i32, %arg1: i32) -> (i32, i32) {
    %c0_i32 = arith.constant 0 : i32
    %c0_i32_0 = arith.constant 0 : i32
    %c0_i32_1 = arith.constant 0 : i32
    return %c0_i32, %c0_i32_0 : i32, i32
  }
  func.func @transform_6(%arg0: i32, %arg1: i32) -> (i32, i32) {
    %c0_i32 = arith.constant 0 : i32
    %c0_i32_0 = arith.constant 0 : i32
    %c0_i32_1 = arith.constant 0 : i32
    return %c0_i32, %c0_i32_0 : i32, i32
  }
  func.func @transform_7(%arg0: i32, %arg1: i32) -> (i32, i32, i32, i32) {
    %c0_i32 = arith.constant 0 : i32
    %c0_i32_0 = arith.constant 0 : i32
    %c0_i32_1 = arith.constant 0 : i32
    return %arg0, %arg1, %c0_i32, %c0_i32_0 : i32, i32, i32, i32
  }
}

module attributes {stable_mosaic.version = 11 : i64} {
  func.func @_norm_out_kernel(%arg0: i32, %arg1: memref<128x64xf32, #tpu.memory_space<vmem>>, %arg2: memref<128x64xf32, #tpu.memory_space<vmem>>, %arg3: memref<1x64xf32, #tpu.memory_space<vmem>>, %arg4: memref<1x64xf32, #tpu.memory_space<vmem>>, %arg5: memref<64x32xbf16, #tpu.memory_space<vmem>>, %arg6: memref<128x32xf32, #tpu.memory_space<vmem>>) attributes {dimension_semantics = [#tpu.dimension_semantics<parallel>], iteration_bounds = array<i64: 1>, scalar_prefetch = 0 : i64, scratch_operands = 0 : i64, tpu.core_type = #tpu.core_type<tc>, window_params = [{transform_indices = @transform_0, window_bounds = array<i64: 128, 64>}, {transform_indices = @transform_1, window_bounds = array<i64: 128, 64>}, {pipeline_mode = #tpu.pipeline_mode<synchronous>, transform_indices = @transform_2, window_bounds = array<i64: 1, 64>}, {pipeline_mode = #tpu.pipeline_mode<synchronous>, transform_indices = @transform_3, window_bounds = array<i64: 1, 64>}, {pipeline_mode = #tpu.pipeline_mode<synchronous>, transform_indices = @transform_4, window_bounds = array<i64: 64, 32>}, {transform_indices = @transform_5, window_bounds = array<i64: 128, 32>}]} {
    %c0 = arith.constant 0 : index
    %c0_0 = arith.constant 0 : index
    %0 = vector.load %arg1[%c0, %c0_0] : memref<128x64xf32, #tpu.memory_space<vmem>>, vector<128x64xf32>
    %cst = arith.constant dense<0.000000e+00> : vector<128xf32>
    %1 = vector.multi_reduction <add>, %0, %cst [1] : vector<128x64xf32> to vector<128xf32>
    %2 = vector.shape_cast %1 : vector<128xf32> to vector<128x1xf32>
    %cst_1 = arith.constant 6.400000e+01 : f32
    %3 = vector.broadcast %cst_1 : f32 to vector<128x1xf32>
    %4 = arith.divf %2, %3 : vector<128x1xf32>
    %5 = vector.broadcast %4 : vector<128x1xf32> to vector<128x64xf32>
    %6 = arith.subf %0, %5 : vector<128x64xf32>
    %7 = arith.mulf %6, %6 : vector<128x64xf32>
    %cst_2 = arith.constant dense<0.000000e+00> : vector<128xf32>
    %8 = vector.multi_reduction <add>, %7, %cst_2 [1] : vector<128x64xf32> to vector<128xf32>
    %9 = vector.shape_cast %8 : vector<128xf32> to vector<128x1xf32>
    %cst_3 = arith.constant 6.400000e+01 : f32
    %10 = vector.broadcast %cst_3 : f32 to vector<128x1xf32>
    %11 = arith.divf %9, %10 : vector<128x1xf32>
    %12 = vector.broadcast %4 : vector<128x1xf32> to vector<128x64xf32>
    %13 = arith.subf %0, %12 : vector<128x64xf32>
    %cst_4 = arith.constant 9.99999997E-7 : f32
    %14 = vector.broadcast %cst_4 : f32 to vector<128x1xf32>
    %15 = arith.addf %11, %14 : vector<128x1xf32>
    %16 = math.rsqrt %15 : vector<128x1xf32>
    %17 = vector.broadcast %16 : vector<128x1xf32> to vector<128x64xf32>
    %18 = arith.mulf %13, %17 : vector<128x64xf32>
    %c0_5 = arith.constant 0 : index
    %c0_6 = arith.constant 0 : index
    %19 = vector.load %arg3[%c0_5, %c0_6] : memref<1x64xf32, #tpu.memory_space<vmem>>, vector<1x64xf32>
    %20 = vector.broadcast %19 : vector<1x64xf32> to vector<128x64xf32>
    %21 = arith.mulf %20, %18 : vector<128x64xf32>
    %c0_7 = arith.constant 0 : index
    %c0_8 = arith.constant 0 : index
    %22 = vector.load %arg4[%c0_7, %c0_8] : memref<1x64xf32, #tpu.memory_space<vmem>>, vector<1x64xf32>
    %23 = vector.broadcast %22 : vector<1x64xf32> to vector<128x64xf32>
    %24 = arith.addf %21, %23 : vector<128x64xf32>
    %c0_9 = arith.constant 0 : index
    %c0_10 = arith.constant 0 : index
    %25 = vector.load %arg2[%c0_9, %c0_10] : memref<128x64xf32, #tpu.memory_space<vmem>>, vector<128x64xf32>
    %26 = arith.mulf %24, %25 : vector<128x64xf32>
    %27 = arith.truncf %26 : vector<128x64xf32> to vector<128x64xbf16>
    %c0_11 = arith.constant 0 : index
    %c0_12 = arith.constant 0 : index
    %28 = vector.load %arg5[%c0_11, %c0_12] : memref<64x32xbf16, #tpu.memory_space<vmem>>, vector<64x32xbf16>
    %cst_13 = arith.constant dense<0.000000e+00> : vector<128x32xf32>
    %29 = tpu.matmul %27, %28, %cst_13 {dimension_numbers = #tpu.dot_dimension_numbers<[1], [0], [0], [1], [0, 0, 1, 1], [], []>} : vector<128x64xbf16>, vector<64x32xbf16>, vector<128x32xf32> -> vector<128x32xf32>
    %c0_14 = arith.constant 0 : index
    %c0_15 = arith.constant 0 : index
    %30 = vector.load %arg6[%c0_14, %c0_15] : memref<128x32xf32, #tpu.memory_space<vmem>>, vector<128x32xf32>
    tpu.vector_store %arg6[%c0_14, %c0_15], %29 {strides = array<i32>} : memref<128x32xf32, #tpu.memory_space<vmem>>, vector<128x32xf32>,
    return
  }
  func.func @transform_0(%arg0: i32) -> (i32, i32) {
    %c0_i32 = arith.constant 0 : i32
    %c0_i32_0 = arith.constant 0 : i32
    return %arg0, %c0_i32 : i32, i32
  }
  func.func @transform_1(%arg0: i32) -> (i32, i32) {
    %c0_i32 = arith.constant 0 : i32
    %c0_i32_0 = arith.constant 0 : i32
    return %arg0, %c0_i32 : i32, i32
  }
  func.func @transform_2(%arg0: i32) -> (i32, i32) {
    %c0_i32 = arith.constant 0 : i32
    %c0_i32_0 = arith.constant 0 : i32
    %c0_i32_1 = arith.constant 0 : i32
    return %c0_i32, %c0_i32_0 : i32, i32
  }
  func.func @transform_3(%arg0: i32) -> (i32, i32) {
    %c0_i32 = arith.constant 0 : i32
    %c0_i32_0 = arith.constant 0 : i32
    %c0_i32_1 = arith.constant 0 : i32
    return %c0_i32, %c0_i32_0 : i32, i32
  }
  func.func @transform_4(%arg0: i32) -> (i32, i32) {
    %c0_i32 = arith.constant 0 : i32
    %c0_i32_0 = arith.constant 0 : i32
    %c0_i32_1 = arith.constant 0 : i32
    return %c0_i32, %c0_i32_0 : i32, i32
  }
  func.func @transform_5(%arg0: i32) -> (i32, i32) {
    %c0_i32 = arith.constant 0 : i32
    %c0_i32_0 = arith.constant 0 : i32
    return %arg0, %c0_i32 : i32, i32
  }
}

</mosaic_0001>

<bundles_post_ra>
// kernel: _lambda_.3
= control target key start
LH: loop header
LB: loop body
LE: loop exit
PB: predicated region body
PF: predicated region fallthrough
CT: control target
= control target key end

     0   :  { %10 = vsyncpa [#allocation3], 0  ;;  %s1339_s0 = inlined_call_operand.hbm [shape: bf16[128,32], index: 0, kind: input, shape index: {}]   ;;  %s1340_s1 = inlined_call_operand.hbm [shape: bf16[32,128], index: 1, kind: input, shape index: {}]   ;;  %s1341_s2 = inlined_call_operand.hbm [shape: bf16[64,384], index: 2, kind: input, shape index: {}]   ;;  %s1342_s3 = inlined_call_operand.hbm [shape: f32[128,128], index: 3, kind: output, shape index: {0}]   ;;  %s1343_s4 = inlined_call_operand.hbm [shape: f32[128,384], index: 4, kind: output, shape index: {1}]  }
   0x1   :  { %11 = vsyncpa [#allocation6], 0 }
   0x2   :  { %12 = vsyncpa [#allocation4], 0 }
   0x3   :  { %13 = vsyncpa [#allocation10], 0  ;;  %s1137_s15 = smov [#allocation5]   ;;  %s1138_s17 = smov [#allocation2]  }
   0x4   :  { %s31_s16 = sshll.u32 %s1137_s15, 4  ;;  %s19_s18 = sshll.u32 %s1138_s17, 4  ;;  %s32_s16 = int_to_ptr.vmem [resolvable:$true] %s31_s16  ;;  %s1176_s18 = int_to_ptr.vmem [resolvable:$true] %s19_s18 }
   0x5   :  { %s1019_s21 = scalar_lea.hbm %s1340_s1, 256 }
   0x6   :  { %p1020_p0 = scmp.ne.s32.totalorder %s1340_s1, %s1019_s21  ;;  %p1023_p1 = scmp.lt.u32.totalorder %s1019_s21, %s1340_s1 }
   0x8   :  { %p1025_p2 = pnand %p1023_p1, %p1020_p0 }
   0xa   :  { %1028 = shalt.err (!%p1025_p2)
}
   0xb   :  { %s1029_s26 = scalar_lea.vmem %s32_s16, 256  ;;  %p1034_p4 = scmp.lt.s32.totalorder %s32_s16, %s32_s16 }
   0xc   :  { %p1030_p3 = scmp.ne.s32.totalorder %s32_s16, %s1029_s26  ;;  %p1035_p5 = scmp.lt.s32.totalorder %s1029_s26, %s1029_s26 }
   0xe   :  { %p1036_p6 = por %p1035_p5, %p1034_p4 }
  0x10   :  { %p1037_p7 = pnand %p1036_p6, %p1030_p3 }
  0x12   :  { %1040 = shalt.err (!%p1037_p7)
}
  0x13   :  { %s1139_s27 = smov 64   ;;  %s1140_s28 = smov 4  }
  0x14   :  { %37 = dma.hbm_to_vmem [thread:$0]  %s1340_s1, 256, %s32_s16, [#allocation6], %s1139_s27, %s1139_s27, %s1140_s28  }
  0x15   :  { %s1041_s7 = scalar_lea.hbm %s1339_s0, 1024 }
  0x16   :  { %p1042_p8 = scmp.ne.s32.totalorder %s1339_s0, %s1041_s7  ;;  %p1045_p9 = scmp.lt.u32.totalorder %s1041_s7, %s1339_s0 }
  0x18   :  { %p1047_p10 = pnand %p1045_p9, %p1042_p8 }
  0x1a   :  { %1050 = shalt.err (!%p1047_p10)
}
  0x1b   :  { %s1051_s12 = scalar_lea.vmem %s1176_s18, 1024  ;;  %p1056_p12 = scmp.lt.s32.totalorder %s1176_s18, %s1176_s18 }
  0x1c   :  { %p1052_p11 = scmp.ne.s32.totalorder %s1176_s18, %s1051_s12  ;;  %p1057_p13 = scmp.lt.s32.totalorder %s1051_s12, %s1051_s12 }
  0x1e   :  { %p1058_p0 = por %p1057_p13, %p1056_p12 }
  0x20   :  { %p1059_p1 = pnand %p1058_p0, %p1052_p11 }
  0x22   :  { %1062 = shalt.err (!%p1059_p1)
}
  0x23   :  { %25 = dma.hbm_to_vmem [thread:$0]  %s1339_s0, 1024, %s1176_s18, [#allocation3], %s1139_s27, %s1139_s27, %s1140_s28  }
  0x24   :  { %s1141_s14 = smov [#allocation7]   ;;  %s1063_s19 = scalar_lea.hbm %s1341_s2, 1536 }
  0x25   :  { %s43_s15 = sshll.u32 %s1141_s14, 4  ;;  %p1064_p2 = scmp.ne.s32.totalorder %s1341_s2, %s1063_s19  ;;  %s44_s15 = int_to_ptr.vmem [resolvable:$true] %s43_s15 }
  0x26   :  { %p1067_p3 = scmp.lt.u32.totalorder %s1063_s19, %s1341_s2 }
  0x28   :  { %p1069_p4 = pnand %p1067_p3, %p1064_p2 }
  0x2a   :  { %1072 = shalt.err (!%p1069_p4)
}
  0x2b   :  { %s1073_s24 = scalar_lea.vmem %s44_s15, 1536  ;;  %p1078_p6 = scmp.lt.s32.totalorder %s44_s15, %s44_s15 }
  0x2c   :  { %p1074_p5 = scmp.ne.s32.totalorder %s44_s15, %s1073_s24  ;;  %p1079_p7 = scmp.lt.s32.totalorder %s1073_s24, %s1073_s24 }
  0x2e   :  { %p1080_p8 = por %p1079_p7, %p1078_p6 }
  0x30   :  { %p1081_p9 = pnand %p1080_p8, %p1074_p5 }
  0x32   :  { %1084 = shalt.err (!%p1081_p9)
}
  0x33   :  { %s1142_s0 = smov 192   ;;  %s1143_s18 = smov 12  }
  0x34   :  { %49 = dma.hbm_to_vmem [thread:$0]  %s1341_s2, 1536, %s44_s15, [#allocation6], %s1142_s0, %s1142_s0, %s1143_s18  }
  0x35   :  { %1129 = dma.done.wait [#allocation3], 1024  }
  0x36   :  { %1130 = vsyncadd [#allocation3], 4294966272 }
  0x37   :  { %1131 = dma.done.wait [#allocation6], 1792  }
  0x38   :  { %1132 = vsyncadd [#allocation6], 4294965504  ;;  %v929_v0 = vld [vmem:[#allocation5] sm:$0xff]   ;;  %v930_v1 = vld [vmem:[#allocation5 + $0x8] sm:$0xff]   ;;  %vm132_vm0 = vcmask 261120   ;;  %v1144_v22 = vmov 0  }
  0x39   :  { %871 = vmatprep.subr.bf16.mxu0 %v929_v0  ;;  %v931_v2 = vld [vmem:[#allocation2] sm:$0xff]   ;;  %v932_v3 = vld [vmem:[#allocation2 + $0x8] sm:$0xff]   ;;  %v933_v4 = vld [vmem:[#allocation2 + $0x10] sm:$0xff]   ;;  %527 = vmatprep.mubr.bf16.mxu1 %v1144_v22  ;;  %vm470_vm1 = vcmask 523264   ;;  %s1145_s2 = smov [#allocation8]  }
  0x3a   :  { %872 = vmatpush3.bf16.msra.mxu0 %v929_v0  ;;  %875 = vmatprep.mubr.msk.bf16.mxu0 %vm132_vm0, %v931_v2  ;;  %v934_v5 = vld [vmem:[#allocation2 + $0x18] sm:$0xff]   ;;  %v935_v6 = vld [vmem:[#allocation2 + $0x20] sm:$0xff]   ;;  %v936_v7 = vld [vmem:[#allocation2 + $0x28] sm:$0xff]   ;;  %s758_s27 = sshll.u32 %s1145_s2, 4  ;;  %s759_s27 = int_to_ptr.vmem [resolvable:$true] %s758_s27 }
  0x3b   :  { %873 = vmatprep.subr.bf16.mxu0 %v930_v1  ;;  %v937_v8 = vld [vmem:[#allocation2 + $0x30] sm:$0xff]   ;;  %v938_v9 = vld [vmem:[#allocation2 + $0x38] sm:$0xff]   ;;  %v949_v17 = vld [vmem:[#allocation7 + $0x30] ss:$12 sps:$4 sm:$0xff]   ;;  %s1085_s28 = scalar_lea.vmem %s759_s27, 2048  ;;  %p1090_p11 = scmp.lt.s32.totalorder %s759_s27, %s759_s27 }
  0x3c   :  { %v939_v10 = vld [vmem:[#allocation7 + $0x4] ss:$12 sps:$4 sm:$0xff]   ;;  %v941_v11 = vld [vmem:[#allocation7] ss:$12 sps:$4 sm:$0xff]   ;;  %v942_v12 = vld [vmem:[#allocation7 + $0x8] ss:$12 sps:$4 sm:$0xff]   ;;  %p1086_p10 = scmp.ne.s32.totalorder %s759_s27, %s1085_s28  ;;  %p1091_p12 = scmp.lt.s32.totalorder %s1085_s28, %s1085_s28 }
  0x3d   :  { %495 = vmatprep.subr.bf16.mxu1 %v939_v10  ;;  %v943_v13 = vld [vmem:[#allocation7 + $0x1c] ss:$12 sps:$4 sm:$0xff]   ;;  %v945_v14 = vld [vmem:[#allocation7 + $0x18] ss:$12 sps:$4 sm:$0xff]   ;;  %v946_v15 = vld [vmem:[#allocation7 + $0x20] ss:$12 sps:$4 sm:$0xff]  }
  0x3e   :  { %874 = vmatpush3.bf16.msra.mxu0 %v930_v1  ;;  %496 = vmatpush1.bf16.msra.mxu1 %v941_v11  ;;  %v947_v16 = vld [vmem:[#allocation7 + $0x34] ss:$12 sps:$4 sm:$0xff]   ;;  %v950_v18 = vld [vmem:[#allocation7 + $0x38] ss:$12 sps:$4 sm:$0xff]   ;;  %v954_v21 = vld [vmem:[#allocation7 + $0x50] ss:$12 sps:$4 sm:$0xff]   ;;  %p1092_p13 = por %p1091_p12, %p1090_p11 }
  0x3f   :  { %891 = vmatprep.subr.bf16.mxu0 %v942_v12  ;;  %497 = vmatprep.subr.bf16.mxu1 %v943_v13  ;;  %v951_v19 = vld [vmem:[#allocation7 + $0x4c] ss:$12 sps:$4 sm:$0xff]   ;;  %v953_v20 = vld [vmem:[#allocation7 + $0x48] ss:$12 sps:$4 sm:$0xff]  }
  0x40   :  { %p1093_p0 = pnand %p1092_p13, %p1086_p10 }
  0x41   :  { %876 = vmatmul.mubr.msk.bf16.vlgmr.msra.gmra.mrb[0].mxu0 %vm132_vm0, %v932_v3 }
  0x42   :  { %879 = vmatprep.mubr.msk.bf16.mxu0 %vm132_vm0, %v933_v4  ;;  %892 = vmatpush3.bf16.msra.mxu0 %v942_v12 }
  0x43   :  { %498 = vmatpush1.bf16.msra.mxu1 %v945_v14  ;;  %893 = vmatprep.subr.bf16.mxu0 %v946_v15 }
  0x44   :  { %499 = vmatprep.subr.bf16.mxu1 %v947_v16 }
  0x46   :  { %894 = vmatpush3.bf16.msra.mxu0 %v946_v15 }
  0x47   :  { %500 = vmatpush1.bf16.msra.mxu1 %v949_v17  ;;  %895 = vmatprep.subr.bf16.mxu0 %v950_v18 }
  0x48   :  { %501 = vmatprep.subr.bf16.mxu1 %v951_v19 }
  0x49   :  { %880 = vmatmul.mubr.msk.bf16.gmra.mrb[4].mxu0 %vm132_vm0, %v934_v5 }
  0x4a   :  { %883 = vmatprep.mubr.msk.bf16.mxu0 %vm132_vm0, %v935_v6  ;;  %896 = vmatpush3.bf16.msra.mxu0 %v950_v18 }
  0x4b   :  { %502 = vmatpush1.bf16.msra.mxu1 %v953_v20  ;;  %897 = vmatprep.subr.bf16.mxu0 %v954_v21 }
  0x4e   :  { %898 = vmatpush3.bf16.msra.mxu0 %v954_v21 }
  0x51   :  { %884 = vmatmul.mubr.msk.bf16.gmra.mrb[8].mxu0 %vm132_vm0, %v936_v7 }
  0x52   :  { %887 = vmatprep.mubr.msk.bf16.mxu0 %vm132_vm0, %v937_v8 }
  0x59   :  { %888 = vmatmul.mubr.msk.bf16.gmra.mrb[12].mxu0 %vm132_vm0, %v938_v9 }
 0x114   :  { %v1228_v23 = vpop.f32.mrb[0].mxu0 }
 0x115   :  { %v807_v24 = vmul.f32 -1.442695, %v1228_v23  ;;  %v1231_v25 = vpop.f32.mrb[1].mxu0 }
 0x116   :  { %v805_v26 = vmul.f32 -1.442695, %v1231_v25  ;;  %v1234_v27 = vpop.f32.mrb[2].mxu0 }
 0x117   :  { %955 = vpow2.f32 %v807_v24  ;;  %v808_v28 = vmul.f32 -1.442695, %v1234_v27  ;;  %v1237_v29 = vpop.f32.mrb[3].mxu0 }
 0x118   :  { %957 = vpow2.f32 %v805_v26  ;;  %v806_v30 = vmul.f32 -1.442695, %v1237_v29 }
 0x119   :  { %959 = vpow2.f32 %v808_v28 }
 0x11a   :  { %961 = vpow2.f32 %v806_v30 }
 0x11c   :  { %v1240_v31 = vpop.f32.mrb[4].mxu0 }
 0x11d   :  { %v811_v32 = vmul.f32 -1.442695, %v1240_v31  ;;  %v1243_v33 = vpop.f32.mrb[5].mxu0 }
 0x11e   :  { %v809_v34 = vmul.f32 -1.442695, %v1243_v33  ;;  %v1246_v35 = vpop.f32.mrb[6].mxu0 }
 0x11f   :  { %963 = vpow2.f32 %v811_v32  ;;  %v812_v36 = vmul.f32 -1.442695, %v1246_v35  ;;  %v1249_v37 = vpop.f32.mrb[7].mxu0 }
 0x120   :  { %965 = vpow2.f32 %v809_v34  ;;  %v810_v38 = vmul.f32 -1.442695, %v1249_v37 }
 0x121   :  { %v956_v39 = vpop.eup %955  ;;  %967 = vpow2.f32 %v812_v36 }
 0x122   :  { %v958_v40 = vpop.eup %957  ;;  %v304_v41 = vadd.f32 1.0, %v956_v39  ;;  %969 = vpow2.f32 %v810_v38 }
 0x123   :  { %v960_v42 = vpop.eup %959  ;;  %v302_v43 = vadd.f32 1.0, %v958_v40 }
 0x124   :  { %v962_v44 = vpop.eup %961  ;;  %971 = vrcp.f32 %v304_v41  ;;  %v305_v45 = vadd.f32 1.0, %v960_v42  ;;  %v1252_v46 = vpop.f32.mrb[8].mxu0 }
 0x125   :  { %973 = vrcp.f32 %v302_v43  ;;  %v303_v47 = vadd.f32 1.0, %v962_v44  ;;  %v815_v48 = vmul.f32 -1.442695, %v1252_v46  ;;  %v1255_v49 = vpop.f32.mrb[9].mxu0 }
 0x126   :  { %975 = vrcp.f32 %v305_v45  ;;  %v813_v50 = vmul.f32 -1.442695, %v1255_v49  ;;  %v1258_v51 = vpop.f32.mrb[10].mxu0 }
 0x127   :  { %977 = vrcp.f32 %v303_v47  ;;  %v816_v52 = vmul.f32 -1.442695, %v1258_v51  ;;  %v1261_v53 = vpop.f32.mrb[11].mxu0 }
 0x128   :  { %979 = vpow2.f32 %v815_v48  ;;  %v814_v54 = vmul.f32 -1.442695, %v1261_v53 }
 0x129   :  { %v964_v55 = vpop.eup %963  ;;  %981 = vpow2.f32 %v813_v50 }
 0x12a   :  { %v966_v56 = vpop.eup %965  ;;  %v308_v57 = vadd.f32 1.0, %v964_v55  ;;  %983 = vpow2.f32 %v816_v52 }
 0x12b   :  { %v968_v58 = vpop.eup %967  ;;  %v306_v59 = vadd.f32 1.0, %v966_v56  ;;  %985 = vpow2.f32 %v814_v54 }
 0x12c   :  { %v970_v60 = vpop.eup %969  ;;  %987 = vrcp.f32 %v308_v57  ;;  %v309_v61 = vadd.f32 1.0, %v968_v58  ;;  %v1264_v62 = vpop.f32.mrb[12].mxu0 }
 0x12d   :  { %989 = vrcp.f32 %v306_v59  ;;  %v307_v63 = vadd.f32 1.0, %v970_v60  ;;  %v819_v0 = vmul.f32 -1.442695, %v1264_v62  ;;  %v1267_v1 = vpop.f32.mrb[13].mxu0 }
 0x12e   :  { %v972_v2 = vpop.eup %971  ;;  %991 = vrcp.f32 %v309_v61  ;;  %v817_v3 = vmul.f32 -1.442695, %v1267_v1  ;;  %v1270_v4 = vpop.f32.mrb[14].mxu0 }
 0x12f   :  { %v974_v5 = vpop.eup %973  ;;  %v352_v6 = vmul.f32 %v972_v2, %v1228_v23  ;;  %993 = vrcp.f32 %v307_v63  ;;  %v820_v7 = vmul.f32 -1.442695, %v1270_v4  ;;  %v1274_v8 = vpop.f32.mrb[15].mxu0 }
 0x130   :  { %v976_v9 = vpop.eup %975  ;;  %v350_v10 = vmul.f32 %v974_v5, %v1231_v25  ;;  %995 = vpow2.f32 %v819_v0  ;;  %v818_v11 = vmul.f32 -1.442695, %v1274_v8 }
 0x131   :  { %v978_v12 = vpop.eup %977  ;;  %368 = vst [vmem:[#allocation8 + $0x10] sm:$0xff] %v352_v6  ;;  %v353_v13 = vmul.f32 %v976_v9, %v1234_v27  ;;  %997 = vpow2.f32 %v817_v3 }
 0x132   :  { %v980_v14 = vpop.eup %979  ;;  %366 = vst [vmem:[#allocation8] sm:$0xff] %v350_v10  ;;  %v351_v15 = vmul.f32 %v978_v12, %v1237_v29  ;;  %999 = vpow2.f32 %v820_v7 }
 0x133   :  { %v982_v16 = vpop.eup %981  ;;  %369 = vst [vmem:[#allocation8 + $0x18] sm:$0xff] %v353_v13  ;;  %v383_v17 = vpack.c.bf16 %v353_v13, %v352_v6  ;;  %v312_v18 = vadd.f32 1.0, %v980_v14  ;;  %1001 = vpow2.f32 %v818_v11 }
 0x134   :  { %v984_v19 = vpop.eup %983  ;;  %367 = vst [vmem:[#allocation8 + $0x8] sm:$0xff] %v351_v15  ;;  %v382_v20 = vpack.c.bf16 %v351_v15, %v350_v10  ;;  %v310_v21 = vadd.f32 1.0, %v982_v16 }
 0x135   :  { %v986_v23 = vpop.eup %985  ;;  %1003 = vrcp.f32 %v312_v18  ;;  %v313_v24 = vadd.f32 1.0, %v984_v19 }
 0x136   :  { %v988_v25 = vpop.eup %987  ;;  %1005 = vrcp.f32 %v310_v21  ;;  %v311_v26 = vadd.f32 1.0, %v986_v23  ;;  %833 = vmatmul.mubr.msk.bf16.vlgmr.msra.gmra.mrb[0].mxu1 %vm470_vm1, %v382_v20  ;;  %899 = vmatprep.mubr.msk.bf16.mxu0 %vm470_vm1, %v382_v20 }
 0x137   :  { %v990_v27 = vpop.eup %989  ;;  %v356_v28 = vmul.f32 %v988_v25, %v1240_v31  ;;  %1007 = vrcp.f32 %v313_v24  ;;  %900 = vmatmul.mubr.msk.bf16.vlgmr.msra.gmra.mrb[16].mxu0 %vm470_vm1, %v383_v17  ;;  %537 = vmatprep.mubr.bf16.mxu1 %v1144_v22 }
 0x138   :  { %v992_v29 = vpop.eup %991  ;;  %v354_v30 = vmul.f32 %v990_v27, %v1243_v33  ;;  %1009 = vrcp.f32 %v311_v26 }
 0x139   :  { %v994_v32 = vpop.eup %993  ;;  %372 = vst [vmem:[#allocation8 + $0x30] sm:$0xff] %v356_v28  ;;  %v357_v34 = vmul.f32 %v992_v29, %v1246_v35 }
 0x13a   :  { %v996_v36 = vpop.eup %995  ;;  %370 = vst [vmem:[#allocation8 + $0x20] sm:$0xff] %v354_v30  ;;  %v355_v38 = vmul.f32 %v994_v32, %v1249_v37 }
 0x13b   :  { %v998_v39 = vpop.eup %997  ;;  %373 = vst [vmem:[#allocation8 + $0x38] sm:$0xff] %v357_v34  ;;  %v385_v31 = vpack.c.bf16 %v357_v34, %v356_v28  ;;  %v316_v40 = vadd.f32 1.0, %v996_v36 }
 0x13c   :  { %v1000_v41 = vpop.eup %999  ;;  %371 = vst [vmem:[#allocation8 + $0x28] sm:$0xff] %v355_v38  ;;  %v384_v42 = vpack.c.bf16 %v355_v38, %v354_v30  ;;  %v314_v43 = vadd.f32 1.0, %v998_v39 }
 0x13d   :  { %v1002_v44 = vpop.eup %1001  ;;  %1011 = vrcp.f32 %v316_v40  ;;  %v317_v33 = vadd.f32 1.0, %v1000_v41 }
 0x13e   :  { %1013 = vrcp.f32 %v314_v43  ;;  %v315_v45 = vadd.f32 1.0, %v1002_v44  ;;  %834 = vmatmul.mubr.msk.bf16.gmra.mrb[4].mxu1 %vm470_vm1, %v383_v17  ;;  %903 = vmatprep.mubr.msk.bf16.mxu0 %vm470_vm1, %v384_v42 }
 0x13f   :  { %v1004_v35 = vpop.eup %1003  ;;  %1015 = vrcp.f32 %v317_v33  ;;  %904 = vmatmul.mubr.msk.bf16.gmra.mrb[20].mxu0 %vm470_vm1, %v385_v31  ;;  %547 = vmatprep.mubr.bf16.mxu1 %v1144_v22 }
 0x140   :  { %v1006_v37 = vpop.eup %1005  ;;  %v360_v47 = vmul.f32 %v1004_v35, %v1252_v46  ;;  %1017 = vrcp.f32 %v315_v45 }
 0x141   :  { %v1008_v48 = vpop.eup %1007  ;;  %v358_v50 = vmul.f32 %v1006_v37, %v1255_v49 }
 0x142   :  { %v1010_v52 = vpop.eup %1009  ;;  %376 = vst [vmem:[#allocation8 + $0x50] sm:$0xff] %v360_v47  ;;  %v361_v54 = vmul.f32 %v1008_v48, %v1258_v51 }
 0x143   :  { %374 = vst [vmem:[#allocation8 + $0x40] sm:$0xff] %v358_v50  ;;  %v359_v55 = vmul.f32 %v1010_v52, %v1261_v53 }
 0x144   :  { %377 = vst [vmem:[#allocation8 + $0x58] sm:$0xff] %v361_v54  ;;  %v387_v56 = vpack.c.bf16 %v361_v54, %v360_v47 }
 0x145   :  { %375 = vst [vmem:[#allocation8 + $0x48] sm:$0xff] %v359_v55  ;;  %v386_v57 = vpack.c.bf16 %v359_v55, %v358_v50 }
 0x146   :  { %835 = vmatmul.mubr.msk.bf16.gmra.mrb[8].mxu1 %vm470_vm1, %v384_v42 }
 0x147   :  { %v1012_v58 = vpop.eup %1011  ;;  %907 = vmatprep.mubr.msk.bf16.mxu0 %vm470_vm1, %v386_v57  ;;  %557 = vmatprep.mubr.bf16.mxu1 %v1144_v22 }
 0x148   :  { %v1014_v46 = vpop.eup %1013  ;;  %v364_v49 = vmul.f32 %v1012_v58, %v1264_v62  ;;  %908 = vmatmul.mubr.msk.bf16.gmra.mrb[24].mxu0 %vm470_vm1, %v387_v56 }
 0x149   :  { %v1016_v51 = vpop.eup %1015  ;;  %v362_v59 = vmul.f32 %v1014_v46, %v1267_v1 }
 0x14a   :  { %v1018_v53 = vpop.eup %1017  ;;  %380 = vst [vmem:[#allocation8 + $0x70] sm:$0xff] %v364_v49  ;;  %v365_v60 = vmul.f32 %v1016_v51, %v1270_v4 }
 0x14b   :  { %378 = vst [vmem:[#allocation8 + $0x60] sm:$0xff] %v362_v59  ;;  %v363_v61 = vmul.f32 %v1018_v53, %v1274_v8 }
 0x14c   :  { %381 = vst [vmem:[#allocation8 + $0x78] sm:$0xff] %v365_v60  ;;  %v389_v63 = vpack.c.bf16 %v365_v60, %v364_v49 }
 0x14d   :  { %379 = vst [vmem:[#allocation8 + $0x68] sm:$0xff] %v363_v61  ;;  %v388_v0 = vpack.c.bf16 %v363_v61, %v362_v59 }
 0x14e   :  { %836 = vmatmul.mubr.msk.bf16.gmra.mrb[12].mxu1 %vm470_vm1, %v385_v31 }
 0x14f   :  { %911 = vmatprep.mubr.msk.bf16.mxu0 %vm470_vm1, %v388_v0  ;;  %567 = vmatprep.mubr.bf16.mxu1 %v1144_v22 }
 0x150   :  { %912 = vmatmul.mubr.msk.bf16.gmra.mrb[28].mxu0 %vm470_vm1, %v389_v63 }
 0x156   :  { %837 = vmatmul.mubr.msk.bf16.gmra.mrb[16].mxu1 %vm470_vm1, %v386_v57 }
 0x157   :  { %577 = vmatprep.mubr.bf16.mxu1 %v1144_v22 }
 0x15e   :  { %838 = vmatmul.mubr.msk.bf16.gmra.mrb[20].mxu1 %vm470_vm1, %v387_v56 }
 0x15f   :  { %587 = vmatprep.mubr.bf16.mxu1 %v1144_v22 }
 0x166   :  { %839 = vmatmul.mubr.msk.bf16.gmra.mrb[24].mxu1 %vm470_vm1, %v388_v0 }
 0x167   :  { %597 = vmatprep.mubr.bf16.mxu1 %v1144_v22 }
 0x16e   :  { %840 = vmatmul.mubr.msk.bf16.gmra.mrb[28].mxu1 %vm470_vm1, %v389_v63 }
 0x16f   :  { %1096 = shalt.err (!%p1093_p0)
}
 0x170   :  { %s1097_s5 = scalar_lea.hbm %s1342_s3, 2048 }
 0x171   :  { %p1098_p1 = scmp.ne.s32.totalorder %s1342_s3, %s1097_s5  ;;  %p1101_p2 = scmp.lt.u32.totalorder %s1097_s5, %s1342_s3 }
 0x173   :  { %p1103_p3 = pnand %p1101_p2, %p1098_p1 }
 0x175   :  { %1106 = shalt.err (!%p1103_p3)
}
 0x176   :  { %s1146_s10 = smov 128   ;;  %s1147_s11 = smov 8  }
 0x177   :  { %764 = dma.vmem_to_hbm [thread:$0]  %s759_s27, 2048, %s1342_s3, [#allocation4], %s1146_s10, %s1146_s10, %s1147_s11  }
 0x178   :  { %s1148_s3 = smov [#allocation9]  }
 0x179   :  { %s770_s13 = sshll.u32 %s1148_s3, 4  ;;  %s771_s13 = int_to_ptr.vmem [resolvable:$true] %s770_s13 }
 0x17a   :  { %s1107_s14 = scalar_lea.vmem %s771_s13, 6144  ;;  %p1112_p5 = scmp.lt.s32.totalorder %s771_s13, %s771_s13 }
 0x17b   :  { %p1108_p4 = scmp.ne.s32.totalorder %s771_s13, %s1107_s14  ;;  %p1113_p6 = scmp.lt.s32.totalorder %s1107_s14, %s1107_s14 }
 0x17d   :  { %p1114_p7 = por %p1113_p6, %p1112_p5 }
 0x17f   :  { %p1115_p8 = pnand %p1114_p7, %p1108_p4 }
 0x209   :  { %v529_v22 = vpop.f32.mrb[0].mxu1 }
 0x20a   :  { %705 = vst [vmem:[#allocation9] sm:$0xff] %v529_v22  ;;  %v531_v62 = vpop.f32.mrb[1].mxu1  ;;  %v901_v1 = vpop.f32.mrb[16].mxu0 }
 0x20b   :  { %706 = vst [vmem:[#allocation9 + $0x8] sm:$0xff] %v531_v62  ;;  %713 = vst [vmem:[#allocation9 + $0x40] sm:$0xff] %v901_v1  ;;  %v533_v2 = vpop.f32.mrb[2].mxu1  ;;  %v642_v3 = vpop.f32.mrb[17].mxu0 }
 0x20c   :  { %708 = vst [vmem:[#allocation9 + $0x18] sm:$0xff] %v533_v2  ;;  %707 = vst [vmem:[#allocation9 + $0x10] sm:$0xff] %v642_v3  ;;  %v535_v4 = vpop.f32.mrb[3].mxu1  ;;  %v902_v5 = vpop.f32.mrb[18].mxu0 }
 0x20d   :  { %709 = vst [vmem:[#allocation9 + $0x20] sm:$0xff] %v535_v4  ;;  %716 = vst [vmem:[#allocation9 + $0x58] sm:$0xff] %v902_v5  ;;  %v645_v6 = vpop.f32.mrb[19].mxu0 }
 0x20e   :  { %710 = vst [vmem:[#allocation9 + $0x28] sm:$0xff] %v645_v6 }
 0x211   :  { %v539_v7 = vpop.f32.mrb[4].mxu1 }
 0x212   :  { %711 = vst [vmem:[#allocation9 + $0x30] sm:$0xff] %v539_v7  ;;  %v541_v8 = vpop.f32.mrb[5].mxu1  ;;  %v905_v9 = vpop.f32.mrb[20].mxu0 }
 0x213   :  { %712 = vst [vmem:[#allocation9 + $0x38] sm:$0xff] %v541_v8  ;;  %725 = vst [vmem:[#allocation9 + $0xa0] sm:$0xff] %v905_v9  ;;  %v543_v10 = vpop.f32.mrb[6].mxu1  ;;  %v658_v11 = vpop.f32.mrb[21].mxu0 }
 0x214   :  { %714 = vst [vmem:[#allocation9 + $0x48] sm:$0xff] %v543_v10  ;;  %719 = vst [vmem:[#allocation9 + $0x70] sm:$0xff] %v658_v11  ;;  %v545_v12 = vpop.f32.mrb[7].mxu1  ;;  %v906_v13 = vpop.f32.mrb[22].mxu0 }
 0x215   :  { %715 = vst [vmem:[#allocation9 + $0x50] sm:$0xff] %v545_v12  ;;  %728 = vst [vmem:[#allocation9 + $0xb8] sm:$0xff] %v906_v13  ;;  %v661_v14 = vpop.f32.mrb[23].mxu0 }
 0x216   :  { %722 = vst [vmem:[#allocation9 + $0x88] sm:$0xff] %v661_v14 }
 0x219   :  { %v549_v15 = vpop.f32.mrb[8].mxu1 }
 0x21a   :  { %717 = vst [vmem:[#allocation9 + $0x60] sm:$0xff] %v549_v15  ;;  %v551_v16 = vpop.f32.mrb[9].mxu1 }
 0x21b   :  { %718 = vst [vmem:[#allocation9 + $0x68] sm:$0xff] %v551_v16  ;;  %v909_v17 = vpop.f32.mrb[24].mxu0  ;;  %v553_v18 = vpop.f32.mrb[10].mxu1 }
 0x21c   :  { %737 = vst [vmem:[#allocation9 + $0x100] sm:$0xff] %v909_v17  ;;  %720 = vst [vmem:[#allocation9 + $0x78] sm:$0xff] %v553_v18  ;;  %v674_v19 = vpop.f32.mrb[25].mxu0  ;;  %v555_v20 = vpop.f32.mrb[11].mxu1 }
 0x21d   :  { %731 = vst [vmem:[#allocation9 + $0xd0] sm:$0xff] %v674_v19  ;;  %721 = vst [vmem:[#allocation9 + $0x80] sm:$0xff] %v555_v20  ;;  %v910_v21 = vpop.f32.mrb[26].mxu0 }
 0x21e   :  { %740 = vst [vmem:[#allocation9 + $0x118] sm:$0xff] %v910_v21  ;;  %v677_v23 = vpop.f32.mrb[27].mxu0 }
 0x21f   :  { %734 = vst [vmem:[#allocation9 + $0xe8] sm:$0xff] %v677_v23 }
 0x221   :  { %v559_v24 = vpop.f32.mrb[12].mxu1 }
 0x222   :  { %723 = vst [vmem:[#allocation9 + $0x90] sm:$0xff] %v559_v24  ;;  %v561_v25 = vpop.f32.mrb[13].mxu1 }
 0x223   :  { %724 = vst [vmem:[#allocation9 + $0x98] sm:$0xff] %v561_v25  ;;  %v913_v26 = vpop.f32.mrb[28].mxu0  ;;  %v563_v27 = vpop.f32.mrb[14].mxu1 }
 0x224   :  { %749 = vst [vmem:[#allocation9 + $0x160] sm:$0xff] %v913_v26  ;;  %726 = vst [vmem:[#allocation9 + $0xa8] sm:$0xff] %v563_v27  ;;  %v690_v28 = vpop.f32.mrb[29].mxu0  ;;  %v565_v29 = vpop.f32.mrb[15].mxu1 }
 0x225   :  { %743 = vst [vmem:[#allocation9 + $0x130] sm:$0xff] %v690_v28  ;;  %727 = vst [vmem:[#allocation9 + $0xb0] sm:$0xff] %v565_v29  ;;  %v914_v30 = vpop.f32.mrb[30].mxu0 }
 0x226   :  { %752 = vst [vmem:[#allocation9 + $0x178] sm:$0xff] %v914_v30  ;;  %v693_v32 = vpop.f32.mrb[31].mxu0 }
 0x227   :  { %746 = vst [vmem:[#allocation9 + $0x148] sm:$0xff] %v693_v32 }
 0x229   :  { %v569_v34 = vpop.f32.mrb[16].mxu1 }
 0x22a   :  { %729 = vst [vmem:[#allocation9 + $0xc0] sm:$0xff] %v569_v34  ;;  %v571_v36 = vpop.f32.mrb[17].mxu1 }
 0x22b   :  { %730 = vst [vmem:[#allocation9 + $0xc8] sm:$0xff] %v571_v36  ;;  %v573_v38 = vpop.f32.mrb[18].mxu1 }
 0x22c   :  { %732 = vst [vmem:[#allocation9 + $0xd8] sm:$0xff] %v573_v38  ;;  %v575_v39 = vpop.f32.mrb[19].mxu1 }
 0x22d   :  { %733 = vst [vmem:[#allocation9 + $0xe0] sm:$0xff] %v575_v39 }
 0x231   :  { %v579_v31 = vpop.f32.mrb[20].mxu1 }
 0x232   :  { %735 = vst [vmem:[#allocation9 + $0xf0] sm:$0xff] %v579_v31  ;;  %v581_v40 = vpop.f32.mrb[21].mxu1 }
 0x233   :  { %736 = vst [vmem:[#allocation9 + $0xf8] sm:$0xff] %v581_v40  ;;  %v583_v41 = vpop.f32.mrb[22].mxu1 }
 0x234   :  { %738 = vst [vmem:[#allocation9 + $0x108] sm:$0xff] %v583_v41  ;;  %v585_v42 = vpop.f32.mrb[23].mxu1 }
 0x235   :  { %739 = vst [vmem:[#allocation9 + $0x110] sm:$0xff] %v585_v42 }
 0x239   :  { %v589_v43 = vpop.f32.mrb[24].mxu1 }
 0x23a   :  { %741 = vst [vmem:[#allocation9 + $0x120] sm:$0xff] %v589_v43  ;;  %v591_v44 = vpop.f32.mrb[25].mxu1 }
 0x23b   :  { %742 = vst [vmem:[#allocation9 + $0x128] sm:$0xff] %v591_v44  ;;  %v593_v33 = vpop.f32.mrb[26].mxu1 }
 0x23c   :  { %744 = vst [vmem:[#allocation9 + $0x138] sm:$0xff] %v593_v33  ;;  %v595_v45 = vpop.f32.mrb[27].mxu1 }
 0x23d   :  { %745 = vst [vmem:[#allocation9 + $0x140] sm:$0xff] %v595_v45 }
 0x241   :  { %v599_v35 = vpop.f32.mrb[28].mxu1 }
 0x242   :  { %747 = vst [vmem:[#allocation9 + $0x150] sm:$0xff] %v599_v35  ;;  %v601_v37 = vpop.f32.mrb[29].mxu1 }
 0x243   :  { %748 = vst [vmem:[#allocation9 + $0x158] sm:$0xff] %v601_v37  ;;  %v603_v47 = vpop.f32.mrb[30].mxu1 }
 0x244   :  { %750 = vst [vmem:[#allocation9 + $0x168] sm:$0xff] %v603_v47  ;;  %v605_v48 = vpop.f32.mrb[31].mxu1 }
 0x245   :  { %751 = vst [vmem:[#allocation9 + $0x170] sm:$0xff] %v605_v48 }
 0x246   :  { %1118 = shalt.err (!%p1115_p8)
}
 0x247   :  { %s1119_s17 = scalar_lea.hbm %s1343_s4, 6144 }
 0x248   :  { %p1120_p9 = scmp.ne.s32.totalorder %s1343_s4, %s1119_s17  ;;  %p1123_p10 = scmp.lt.u32.totalorder %s1119_s17, %s1343_s4 }
 0x24a   :  { %p1125_p11 = pnand %p1123_p10, %p1120_p9 }
 0x24c   :  { %1128 = shalt.err (!%p1125_p11)
}
 0x24d   :  { %s1149_s23 = smov 384   ;;  %s1150_s24 = smov 24  }
 0x24e   :  { %776 = dma.vmem_to_hbm [thread:$0]  %s771_s13, 6144, %s1343_s4, [#allocation10], %s1149_s23, %s1149_s23, %s1150_s24  }
 0x24f   :  { %1133 = dma.done.wait [#allocation4], 2048  }
 0x250   :  { %1134 = vsyncadd [#allocation4], 4294965248 }
 0x251   :  { %1135 = dma.done.wait [#allocation10], 6144  }
 0x252   :  { %1136 = vsyncadd [#allocation10], 4294961152 }
 0x253   :  { %783 = vsyncpa [#allocation3], 1 }
 0x254   :  { %784 = vsyncpa [#allocation6], 1 }
 0x255   :  { %785 = vsyncpa [#allocation4], 1 }
 0x256   :  { %786 = vsyncpa [#allocation10], 1 }

// kernel: _lambda_.5
= control target key start
LH: loop header
LB: loop body
LE: loop exit
PB: predicated region body
PF: predicated region fallthrough
CT: control target
= control target key end

     0   :  { %10 = vsyncpa [#allocation3], 0  ;;  %s1176_s0 = inlined_call_operand.hbm [shape: f32[128,64], index: 0, kind: input, shape index: {}]   ;;  %s1177_s1 = inlined_call_operand.hbm [shape: f32[128,64], index: 1, kind: input, shape index: {}]   ;;  %s1178_s2 = inlined_call_operand.hbm [shape: f32[1,64], index: 2, kind: input, shape index: {}]   ;;  %s1179_s3 = inlined_call_operand.hbm [shape: f32[1,64], index: 3, kind: input, shape index: {}]   ;;  %s1180_s4 = inlined_call_operand.hbm [shape: bf16[64,32], index: 4, kind: input, shape index: {}]   ;;  %s1181_s5 = inlined_call_operand.hbm [shape: f32[128,32], index: 5, kind: output, shape index: {}]  }
   0x1   :  { %11 = vsyncpa [#allocation6], 0 }
   0x2   :  { %12 = vsyncpa [#allocation9], 0 }
   0x3   :  { %13 = vsyncpa [#allocation4], 0  ;;  %s831_s18 = smov [#allocation5]   ;;  %s832_s20 = smov [#allocation8]  }
   0x4   :  { %s31_s19 = sshll.u32 %s831_s18, 4  ;;  %s54_s21 = sshll.u32 %s832_s20, 4  ;;  %s32_s19 = int_to_ptr.vmem [resolvable:$true] %s31_s19  ;;  %s871_s21 = int_to_ptr.vmem [resolvable:$true] %s54_s21 }
   0x5   :  { %s691_s24 = scalar_lea.hbm %s1177_s1, 2048 }
   0x6   :  { %p692_p0 = scmp.ne.s32.totalorder %s1177_s1, %s691_s24  ;;  %p695_p1 = scmp.lt.u32.totalorder %s691_s24, %s1177_s1 }
   0x8   :  { %p697_p2 = pnand %p695_p1, %p692_p0 }
   0xa   :  { %700 = shalt.err (!%p697_p2)
}
   0xb   :  { %s701_s29 = scalar_lea.vmem %s32_s19, 2048  ;;  %p706_p4 = scmp.lt.s32.totalorder %s32_s19, %s32_s19 }
   0xc   :  { %p702_p3 = scmp.ne.s32.totalorder %s32_s19, %s701_s29  ;;  %p707_p5 = scmp.lt.s32.totalorder %s701_s29, %s701_s29 }
   0xe   :  { %p708_p6 = por %p707_p5, %p706_p4 }
  0x10   :  { %p709_p7 = pnand %p708_p6, %p702_p3 }
  0x12   :  { %712 = shalt.err (!%p709_p7)
}
  0x13   :  { %s833_s30 = smov 128   ;;  %s834_s6 = smov 8  }
  0x14   :  { %37 = dma.hbm_to_vmem [thread:$0]  %s1177_s1, 2048, %s32_s19, [#allocation6], %s833_s30, %s833_s30, %s834_s6  }
  0x15   :  { %s713_s11 = scalar_lea.hbm %s1179_s3, 16 }
  0x16   :  { %p714_p8 = scmp.ne.s32.totalorder %s1179_s3, %s713_s11  ;;  %p717_p9 = scmp.lt.u32.totalorder %s713_s11, %s1179_s3 }
  0x18   :  { %p719_p10 = pnand %p717_p9, %p714_p8 }
  0x1a   :  { %722 = shalt.err (!%p719_p10)
}
  0x1b   :  { %s723_s16 = scalar_lea.vmem %s871_s21, 16  ;;  %s727_s1 = scalar_lea.vmem %s871_s21, 32 }
  0x1c   :  { %p724_p11 = scmp.ne.s32.totalorder %s871_s21, %s723_s16  ;;  %p728_p12 = scmp.lt.s32.totalorder %s871_s21, %s871_s21 }
  0x1d   :  { %p729_p13 = scmp.lt.s32.totalorder %s727_s1, %s723_s16 }
  0x1f   :  { %p730_p0 = por %p729_p13, %p728_p12 }
  0x21   :  { %p731_p1 = pnand %p730_p0, %p724_p11 }
  0x23   :  { %734 = shalt.err (!%p731_p1)
}
  0x24   :  { %57 = dma.hbm_to_vmem [thread:$0]  %s1179_s3, 16, %s871_s21, [#allocation9]  }
  0x25   :  { %s835_s19 = smov [#allocation2]   ;;  %s836_s22 = smov [#allocation7]  }
  0x26   :  { %s19_s20 = sshll.u32 %s835_s19, 4  ;;  %s44_s23 = sshll.u32 %s836_s22, 4  ;;  %s20_s20 = int_to_ptr.vmem [resolvable:$true] %s19_s20  ;;  %s45_s23 = int_to_ptr.vmem [resolvable:$true] %s44_s23 }
  0x27   :  { %s735_s26 = scalar_lea.hbm %s1176_s0, 2048 }
  0x28   :  { %p736_p2 = scmp.ne.s32.totalorder %s1176_s0, %s735_s26  ;;  %p739_p3 = scmp.lt.u32.totalorder %s735_s26, %s1176_s0 }
  0x2a   :  { %p741_p4 = pnand %p739_p3, %p736_p2 }
  0x2c   :  { %744 = shalt.err (!%p741_p4)
}
  0x2d   :  { %s745_s3 = scalar_lea.vmem %s20_s20, 2048  ;;  %p750_p6 = scmp.lt.s32.totalorder %s20_s20, %s20_s20 }
  0x2e   :  { %p746_p5 = scmp.ne.s32.totalorder %s20_s20, %s745_s3  ;;  %p751_p7 = scmp.lt.s32.totalorder %s745_s3, %s745_s3 }
  0x30   :  { %p752_p8 = por %p751_p7, %p750_p6 }
  0x32   :  { %p753_p9 = pnand %p752_p8, %p746_p5 }
  0x34   :  { %756 = shalt.err (!%p753_p9)
}
  0x35   :  { %25 = dma.hbm_to_vmem [thread:$0]  %s1176_s0, 2048, %s20_s20, [#allocation3], %s833_s30, %s833_s30, %s834_s6  }
  0x36   :  { %s757_s11 = scalar_lea.hbm %s1178_s2, 16 }
  0x37   :  { %p758_p10 = scmp.ne.s32.totalorder %s1178_s2, %s757_s11  ;;  %p761_p11 = scmp.lt.u32.totalorder %s757_s11, %s1178_s2 }
  0x39   :  { %p763_p12 = pnand %p761_p11, %p758_p10 }
  0x3b   :  { %766 = shalt.err (!%p763_p12)
}
  0x3c   :  { %s767_s16 = scalar_lea.vmem %s45_s23, 16  ;;  %s771_s1 = scalar_lea.vmem %s45_s23, 32 }
  0x3d   :  { %p768_p13 = scmp.ne.s32.totalorder %s45_s23, %s767_s16  ;;  %p772_p0 = scmp.lt.s32.totalorder %s45_s23, %s45_s23 }
  0x3e   :  { %p773_p1 = scmp.lt.s32.totalorder %s771_s1, %s767_s16 }
  0x40   :  { %p774_p2 = por %p773_p1, %p772_p0 }
  0x42   :  { %p775_p3 = pnand %p774_p2, %p768_p13 }
  0x44   :  { %778 = shalt.err (!%p775_p3)
}
  0x45   :  { %47 = dma.hbm_to_vmem [thread:$0]  %s1178_s2, 16, %s45_s23, [#allocation6]  }
  0x46   :  { %s837_s18 = smov [#allocation10]   ;;  %s779_s24 = scalar_lea.hbm %s1180_s4, 512 }
  0x47   :  { %s63_s19 = sshll.u32 %s837_s18, 4  ;;  %p780_p4 = scmp.ne.s32.totalorder %s1180_s4, %s779_s24  ;;  %s64_s19 = int_to_ptr.vmem [resolvable:$true] %s63_s19 }
  0x48   :  { %p783_p5 = scmp.lt.u32.totalorder %s779_s24, %s1180_s4 }
  0x4a   :  { %p785_p6 = pnand %p783_p5, %p780_p4 }
  0x4c   :  { %788 = shalt.err (!%p785_p6)
}
  0x4d   :  { %s789_s29 = scalar_lea.vmem %s64_s19, 512  ;;  %p794_p8 = scmp.lt.s32.totalorder %s64_s19, %s64_s19 }
  0x4e   :  { %p790_p7 = scmp.ne.s32.totalorder %s64_s19, %s789_s29  ;;  %p795_p9 = scmp.lt.s32.totalorder %s789_s29, %s789_s29 }
  0x50   :  { %p796_p10 = por %p795_p9, %p794_p8 }
  0x52   :  { %p797_p11 = pnand %p796_p10, %p790_p7 }
  0x54   :  { %800 = shalt.err (!%p797_p11)
}
  0x55   :  { %s838_s2 = smov 64   ;;  %s839_s23 = smov 4  }
  0x56   :  { %69 = dma.hbm_to_vmem [thread:$0]  %s1180_s4, 512, %s64_s19, [#allocation9], %s838_s2, %s838_s2, %s839_s23  }
  0x57   :  { %823 = dma.done.wait [#allocation3], 2048  }
  0x58   :  { %824 = vsyncadd [#allocation3], 4294965248 }
  0x59   :  { %825 = dma.done.wait [#allocation6], 2064  }
  0x5a   :  { %826 = vsyncadd [#allocation6], 4294965232 }
  0x5b   :  { %827 = dma.done.wait [#allocation9], 528  }
  0x5c   :  { %828 = vsyncadd [#allocation9], 4294966768  ;;  %vm102_vm0 = vcmask 523264   ;;  %v86_v0 = vld [vmem:[#allocation2] sm:$0xff]  ;;  %v87_v2 = vld [vmem:[#allocation2 + $0x8] sm:$0xff]  ;;  %vm551_vm1 = vcmask 261120  }
  0x5d   :  { %v94_v1 = vld [vmem:[#allocation2 + $0x40] sm:$0xff]  ;;  %v103_v3 = vsel %vm102_vm0, %v86_v0, 0.0  ;;  %v95_v5 = vld [vmem:[#allocation2 + $0x48] sm:$0xff]  ;;  %v947_v6 = vld [vmem:[#allocation2 + $0x10] sm:$0xff]  ;;  %v106_v7 = vsel %vm102_vm0, %v87_v2, 0.0  ;;  %s840_s4 = smov [#allocation11]  }
  0x5e   :  { %v127_v4 = vsel %vm102_vm0, %v94_v1, 0.0  ;;  %104 = vadd.xlane.f32.xlu0 %v103_v3  ;;  %v130_v8 = vsel %vm102_vm0, %v95_v5, 0.0  ;;  %v89_v9 = vld [vmem:[#allocation2 + $0x18] sm:$0xff]  ;;  %v109_v10 = vsel %vm102_vm0, %v947_v6, 0.0  ;;  %v954_v12 = vld [vmem:[#allocation2 + $0x50] sm:$0xff]  ;;  %v962_v16 = vld [vmem:[#allocation2 + $0x20] sm:$0xff] }
  0x5f   :  { %128 = vadd.xlane.f32.xlu1 %v127_v4  ;;  %v112_v11 = vsel %vm102_vm0, %v89_v9, 0.0  ;;  %v956_v13 = vld [vmem:[#allocation2 + $0x58] sm:$0xff]  ;;  %v133_v14 = vsel %vm102_vm0, %v954_v12, 0.0  ;;  %v964_v17 = vld [vmem:[#allocation2 + $0x28] sm:$0xff]  ;;  %v115_v18 = vsel %vm102_vm0, %v962_v16, 0.0  ;;  %v970_v20 = vld [vmem:[#allocation2 + $0x60] sm:$0xff] }
  0x60   :  { %v136_v15 = vsel %vm102_vm0, %v956_v13, 0.0  ;;  %v118_v19 = vsel %vm102_vm0, %v964_v17, 0.0  ;;  %v972_v21 = vld [vmem:[#allocation2 + $0x68] sm:$0xff]  ;;  %v139_v22 = vsel %vm102_vm0, %v970_v20, 0.0  ;;  %v978_v24 = vld [vmem:[#allocation2 + $0x30] sm:$0xff]  ;;  %v980_v25 = vld [vmem:[#allocation2 + $0x38] sm:$0xff] }
  0x61   :  { %v142_v23 = vsel %vm102_vm0, %v972_v21, 0.0  ;;  %v121_v26 = vsel %vm102_vm0, %v978_v24, 0.0  ;;  %v124_v27 = vsel %vm102_vm0, %v980_v25, 0.0  ;;  %v986_v28 = vld [vmem:[#allocation2 + $0x70] sm:$0xff]  ;;  %v988_v29 = vld [vmem:[#allocation2 + $0x78] sm:$0xff]  ;;  %s573_s21 = sshll.u32 %s840_s4, 4  ;;  %s574_s21 = int_to_ptr.vmem [resolvable:$true] %s573_s21 }
  0x62   :  { %107 = vadd.xlane.f32.xlu0 %v106_v7  ;;  %v145_v30 = vsel %vm102_vm0, %v986_v28, 0.0  ;;  %v148_v31 = vsel %vm102_vm0, %v988_v29, 0.0  ;;  %s801_s8 = scalar_lea.vmem %s574_s21, 2048  ;;  %p806_p13 = scmp.lt.s32.totalorder %s574_s21, %s574_s21 }
  0x63   :  { %131 = vadd.xlane.f32.xlu1 %v130_v8  ;;  %p802_p12 = scmp.ne.s32.totalorder %s574_s21, %s801_s8  ;;  %p807_p0 = scmp.lt.s32.totalorder %s801_s8, %s801_s8 }
  0x65   :  { %p808_p1 = por %p807_p0, %p806_p13 }
  0x66   :  { %110 = vadd.xlane.f32.xlu0 %v109_v10 }
  0x67   :  { %113 = vadd.xlane.f32.xlu1 %v112_v11  ;;  %p809_p2 = pnand %p808_p1, %p802_p12 }
  0x6a   :  { %134 = vadd.xlane.f32.xlu0 %v133_v14 }
  0x6b   :  { %137 = vadd.xlane.f32.xlu1 %v136_v15 }
  0x6e   :  { %116 = vadd.xlane.f32.xlu0 %v115_v18 }
  0x6f   :  { %119 = vadd.xlane.f32.xlu1 %v118_v19 }
  0x72   :  { %140 = vadd.xlane.f32.xlu0 %v139_v22 }
  0x73   :  { %143 = vadd.xlane.f32.xlu1 %v142_v23 }
  0x76   :  { %122 = vadd.xlane.f32.xlu0 %v121_v26 }
  0x77   :  { %125 = vadd.xlane.f32.xlu1 %v124_v27 }
  0x7a   :  { %146 = vadd.xlane.f32.xlu0 %v145_v30 }
  0x7b   :  { %149 = vadd.xlane.f32.xlu1 %v148_v31 }
  0xeb   :  { %v105_v32 = vpop.xlane.xlu0 %104 }
  0xec   :  { %v129_v33 = vpop.xlane.xlu1 %128  ;;  %v152_v34 = vmul.f32 0.015625, %v105_v32 }
  0xed   :  { %v160_v35 = vmul.f32 0.015625, %v129_v33 }
  0xee   :  { %v994_v36 = vsub.f32 %v86_v0, %v152_v34 }
  0xef   :  { %v996_v37 = vsub.f32 %v94_v1, %v160_v35  ;;  %v108_v38 = vpop.xlane.xlu0 %107 }
  0xf0   :  { %v132_v39 = vpop.xlane.xlu1 %131  ;;  %v153_v40 = vmul.f32 0.015625, %v108_v38  ;;  %v184_v42 = vmul.f32 %v994_v36, %v994_v36 }
  0xf1   :  { %v161_v41 = vmul.f32 0.015625, %v132_v39  ;;  %v192_v43 = vmul.f32 %v996_v37, %v996_v37 }
  0xf2   :  { %v1002_v44 = vsub.f32 %v87_v2, %v153_v40  ;;  %v200_v46 = vsel %vm102_vm0, %v184_v42, 0.0 }
  0xf3   :  { %v1004_v45 = vsub.f32 %v95_v5, %v161_v41  ;;  %201 = vadd.xlane.f32.xlu0 %v200_v46  ;;  %v111_v47 = vpop.xlane.xlu0 %110  ;;  %v224_v49 = vsel %vm102_vm0, %v192_v43, 0.0 }
  0xf4   :  { %v114_v48 = vpop.xlane.xlu1 %113  ;;  %v154_v50 = vmul.f32 0.015625, %v111_v47  ;;  %v185_v52 = vmul.f32 %v1002_v44, %v1002_v44 }
  0xf5   :  { %v155_v51 = vmul.f32 0.015625, %v114_v48  ;;  %v193_v53 = vmul.f32 %v1004_v45, %v1004_v45 }
  0xf6   :  { %v1013_v54 = vsub.f32 %v947_v6, %v154_v50  ;;  %v203_v56 = vsel %vm102_vm0, %v185_v52, 0.0 }
  0xf7   :  { %v1015_v55 = vsub.f32 %v89_v9, %v155_v51  ;;  %225 = vadd.xlane.f32.xlu0 %v224_v49  ;;  %204 = vadd.xlane.f32.xlu1 %v203_v56  ;;  %v135_v57 = vpop.xlane.xlu0 %134  ;;  %v227_v59 = vsel %vm102_vm0, %v193_v53, 0.0  ;;  %v656_v53 = vld [vmem:[#allocation10 + $0x8] sm:$0xff]   ;;  %v657_v56 = vld [vmem:[#allocation10 + $0x10] sm:$0xff]  }
  0xf8   :  { %v138_v58 = vpop.xlane.xlu1 %137  ;;  %v162_v60 = vmul.f32 0.015625, %v135_v57  ;;  %v186_v62 = vmul.f32 %v1013_v54, %v1013_v54  ;;  %v658_v57 = vld [vmem:[#allocation10 + $0x18] sm:$0xff]  }
  0xf9   :  { %v163_v61 = vmul.f32 0.015625, %v138_v58  ;;  %v187_v63 = vmul.f32 %v1015_v55, %v1015_v55 }
  0xfa   :  { %v1024_v0 = vsub.f32 %v954_v12, %v162_v60  ;;  %v206_v2 = vsel %vm102_vm0, %v186_v62, 0.0 }
  0xfb   :  { %v1027_v1 = vsub.f32 %v956_v13, %v163_v61  ;;  %228 = vadd.xlane.f32.xlu1 %v227_v59  ;;  %207 = vadd.xlane.f32.xlu0 %v206_v2  ;;  %v117_v3 = vpop.xlane.xlu0 %116  ;;  %v209_v5 = vsel %vm102_vm0, %v187_v63, 0.0 }
  0xfc   :  { %v120_v4 = vpop.xlane.xlu1 %119  ;;  %v156_v6 = vmul.f32 0.015625, %v117_v3  ;;  %v194_v8 = vmul.f32 %v1024_v0, %v1024_v0 }
  0xfd   :  { %v157_v7 = vmul.f32 0.015625, %v120_v4  ;;  %v195_v9 = vmul.f32 %v1027_v1, %v1027_v1 }
  0xfe   :  { %v1036_v10 = vsub.f32 %v962_v16, %v156_v6  ;;  %v230_v12 = vsel %vm102_vm0, %v194_v8, 0.0 }
  0xff   :  { %v1039_v11 = vsub.f32 %v964_v17, %v157_v7  ;;  %210 = vadd.xlane.f32.xlu1 %v209_v5  ;;  %231 = vadd.xlane.f32.xlu0 %v230_v12  ;;  %v141_v13 = vpop.xlane.xlu0 %140  ;;  %v233_v15 = vsel %vm102_vm0, %v195_v9, 0.0 }
 0x100   :  { %v144_v14 = vpop.xlane.xlu1 %143  ;;  %v164_v18 = vmul.f32 0.015625, %v141_v13  ;;  %v188_v22 = vmul.f32 %v1036_v10, %v1036_v10 }
 0x101   :  { %v165_v19 = vmul.f32 0.015625, %v144_v14  ;;  %v189_v16 = vmul.f32 %v1039_v11, %v1039_v11 }
 0x102   :  { %v1048_v23 = vsub.f32 %v970_v20, %v164_v18  ;;  %v212_v26 = vsel %vm102_vm0, %v188_v22, 0.0 }
 0x103   :  { %v1051_v17 = vsub.f32 %v972_v21, %v165_v19  ;;  %234 = vadd.xlane.f32.xlu1 %v233_v15  ;;  %213 = vadd.xlane.f32.xlu0 %v212_v26  ;;  %v123_v27 = vpop.xlane.xlu0 %122  ;;  %v215_v31 = vsel %vm102_vm0, %v189_v16, 0.0  ;;  %v1085_v26 = vld [vmem:[#allocation7] ss:$0 sm:$0xff] }
 0x104   :  { %v126_v30 = vpop.xlane.xlu1 %125  ;;  %v158_v32 = vmul.f32 0.015625, %v123_v27  ;;  %v196_v34 = vmul.f32 %v1048_v23, %v1048_v23 }
 0x105   :  { %v159_v33 = vmul.f32 0.015625, %v126_v30  ;;  %v197_v20 = vmul.f32 %v1051_v17, %v1051_v17 }
 0x106   :  { %v1060_v35 = vsub.f32 %v978_v24, %v158_v32  ;;  %v236_v38 = vsel %vm102_vm0, %v196_v34, 0.0  ;;  %v1088_v34 = vld [vmem:[#allocation8] ss:$0 sm:$0xff] }
 0x107   :  { %v1063_v21 = vsub.f32 %v980_v25, %v159_v33  ;;  %216 = vadd.xlane.f32.xlu1 %v215_v31  ;;  %237 = vadd.xlane.f32.xlu0 %v236_v38  ;;  %v147_v39 = vpop.xlane.xlu0 %146  ;;  %v239_v41 = vsel %vm102_vm0, %v197_v20, 0.0 }
 0x108   :  { %v150_v40 = vpop.xlane.xlu1 %149  ;;  %v166_v42 = vmul.f32 0.015625, %v147_v39  ;;  %v190_v46 = vmul.f32 %v1060_v35, %v1060_v35 }
 0x109   :  { %v167_v43 = vmul.f32 0.015625, %v150_v40  ;;  %v191_v24 = vmul.f32 %v1063_v21, %v1063_v21 }
 0x10a   :  { %v1072_v47 = vsub.f32 %v986_v28, %v166_v42  ;;  %v218_v48 = vsel %vm102_vm0, %v190_v46, 0.0 }
 0x10b   :  { %v1075_v25 = vsub.f32 %v988_v29, %v167_v43  ;;  %240 = vadd.xlane.f32.xlu1 %v239_v41  ;;  %219 = vadd.xlane.f32.xlu0 %v218_v48  ;;  %v221_v49 = vsel %vm102_vm0, %v191_v24, 0.0  ;;  %v655_v29 = vld [vmem:[#allocation10] sm:$0xff]  }
 0x10c   :  { %v198_v50 = vmul.f32 %v1072_v47, %v1072_v47  ;;  %613 = vmatprep.subr.bf16.mxu0 %v655_v29  ;;  %637 = vmatprep.subr.bf16.mxu1 %v655_v29 }
 0x10d   :  { %v199_v51 = vmul.f32 %v1075_v25, %v1075_v25  ;;  %614 = vmatpush3.bf16.msra.mxu0 %v655_v29  ;;  %641 = vmatpush3.bf16.msra.mxu1 %v655_v29 }
 0x10e   :  { %v242_v52 = vsel %vm102_vm0, %v198_v50, 0.0  ;;  %615 = vmatprep.subr.bf16.mxu0 %v656_v53  ;;  %638 = vmatprep.subr.bf16.mxu1 %v656_v53 }
 0x10f   :  { %222 = vadd.xlane.f32.xlu1 %v221_v49  ;;  %243 = vadd.xlane.f32.xlu0 %v242_v52  ;;  %v245_v28 = vsel %vm102_vm0, %v199_v51, 0.0  ;;  %v358_v49 = vld [vmem:[#allocation5] sm:$0xff] }
 0x111   :  { %616 = vmatpush3.bf16.msra.mxu0 %v656_v53  ;;  %642 = vmatpush3.bf16.msra.mxu1 %v656_v53  ;;  %v359_v53 = vld [vmem:[#allocation5 + $0x8] sm:$0xff] }
 0x112   :  { %617 = vmatprep.subr.bf16.mxu0 %v657_v56  ;;  %639 = vmatprep.subr.bf16.mxu1 %v657_v56 }
 0x113   :  { %246 = vadd.xlane.f32.xlu1 %v245_v28 }
 0x115   :  { %618 = vmatpush3.bf16.msra.mxu0 %v657_v56  ;;  %643 = vmatpush3.bf16.msra.mxu1 %v657_v56 }
 0x116   :  { %619 = vmatprep.subr.bf16.mxu0 %v658_v57  ;;  %640 = vmatprep.subr.bf16.mxu1 %v658_v57 }
 0x119   :  { %620 = vmatpush3.bf16.msra.mxu0 %v658_v57  ;;  %644 = vmatpush3.bf16.msra.mxu1 %v658_v57 }
 0x180   :  { %v202_v58 = vpop.xlane.xlu0 %201 }
 0x181   :  { %v248_v59 = vmul.f32 0.015625, %v202_v58 }
 0x183   :  { %v264_v60 = vadd.f32 1e-06, %v248_v59 }
 0x184   :  { %v205_v61 = vpop.xlane.xlu1 %204  ;;  %v226_v62 = vpop.xlane.xlu0 %225 }
 0x185   :  { %659 = vrsqrt.f32 %v264_v60  ;;  %v249_v63 = vmul.f32 0.015625, %v205_v61  ;;  %v256_v2 = vmul.f32 0.015625, %v226_v62 }
 0x187   :  { %v265_v3 = vadd.f32 1e-06, %v249_v63  ;;  %v272_v4 = vadd.f32 1e-06, %v256_v2  ;;  %v366_v2 = vld [vmem:[#allocation5 + $0x40] sm:$0xff] }
 0x188   :  { %v229_v5 = vpop.xlane.xlu1 %228  ;;  %v208_v6 = vpop.xlane.xlu0 %207 }
 0x189   :  { %661 = vrsqrt.f32 %v265_v3  ;;  %v257_v7 = vmul.f32 0.015625, %v229_v5  ;;  %v250_v8 = vmul.f32 0.015625, %v208_v6 }
 0x18a   :  { %663 = vrsqrt.f32 %v272_v4 }
 0x18b   :  { %v273_v9 = vadd.f32 1e-06, %v257_v7  ;;  %v266_v12 = vadd.f32 1e-06, %v250_v8 }
 0x18c   :  { %v211_v13 = vpop.xlane.xlu1 %210  ;;  %v232_v14 = vpop.xlane.xlu0 %231 }
 0x18d   :  { %665 = vrsqrt.f32 %v273_v9  ;;  %v251_v15 = vmul.f32 0.015625, %v211_v13  ;;  %v258_v18 = vmul.f32 0.015625, %v232_v14  ;;  %v367_v9 = vld [vmem:[#allocation5 + $0x48] sm:$0xff] }
 0x18e   :  { %667 = vrsqrt.f32 %v266_v12 }
 0x18f   :  { %v660_v19 = vpop.eup %659  ;;  %v267_v22 = vadd.f32 1e-06, %v251_v15  ;;  %v274_v16 = vadd.f32 1e-06, %v258_v18 }
 0x190   :  { %v235_v27 = vpop.xlane.xlu1 %234  ;;  %v214_v30 = vpop.xlane.xlu0 %213  ;;  %v296_v31 = vmul.f32 %v660_v19, %v994_v36 }
 0x191   :  { %669 = vrsqrt.f32 %v267_v22  ;;  %v259_v32 = vmul.f32 0.015625, %v235_v27  ;;  %v252_v33 = vmul.f32 0.015625, %v214_v30 }
 0x192   :  { %671 = vrsqrt.f32 %v274_v16  ;;  %v319_v20 = vmul.f32 %v1085_v26, %v296_v31 }
 0x193   :  { %v662_v38 = vpop.eup %661  ;;  %v275_v39 = vadd.f32 1e-06, %v259_v32  ;;  %v268_v40 = vadd.f32 1e-06, %v252_v33 }
 0x194   :  { %v664_v41 = vpop.eup %663  ;;  %v217_v42 = vpop.xlane.xlu1 %216  ;;  %v297_v46 = vmul.f32 %v662_v38, %v1002_v44  ;;  %v342_v24 = vadd.f32 %v1088_v34, %v319_v20 }
 0x195   :  { %v238_v43 = vpop.xlane.xlu0 %237  ;;  %673 = vrsqrt.f32 %v275_v39  ;;  %v253_v36 = vmul.f32 0.015625, %v217_v42  ;;  %v304_v50 = vmul.f32 %v664_v41, %v996_v37  ;;  %v361_v39 = vld [vmem:[#allocation5 + $0x18] sm:$0xff] }
 0x196   :  { %v260_v48 = vmul.f32 0.015625, %v238_v43  ;;  %675 = vrsqrt.f32 %v268_v40  ;;  %v320_v51 = vmul.f32 %v1085_v26, %v297_v46  ;;  %v374_v60 = vmul.f32 %v358_v49, %v342_v24 }
 0x197   :  { %v666_v52 = vpop.eup %665  ;;  %v269_v28 = vadd.f32 1e-06, %v253_v36  ;;  %v327_v56 = vmul.f32 %v1085_v26, %v304_v50 }
 0x198   :  { %v276_v29 = vadd.f32 1e-06, %v260_v48  ;;  %v668_v57 = vpop.eup %667  ;;  %v241_v58 = vpop.xlane.xlu1 %240  ;;  %v343_v59 = vadd.f32 %v1088_v34, %v320_v51  ;;  %v305_v61 = vmul.f32 %v666_v52, %v1004_v45 }
 0x199   :  { %v220_v44 = vpop.xlane.xlu0 %219  ;;  %v298_v62 = vmul.f32 %v668_v57, %v1013_v54  ;;  %677 = vrsqrt.f32 %v269_v28  ;;  %v261_v37 = vmul.f32 0.015625, %v241_v58  ;;  %v350_v5 = vadd.f32 %v1088_v34, %v327_v56 }
 0x19a   :  { %v254_v63 = vmul.f32 0.015625, %v220_v44  ;;  %679 = vrsqrt.f32 %v276_v29  ;;  %v375_v3 = vmul.f32 %v359_v53, %v343_v59  ;;  %v328_v4 = vmul.f32 %v1085_v26, %v305_v61  ;;  %v369_v29 = vld [vmem:[#allocation5 + $0x58] sm:$0xff] }
 0x19b   :  { %v670_v6 = vpop.eup %669  ;;  %v277_v7 = vadd.f32 1e-06, %v261_v37  ;;  %v321_v12 = vmul.f32 %v1085_v26, %v298_v62  ;;  %v382_v19 = vmul.f32 %v366_v2, %v350_v5  ;;  %v363_v2 = vld [vmem:[#allocation5 + $0x28] sm:$0xff] }
 0x19c   :  { %v270_v8 = vadd.f32 1e-06, %v254_v63  ;;  %v672_v13 = vpop.eup %671  ;;  %v299_v45 = vmul.f32 %v670_v6, %v1015_v55  ;;  %v223_v54 = vpop.xlane.xlu1 %222  ;;  %v390_v15 = vpack.c.bf16 %v375_v3, %v374_v60  ;;  %v351_v18 = vadd.f32 %v1088_v34, %v328_v4  ;;  %v360_v55 = vld [vmem:[#allocation5 + $0x10] sm:$0xff]  ;;  %v362_v63 = vld [vmem:[#allocation5 + $0x20] sm:$0xff] }
 0x19d   :  { %v244_v14 = vpop.xlane.xlu0 %243  ;;  %v306_v22 = vmul.f32 %v672_v13, %v1024_v0  ;;  %681 = vrsqrt.f32 %v277_v7  ;;  %v255_v16 = vmul.f32 0.015625, %v223_v54  ;;  %v344_v32 = vadd.f32 %v1088_v34, %v321_v12  ;;  %v371_v54 = vld [vmem:[#allocation5 + $0x68] sm:$0xff] }
 0x19e   :  { %v262_v27 = vmul.f32 0.015625, %v244_v14  ;;  %683 = vrsqrt.f32 %v270_v8  ;;  %621 = vmatprep.mubr.msk.bf16.mxu0 %vm102_vm0, %v390_v15  ;;  %v383_v30 = vmul.f32 %v367_v9, %v351_v18  ;;  %v322_v31 = vmul.f32 %v1085_v26, %v299_v45  ;;  %v370_v45 = vld [vmem:[#allocation5 + $0x60] sm:$0xff] }
 0x19f   :  { %v674_v33 = vpop.eup %673  ;;  %v271_v20 = vadd.f32 1e-06, %v255_v16  ;;  %v329_v40 = vmul.f32 %v1085_v26, %v306_v22  ;;  %v376_v48 = vmul.f32 %v360_v55, %v344_v32  ;;  %v364_v32 = vld [vmem:[#allocation5 + $0x30] sm:$0xff]  ;;  %v365_v55 = vld [vmem:[#allocation5 + $0x38] sm:$0xff] }
 0x1a0   :  { %v278_v38 = vadd.f32 1e-06, %v262_v27  ;;  %v676_v41 = vpop.eup %675  ;;  %v307_v0 = vmul.f32 %v674_v33, %v1027_v1  ;;  %v247_v42 = vpop.xlane.xlu1 %246  ;;  %v394_v43 = vpack.c.bf16 %v383_v30, %v382_v19  ;;  %v345_v46 = vadd.f32 %v1088_v34, %v322_v31  ;;  %v368_v1 = vld [vmem:[#allocation5 + $0x50] sm:$0xff] }
 0x1a1   :  { %v300_v24 = vmul.f32 %v676_v41, %v1036_v10  ;;  %685 = vrsqrt.f32 %v271_v20  ;;  %v263_v36 = vmul.f32 0.015625, %v247_v42  ;;  %v352_v51 = vadd.f32 %v1088_v34, %v329_v40  ;;  %v373_v42 = vld [vmem:[#allocation5 + $0x78] sm:$0xff] }
 0x1a2   :  { %687 = vrsqrt.f32 %v278_v38  ;;  %629 = vmatprep.mubr.msk.bf16.mxu1 %vm102_vm0, %v394_v43  ;;  %v377_v49 = vmul.f32 %v361_v39, %v345_v46  ;;  %v330_v50 = vmul.f32 %v1085_v26, %v307_v0  ;;  %v372_v0 = vld [vmem:[#allocation5 + $0x70] sm:$0xff] }
 0x1a3   :  { %v678_v52 = vpop.eup %677  ;;  %v279_v28 = vadd.f32 1e-06, %v263_v36  ;;  %v323_v53 = vmul.f32 %v1085_v26, %v300_v24  ;;  %v384_v59 = vmul.f32 %v368_v1, %v352_v51 }
 0x1a4   :  { %v680_v56 = vpop.eup %679  ;;  %v301_v10 = vmul.f32 %v678_v52, %v1039_v11  ;;  %v391_v57 = vpack.c.bf16 %v377_v49, %v376_v48  ;;  %v353_v58 = vadd.f32 %v1088_v34, %v330_v50 }
 0x1a5   :  { %v308_v44 = vmul.f32 %v680_v56, %v1048_v23  ;;  %689 = vrsqrt.f32 %v279_v28  ;;  %v346_v62 = vadd.f32 %v1088_v34, %v323_v53 }
 0x1a6   :  { %622 = vmatmul.mubr.msk.bf16.vlgmr.msra.gmra.mrb[0].mxu0 %vm102_vm0, %v391_v57  ;;  %v385_v60 = vmul.f32 %v369_v29, %v353_v58  ;;  %v324_v61 = vmul.f32 %v1085_v26, %v301_v10 }
 0x1a7   :  { %v682_v37 = vpop.eup %681  ;;  %v331_v3 = vmul.f32 %v1085_v26, %v308_v44  ;;  %v378_v7 = vmul.f32 %v362_v63, %v346_v62 }
 0x1a8   :  { %v684_v11 = vpop.eup %683  ;;  %v309_v4 = vmul.f32 %v682_v37, %v1051_v17  ;;  %v395_v5 = vpack.c.bf16 %v385_v60, %v384_v59  ;;  %v347_v23 = vadd.f32 %v1088_v34, %v324_v61 }
 0x1a9   :  { %v302_v6 = vmul.f32 %v684_v11, %v1060_v35  ;;  %v354_v12 = vadd.f32 %v1088_v34, %v331_v3 }
 0x1aa   :  { %630 = vmatmul.mubr.msk.bf16.vlgmr.msra.gmra.mrb[0].mxu1 %vm102_vm0, %v395_v5  ;;  %v379_v8 = vmul.f32 %v363_v2, %v347_v23  ;;  %v332_v9 = vmul.f32 %v1085_v26, %v309_v4 }
 0x1ab   :  { %v686_v13 = vpop.eup %685  ;;  %v325_v14 = vmul.f32 %v1085_v26, %v302_v6  ;;  %v386_v22 = vmul.f32 %v370_v45, %v354_v12 }
 0x1ac   :  { %v688_v15 = vpop.eup %687  ;;  %v303_v17 = vmul.f32 %v686_v13, %v1063_v21  ;;  %v392_v18 = vpack.c.bf16 %v379_v8, %v378_v7  ;;  %v355_v19 = vadd.f32 %v1088_v34, %v332_v9 }
 0x1ad   :  { %v310_v35 = vmul.f32 %v688_v15, %v1072_v47  ;;  %v348_v30 = vadd.f32 %v1088_v34, %v325_v14 }
 0x1ae   :  { %625 = vmatprep.mubr.msk.bf16.mxu0 %vm102_vm0, %v392_v18  ;;  %v387_v16 = vmul.f32 %v371_v54, %v355_v19  ;;  %v326_v27 = vmul.f32 %v1085_v26, %v303_v17 }
 0x1af   :  { %v690_v31 = vpop.eup %689  ;;  %v333_v33 = vmul.f32 %v1085_v26, %v310_v35  ;;  %v380_v47 = vmul.f32 %v364_v32, %v348_v30 }
 0x1b0   :  { %v311_v21 = vmul.f32 %v690_v31, %v1075_v25  ;;  %v396_v20 = vpack.c.bf16 %v387_v16, %v386_v22  ;;  %v349_v38 = vadd.f32 %v1088_v34, %v326_v27 }
 0x1b1   :  { %v356_v41 = vadd.f32 %v1088_v34, %v333_v33 }
 0x1b2   :  { %633 = vmatprep.mubr.msk.bf16.mxu1 %vm102_vm0, %v396_v20  ;;  %v381_v39 = vmul.f32 %v365_v55, %v349_v38  ;;  %v334_v40 = vmul.f32 %v1085_v26, %v311_v21 }
 0x1b3   :  { %v388_v24 = vmul.f32 %v372_v0, %v356_v41 }
 0x1b4   :  { %v393_v43 = vpack.c.bf16 %v381_v39, %v380_v47  ;;  %v357_v46 = vadd.f32 %v1088_v34, %v334_v40 }
 0x1b6   :  { %626 = vmatmul.mubr.msk.bf16.gmra.mrb[4].mxu0 %vm102_vm0, %v393_v43  ;;  %v389_v25 = vmul.f32 %v373_v42, %v357_v46 }
 0x1b8   :  { %v397_v36 = vpack.c.bf16 %v389_v25, %v388_v24 }
 0x1ba   :  { %634 = vmatmul.mubr.msk.bf16.gmra.mrb[4].mxu1 %vm102_vm0, %v397_v36 }
 0x279   :  { %v623_v48 = vpop.f32.mrb[0].mxu0 }
 0x27a   :  { %554 = vst.msk [vmem:[#allocation11 + $0x10] sm:$0xff] %vm551_vm1, %v623_v48  ;;  %v488_v49 = vpop.f32.mrb[1].mxu0 }
 0x27b   :  { %552 = vst.msk [vmem:[#allocation11] sm:$0xff] %vm551_vm1, %v488_v49  ;;  %v624_v26 = vpop.f32.mrb[2].mxu0 }
 0x27c   :  { %555 = vst.msk [vmem:[#allocation11 + $0x18] sm:$0xff] %vm551_vm1, %v624_v26  ;;  %v491_v50 = vpop.f32.mrb[3].mxu0 }
 0x27d   :  { %553 = vst.msk [vmem:[#allocation11 + $0x8] sm:$0xff] %vm551_vm1, %v491_v50  ;;  %v631_v34 = vpop.f32.mrb[0].mxu1 }
 0x27e   :  { %562 = vst.msk [vmem:[#allocation11 + $0x50] sm:$0xff] %vm551_vm1, %v631_v34  ;;  %v520_v51 = vpop.f32.mrb[1].mxu1 }
 0x27f   :  { %560 = vst.msk [vmem:[#allocation11 + $0x40] sm:$0xff] %vm551_vm1, %v520_v51  ;;  %v632_v52 = vpop.f32.mrb[2].mxu1 }
 0x280   :  { %563 = vst.msk [vmem:[#allocation11 + $0x58] sm:$0xff] %vm551_vm1, %v632_v52  ;;  %v523_v28 = vpop.f32.mrb[3].mxu1 }
 0x281   :  { %561 = vst.msk [vmem:[#allocation11 + $0x48] sm:$0xff] %vm551_vm1, %v523_v28 }
 0x289   :  { %v627_v1 = vpop.f32.mrb[4].mxu0 }
 0x28a   :  { %558 = vst.msk [vmem:[#allocation11 + $0x30] sm:$0xff] %vm551_vm1, %v627_v1  ;;  %v504_v29 = vpop.f32.mrb[5].mxu0 }
 0x28b   :  { %556 = vst.msk [vmem:[#allocation11 + $0x20] sm:$0xff] %vm551_vm1, %v504_v29  ;;  %v628_v53 = vpop.f32.mrb[6].mxu0 }
 0x28c   :  { %559 = vst.msk [vmem:[#allocation11 + $0x38] sm:$0xff] %vm551_vm1, %v628_v53  ;;  %v507_v56 = vpop.f32.mrb[7].mxu0 }
 0x28d   :  { %557 = vst.msk [vmem:[#allocation11 + $0x28] sm:$0xff] %vm551_vm1, %v507_v56  ;;  %v635_v10 = vpop.f32.mrb[4].mxu1 }
 0x28e   :  { %566 = vst.msk [vmem:[#allocation11 + $0x70] sm:$0xff] %vm551_vm1, %v635_v10  ;;  %v536_v57 = vpop.f32.mrb[5].mxu1 }
 0x28f   :  { %564 = vst.msk [vmem:[#allocation11 + $0x60] sm:$0xff] %vm551_vm1, %v536_v57  ;;  %v636_v58 = vpop.f32.mrb[6].mxu1 }
 0x290   :  { %567 = vst.msk [vmem:[#allocation11 + $0x78] sm:$0xff] %vm551_vm1, %v636_v58  ;;  %v539_v44 = vpop.f32.mrb[7].mxu1 }
 0x291   :  { %565 = vst.msk [vmem:[#allocation11 + $0x68] sm:$0xff] %vm551_vm1, %v539_v44 }
 0x292   :  { %812 = shalt.err (!%p809_p2)
}
 0x293   :  { %s813_s11 = scalar_lea.hbm %s1181_s5, 2048 }
 0x294   :  { %p814_p3 = scmp.ne.s32.totalorder %s1181_s5, %s813_s11  ;;  %p817_p4 = scmp.lt.u32.totalorder %s813_s11, %s1181_s5 }
 0x296   :  { %p819_p5 = pnand %p817_p4, %p814_p3 }
 0x298   :  { %822 = shalt.err (!%p819_p5)
}
 0x299   :  { %579 = dma.vmem_to_hbm [thread:$0]  %s574_s21, 2048, %s1181_s5, [#allocation4], %s833_s30, %s833_s30, %s834_s6  }
 0x29a   :  { %829 = dma.done.wait [#allocation4], 2048  }
 0x29b   :  { %830 = vsyncadd [#allocation4], 4294965248 }
 0x29c   :  { %583 = vsyncpa [#allocation3], 1 }
 0x29d   :  { %584 = vsyncpa [#allocation6], 1 }
 0x29e   :  { %585 = vsyncpa [#allocation9], 1 }
 0x29f   :  { %586 = vsyncpa [#allocation4], 1 }

// kernel: _lambda_.4
= control target key start
LH: loop header
LB: loop body
LE: loop exit
PB: predicated region body
PF: predicated region fallthrough
CT: control target
= control target key end

     0   :  { %s15890_s0 = inlined_call_operand.hbm [shape: f32[2,64,4,64], index: 0, kind: input, shape index: {}]   ;;  %s15891_s1 = inlined_call_operand.hbm [shape: f32[2,64,4,64], index: 1, kind: input, shape index: {}]   ;;  %s15892_s2 = inlined_call_operand.hbm [shape: f32[2,64,4,16], index: 2, kind: input, shape index: {}]   ;;  %s15893_s3 = inlined_call_operand.hbm [shape: f32[2,64,4,16], index: 3, kind: input, shape index: {}]   ;;  %s15894_s4 = inlined_call_operand.hbm [shape: f32[4,16,64], index: 4, kind: input, shape index: {}]   ;;  %s15895_s5 = inlined_call_operand.hbm [shape: f32[4,64], index: 5, kind: input, shape index: {}]   ;;  %s15896_s6 = inlined_call_operand.hbm [shape: f32[4,64], index: 6, kind: input, shape index: {}]   ;;  %s15897_s7 = inlined_call_operand.hbm [shape: f32[2,64,4,64], index: 7, kind: output, shape index: {}]  }
   0x1   :  { %15964 = sst [smem:[#allocation78_spill]] %s15891_s1 }
   0x2   :  { %15965 = sst [smem:[#allocation79_spill]] %s15894_s4 }
   0x3   :  { %15966 = sst [smem:[#allocation80_spill]] %s15895_s5 }
   0x4   :  { %15967 = sst [smem:[#allocation81_spill]] %s15897_s7 }
   0x5   :  { %12 = vsyncpa [#allocation6], 0 }
   0x6   :  { %14 = vsyncpa [#allocation6 + $0x1], 0 }
   0x7   :  { %15 = vsyncpa [#allocation9], 0 }
   0x8   :  { %17 = vsyncpa [#allocation9 + $0x1], 0 }
   0x9   :  { %18 = vsyncpa [#allocation12], 0 }
   0xa   :  { %20 = vsyncpa [#allocation12 + $0x1], 0 }
   0xb   :  { %21 = vsyncpa [#allocation15], 0 }
   0xc   :  { %22 = vsyncpa [#allocation7], 0 }
   0xd   :  { %24 = vsyncpa [#allocation7 + $0x1], 0  ;;  %s11151_s24 = smov 0   ;;  %s11153_s25 = smov 0  }
   0xe   :  { %s11155_s26 = smov 0   ;;  %s11157_s27 = smov 0  }
   0xf   :  { %s11159_s28 = smov 0   ;;  %s11161_s29 = smov 0  }
  0x10 LB: > { %15968 = sst [smem:[#allocation24_spill]] %s11069_s24  ;;  %s11182_s30 = sadd.s32 4294967295, %s11089_s29   ;;  %s11089_s29 = sphi %s11161_s29, %s30_s29   ;;  %s11085_s28 = sphi %s11159_s28, %s16243_s28   ;;  %s11081_s27 = sphi %s11157_s27, %s16242_s27   ;;  %s11077_s26 = sphi %s11155_s26, %s16246_s26   ;;  %s11073_s25 = sphi %s11153_s25, %s16245_s25   ;;  %s11069_s24 = sphi %s11151_s24, %s16244_s24  }
  0x11   : > { %15969 = sst [smem:[#allocation25_spill]] %s11081_s27  ;;  %s9050_s8 = sadd.s32 4294967294, %s11089_s29  }
  0x12   : > { %15970 = sst [smem:[#allocation26_spill]] %s11085_s28  ;;  %p58_p0 = scmp.ne.s32.totalorder %s11077_s26, %s11073_s25 }
  0x13   : > { %p59_p1 = scmp.eq.s32.totalorder %s11089_s29, 0  ;;  %p64_p2 = scmp.ne.s32.totalorder %s11073_s25, %s11069_s24 }
  0x14   : > { %p15899_p3 = scmp.eq.s32.totalorder %s11182_s30, 0  ;;  %p237_p4 = scmp.eq.s32.totalorder %s11182_s30, 1 }
  0x15   : > { %p11193_p5 = por %p59_p1, %p58_p0  ;;  %p243_p6 = scmp.eq.s32.totalorder %s9050_s8, 1 }
  0x16   : > { %p11199_p7 = por %p15899_p3, %p64_p2  ;;  %p11203_p8 = por %p237_p4, %p58_p0 }
  0x17   : > { %p11207_p9 = por %p243_p6, %p64_p2  ;;  %p9051_p10 = scmp.ge.s32.totalorder %s11089_s29, 1 }
  0x18   : > { %s15972_s11 = scalar_select %p11199_p7, 1, 0 }
  0x19   : > { %s15973_s12 = scalar_select %p11203_p8, 1, 0 }
  0x1a   : > { %s15975_s13 = scalar_select %p11207_p9, 1, 0 }
  0x1b   : > { %15974 = sst [smem:[#allocation27_spill]] %s15973_s12  ;;  %p250_p11 = scmp.lt.s32.totalorder %s11089_s29, 3 }
  0x1c   : > { %15976 = sst [smem:[#allocation28_spill]] %s15975_s13  ;;  %s11095_s15 = smov [#allocation13]  }
  0x1d   : > { %p11213_p12 = pnand %p9051_p10, %p250_p11  ;;  %s262_s16 = sshll.u32 %s11095_s15, 4  ;;  %s11217_s16 = int_to_ptr.vmem [resolvable:$true] %s262_s16 }
  0x1e   : > { %s11096_s18 = smov [#allocation14]   ;;  %s15979_s4 = sld [smem:[#allocation79_spill]] }
  0x1f   : > { %s15977_s14 = scalar_select %p11213_p12, 1, 0 }
  0x20   : > { %p9339_p13 = pneg %p11213_p12  ;;  %s276_s19 = sshll.u32 %s11096_s18, 4  ;;  %s11228_s19 = int_to_ptr.vmem [resolvable:$true] %s276_s19 }
  0x22   : > { %p11224_p1 = pnand %p9339_p13, %p15899_p3 }
  0x24   : > { %s15978_s17 = scalar_select %p11224_p1, 1, 0 }
  0x25   : > { %s10783_s23 = scalar_lea.hbm %s15979_s4, 1024  ;;  %p11239_p4 = pneg %p11224_p1 }
  0x26   : > { %p10784_p2 = scmp.ne.s32.totalorder %s15979_s4, %s10783_s23  ;;  %p10790_p11 = scmp.lt.u32.totalorder %s10783_s23, %s15979_s4 }
  0x27   : > { %s15980_s9 = scalar_select %p11239_p4, 1, 0 }
  0x28   : > { %p10786_p6 = pnand %p11239_p4, %p10784_p2 }
  0x2a   : > { %p10787_p10 = pneg %p10786_p6 }
  0x2c   : > { %p10792_p13 = pnand %p10790_p11, %p10787_p10 }
  0x2e   : > { %10795 = shalt.err (!%p10792_p13)
}
  0x2f   : > { %s10796_s21 = scalar_lea.vmem %s11217_s16, 1024  ;;  %p10804_p8 = scmp.lt.s32.totalorder %s11217_s16, %s11217_s16 }
  0x30   : > { %p10797_p0 = scmp.ne.s32.totalorder %s11217_s16, %s10796_s21  ;;  %p10805_p7 = scmp.lt.s32.totalorder %s10796_s21, %s10796_s21 }
  0x32   : > { %p10799_p3 = pnand %p10797_p0, %p11239_p4  ;;  %p10806_p2 = por %p10805_p7, %p10804_p8 }
  0x34   : > { %p10800_p9 = pneg %p10799_p3 }
  0x36   : > { %p10807_p6 = pnand %p10806_p2, %p10800_p9 }
  0x38   : > { %10810 = shalt.err (!%p10807_p6)
}
  0x39   : > { %s11097_s22 = smov 128   ;;  %s11098_s13 = smov 8  }
  0x3a   : > { %9342 = dma.hbm_to_vmem [thread:$0]  (!%p11224_p1), %s15979_s4, 1024, %s11217_s16, [#allocation12], %s11097_s22, %s11097_s22, %s11098_s13  }
  0x3b   : > { %s15981_s5 = sld [smem:[#allocation80_spill]] }
  0x41   : > { %s10811_s20 = scalar_lea.hbm %s15981_s5, 64 }
  0x42   : > { %p10812_p3 = scmp.ne.s32.totalorder %s15981_s5, %s10811_s20  ;;  %p10818_p9 = scmp.lt.u32.totalorder %s10811_s20, %s15981_s5 }
  0x44   : > { %p10814_p7 = pnand %p10812_p3, %p11239_p4 }
  0x46   : > { %p10815_p8 = pneg %p10814_p7 }
  0x48   : > { %p10820_p0 = pnand %p10818_p9, %p10815_p8 }
  0x4a   : > { %10823 = shalt.err (!%p10820_p0)
}
  0x4b   : > { %s10824_s16 = scalar_lea.vmem %s11228_s19, 64  ;;  %p10832_p2 = scmp.lt.s32.totalorder %s11228_s19, %s11228_s19 }
  0x4c   : > { %p10825_p10 = scmp.ne.s32.totalorder %s11228_s19, %s10824_s16  ;;  %p10833_p6 = scmp.lt.s32.totalorder %s10824_s16, %s10824_s16 }
  0x4e   : > { %p10827_p11 = pnand %p10825_p10, %p11239_p4  ;;  %p10834_p3 = por %p10833_p6, %p10832_p2 }
  0x50   : > { %p10828_p13 = pneg %p10827_p11 }
  0x52   : > { %p10835_p7 = pnand %p10834_p3, %p10828_p13 }
  0x54   : > { %10838 = shalt.err (!%p10835_p7)
}
  0x55   : > { %9345 = dma.hbm_to_vmem [thread:$0]  (!%p11224_p1), %s15981_s5, 64, %s11228_s19, [#allocation15]  }
  0x56   : > { %s15982_s12 = sadd.s32 1, %s11085_s28  ;;  %p9369_p9 = scmp.lt.s32.totalorder %s11089_s29, 2 }
  0x57   : > { %p44_p8 = scmp.ge.s32.totalorder %s15982_s12, 2  ;;  %s15906_s20 = sand.u32 1, %s11077_s26  }
  0x58   : > { %s11288_s22 = sshll.u32 %s11085_s28, 12  ;;  %s15983_s13 = smov %s15982_s12 }
  0x59   : > { %s16248_s13 = smov (%p44_p8, %s15983_s13), 0  ;;  %s11296_s23 = sshll.u32 %s15906_s20, 8 }
  0x5a   : > { %15984 = sst [smem:[#allocation29_spill]] %s16248_s13  ;;  %p11300_p0 = pnand %p9369_p9, %p11193_p5 }
  0x5b   : > { %s46_s19 = ssub.s32 %s11085_s28, %s16248_s13  ;;  %s15907_s15 = sand.u32 1, %s11089_s29  }
  0x5c   : > { %s15985_s8 = scalar_select %p11300_p0, 1, 0 }
  0x5d   : > { %p49_p10 = scmp.eq.s32.totalorder %s46_s19, 0  ;;  %s15986_s18 = sadd.s32 1, %s11077_s26 }
  0x5e   : > { %s15988_s1 = sld [smem:[#allocation78_spill]]  ;;  %s325_s10 = scalar_lea.vmem [#allocation8], %s11296_s23 }
  0x5f   : > { %s11310_s21 = scalar_select %p49_p10, %s11077_s26, %s15986_s18  }
  0x60   : > { %s334_s12 = sshll.u32 %s325_s10, 4  ;;  %s11323_s20 = scalar_lea.sflag [#allocation9], %s15907_s15  ;;  %s11319_s12 = int_to_ptr.vmem [resolvable:$true] %s334_s12 }
  0x61   : > { %15987 = sst [smem:[#allocation30_spill]] %s11310_s21  ;;  %p11329_p11 = pneg %p11300_p0 }
  0x64   : > { %s11316_s24 = scalar_lea.hbm %s15988_s1, %s11288_s22  ;;  %s10844_s10 = scalar_lea.hbm %s15988_s1, 8192 }
  0x65   : > { %s10839_s19 = scalar_lea.hbm %s11316_s24, 4096  ;;  %p10845_p6 = scmp.lt.u32.totalorder %s11316_s24, %s15988_s1 }
  0x66   : > { %p10840_p5 = scmp.ne.s32.totalorder %s11316_s24, %s10839_s19  ;;  %p10846_p3 = scmp.lt.u32.totalorder %s10844_s10, %s10839_s19 }
  0x67   : > { %p10848_p8 = scmp.lt.u32.totalorder %s10839_s19, %s11316_s24 }
  0x68   : > { %p10842_p13 = pnand %p11329_p11, %p10840_p5  ;;  %p10847_p7 = por %p10846_p3, %p10845_p6 }
  0x6a   : > { %p10843_p2 = pneg %p10842_p13  ;;  %p10849_p9 = por %p10848_p8, %p10847_p7 }
  0x6c   : > { %p10850_p10 = pnand %p10849_p9, %p10843_p2 }
  0x6e   : > { %10853 = shalt.err (!%p10850_p10)
}
  0x6f   : > { %s10854_s15 = scalar_lea.vmem %s11319_s12, 4096  ;;  %s11099_s16 = smov [#allocation8]  }
  0x70   : > { %p10855_p5 = scmp.ne.s32.totalorder %s11319_s12, %s10854_s15  ;;  %s10859_s7 = sshll.u32 %s11099_s16, 4  ;;  %s10860_s7 = int_to_ptr.vmem [resolvable:$false] %s10859_s7 }
  0x71   : > { %s10861_s4 = scalar_lea.vmem %s10860_s7, 8192  ;;  %p10862_p1 = scmp.lt.s32.totalorder %s11319_s12, %s10860_s7 }
  0x72   : > { %p10857_p13 = pnand %p10855_p5, %p11329_p11  ;;  %p10863_p4 = scmp.lt.s32.totalorder %s10861_s4, %s10854_s15 }
  0x74   : > { %p10858_p12 = pneg %p10857_p13  ;;  %p10864_p6 = por %p10863_p4, %p10862_p1 }
  0x76   : > { %p10865_p3 = pnand %p10864_p6, %p10858_p12 }
  0x78   : > { %10868 = shalt.err (!%p10865_p3)
}
  0x79   : > { %s11100_s5 = smov 64   ;;  %s11101_s19 = smov 4  }
  0x7a   : > { %9355 = dma.hbm_to_vmem [thread:$0]  (!%p11300_p0), %s11316_s24, 4096, %s11319_s12, %s11323_s20, %s11100_s5, %s11100_s5, %s11101_s19  }
  0x7b   : > { %s11102_s10 = smov [#allocation16]   ;;  %s11360_s4 = scalar_lea.hbm %s15890_s0, %s11288_s22 }
  0x7c   : > { %s287_s16 = sshll.u32 %s11102_s10, 4  ;;  %s10869_s28 = scalar_lea.hbm %s15896_s6, 64  ;;  %s288_s16 = int_to_ptr.vmem [resolvable:$true] %s287_s16 }
  0x7d   : > { %p10870_p12 = scmp.ne.s32.totalorder %s15896_s6, %s10869_s28  ;;  %p15990_p1 = scmp.ne.s32.totalorder %s15980_s9, 0 }
  0x7e   : > { %p10876_p7 = scmp.lt.u32.totalorder %s10869_s28, %s15896_s6 }
  0x7f   : > { %p10872_p4 = pnand %p10870_p12, %p15990_p1 }
  0x81   : > { %p10873_p2 = pneg %p10872_p4 }
  0x83   : > { %p10878_p8 = pnand %p10876_p7, %p10873_p2 }
  0x85   : > { %10881 = shalt.err (!%p10878_p8)
}
  0x86   : > { %s10882_s10 = scalar_lea.vmem %s288_s16, 64  ;;  %p10890_p13 = scmp.lt.s32.totalorder %s288_s16, %s288_s16 }
  0x87   : > { %p10883_p9 = scmp.ne.s32.totalorder %s288_s16, %s10882_s10  ;;  %p10891_p6 = scmp.lt.s32.totalorder %s10882_s10, %s10882_s10 }
  0x89   : > { %p10885_p10 = pnand %p10883_p9, %p15990_p1  ;;  %p10892_p3 = por %p10891_p6, %p10890_p13 }
  0x8b   : > { %p10886_p5 = pneg %p10885_p10 }
  0x8d   : > { %p10893_p0 = pnand %p10892_p3, %p10886_p5 }
  0x8f   : > { %10896 = shalt.err (!%p10893_p0)
}
  0x90   : > { %p15991_p12 = scmp.ne.s32.totalorder %s15978_s17, 0  ;;  %s302_s28 = scalar_lea.vmem [#allocation5], %s11296_s23 }
  0x91   : > { %s311_s9 = sshll.u32 %s302_s28, 4  ;;  %s11387_s17 = scalar_lea.hbm %s15892_s2, %s11288_s22  ;;  %s11381_s9 = int_to_ptr.vmem [resolvable:$true] %s311_s9 }
  0x92   : > { %9348 = dma.hbm_to_vmem [thread:$0]  (!%p15991_p12), %s15896_s6, 64, %s288_s16, [#allocation15]  }
  0x93   : > { %s15992_s15 = sand.u32 1, %s11077_s26   ;;  %s10897_s24 = scalar_lea.hbm %s11360_s4, 4096 }
  0x94   : > { %s11391_s7 = scalar_lea.sflag [#allocation6], %s15992_s15  ;;  %p10898_p0 = scmp.ne.s32.totalorder %s11360_s4, %s10897_s24 }
  0x95   : > { %s10902_s16 = scalar_lea.hbm %s15890_s0, 8192  ;;  %p10903_p2 = scmp.lt.u32.totalorder %s11360_s4, %s15890_s0 }
  0x96   : > { %p10900_p1 = pnand %p10898_p0, %p11329_p11  ;;  %p10904_p7 = scmp.lt.u32.totalorder %s10902_s16, %s10897_s24 }
  0x97   : > { %p10906_p9 = scmp.lt.u32.totalorder %s10897_s24, %s11360_s4 }
  0x98   : > { %p10901_p4 = pneg %p10900_p1  ;;  %p10905_p8 = por %p10904_p7, %p10903_p2 }
  0x9a   : > { %p10907_p10 = por %p10906_p9, %p10905_p8 }
  0x9c   : > { %p10908_p5 = pnand %p10907_p10, %p10901_p4 }
  0x9e   : > { %10911 = shalt.err (!%p10908_p5)
}
  0x9f   : > { %s10912_s28 = scalar_lea.vmem %s11381_s9, 4096  ;;  %s11103_s13 = smov [#allocation5]  }
  0xa0   : > { %p10913_p13 = scmp.ne.s32.totalorder %s11381_s9, %s10912_s28  ;;  %s10917_s21 = sshll.u32 %s11103_s13, 4  ;;  %s10918_s21 = int_to_ptr.vmem [resolvable:$false] %s10917_s21 }
  0xa1   : > { %s10919_s15 = scalar_lea.vmem %s10918_s21, 8192  ;;  %p10920_p12 = scmp.lt.s32.totalorder %s11381_s9, %s10918_s21 }
  0xa2   : > { %p10915_p6 = pnand %p10913_p13, %p11329_p11  ;;  %p10921_p0 = scmp.lt.s32.totalorder %s10919_s15, %s10912_s28 }
  0xa4   : > { %p10916_p3 = pneg %p10915_p6  ;;  %p10922_p1 = por %p10921_p0, %p10920_p12 }
  0xa6   : > { %p10923_p2 = pnand %p10922_p1, %p10916_p3 }
  0xa8   : > { %10926 = shalt.err (!%p10923_p2)
}
  0xa9   : > { %p15993_p4 = scmp.ne.s32.totalorder %s15985_s8, 0  ;;  %s348_s24 = scalar_lea.vmem [#allocation10], %s11296_s23 }
  0xaa   : > { %s357_s12 = sshll.u32 %s348_s24, 4  ;;  %s11425_s1 = scalar_lea.hbm %s15893_s3, %s11288_s22  ;;  %s11419_s12 = int_to_ptr.vmem [resolvable:$true] %s357_s12 }
  0xab   : > { %9352 = dma.hbm_to_vmem [thread:$0]  (!%p15993_p4), %s11360_s4, 4096, %s11381_s9, %s11391_s7, %s11100_s5, %s11100_s5, %s11101_s19  }
  0xac   : > { %s10927_s27 = scalar_lea.hbm %s11387_s17, 4096  ;;  %s10932_s21 = scalar_lea.hbm %s15892_s2, 8192 }
  0xad   : > { %p10928_p7 = scmp.ne.s32.totalorder %s11387_s17, %s10927_s27  ;;  %p10933_p10 = scmp.lt.u32.totalorder %s11387_s17, %s15892_s2 }
  0xae   : > { %p10934_p5 = scmp.lt.u32.totalorder %s10932_s21, %s10927_s27  ;;  %p10936_p6 = scmp.lt.u32.totalorder %s10927_s27, %s11387_s17 }
  0xaf   : > { %p10930_p8 = pnand %p10928_p7, %p11329_p11 }
  0xb0   : > { %p10935_p13 = por %p10934_p5, %p10933_p10 }
  0xb1   : > { %p10931_p9 = pneg %p10930_p8 }
  0xb2   : > { %p10937_p3 = por %p10936_p6, %p10935_p13 }
  0xb4   : > { %p10938_p12 = pnand %p10937_p3, %p10931_p9 }
  0xb6   : > { %10941 = shalt.err (!%p10938_p12)
}
  0xb7   : > { %s10942_s22 = scalar_lea.vmem %s11419_s12, 4096  ;;  %s11104_s9 = smov [#allocation10]  }
  0xb8   : > { %p10943_p0 = scmp.ne.s32.totalorder %s11419_s12, %s10942_s22  ;;  %s10947_s7 = sshll.u32 %s11104_s9, 4  ;;  %s10948_s7 = int_to_ptr.vmem [resolvable:$false] %s10947_s7 }
  0xb9   : > { %s10949_s24 = scalar_lea.vmem %s10948_s7, 8192  ;;  %p10950_p7 = scmp.lt.s32.totalorder %s11419_s12, %s10948_s7 }
  0xba   : > { %p10945_p1 = pnand %p10943_p0, %p11329_p11  ;;  %p10951_p8 = scmp.lt.s32.totalorder %s10949_s24, %s10942_s22 }
  0xbc   : > { %p10946_p2 = pneg %p10945_p1  ;;  %p10952_p10 = por %p10951_p8, %p10950_p7 }
  0xbe   : > { %p10953_p5 = pnand %p10952_p10, %p10946_p2 }
  0xc0   : > { %10956 = shalt.err (!%p10953_p5)
}
  0xc1   : > { %9358 = dma.hbm_to_vmem [thread:$0]  (!%p15993_p4), %s11387_s17, 4096, %s11419_s12, %s11323_s20, %s11100_s5, %s11100_s5, %s11101_s19  }
  0xc2   : > { %s371_s10 = scalar_lea.vmem [#allocation11], %s11296_s23  ;;  %s15994_s27 = sand.u32 1, %s11089_s29  }
  0xc3   : > { %s380_s16 = sshll.u32 %s371_s10, 4  ;;  %s11457_s28 = scalar_lea.sflag [#allocation12], %s15994_s27  ;;  %s11453_s16 = int_to_ptr.vmem [resolvable:$true] %s380_s16 }
  0xc4   : > { %s10957_s13 = scalar_lea.hbm %s11425_s1, 4096  ;;  %s10962_s4 = scalar_lea.hbm %s15893_s3, 8192 }
  0xc5   : > { %p10958_p9 = scmp.ne.s32.totalorder %s11425_s1, %s10957_s13  ;;  %p10963_p3 = scmp.lt.u32.totalorder %s11425_s1, %s15893_s3 }
  0xc6   : > { %p10964_p12 = scmp.lt.u32.totalorder %s10962_s4, %s10957_s13  ;;  %p10966_p1 = scmp.lt.u32.totalorder %s10957_s13, %s11425_s1 }
  0xc7   : > { %p10960_p13 = pnand %p10958_p9, %p11329_p11 }
  0xc8   : > { %p10965_p0 = por %p10964_p12, %p10963_p3 }
  0xc9   : > { %p10961_p6 = pneg %p10960_p13 }
  0xca   : > { %p10967_p2 = por %p10966_p1, %p10965_p0 }
  0xcc   : > { %p10968_p7 = pnand %p10967_p2, %p10961_p6 }
  0xce   : > { %10971 = shalt.err (!%p10968_p7)
}
  0xcf   : > { %s10972_s20 = scalar_lea.vmem %s11453_s16, 4096  ;;  %s11105_s23 = smov [#allocation11]  }
  0xd0   : > { %p10973_p8 = scmp.ne.s32.totalorder %s11453_s16, %s10972_s20  ;;  %s10977_s17 = sshll.u32 %s11105_s23, 4  ;;  %s10978_s17 = int_to_ptr.vmem [resolvable:$false] %s10977_s17 }
  0xd1   : > { %s10979_s12 = scalar_lea.vmem %s10978_s17, 8192  ;;  %p10980_p9 = scmp.lt.s32.totalorder %s11453_s16, %s10978_s17 }
  0xd2   : > { %p10975_p10 = pnand %p10973_p8, %p11329_p11  ;;  %p10981_p13 = scmp.lt.s32.totalorder %s10979_s12, %s10972_s20 }
  0xd4   : > { %p10976_p5 = pneg %p10975_p10  ;;  %p10982_p3 = por %p10981_p13, %p10980_p9 }
  0xd6   : > { %p10983_p12 = pnand %p10982_p3, %p10976_p5 }
  0xd8   : > { %10986 = shalt.err (!%p10983_p12)
}
  0xd9   : > { %9361 = dma.hbm_to_vmem [thread:$0]  (!%p15993_p4), %s11425_s1, 4096, %s11453_s16, %s11457_s28, %s11100_s5, %s11100_s5, %s11101_s19  }
  0xda   : > { %p15995_p11 = scmp.ne.s32.totalorder %s15977_s14, 0 }
  0xdc   : > { %392 = sbr.rel (%p15995_p11) target bundleno = 1512 (0x5e8), region = 48 }
  0xe3   : > { %s11487_s18 = sand.u32 1, %s11073_s25   ;;  %p15996_p6 = scmp.ne.s32.totalorder %s15972_s11, 0 }
  0xe4   : > { %s11490_s7 = sshll.u32 %s11487_s18, 8  ;;  %s395_s8 = scalar_lea.sflag [#allocation6], %s11487_s18 }
  0xe5   : > { %s11494_s24 = scalar_lea.vmem [#allocation5], %s11490_s7 }
  0xe6   : > { %11044 = dma.done.wait (%p15996_p6), %s395_s8, 4096  }
  0xe7   : > { %11046 = vsyncadd (%p15996_p6), %s395_s8, 4294963200  ;;  %s403_s14 = sand.u32 1, %s11182_s30   ;;  %s11502_s19 = scalar_lea.vmem [#allocation8], %s11490_s7 }
  0xe8   : > { %s404_s5 = scalar_lea.sflag [#allocation9], %s403_s14 }
  0xe9   : > { %11048 = dma.done.wait (%p15996_p6), %s404_s5, 8192  }
  0xea   : > { %11050 = vsyncadd (%p15996_p6), %s404_s5, 4294959104  ;;  %s416_s1 = scalar_lea.vmem [#allocation10], %s11490_s7  ;;  %s422_s10 = scalar_lea.sflag [#allocation12], %s403_s14 }
  0xeb   : > { %s425_s16 = scalar_lea.vmem [#allocation11], %s11490_s7 }
  0xec   : > { %11052 = dma.done.wait (%p15996_p6), %s422_s10, 4096  }
  0xed   : > { %11054 = vsyncadd (%p15996_p6), %s422_s10, 4294963200  ;;  %p15997_p4 = scmp.eq.s32.totalorder %s11182_s30, 0 }
  0xef   : > { %11056 = dma.done.wait (%p15997_p4), [#allocation12], 1024   ;;  %p15998_p0 = pmov %p15997_p4 }
  0xf1   : > { %11058 = vsyncadd (%p15998_p0), [#allocation12], 4294966272  ;;  %p15999_p1 = pmov %p15998_p0 }
  0xf2   : > { %p16000_p2 = pmov %p15998_p0 }
  0xf3   : > { %11060 = dma.done.wait (%p15999_p1), [#allocation15], 128  }
  0xf4   : > { %11062 = vsyncadd (%p16000_p2), [#allocation15], 4294967168  ;;  %vm492_vm0 = vcmask 523264   ;;  %v11106_v0 = vmov 0.0   ;;  %v11530_v1 = vld [vmem:[#allocation14] sm:$0xf]  ;;  %v1593_v28 = vlaneseq }
  0xf5   : > { %493 = vst.msk [vmem:[#allocation2] sm:$0xff] %vm492_vm0, %v11106_v0  ;;  %494 = vst.msk [vmem:[#allocation2 + $0x8] sm:$0xff] %vm492_vm0, %v11106_v0  ;;  %v501_v2 = vld [vmem:[%s11502_s19] sm:$0xf]  ;;  %v11533_v3 = vld [vmem:[#allocation16] sm:$0xf] }
  0xf6   : > { %495 = vst.msk [vmem:[#allocation2 + $0x10] sm:$0xff] %vm492_vm0, %v11106_v0  ;;  %496 = vst.msk [vmem:[#allocation2 + $0x18] sm:$0xff] %vm492_vm0, %v11106_v0  ;;  %v11536_v4 = vadd.f32 %v11533_v3, %v501_v2  ;;  %v502_v6 = vld [vmem:[%s11502_s19 + $0x4] sm:$0xf]  ;;  %v503_v8 = vld [vmem:[%s11502_s19 + $0x8] sm:$0xf] }
  0xf7   : > { %497 = vst.msk [vmem:[#allocation2 + $0x20] sm:$0xff] %vm492_vm0, %v11106_v0  ;;  %498 = vst.msk [vmem:[#allocation2 + $0x28] sm:$0xff] %vm492_vm0, %v11106_v0  ;;  %v11541_v7 = vadd.f32 %v11533_v3, %v502_v6  ;;  %v504_v9 = vld [vmem:[%s11502_s19 + $0xc] sm:$0xf]  ;;  %v505_v10 = vld [vmem:[%s11502_s19 + $0x10] sm:$0xf]  ;;  %v11547_v12 = vadd.f32 %v11533_v3, %v503_v8 }
  0xf8   : > { %499 = vst.msk [vmem:[#allocation2 + $0x30] sm:$0xff] %vm492_vm0, %v11106_v0  ;;  %500 = vst.msk [vmem:[#allocation2 + $0x38] sm:$0xff] %vm492_vm0, %v11106_v0  ;;  %v694_v5 = vmin.f32 %v11536_v4, 20.0  ;;  %v11550_v13 = vadd.f32 %v11533_v3, %v504_v9  ;;  %v11553_v14 = vadd.f32 %v11533_v3, %v505_v10  ;;  %v506_v15 = vld [vmem:[%s11502_s19 + $0x14] sm:$0xf]  ;;  %v11589_v48 = vshrl.u32 %v1593_v28, 7 }
  0xf9   : > { %16001 = vst [vmem:[#allocation31_spill] sm:$0xff] %v11530_v1  ;;  %v507_v16 = vld [vmem:[%s11502_s19 + $0x18] sm:$0xf]  ;;  %v695_v17 = vmin.f32 %v11541_v7, 20.0  ;;  %v11559_v18 = vadd.f32 %v11533_v3, %v506_v15  ;;  %v696_v20 = vmin.f32 %v11547_v12, 20.0  ;;  %vm630_vm1 = vcmp.gt.f32.partialorder %v11536_v4, 20.0 }
  0xfa   : > { %v758_v11 = vmul.f32 1.442695, %v694_v5  ;;  %v11562_v19 = vadd.f32 %v11533_v3, %v507_v16  ;;  %v508_v21 = vld [vmem:[%s11502_s19 + $0x1c] sm:$0xf]  ;;  %v697_v23 = vmin.f32 %v11550_v13, 20.0  ;;  %v698_v24 = vmin.f32 %v11553_v14, 20.0 }
  0xfb   : > { %v760_v22 = vmul.f32 1.442695, %v695_v17  ;;  %v509_v25 = vld [vmem:[%s11502_s19 + $0x20] sm:$0xf]  ;;  %v11107_v26 = vmov 1966171168   ;;  %v11573_v36 = vadd.f32 %v11533_v3, %v508_v21 }
  0xfc   : > { %9441 = vpow2.f32 %v758_v11  ;;  %v1591_v27 = vunpack.c.l.s4 %v11107_v26  ;;  %v762_v29 = vmul.f32 1.442695, %v696_v20  ;;  %v699_v30 = vmin.f32 %v11559_v18, 20.0  ;;  %v510_v31 = vld [vmem:[%s11502_s19 + $0x24] sm:$0xf]  ;;  %16002 = vst [vmem:[#allocation32_spill] sm:$0xff] %v11589_v48 }
  0xfd   : > { %9443 = vpow2.f32 %v760_v22  ;;  %v764_v32 = vmul.f32 1.442695, %v697_v23  ;;  %v766_v33 = vmul.f32 1.442695, %v698_v24  ;;  %v700_v34 = vmin.f32 %v11562_v19, 20.0  ;;  %s482_s30 = scalar_lea.vmem [#allocation17], %s11490_s7 }
  0xfe   : > { %9445 = vpow2.f32 %v762_v29  ;;  %v768_v35 = vmul.f32 1.442695, %v699_v30  ;;  %v11576_v37 = vadd.f32 %v11533_v3, %v509_v25  ;;  %v511_v38 = vld [vmem:[%s11502_s19 + $0x28] sm:$0xf]  ;;  %v11580_v40 = vadd.f32 %v11533_v3, %v510_v31  ;;  %v512_v52 = vld [vmem:[%s11502_s19 + $0x2c] sm:$0xf] }
  0xff   : > { %9447 = vpow2.f32 %v764_v32  ;;  %v770_v39 = vmul.f32 1.442695, %v700_v34  ;;  %v11583_v41 = vadd.f32 %v11533_v3, %v511_v38  ;;  %v701_v42 = vmin.f32 %v11573_v36, 20.0  ;;  %v513_v53 = vld [vmem:[%s11502_s19 + $0x30] sm:$0xf]  ;;  %s15124_s11 = smov 0  }
 0x100   : > { %9449 = vpow2.f32 %v766_v33  ;;  %v702_v43 = vmin.f32 %v11576_v37, 20.0  ;;  %v703_v44 = vmin.f32 %v11580_v40, 20.0  ;;  %v1592_v47 = vunpack.c.0.s8 %v1591_v27  ;;  %v11685_v27 = vld [vmem:[#allocation13] sm:$0xff] }
 0x101   : > { %9451 = vpow2.f32 %v768_v35  ;;  %v772_v45 = vmul.f32 1.442695, %v701_v42  ;;  %v704_v46 = vmin.f32 %v11583_v41, 20.0  ;;  %v11594_v58 = vsub.s32 0, %v11589_v48 }
 0x102   : > { %9453 = vpow2.f32 %v770_v39  ;;  %v774_v49 = vmul.f32 1.442695, %v702_v43  ;;  %v776_v51 = vmul.f32 1.442695, %v703_v44  ;;  %v11597_v60 = vsub.s32 %v1592_v47, %v11589_v48 }
 0x103   : > { %9455 = vpow2.f32 %v772_v45  ;;  %v778_v56 = vmul.f32 1.442695, %v704_v46  ;;  %v11600_v61 = vadd.f32 %v11533_v3, %v512_v52  ;;  %v11603_v62 = vadd.f32 %v11533_v3, %v513_v53 }
 0x104   : > { %9457 = vpow2.f32 %v774_v49  ;;  %vm631_vm3 = vcmp.gt.f32.partialorder %v11541_v7, 20.0  ;;  %vm632_vm5 = vcmp.gt.f32.partialorder %v11547_v12, 20.0  ;;  %vm633_vm8 = vcmp.gt.f32.partialorder %v11550_v13, 20.0 }
 0x105   : > { %vm634_vm10 = vcmp.gt.f32.partialorder %v11553_v14, 20.0  ;;  %vm635_vm13 = vcmp.gt.f32.partialorder %v11559_v18, 20.0  ;;  %vm636_vm14 = vcmp.gt.f32.partialorder %v11562_v19, 20.0 }
 0x106   : > { %v9442_v50 = vpop.eup %9441 }
 0x107   : > { %v886_v54 = vadd.f32 1.0, %v9442_v50  ;;  %v889_v55 = vmul.f32 -0.5, %v9442_v50  ;;  %v892_v57 = vand.u32 2147483647, %v9442_v50  ;;  %v9444_v59 = vpop.eup %9443 }
 0x108   : > { %v9446_v63 = vpop.eup %9445  ;;  %v895_v2 = vadd.f32 1.0, %v9444_v59  ;;  %v898_v5 = vmul.f32 -0.5, %v9444_v59  ;;  %v901_v8 = vand.u32 2147483647, %v9444_v59 }
 0x109   : > { %9459 = vlog2.f32 %v886_v54  ;;  %v890_v0 = vadd.f32 1.0, %v889_v55  ;;  %v9448_v6 = vpop.eup %9447  ;;  %v904_v9 = vadd.f32 1.0, %v9446_v63  ;;  %v907_v10 = vmul.f32 -0.5, %v9446_v63 }
 0x10a   : > { %9461 = vpow2.f32 %v776_v51  ;;  %v9450_v11 = vpop.eup %9449  ;;  %vm11606_vm2 = vcmp.lt.f32.partialorder %v892_v57, 0.0004427343  ;;  %v910_v3 = vand.u32 2147483647, %v9446_v63  ;;  %v913_v16 = vadd.f32 1.0, %v9448_v6 }
 0x10b   : > { %9463 = vpow2.f32 %v778_v56  ;;  %v11610_v17 = vpop.eup %9451  ;;  %v899_v20 = vadd.f32 1.0, %v898_v5  ;;  %v908_v21 = vadd.f32 1.0, %v907_v10  ;;  %v916_v22 = vmul.f32 -0.5, %v9448_v6 }
 0x10c   : > { %9465 = vlog2.f32 %v895_v2  ;;  %v891_v23 = vmul.f32 %v9442_v50, %v890_v0  ;;  %v919_v24 = vand.u32 2147483647, %v9448_v6  ;;  %v922_v25 = vadd.f32 1.0, %v9450_v11  ;;  %v11612_v26 = vpop.eup %9453 }
 0x10d   : > { %9467 = vlog2.f32 %v904_v9  ;;  %vm11615_vm4 = vcmp.lt.f32.partialorder %v901_v8, 0.0004427343  ;;  %v917_v28 = vadd.f32 1.0, %v916_v22  ;;  %v925_v29 = vmul.f32 -0.5, %v9450_v11  ;;  %v11619_v31 = vpop.eup %9455 }
 0x10e   : > { %9469 = vlog2.f32 %v913_v16  ;;  %v928_v30 = vand.u32 2147483647, %v9450_v11  ;;  %vm11622_vm6 = vcmp.lt.f32.partialorder %v910_v3, 0.0004427343  ;;  %v931_v33 = vadd.f32 1.0, %v11610_v17  ;;  %v11632_v43 = vpop.eup %9457 }
 0x10f   : > { %9471 = vlog2.f32 %v922_v25  ;;  %v934_v34 = vmul.f32 -0.5, %v11610_v17  ;;  %v900_v35 = vmul.f32 %v9444_v59, %v899_v20  ;;  %v909_v38 = vmul.f32 %v9446_v63, %v908_v21 }
 0x110   : > { %vm11628_vm7 = vcmp.lt.f32.partialorder %v919_v24, 0.0004427343  ;;  %v926_v42 = vadd.f32 1.0, %v925_v29  ;;  %v918_v44 = vmul.f32 %v9448_v6, %v917_v28  ;;  %v940_v46 = vadd.f32 1.0, %v11612_v26 }
 0x111   : > { %v935_v45 = vadd.f32 1.0, %v934_v34  ;;  %v943_v47 = vmul.f32 -0.5, %v11612_v26  ;;  %vm11637_vm9 = vcmp.lt.f32.partialorder %v928_v30, 0.0004427343  ;;  %9473 = vlog2.f32 %v931_v33 }
 0x112   : > { %v949_v52 = vadd.f32 1.0, %v11619_v31  ;;  %v11645_v55 = vmul.f32 %v9450_v11, %v926_v42  ;;  %9475 = vlog2.f32 %v940_v46  ;;  %v952_v0 = vmul.f32 -0.5, %v11619_v31 }
 0x113   : > { %v9460_v49 = vpop.eup %9459  ;;  %v944_v56 = vadd.f32 1.0, %v943_v47  ;;  %v11650_v59 = vmul.f32 %v11610_v17, %v935_v45  ;;  %v958_v8 = vadd.f32 1.0, %v11632_v43  ;;  %v961_v9 = vmul.f32 -0.5, %v11632_v43 }
 0x114   : > { %v11643_v53 = vpop.eup %9461  ;;  %v888_v54 = vmul.f32 0.6931472, %v9460_v49  ;;  %9477 = vlog2.f32 %v949_v52  ;;  %v953_v20 = vadd.f32 1.0, %v952_v0 }
 0x115   : > { %v11647_v57 = vpop.eup %9463  ;;  %v11665_v16 = vmul.f32 %v11612_v26, %v944_v56  ;;  %9479 = vlog2.f32 %v958_v8  ;;  %v11708_v56 = vld [vmem:[#allocation13 + $0x10] sm:$0xff] }
 0x116   : > { %v9466_v2 = vpop.eup %9465  ;;  %v894_v5 = vsel %vm11606_vm2, %v891_v23, %v888_v54  ;;  %v11669_v23 = vadd.f32 1.0, %v961_v9  ;;  %vm638_vm2 = vcmp.gt.f32.partialorder %v11576_v37, 20.0 }
 0x117   : > { %v9468_v10 = vpop.eup %9467  ;;  %v11662_v11 = vsel %vm630_vm1, %v11536_v4, %v894_v5  ;;  %v897_v3 = vmul.f32 0.6931472, %v9466_v2  ;;  %v11674_v4 = vmul.f32 %v11619_v31, %v953_v20  ;;  %vm637_vm1 = vcmp.gt.f32.partialorder %v11573_v36, 20.0 }
 0x118   : > { %v9470_v21 = vpop.eup %9469  ;;  %v1596_v15 = vrot.slane %v11662_v11, %v11597_v60  ;;  %v906_v22 = vmul.f32 0.6931472, %v9468_v10 }
 0x119   : > { %v903_v24 = vsel %vm11615_vm4, %v900_v35, %v897_v3  ;;  %v915_v25 = vmul.f32 0.6931472, %v9470_v21  ;;  %v9472_v29 = vpop.eup %9471  ;;  %v11687_v35 = vld [vmem:[#allocation13 + $0x8] sm:$0xff]  ;;  %v11727_v3 = vld [vmem:[#allocation13 + $0x20] sm:$0xff]  ;;  %vm639_vm4 = vcmp.gt.f32.partialorder %v11580_v40, 20.0 }
 0x11a   : > { %v1604_v30 = vrot.slane %v1596_v15, %v11597_v60  ;;  %v1597_v33 = vcombine.high %v1596_v15, %v1596_v15  ;;  %v11681_v34 = vsel %vm631_vm3, %v11541_v7, %v903_v24  ;;  %v912_v42 = vsel %vm11622_vm6, %v909_v38, %v906_v22  ;;  %v11730_v21 = vld [vmem:[#allocation13 + $0x28] sm:$0xff] }
 0x11b   : > { %v1620_v45 = vrot.slane %v11681_v34, %v11597_v60  ;;  %v11694_v46 = vsel %vm632_vm5, %v11547_v12, %v912_v42  ;;  %v921_v47 = vsel %vm11628_vm7, %v918_v44, %v915_v25  ;;  %v11698_v7 = vmul.f32 0.6931472, %v9472_v29  ;;  %v11706_v54 = vpop.eup %9473  ;;  %v11710_v12 = vld [vmem:[#allocation13 + $0x18] sm:$0xff] }
 0x11c   : > { %v3137_v32 = vrot.slane %v1604_v30, %v11594_v58  ;;  %v1611_v38 = vrot.slane %v1597_v33, %v11597_v60  ;;  %v1612_v49 = vcombine.high %v1604_v30, %v1604_v30  ;;  %v11704_v52 = vrot.slane %v11694_v46, %v11597_v60  ;;  %v11722_v5 = vpop.eup %9475 }
 0x11d   : > { %v1628_v39 = vrot.slane %v1620_v45, %v11597_v60  ;;  %v1621_v44 = vcombine.high %v1620_v45, %v1620_v45  ;;  %v11716_v0 = vsel %vm633_vm8, %v11550_v13, %v921_v47  ;;  %v11738_v45 = vld [vmem:[#allocation13 + $0x30] sm:$0xff]  ;;  %vm640_vm7 = vcmp.gt.f32.partialorder %v11583_v41, 20.0 }
 0x11e   : > { %v4414_v8 = vmul.f32 %v3137_v32, %v11685_v27  ;;  %v4415_v9 = vmul.f32 %v3137_v32, %v11687_v35  ;;  %v3141_v10 = vrot.slane %v1611_v38, %v11594_v58  ;;  %v3145_v20 = vrot.slane %v1612_v49, %v11594_v58  ;;  %v11732_v13 = vpop.eup %9477 }
 0x11f   : > { %v1613_v15 = vcombine.high %v1611_v38, %v1611_v38  ;;  %v3153_v22 = vrot.slane %v1628_v39, %v11594_v58  ;;  %v1635_v24 = vrot.slane %v1621_v44, %v11597_v60  ;;  %v1636_v25 = vcombine.high %v1628_v39, %v1628_v39  ;;  %v11743_v38 = vld [vmem:[#allocation13 + $0x38] sm:$0xff]  ;;  %v11746_v44 = vpop.eup %9479 }
 0x120   : > { %v4926_v29 = vmul.f32 1.442695, %v4414_v8  ;;  %v4928_v30 = vmul.f32 1.442695, %v4415_v9  ;;  %v4416_v33 = vmul.f32 %v3141_v10, %v11708_v56  ;;  %v4417_v42 = vmul.f32 %v3141_v10, %v11710_v12 }
 0x121   : > { %v4418_v47 = vmul.f32 %v3145_v20, %v11727_v3  ;;  %v4419_v32 = vmul.f32 %v3145_v20, %v11730_v21  ;;  %v3149_v49 = vrot.slane %v1613_v15, %v11594_v58  ;;  %v4422_v28 = vmul.f32 %v3153_v22, %v11685_v27 }
 0x122   : > { %9481 = vpow2.f32 %v4926_v29  ;;  %v4930_v39 = vmul.f32 1.442695, %v4416_v33  ;;  %v4932_v8 = vmul.f32 1.442695, %v4417_v42  ;;  %v4423_v9 = vmul.f32 %v3153_v22, %v11687_v35 }
 0x123   : > { %9483 = vpow2.f32 %v4928_v30  ;;  %v4934_v10 = vmul.f32 1.442695, %v4418_v47  ;;  %v4936_v6 = vmul.f32 1.442695, %v4419_v32  ;;  %v4420_v63 = vmul.f32 %v3149_v49, %v11738_v45 }
 0x124   : > { %9485 = vpow2.f32 %v4930_v39  ;;  %v4421_v20 = vmul.f32 %v3149_v49, %v11743_v38  ;;  %v4942_v15 = vmul.f32 1.442695, %v4422_v28  ;;  %v4944_v51 = vmul.f32 1.442695, %v4423_v9 }
 0x125   : > { %9487 = vpow2.f32 %v4932_v8  ;;  %v4938_v2 = vmul.f32 1.442695, %v4420_v63  ;;  %v3157_v29 = vrot.slane %v1635_v24, %v11594_v58  ;;  %v3161_v33 = vrot.slane %v1636_v25, %v11594_v58 }
 0x126   : > { %9489 = vpow2.f32 %v4934_v10  ;;  %v4940_v22 = vmul.f32 1.442695, %v4421_v20  ;;  %v1637_v30 = vcombine.high %v1635_v24, %v1635_v24  ;;  %v1652_v42 = vrot.slane %v11704_v52, %v11597_v60 }
 0x127   : > { %9491 = vpow2.f32 %v4936_v6  ;;  %v4424_v47 = vmul.f32 %v3157_v29, %v11708_v56  ;;  %v4425_v32 = vmul.f32 %v3157_v29, %v11710_v12  ;;  %v4426_v28 = vmul.f32 %v3161_v33, %v11727_v3 }
 0x128   : > { %9493 = vpow2.f32 %v4938_v2  ;;  %v4427_v63 = vmul.f32 %v3161_v33, %v11730_v21  ;;  %v3165_v49 = vrot.slane %v1637_v30, %v11594_v58  ;;  %v3169_v25 = vrot.slane %v1652_v42, %v11594_v58 }
 0x129   : > { %9495 = vpow2.f32 %v4940_v22  ;;  %v4946_v39 = vmul.f32 1.442695, %v4424_v47  ;;  %v4948_v24 = vmul.f32 1.442695, %v4425_v32  ;;  %v4950_v8 = vmul.f32 1.442695, %v4426_v28 }
 0x12a   : > { %9497 = vpow2.f32 %v4942_v15  ;;  %v4952_v9 = vmul.f32 1.442695, %v4427_v63  ;;  %v4428_v6 = vmul.f32 %v3165_v49, %v11738_v45  ;;  %v4429_v10 = vmul.f32 %v3165_v49, %v11743_v38 }
 0x12b   : > { %9499 = vpow2.f32 %v4944_v51  ;;  %v4430_v20 = vmul.f32 %v3169_v25, %v11685_v27  ;;  %v4431_v2 = vmul.f32 %v3169_v25, %v11687_v35  ;;  %v1645_v29 = vcombine.high %v11704_v52, %v11704_v52 }
 0x12c   : > { %v9482_v33 = vpop.eup %9481  ;;  %9501 = vpow2.f32 %v4946_v39  ;;  %v4954_v22 = vmul.f32 1.442695, %v4428_v6  ;;  %v4956_v30 = vmul.f32 1.442695, %v4429_v10  ;;  %v1660_v47 = vcombine.high %v1652_v42, %v1652_v42 }
 0x12d   : > { %v9484_v32 = vpop.eup %9483  ;;  %5951 = vst.msk [vmem:[#allocation3] sm:$0xff] %vm492_vm0, %v9482_v33  ;;  %9503 = vpow2.f32 %v4948_v24  ;;  %v4958_v15 = vmul.f32 1.442695, %v4430_v20  ;;  %v4960_v28 = vmul.f32 1.442695, %v4431_v2  ;;  %v1659_v51 = vrot.slane %v1645_v29, %v11597_v60 }
 0x12e   : > { %v9486_v63 = vpop.eup %9485  ;;  %5952 = vst.msk [vmem:[#allocation3 + $0x8] sm:$0xff] %vm492_vm0, %v9484_v32  ;;  %9505 = vpow2.f32 %v4950_v8  ;;  %v3177_v49 = vrot.slane %v1660_v47, %v11594_v58  ;;  %v1668_v52 = vrot.slane %v11716_v0, %v11597_v60  ;;  %v16013_v42 = vsel %vm11637_vm9, %v11645_v55, %v11698_v7 }
 0x12f   : > { %v11782_v25 = vsel %vm634_vm10, %v11553_v14, %v16013_v42  ;;  %v9488_v39 = vpop.eup %9487  ;;  %5953 = vst.msk [vmem:[#allocation3 + $0x10] sm:$0xff] %vm492_vm0, %v9486_v63  ;;  %9507 = vpow2.f32 %v4952_v9  ;;  %v3173_v24 = vrot.slane %v1659_v51, %v11594_v58  ;;  %v1661_v8 = vcombine.high %v1659_v51, %v1659_v51 }
 0x130   : > { %16014 = vst [vmem:[#allocation33_spill] sm:$0xff] %v11782_v25  ;;  %v11788_v6 = vrot.slane %v11782_v25, %v11597_v60  ;;  %v9490_v50 = vpop.eup %9489  ;;  %5954 = vst.msk [vmem:[#allocation3 + $0x18] sm:$0xff] %vm492_vm0, %v9488_v39  ;;  %9509 = vpow2.f32 %v4954_v22  ;;  %v4434_v55 = vmul.f32 %v3177_v49, %v11727_v3  ;;  %v4435_v14 = vmul.f32 %v3177_v49, %v11730_v21 }
 0x131   : > { %v1676_v7 = vrot.slane %v1668_v52, %v11597_v60  ;;  %v9492_v10 = vpop.eup %9491  ;;  %5955 = vst.msk [vmem:[#allocation3 + $0x20] sm:$0xff] %vm492_vm0, %v9490_v50  ;;  %9511 = vpow2.f32 %v4956_v30  ;;  %v4432_v9 = vmul.f32 %v3173_v24, %v11708_v56  ;;  %v4433_v20 = vmul.f32 %v3173_v24, %v11710_v12 }
 0x132   : > { %v3181_v2 = vrot.slane %v1661_v8, %v11594_v58  ;;  %v9494_v29 = vpop.eup %9493  ;;  %5956 = vst.msk [vmem:[#allocation3 + $0x28] sm:$0xff] %vm492_vm0, %v9492_v10  ;;  %9513 = vpow2.f32 %v4958_v15  ;;  %v4966_v33 = vmul.f32 1.442695, %v4434_v55  ;;  %v4968_v22 = vmul.f32 1.442695, %v4435_v14 }
 0x133   : > { %v3185_v47 = vrot.slane %v1676_v7, %v11594_v58  ;;  %v9496_v32 = vpop.eup %9495  ;;  %5957 = vst.msk [vmem:[#allocation3 + $0x30] sm:$0xff] %vm492_vm0, %v9494_v29  ;;  %9515 = vpow2.f32 %v4960_v28  ;;  %v4962_v51 = vmul.f32 1.442695, %v4432_v9  ;;  %v4964_v30 = vmul.f32 1.442695, %v4433_v20 }
 0x134   : > { %v4436_v63 = vmul.f32 %v3181_v2, %v11738_v45  ;;  %v9498_v49 = vpop.eup %9497  ;;  %5958 = vst.msk [vmem:[#allocation3 + $0x38] sm:$0xff] %vm492_vm0, %v9496_v32  ;;  %9517 = vpow2.f32 %v4966_v33  ;;  %v4437_v42 = vmul.f32 %v3181_v2, %v11743_v38  ;;  %v1669_v28 = vcombine.high %v1668_v52, %v1668_v52 }
 0x135   : > { %v4438_v15 = vmul.f32 %v3185_v47, %v11685_v27  ;;  %v4439_v39 = vmul.f32 %v3185_v47, %v11687_v35  ;;  %v9500_v24 = vpop.eup %9499  ;;  %5959 = vst.msk [vmem:[#allocation3 + $0x40] sm:$0xff] %vm492_vm0, %v9498_v49  ;;  %9519 = vpow2.f32 %v4962_v51  ;;  %v1684_v50 = vcombine.high %v1676_v7, %v1676_v7 }
 0x136   : > { %v4970_v8 = vmul.f32 1.442695, %v4436_v63  ;;  %v9502_v55 = vpop.eup %9501  ;;  %5960 = vst.msk [vmem:[#allocation3 + $0x48] sm:$0xff] %vm492_vm0, %v9500_v24  ;;  %9521 = vpow2.f32 %v4964_v30  ;;  %v4972_v14 = vmul.f32 1.442695, %v4437_v42  ;;  %v1683_v2 = vrot.slane %v1669_v28, %v11597_v60 }
 0x137   : > { %v4974_v10 = vmul.f32 1.442695, %v4438_v15  ;;  %v4976_v9 = vmul.f32 1.442695, %v4439_v39  ;;  %v9504_v20 = vpop.eup %9503  ;;  %5961 = vst.msk [vmem:[#allocation3 + $0x50] sm:$0xff] %vm492_vm0, %v9502_v55  ;;  %9523 = vpow2.f32 %v4968_v22  ;;  %v3193_v29 = vrot.slane %v1684_v50, %v11594_v58 }
 0x138   : > { %v11813_v33 = vrot.slane %v11788_v6, %v11597_v60  ;;  %v16015_v52 = vand.u32 2147483647, %v11610_v17  ;;  %v16018_v47 = vand.u32 2147483647, %v11612_v26  ;;  %v9506_v22 = vpop.eup %9505  ;;  %5962 = vst.msk [vmem:[#allocation3 + $0x58] sm:$0xff] %vm492_vm0, %v9504_v20  ;;  %9525 = vpow2.f32 %v4970_v8 }
 0x139   : > { %v1693_v51 = vcombine.high %v11788_v6, %v11788_v6  ;;  %v11832_v17 = vmul.f32 0.6931472, %v11706_v54  ;;  %v11836_v26 = vmul.f32 0.6931472, %v11722_v5  ;;  %v9508_v30 = vpop.eup %9507  ;;  %5963 = vst.msk [vmem:[#allocation3 + $0x60] sm:$0xff] %vm492_vm0, %v9506_v22  ;;  %9527 = vpow2.f32 %v4972_v14 }
 0x13a   : > { %vm11817_vm11 = vcmp.lt.f32.partialorder %v16015_v52, 0.0004427343  ;;  %vm11823_vm12 = vcmp.lt.f32.partialorder %v16018_v47, 0.0004427343  ;;  %v3189_v63 = vrot.slane %v1683_v2, %v11594_v58  ;;  %v4442_v49 = vmul.f32 %v3193_v29, %v11727_v3  ;;  %v9510_v42 = vpop.eup %9509  ;;  %5964 = vst.msk [vmem:[#allocation3 + $0x68] sm:$0xff] %vm492_vm0, %v9508_v30 }
 0x13b   : > { %v4443_v6 = vmul.f32 %v3193_v29, %v11730_v21  ;;  %9529 = vpow2.f32 %v4974_v10  ;;  %v1685_v54 = vcombine.high %v1683_v2, %v1683_v2  ;;  %v3201_v15 = vrot.slane %v11813_v33, %v11594_v58  ;;  %v9512_v39 = vpop.eup %9511  ;;  %5965 = vst.msk [vmem:[#allocation3 + $0x70] sm:$0xff] %vm492_vm0, %v9510_v42 }
 0x13c   : > { %v1707_v5 = vrot.slane %v1693_v51, %v11597_v60  ;;  %9531 = vpow2.f32 %v4976_v9  ;;  %v4440_v24 = vmul.f32 %v3189_v63, %v11708_v56  ;;  %v4441_v8 = vmul.f32 %v3189_v63, %v11710_v12  ;;  %v9514_v50 = vpop.eup %9513  ;;  %5966 = vst.msk [vmem:[#allocation3 + $0x78] sm:$0xff] %vm492_vm0, %v9512_v39 }
 0x13d   : > { %v4982_v28 = vmul.f32 1.442695, %v4442_v49  ;;  %v4984_v55 = vmul.f32 1.442695, %v4443_v6  ;;  %v3197_v14 = vrot.slane %v1685_v54, %v11594_v58  ;;  %v4446_v10 = vmul.f32 %v3201_v15, %v11685_v27  ;;  %v9516_v2 = vpop.eup %9515  ;;  %5967 = vst.msk [vmem:[#allocation3 + $0x80] sm:$0xff] %vm492_vm0, %v9514_v50 }
 0x13e   : > { %v4447_v20 = vmul.f32 %v3201_v15, %v11687_v35  ;;  %v4978_v29 = vmul.f32 1.442695, %v4440_v24  ;;  %v4980_v9 = vmul.f32 1.442695, %v4441_v8  ;;  %v3205_v52 = vrot.slane %v1707_v5, %v11594_v58  ;;  %v9518_v47 = vpop.eup %9517  ;;  %5968 = vst.msk [vmem:[#allocation3 + $0x88] sm:$0xff] %vm492_vm0, %v9516_v2 }
 0x13f   : > { %9533 = vpow2.f32 %v4982_v28  ;;  %v4444_v22 = vmul.f32 %v3197_v14, %v11738_v45  ;;  %v4445_v51 = vmul.f32 %v3197_v14, %v11743_v38  ;;  %v4990_v30 = vmul.f32 1.442695, %v4446_v10  ;;  %v9520_v63 = vpop.eup %9519  ;;  %5971 = vst.msk [vmem:[#allocation3 + $0xa0] sm:$0xff] %vm492_vm0, %v9518_v47 }
 0x140   : > { %9535 = vpow2.f32 %v4984_v55  ;;  %v4992_v49 = vmul.f32 1.442695, %v4447_v20  ;;  %v4448_v6 = vmul.f32 %v3205_v52, %v11708_v56  ;;  %v4449_v42 = vmul.f32 %v3205_v52, %v11710_v12  ;;  %v9522_v54 = vpop.eup %9521  ;;  %5969 = vst.msk [vmem:[#allocation3 + $0x90] sm:$0xff] %vm492_vm0, %v9520_v63 }
 0x141   : > { %9537 = vpow2.f32 %v4978_v29  ;;  %v4986_v15 = vmul.f32 1.442695, %v4444_v22  ;;  %v4988_v39 = vmul.f32 1.442695, %v4445_v51  ;;  %v1708_v24 = vcombine.high %v11813_v33, %v11813_v33  ;;  %v9524_v8 = vpop.eup %9523  ;;  %5970 = vst.msk [vmem:[#allocation3 + $0x98] sm:$0xff] %vm492_vm0, %v9522_v54 }
 0x142   : > { %9539 = vpow2.f32 %v4980_v9  ;;  %v4994_v28 = vmul.f32 1.442695, %v4448_v6  ;;  %v4996_v50 = vmul.f32 1.442695, %v4449_v42  ;;  %v1709_v55 = vcombine.high %v1707_v5, %v1707_v5  ;;  %v9526_v14 = vpop.eup %9525  ;;  %5972 = vst.msk [vmem:[#allocation3 + $0xa8] sm:$0xff] %vm492_vm0, %v9524_v8 }
 0x143   : > { %9541 = vpow2.f32 %v4990_v30  ;;  %v3209_v10 = vrot.slane %v1708_v24, %v11594_v58  ;;  %v939_v20 = vsel %vm11817_vm11, %v11650_v59, %v11832_v17  ;;  %v948_v33 = vsel %vm11823_vm12, %v11665_v16, %v11836_v26  ;;  %v9528_v2 = vpop.eup %9527  ;;  %5973 = vst.msk [vmem:[#allocation3 + $0xb0] sm:$0xff] %vm492_vm0, %v9526_v14 }
 0x144   : > { %9543 = vpow2.f32 %v4986_v15  ;;  %v3213_v5 = vrot.slane %v1709_v55, %v11594_v58  ;;  %v11880_v29 = vsel %vm635_vm13, %v11559_v18, %v939_v20  ;;  %v11885_v59 = vsel %vm636_vm14, %v11562_v19, %v948_v33  ;;  %5974 = vst.msk [vmem:[#allocation3 + $0xb8] sm:$0xff] %vm492_vm0, %v9528_v2 }
 0x145   : > { %9545 = vpow2.f32 %v4988_v39  ;;  %16021 = vst [vmem:[#allocation34_spill] sm:$0xff] %v11880_v29  ;;  %16022 = vst [vmem:[#allocation35_spill] sm:$0xff] %v11885_v59  ;;  %v9530_v7 = vpop.eup %9529  ;;  %v4450_v16 = vmul.f32 %v3209_v10, %v11727_v3  ;;  %v4451_v32 = vmul.f32 %v3209_v10, %v11730_v21  ;;  %v1716_v17 = vrot.slane %v11880_v29, %v11597_v60 }
 0x146   : > { %9547 = vpow2.f32 %v4992_v49  ;;  %v9532_v26 = vpop.eup %9531  ;;  %5975 = vst.msk [vmem:[#allocation3 + $0xc0] sm:$0xff] %vm492_vm0, %v9530_v7  ;;  %v4452_v18 = vmul.f32 %v3213_v5, %v11738_v45  ;;  %v4453_v19 = vmul.f32 %v3213_v5, %v11743_v38  ;;  %v11897_v9 = vrot.slane %v11885_v59, %v11597_v60 }
 0x147   : > { %9549 = vpow2.f32 %v4994_v28  ;;  %5976 = vst.msk [vmem:[#allocation3 + $0xc8] sm:$0xff] %vm492_vm0, %v9532_v26  ;;  %v4998_v52 = vmul.f32 1.442695, %v4450_v16  ;;  %v5000_v47 = vmul.f32 1.442695, %v4451_v32  ;;  %v1724_v22 = vrot.slane %v1716_v17, %v11597_v60 }
 0x148   : > { %9551 = vpow2.f32 %v4996_v50  ;;  %v5002_v30 = vmul.f32 1.442695, %v4452_v18  ;;  %v5004_v63 = vmul.f32 1.442695, %v4453_v19  ;;  %v1717_v49 = vcombine.high %v1716_v17, %v1716_v17 }
 0x149   : > { %v9534_v51 = vpop.eup %9533  ;;  %v1748_v6 = vrot.slane %v11897_v9, %v11597_v60  ;;  %9553 = vpow2.f32 %v4998_v52  ;;  %v3217_v54 = vrot.slane %v1724_v22, %v11594_v58  ;;  %v1732_v15 = vcombine.high %v1724_v22, %v1724_v22 }
 0x14a   : > { %v9536_v42 = vpop.eup %9535  ;;  %5979 = vst.msk [vmem:[#allocation3 + $0xe0] sm:$0xff] %vm492_vm0, %v9534_v51  ;;  %v1741_v39 = vcombine.high %v11897_v9, %v11897_v9  ;;  %v16023_v24 = vand.u32 2147483647, %v11619_v31  ;;  %9555 = vpow2.f32 %v5000_v47  ;;  %v1731_v50 = vrot.slane %v1717_v49, %v11597_v60 }
 0x14b   : > { %v9538_v28 = vpop.eup %9537  ;;  %5980 = vst.msk [vmem:[#allocation3 + $0xe8] sm:$0xff] %vm492_vm0, %v9536_v42  ;;  %v3233_v55 = vrot.slane %v1748_v6, %v11594_v58  ;;  %v1756_v14 = vcombine.high %v1748_v6, %v1748_v6  ;;  %9557 = vpow2.f32 %v5002_v30  ;;  %v4454_v20 = vmul.f32 %v3217_v54, %v11685_v27 }
 0x14c   : > { %vm11909_vm15 = vcmp.lt.f32.partialorder %v16023_v24, 0.0004427343  ;;  %v9540_v10 = vpop.eup %9539  ;;  %5977 = vst.msk [vmem:[#allocation3 + $0xd0] sm:$0xff] %vm492_vm0, %v9538_v28  ;;  %v4455_v31 = vmul.f32 %v3217_v54, %v11687_v35  ;;  %v3225_v33 = vrot.slane %v1732_v15, %v11594_v58  ;;  %9559 = vpow2.f32 %v5004_v63 }
 0x14d   : > { %v9542_v2 = vpop.eup %9541  ;;  %5978 = vst.msk [vmem:[#allocation3 + $0xd8] sm:$0xff] %vm492_vm0, %v9540_v10  ;;  %v3221_v5 = vrot.slane %v1731_v50, %v11594_v58  ;;  %v1733_v7 = vcombine.high %v1731_v50, %v1731_v50  ;;  %v4462_v16 = vmul.f32 %v3233_v55, %v11685_v27  ;;  %v5006_v17 = vmul.f32 1.442695, %v4454_v20 }
 0x14e   : > { %v9544_v32 = vpop.eup %9543  ;;  %5983 = vst.msk [vmem:[#allocation3 + $0x100] sm:$0xff] %vm492_vm0, %v9542_v2  ;;  %v5008_v26 = vmul.f32 1.442695, %v4455_v31  ;;  %v4458_v18 = vmul.f32 %v3225_v33, %v11727_v3  ;;  %v4459_v19 = vmul.f32 %v3225_v33, %v11730_v21  ;;  %v4463_v6 = vmul.f32 %v3233_v55, %v11687_v35 }
 0x14f   : > { %v9546_v9 = vpop.eup %9545  ;;  %5981 = vst.msk [vmem:[#allocation3 + $0xf0] sm:$0xff] %vm492_vm0, %v9544_v32  ;;  %v4456_v52 = vmul.f32 %v3221_v5, %v11708_v56  ;;  %v4457_v47 = vmul.f32 %v3221_v5, %v11710_v12  ;;  %v3229_v22 = vrot.slane %v1733_v7, %v11594_v58  ;;  %v5022_v51 = vmul.f32 1.442695, %v4462_v16 }
 0x150   : > { %v9548_v30 = vpop.eup %9547  ;;  %5982 = vst.msk [vmem:[#allocation3 + $0xf8] sm:$0xff] %vm492_vm0, %v9546_v9  ;;  %9561 = vpow2.f32 %v5006_v17  ;;  %v5014_v63 = vmul.f32 1.442695, %v4458_v18  ;;  %v5016_v49 = vmul.f32 1.442695, %v4459_v19  ;;  %v1755_v20 = vrot.slane %v1741_v39, %v11597_v60 }
 0x151   : > { %v9550_v42 = vpop.eup %9549  ;;  %5984 = vst.msk [vmem:[#allocation3 + $0x108] sm:$0xff] %vm492_vm0, %v9548_v30  ;;  %9563 = vpow2.f32 %v5008_v26  ;;  %v5010_v54 = vmul.f32 1.442695, %v4456_v52  ;;  %v5012_v15 = vmul.f32 1.442695, %v4457_v47  ;;  %v4460_v24 = vmul.f32 %v3229_v22, %v11738_v45 }
 0x152   : > { %v9552_v28 = vpop.eup %9551  ;;  %5985 = vst.msk [vmem:[#allocation3 + $0x110] sm:$0xff] %vm492_vm0, %v9550_v42  ;;  %9565 = vpow2.f32 %v5014_v63  ;;  %v4461_v50 = vmul.f32 %v3229_v22, %v11743_v38  ;;  %v5024_v10 = vmul.f32 1.442695, %v4463_v6  ;;  %v3241_v31 = vrot.slane %v1756_v14, %v11594_v58 }
 0x153   : > { %5986 = vst.msk [vmem:[#allocation3 + $0x118] sm:$0xff] %vm492_vm0, %v9552_v28  ;;  %9567 = vpow2.f32 %v5010_v54  ;;  %v5018_v55 = vmul.f32 1.442695, %v4460_v24  ;;  %v951_v33 = vmul.f32 0.6931472, %v11732_v13  ;;  %v9554_v2 = vpop.eup %9553  ;;  %v3237_v7 = vrot.slane %v1755_v20, %v11594_v58 }
 0x154   : > { %9569 = vpow2.f32 %v5012_v15  ;;  %v5020_v5 = vmul.f32 1.442695, %v4461_v50  ;;  %v1757_v16 = vcombine.high %v1755_v20, %v1755_v20  ;;  %v9556_v32 = vpop.eup %9555  ;;  %5987 = vst.msk [vmem:[#allocation3 + $0x120] sm:$0xff] %vm492_vm0, %v9554_v2  ;;  %v4466_v39 = vmul.f32 %v3241_v31, %v11727_v3 }
 0x155   : > { %9571 = vpow2.f32 %v5016_v49  ;;  %v4467_v17 = vmul.f32 %v3241_v31, %v11730_v21  ;;  %v957_v13 = vsel %vm11909_vm15, %v11674_v4, %v951_v33  ;;  %v9558_v14 = vpop.eup %9557  ;;  %5988 = vst.msk [vmem:[#allocation3 + $0x128] sm:$0xff] %vm492_vm0, %v9556_v32  ;;  %v4464_v26 = vmul.f32 %v3237_v7, %v11708_v56 }
 0x156   : > { %9573 = vpow2.f32 %v5018_v55  ;;  %v4465_v18 = vmul.f32 %v3237_v7, %v11710_v12  ;;  %v3245_v19 = vrot.slane %v1757_v16, %v11594_v58  ;;  %v9560_v9 = vpop.eup %9559  ;;  %5989 = vst.msk [vmem:[#allocation3 + $0x130] sm:$0xff] %vm492_vm0, %v9558_v14  ;;  %v5030_v52 = vmul.f32 1.442695, %v4466_v39 }
 0x157   : > { %9575 = vpow2.f32 %v5020_v5  ;;  %v5032_v47 = vmul.f32 1.442695, %v4467_v17  ;;  %v11957_v4 = vsel %vm637_vm1, %v11573_v36, %v957_v13  ;;  %5990 = vst.msk [vmem:[#allocation3 + $0x138] sm:$0xff] %vm492_vm0, %v9560_v9  ;;  %v5026_v8 = vmul.f32 1.442695, %v4464_v26 }
 0x158   : > { %16026 = vst [vmem:[#allocation36_spill] sm:$0xff] %v11957_v4  ;;  %9577 = vpow2.f32 %v5022_v51  ;;  %v5028_v22 = vmul.f32 1.442695, %v4465_v18  ;;  %v4468_v30 = vmul.f32 %v3245_v19, %v11738_v45  ;;  %v4469_v63 = vmul.f32 %v3245_v19, %v11743_v38 }
 0x159   : > { %9579 = vpow2.f32 %v5024_v10  ;;  %v1764_v49 = vrot.slane %v11957_v4, %v11597_v60  ;;  %v960_v6 = vmul.f32 0.6931472, %v11746_v44  ;;  %v963_v36 = vmul.f32 %v11632_v43, %v11669_v23 }
 0x15a   : > { %v9562_v42 = vpop.eup %9561  ;;  %9581 = vpow2.f32 %v5026_v8  ;;  %v5034_v54 = vmul.f32 1.442695, %v4468_v30  ;;  %v16027_v51 = vand.u32 2147483647, %v11632_v43  ;;  %v5036_v28 = vmul.f32 1.442695, %v4469_v63 }
 0x15b   : > { %v9564_v24 = vpop.eup %9563  ;;  %5991 = vst.msk [vmem:[#allocation3 + $0x140] sm:$0xff] %vm492_vm0, %v9562_v42  ;;  %9583 = vpow2.f32 %v5028_v22  ;;  %v1772_v50 = vrot.slane %v1764_v49, %v11597_v60  ;;  %v1765_v44 = vcombine.high %v1764_v49, %v1764_v49  ;;  %v967_v43 = vadd.f32 1.0, %v11643_v53 }
 0x15c   : > { %vm11969_vm3 = vcmp.lt.f32.partialorder %v16027_v51, 0.0004427343  ;;  %v9566_v10 = vpop.eup %9565  ;;  %5992 = vst.msk [vmem:[#allocation3 + $0x148] sm:$0xff] %vm492_vm0, %v9564_v24  ;;  %9585 = vpow2.f32 %v5030_v52  ;;  %v970_v20 = vmul.f32 -0.5, %v11643_v53  ;;  %v973_v32 = vand.u32 2147483647, %v11643_v53 }
 0x15d   : > { %v966_v23 = vsel %vm11969_vm3, %v963_v36, %v960_v6  ;;  %v9568_v55 = vpop.eup %9567  ;;  %5995 = vst.msk [vmem:[#allocation3 + $0x160] sm:$0xff] %vm492_vm0, %v9566_v10  ;;  %9587 = vpow2.f32 %v5032_v47  ;;  %v3249_v31 = vrot.slane %v1772_v50, %v11594_v58  ;;  %v1779_v33 = vrot.slane %v1765_v44, %v11597_v60 }
 0x15e   : > { %v1780_v2 = vcombine.high %v1772_v50, %v1772_v50  ;;  %v9570_v5 = vpop.eup %9569  ;;  %5993 = vst.msk [vmem:[#allocation3 + $0x150] sm:$0xff] %vm492_vm0, %v9568_v55  ;;  %9589 = vpow2.f32 %v5034_v54  ;;  %v11987_v7 = vsel %vm638_vm2, %v11576_v37, %v966_v23  ;;  %v971_v16 = vadd.f32 1.0, %v970_v20 }
 0x15f   : > { %16030 = vst [vmem:[#allocation37_spill] sm:$0xff] %v11987_v7  ;;  %v9572_v39 = vpop.eup %9571  ;;  %5994 = vst.msk [vmem:[#allocation3 + $0x158] sm:$0xff] %vm492_vm0, %v9570_v5  ;;  %9591 = vpow2.f32 %v5036_v28  ;;  %v4470_v17 = vmul.f32 %v3249_v31, %v11685_v27  ;;  %v4471_v13 = vmul.f32 %v3249_v31, %v11687_v35  ;;  %v3253_v14 = vrot.slane %v1779_v33, %v11594_v58 }
 0x160   : > { %v9574_v26 = vpop.eup %9573  ;;  %5996 = vst.msk [vmem:[#allocation3 + $0x168] sm:$0xff] %vm492_vm0, %v9572_v39  ;;  %v3257_v18 = vrot.slane %v1780_v2, %v11594_v58  ;;  %v1781_v37 = vcombine.high %v1779_v33, %v1779_v33  ;;  %v1788_v19 = vrot.slane %v11987_v7, %v11597_v60  ;;  %9593 = vlog2.f32 %v967_v43 }
 0x161   : > { %v9576_v9 = vpop.eup %9575  ;;  %5997 = vst.msk [vmem:[#allocation3 + $0x170] sm:$0xff] %vm492_vm0, %v9574_v26  ;;  %v5038_v52 = vmul.f32 1.442695, %v4470_v17  ;;  %v5040_v47 = vmul.f32 1.442695, %v4471_v13  ;;  %v4472_v8 = vmul.f32 %v3253_v14, %v11708_v56  ;;  %v4473_v22 = vmul.f32 %v3253_v14, %v11710_v12 }
 0x162   : > { %v9578_v30 = vpop.eup %9577  ;;  %5998 = vst.msk [vmem:[#allocation3 + $0x178] sm:$0xff] %vm492_vm0, %v9576_v9  ;;  %v4474_v63 = vmul.f32 %v3257_v18, %v11727_v3  ;;  %v4475_v49 = vmul.f32 %v3257_v18, %v11730_v21  ;;  %v3261_v6 = vrot.slane %v1781_v37, %v11594_v58  ;;  %v1796_v42 = vrot.slane %v1788_v19, %v11597_v60 }
 0x163   : > { %v9580_v54 = vpop.eup %9579  ;;  %5999 = vst.msk [vmem:[#allocation3 + $0x180] sm:$0xff] %vm492_vm0, %v9578_v30  ;;  %9595 = vpow2.f32 %v5038_v52  ;;  %v5042_v36 = vmul.f32 1.442695, %v4472_v8  ;;  %v5044_v51 = vmul.f32 1.442695, %v4473_v22  ;;  %v1789_v15 = vcombine.high %v1788_v19, %v1788_v19 }
 0x164   : > { %v9582_v24 = vpop.eup %9581  ;;  %6000 = vst.msk [vmem:[#allocation3 + $0x188] sm:$0xff] %vm492_vm0, %v9580_v54  ;;  %9597 = vpow2.f32 %v5040_v47  ;;  %v5046_v28 = vmul.f32 1.442695, %v4474_v63  ;;  %v5048_v50 = vmul.f32 1.442695, %v4475_v49  ;;  %v4476_v44 = vmul.f32 %v3261_v6, %v11738_v45 }
 0x165   : > { %v9584_v10 = vpop.eup %9583  ;;  %6001 = vst.msk [vmem:[#allocation3 + $0x190] sm:$0xff] %vm492_vm0, %v9582_v24  ;;  %9599 = vpow2.f32 %v5042_v36  ;;  %v4477_v23 = vmul.f32 %v3261_v6, %v11743_v38  ;;  %v3265_v43 = vrot.slane %v1796_v42, %v11594_v58  ;;  %v1803_v20 = vrot.slane %v1789_v15, %v11597_v60 }
 0x166   : > { %v9586_v55 = vpop.eup %9585  ;;  %6002 = vst.msk [vmem:[#allocation3 + $0x198] sm:$0xff] %vm492_vm0, %v9584_v10  ;;  %9601 = vpow2.f32 %v5044_v51  ;;  %v5050_v31 = vmul.f32 1.442695, %v4476_v44  ;;  %v1804_v33 = vcombine.high %v1796_v42, %v1796_v42  ;;  %v972_v2 = vmul.f32 %v11643_v53, %v971_v16 }
 0x167   : > { %v9588_v5 = vpop.eup %9587  ;;  %6003 = vst.msk [vmem:[#allocation3 + $0x1a0] sm:$0xff] %vm492_vm0, %v9586_v55  ;;  %9603 = vpow2.f32 %v5046_v28  ;;  %v5052_v39 = vmul.f32 1.442695, %v4477_v23  ;;  %v4478_v17 = vmul.f32 %v3265_v43, %v11685_v27  ;;  %v4479_v13 = vmul.f32 %v3265_v43, %v11687_v35  ;;  %v514_v28 = vld [vmem:[%s11502_s19 + $0x34] sm:$0xf] }
 0x168   : > { %v9590_v14 = vpop.eup %9589  ;;  %6004 = vst.msk [vmem:[#allocation3 + $0x1a8] sm:$0xff] %vm492_vm0, %v9588_v5  ;;  %9605 = vpow2.f32 %v5048_v50  ;;  %v3269_v26 = vrot.slane %v1803_v20, %v11594_v58  ;;  %v3273_v18 = vrot.slane %v1804_v33, %v11594_v58  ;;  %v1805_v37 = vcombine.high %v1803_v20, %v1803_v20 }
 0x169   : > { %v9592_v19 = vpop.eup %9591  ;;  %6005 = vst.msk [vmem:[#allocation3 + $0x1b0] sm:$0xff] %vm492_vm0, %v9590_v14  ;;  %9607 = vpow2.f32 %v5050_v31  ;;  %v5054_v16 = vmul.f32 1.442695, %v4478_v17  ;;  %v5056_v9 = vmul.f32 1.442695, %v4479_v13  ;;  %v705_v10 = vmin.f32 %v11600_v61, 20.0 }
 0x16a   : > { %vm12025_vm5 = vcmp.lt.f32.partialorder %v973_v32, 0.0004427343  ;;  %v9594_v47 = vpop.eup %9593  ;;  %6006 = vst.msk [vmem:[#allocation3 + $0x1b8] sm:$0xff] %vm492_vm0, %v9592_v19  ;;  %9609 = vpow2.f32 %v5052_v39  ;;  %v4480_v8 = vmul.f32 %v3269_v26, %v11708_v56  ;;  %v4481_v22 = vmul.f32 %v3269_v26, %v11710_v12  ;;  %v515_v14 = vld [vmem:[%s11502_s19 + $0x38] sm:$0xf] }
 0x16b   : > { %v4482_v30 = vmul.f32 %v3273_v18, %v11727_v3  ;;  %9611 = vpow2.f32 %v5054_v16  ;;  %v4483_v63 = vmul.f32 %v3273_v18, %v11730_v21  ;;  %v3277_v53 = vrot.slane %v1805_v37, %v11594_v58 }
 0x16c   : > { %v969_v32 = vmul.f32 0.6931472, %v9594_v47  ;;  %9613 = vpow2.f32 %v5056_v9  ;;  %v5058_v49 = vmul.f32 1.442695, %v4480_v8  ;;  %v5060_v6 = vmul.f32 1.442695, %v4481_v22 }
 0x16d   : > { %v5062_v42 = vmul.f32 1.442695, %v4482_v30  ;;  %v9596_v54 = vpop.eup %9595  ;;  %v5064_v36 = vmul.f32 1.442695, %v4483_v63  ;;  %v4484_v51 = vmul.f32 %v3277_v53, %v11738_v45  ;;  %v4485_v15 = vmul.f32 %v3277_v53, %v11743_v38 }
 0x16e   : > { %v975_v24 = vsel %vm12025_vm5, %v972_v2, %v969_v32  ;;  %v9598_v50 = vpop.eup %9597  ;;  %6007 = vst.msk [vmem:[#allocation3 + $0x1c0] sm:$0xff] %vm492_vm0, %v9596_v54  ;;  %9615 = vpow2.f32 %v5058_v49  ;;  %v976_v33 = vadd.f32 1.0, %v11647_v57  ;;  %v12053_v2 = vld [vmem:[#allocation16] sm:$0xf]  ;;  %v979_v18 = vmul.f32 -0.5, %v11647_v57 }
 0x16f   : > { %v12044_v44 = vsel %vm639_vm4, %v11580_v40, %v975_v24  ;;  %v9600_v23 = vpop.eup %9599  ;;  %6008 = vst.msk [vmem:[#allocation3 + $0x1c8] sm:$0xff] %vm492_vm0, %v9598_v50  ;;  %9617 = vpow2.f32 %v5060_v6  ;;  %v5066_v43 = vmul.f32 1.442695, %v4484_v51  ;;  %v5068_v20 = vmul.f32 1.442695, %v4485_v15 }
 0x170   : > { %16033 = vst [vmem:[#allocation38_spill] sm:$0xff] %v12044_v44  ;;  %v1812_v55 = vrot.slane %v12044_v44, %v11597_v60  ;;  %v9602_v31 = vpop.eup %9601  ;;  %6009 = vst.msk [vmem:[#allocation3 + $0x1d0] sm:$0xff] %vm492_vm0, %v9600_v23  ;;  %9619 = vpow2.f32 %v5062_v42  ;;  %v706_v40 = vmin.f32 %v11603_v62, 20.0  ;;  %v12056_v5 = vadd.f32 %v12053_v2, %v514_v28  ;;  %v516_v15 = vld [vmem:[%s11502_s19 + $0x3c] sm:$0xf] }
 0x171   : > { %v9604_v39 = vpop.eup %9603  ;;  %6010 = vst.msk [vmem:[#allocation3 + $0x1d8] sm:$0xff] %vm492_vm0, %v9602_v31  ;;  %9621 = vpow2.f32 %v5064_v36  ;;  %v780_v37 = vmul.f32 1.442695, %v705_v10  ;;  %v12069_v30 = vadd.f32 %v12053_v2, %v515_v14  ;;  %v980_v36 = vadd.f32 1.0, %v979_v18 }
 0x172   : > { %v1820_v17 = vrot.slane %v1812_v55, %v11597_v60  ;;  %v1813_v13 = vcombine.high %v1812_v55, %v1812_v55  ;;  %v9606_v26 = vpop.eup %9605  ;;  %6011 = vst.msk [vmem:[#allocation3 + $0x1e0] sm:$0xff] %vm492_vm0, %v9604_v39  ;;  %9623 = vpow2.f32 %v5066_v43  ;;  %v782_v8 = vmul.f32 1.442695, %v706_v40 }
 0x173   : > { %v9608_v19 = vpop.eup %9607  ;;  %6012 = vst.msk [vmem:[#allocation3 + $0x1e8] sm:$0xff] %vm492_vm0, %v9606_v26  ;;  %9625 = vpow2.f32 %v5068_v20  ;;  %v707_v22 = vmin.f32 %v12056_v5, 20.0  ;;  %v982_v51 = vand.u32 2147483647, %v11647_v57  ;;  %v517_v20 = vld [vmem:[%s11502_s19 + $0x40] sm:$0xf]  ;;  %v981_v26 = vmul.f32 %v11647_v57, %v980_v36 }
 0x174   : > { %v3281_v16 = vrot.slane %v1820_v17, %v11594_v58  ;;  %v1827_v9 = vrot.slane %v1813_v13, %v11597_v60  ;;  %v1828_v52 = vcombine.high %v1820_v17, %v1820_v17  ;;  %v9610_v47 = vpop.eup %9609  ;;  %6013 = vst.msk [vmem:[#allocation3 + $0x1f0] sm:$0xff] %vm492_vm0, %v9608_v19  ;;  %9627 = vlog2.f32 %v976_v33  ;;  %v519_v17 = vld [vmem:[%s11502_s19 + $0x48] sm:$0xf] }
 0x175   : > { %v9612_v63 = vpop.eup %9611  ;;  %6014 = vst.msk [vmem:[#allocation3 + $0x1f8] sm:$0xff] %vm492_vm0, %v9610_v47  ;;  %9629 = vpow2.f32 %v780_v37  ;;  %v708_v18 = vmin.f32 %v12069_v30, 20.0  ;;  %vm12111_vm6 = vcmp.lt.f32.partialorder %v982_v51, 0.0004427343  ;;  %vm641_vm9 = vcmp.gt.f32.partialorder %v11600_v61, 20.0 }
 0x176   : > { %v4486_v53 = vmul.f32 %v3281_v16, %v11685_v27  ;;  %v4487_v32 = vmul.f32 %v3281_v16, %v11687_v35  ;;  %v3285_v49 = vrot.slane %v1827_v9, %v11594_v58  ;;  %v3289_v6 = vrot.slane %v1828_v52, %v11594_v58  ;;  %v9614_v42 = vpop.eup %9613  ;;  %6015 = vst.msk [vmem:[#allocation3 + $0x200] sm:$0xff] %vm492_vm0, %v9612_v63 }
 0x177   : > { %v1829_v54 = vcombine.high %v1827_v9, %v1827_v9  ;;  %6016 = vst.msk [vmem:[#allocation3 + $0x208] sm:$0xff] %vm492_vm0, %v9614_v42  ;;  %9631 = vpow2.f32 %v782_v8  ;;  %v12100_v16 = vadd.f32 %v12053_v2, %v517_v20  ;;  %v12108_v52 = vadd.f32 %v12053_v2, %v519_v17 }
 0x178   : > { %v5070_v24 = vmul.f32 1.442695, %v4486_v53  ;;  %v5072_v27 = vmul.f32 1.442695, %v4487_v32  ;;  %v4488_v35 = vmul.f32 %v3285_v49, %v11708_v56  ;;  %v4489_v28 = vmul.f32 %v3285_v49, %v11710_v12  ;;  %v9616_v50 = vpop.eup %9615  ;;  %v518_v12 = vld [vmem:[%s11502_s19 + $0x44] sm:$0xf] }
 0x179   : > { %v4490_v10 = vmul.f32 %v3289_v6, %v11727_v3  ;;  %v4491_v23 = vmul.f32 %v3289_v6, %v11730_v21  ;;  %v3293_v43 = vrot.slane %v1829_v54, %v11594_v58  ;;  %v9618_v55 = vpop.eup %9617  ;;  %6017 = vst.msk [vmem:[#allocation3 + $0x210] sm:$0xff] %vm492_vm0, %v9616_v50  ;;  %v12088_v56 = vadd.f32 %v12053_v2, %v516_v15  ;;  %v520_v54 = vld [vmem:[%s11502_s19 + $0x4c] sm:$0xf] }
 0x17a   : > { %9633 = vpow2.f32 %v5070_v24  ;;  %v5074_v31 = vmul.f32 1.442695, %v4488_v35  ;;  %v5076_v33 = vmul.f32 1.442695, %v4489_v28  ;;  %v9620_v40 = vpop.eup %9619  ;;  %6018 = vst.msk [vmem:[#allocation3 + $0x218] sm:$0xff] %vm492_vm0, %v9618_v55  ;;  %v710_v32 = vmin.f32 %v12100_v16, 20.0 }
 0x17b   : > { %9635 = vpow2.f32 %v5072_v27  ;;  %v5078_v3 = vmul.f32 1.442695, %v4490_v10  ;;  %v5080_v21 = vmul.f32 1.442695, %v4491_v23  ;;  %v4492_v39 = vmul.f32 %v3293_v43, %v11738_v45  ;;  %v9622_v13 = vpop.eup %9621  ;;  %6019 = vst.msk [vmem:[#allocation3 + $0x220] sm:$0xff] %vm492_vm0, %v9620_v40 }
 0x17c   : > { %9637 = vpow2.f32 %v5074_v31  ;;  %v4493_v14 = vmul.f32 %v3293_v43, %v11743_v38  ;;  %v9624_v37 = vpop.eup %9623  ;;  %6020 = vst.msk [vmem:[#allocation3 + $0x228] sm:$0xff] %vm492_vm0, %v9622_v13  ;;  %v12103_v45 = vadd.f32 %v12053_v2, %v518_v12  ;;  %v709_v57 = vmin.f32 %v12088_v56, 20.0 }
 0x17d   : > { %9639 = vpow2.f32 %v5076_v33  ;;  %v5082_v19 = vmul.f32 1.442695, %v4492_v39  ;;  %v9626_v9 = vpop.eup %9625  ;;  %6021 = vst.msk [vmem:[#allocation3 + $0x230] sm:$0xff] %vm492_vm0, %v9624_v37  ;;  %v784_v63 = vmul.f32 1.442695, %v707_v22  ;;  %v712_v24 = vmin.f32 %v12108_v52, 20.0 }
 0x17e   : > { %9641 = vpow2.f32 %v5078_v3  ;;  %v5084_v38 = vmul.f32 1.442695, %v4493_v14  ;;  %v9628_v47 = vpop.eup %9627  ;;  %6022 = vst.msk [vmem:[#allocation3 + $0x238] sm:$0xff] %vm492_vm0, %v9626_v9  ;;  %v786_v6 = vmul.f32 1.442695, %v708_v18  ;;  %v711_v42 = vmin.f32 %v12103_v45, 20.0 }
 0x17f   : > { %9643 = vpow2.f32 %v5080_v21  ;;  %v978_v53 = vmul.f32 0.6931472, %v9628_v47  ;;  %v9630_v49 = vpop.eup %9629  ;;  %v788_v15 = vmul.f32 1.442695, %v709_v57  ;;  %v790_v23 = vmul.f32 1.442695, %v710_v32 }
 0x180   : > { %9645 = vpow2.f32 %v5082_v19  ;;  %v985_v51 = vadd.f32 1.0, %v9630_v49  ;;  %v988_v35 = vmul.f32 -0.5, %v9630_v49  ;;  %v991_v28 = vand.u32 2147483647, %v9630_v49  ;;  %v12150_v47 = vld [vmem:[#allocation13] sm:$0xff] }
 0x181   : > { %9647 = vpow2.f32 %v5084_v38  ;;  %v984_v36 = vsel %vm12111_vm6, %v981_v26, %v978_v53  ;;  %v12122_v22 = vpop.eup %9631  ;;  %v12130_v43 = vadd.f32 %v12053_v2, %v520_v54  ;;  %v792_v31 = vmul.f32 1.442695, %v711_v42 }
 0x182   : > { %v12125_v27 = vsel %vm640_vm7, %v11583_v41, %v984_v36  ;;  %9649 = vpow2.f32 %v784_v63  ;;  %v994_v55 = vadd.f32 1.0, %v12122_v22  ;;  %v997_v41 = vmul.f32 -0.5, %v12122_v22  ;;  %v12153_v63 = vld [vmem:[#allocation13 + $0x8] sm:$0xff] }
 0x183   : > { %16036 = vst [vmem:[#allocation39_spill] sm:$0xff] %v12125_v27  ;;  %v1836_v10 = vrot.slane %v12125_v27, %v11597_v60  ;;  %9651 = vlog2.f32 %v985_v51  ;;  %v989_v21 = vadd.f32 1.0, %v988_v35  ;;  %vm12138_vm8 = vcmp.lt.f32.partialorder %v991_v28, 0.0004427343  ;;  %v12161_v35 = vld [vmem:[#allocation13 + $0x10] sm:$0xff] }
 0x184   : > { %v9634_v50 = vpop.eup %9633  ;;  %9653 = vpow2.f32 %v786_v6  ;;  %v794_v17 = vmul.f32 1.442695, %v712_v24  ;;  %v998_v19 = vadd.f32 1.0, %v997_v41  ;;  %v1000_v9 = vand.u32 2147483647, %v12122_v22  ;;  %v13485_v27 = vld [vmem:[#allocation13 + $0x30] sm:$0xff] }
 0x185   : > { %v9636_v20 = vpop.eup %9635  ;;  %6023 = vst.msk [vmem:[#allocation3 + $0x240] sm:$0xff] %vm492_vm0, %v9634_v50  ;;  %v1844_v12 = vrot.slane %v1836_v10, %v11597_v60  ;;  %v1837_v40 = vcombine.high %v1836_v10, %v1836_v10  ;;  %9655 = vpow2.f32 %v788_v15  ;;  %v713_v38 = vmin.f32 %v12130_v43, 20.0  ;;  %v12164_v50 = vld [vmem:[#allocation13 + $0x18] sm:$0xff] }
 0x186   : > { %v9638_v33 = vpop.eup %9637  ;;  %6024 = vst.msk [vmem:[#allocation3 + $0x248] sm:$0xff] %vm492_vm0, %v9636_v20  ;;  %9657 = vlog2.f32 %v994_v55  ;;  %vm642_vm10 = vcmp.gt.f32.partialorder %v11603_v62, 20.0  ;;  %v990_v36 = vmul.f32 %v9630_v49, %v989_v21  ;;  %v12169_v20 = vld [vmem:[#allocation13 + $0x20] sm:$0xff]  ;;  %v12172_v55 = vld [vmem:[#allocation13 + $0x28] sm:$0xff]  ;;  %vm12188_vm11 = vcmp.lt.f32.partialorder %v1000_v9, 0.0004427343 }
 0x187   : > { %v9640_v3 = vpop.eup %9639  ;;  %6025 = vst.msk [vmem:[#allocation3 + $0x250] sm:$0xff] %vm492_vm0, %v9638_v33  ;;  %v3297_v14 = vrot.slane %v1844_v12, %v11594_v58  ;;  %v1851_v26 = vrot.slane %v1837_v40, %v11597_v60  ;;  %v1852_v18 = vcombine.high %v1844_v12, %v1844_v12  ;;  %9659 = vpow2.f32 %v790_v23 }
 0x188   : > { %v9642_v13 = vpop.eup %9641  ;;  %6026 = vst.msk [vmem:[#allocation3 + $0x258] sm:$0xff] %vm492_vm0, %v9640_v3  ;;  %9661 = vpow2.f32 %v792_v31  ;;  %v796_v51 = vmul.f32 1.442695, %v713_v38  ;;  %v999_v3 = vmul.f32 %v12122_v22, %v998_v19  ;;  %vm643_vm13 = vcmp.gt.f32.partialorder %v12056_v5, 20.0 }
 0x189   : > { %v9644_v37 = vpop.eup %9643  ;;  %6027 = vst.msk [vmem:[#allocation3 + $0x260] sm:$0xff] %vm492_vm0, %v9642_v13  ;;  %v4494_v8 = vmul.f32 %v12150_v47, %v3297_v14  ;;  %v4495_v53 = vmul.f32 %v12153_v63, %v3297_v14  ;;  %v3301_v32 = vrot.slane %v1851_v26, %v11594_v58  ;;  %v3305_v6 = vrot.slane %v1852_v18, %v11594_v58  ;;  %v12179_v14 = vld [vmem:[#allocation13 + $0x30] sm:$0xff] }
 0x18a   : > { %v9646_v57 = vpop.eup %9645  ;;  %6028 = vst.msk [vmem:[#allocation3 + $0x268] sm:$0xff] %vm492_vm0, %v9644_v37  ;;  %v1853_v54 = vcombine.high %v1851_v26, %v1851_v26  ;;  %9663 = vpow2.f32 %v794_v17  ;;  %v12184_v37 = vld [vmem:[#allocation13 + $0x38] sm:$0xff]  ;;  %vm644_vm15 = vcmp.gt.f32.partialorder %v12069_v30, 20.0  ;;  %vm645_vm1 = vcmp.gt.f32.partialorder %v12088_v56, 20.0 }
 0x18b   : > { %v9648_v42 = vpop.eup %9647  ;;  %6029 = vst.msk [vmem:[#allocation3 + $0x270] sm:$0xff] %vm492_vm0, %v9646_v57  ;;  %v5086_v15 = vmul.f32 1.442695, %v4494_v8  ;;  %v5088_v24 = vmul.f32 1.442695, %v4495_v53  ;;  %v4496_v28 = vmul.f32 %v12161_v35, %v3301_v32  ;;  %v4497_v10 = vmul.f32 %v12164_v50, %v3301_v32 }
 0x18c   : > { %6030 = vst.msk [vmem:[#allocation3 + $0x278] sm:$0xff] %vm492_vm0, %v9648_v42  ;;  %v12167_v23 = vpop.eup %9649  ;;  %v4498_v49 = vmul.f32 %v12169_v20, %v3305_v6  ;;  %v4499_v41 = vmul.f32 %v12172_v55, %v3305_v6  ;;  %v3309_v31 = vrot.slane %v1853_v54, %v11594_v58  ;;  %9665 = vpow2.f32 %v796_v51 }
 0x18d   : > { %v9652_v33 = vpop.eup %9651  ;;  %9667 = vpow2.f32 %v5086_v15  ;;  %v5090_v12 = vmul.f32 1.442695, %v4496_v28  ;;  %v5092_v40 = vmul.f32 1.442695, %v4497_v10  ;;  %v1006_v8 = vmul.f32 -0.5, %v12167_v23 }
 0x18e   : > { %v12177_v21 = vpop.eup %9653  ;;  %9669 = vpow2.f32 %v5088_v24  ;;  %v5094_v17 = vmul.f32 1.442695, %v4498_v49  ;;  %v5096_v13 = vmul.f32 1.442695, %v4499_v41  ;;  %v4500_v26 = vmul.f32 %v12179_v14, %v3309_v31 }
 0x18f   : > { %v12182_v18 = vpop.eup %9655  ;;  %9671 = vpow2.f32 %v5090_v12  ;;  %v4501_v38 = vmul.f32 %v12184_v37, %v3309_v31  ;;  %v987_v57 = vmul.f32 0.6931472, %v9652_v33  ;;  %v1003_v32 = vadd.f32 1.0, %v12167_v23 }
 0x190   : > { %v9658_v22 = vpop.eup %9657  ;;  %9673 = vpow2.f32 %v5092_v40  ;;  %v5098_v19 = vmul.f32 1.442695, %v4500_v26  ;;  %v1007_v24 = vadd.f32 1.0, %v1006_v8  ;;  %v1012_v28 = vadd.f32 1.0, %v12177_v21 }
 0x191   : > { %v12193_v6 = vpop.eup %9659  ;;  %9675 = vpow2.f32 %v5094_v17  ;;  %v5100_v42 = vmul.f32 1.442695, %v4501_v38  ;;  %v993_v54 = vsel %vm12138_vm8, %v990_v36, %v987_v57  ;;  %v996_v51 = vmul.f32 0.6931472, %v9658_v22 }
 0x192   : > { %v12197_v15 = vpop.eup %9661  ;;  %9677 = vpow2.f32 %v5096_v13  ;;  %v12202_v9 = vsel %vm641_vm9, %v11600_v61, %v993_v54  ;;  %v1015_v36 = vmul.f32 -0.5, %v12177_v21  ;;  %v12218_v41 = vmul.f32 %v12167_v23, %v1007_v24 }
 0x193   : > { %16041 = vst [vmem:[#allocation40_spill] sm:$0xff] %v12202_v9  ;;  %9679 = vpow2.f32 %v5098_v19  ;;  %v1860_v10 = vrot.slane %v12202_v9, %v11597_v60  ;;  %v1002_v39 = vsel %vm12188_vm11, %v999_v3, %v996_v51  ;;  %v1009_v31 = vand.u32 2147483647, %v12167_v23 }
 0x194   : > { %v12210_v49 = vpop.eup %9663  ;;  %9681 = vpow2.f32 %v5100_v42  ;;  %v12215_v61 = vsel %vm642_vm10, %v11603_v62, %v1002_v39  ;;  %v1016_v17 = vadd.f32 1.0, %v1015_v36  ;;  %v1018_v13 = vand.u32 2147483647, %v12177_v21 }
 0x195   : > { %16042 = vst [vmem:[#allocation41_spill] sm:$0xff] %v12215_v61  ;;  %v1868_v33 = vrot.slane %v1860_v10, %v11597_v60  ;;  %v1861_v12 = vcombine.high %v1860_v10, %v1860_v10  ;;  %v1884_v40 = vrot.slane %v12215_v61, %v11597_v60  ;;  %9683 = vlog2.f32 %v1003_v32 }
 0x196   : > { %v12224_v3 = vpop.eup %9665  ;;  %9685 = vlog2.f32 %v1012_v28  ;;  %v1021_v62 = vadd.f32 1.0, %v12182_v18  ;;  %vm12232_vm12 = vcmp.lt.f32.partialorder %v1009_v31, 0.0004427343  ;;  %v12237_v32 = vmul.f32 %v12177_v21, %v1016_v17 }
 0x197   : > { %v9668_v26 = vpop.eup %9667  ;;  %v3313_v38 = vrot.slane %v1868_v33, %v11594_v58  ;;  %v1875_v23 = vrot.slane %v1861_v12, %v11597_v60  ;;  %v1876_v57 = vcombine.high %v1868_v33, %v1868_v33  ;;  %v1892_v8 = vrot.slane %v1884_v40, %v11597_v60 }
 0x198   : > { %v9670_v22 = vpop.eup %9669  ;;  %6031 = vst.msk [vmem:[#allocation3 + $0x280] sm:$0xff] %vm492_vm0, %v9668_v26  ;;  %v1885_v19 = vcombine.high %v1884_v40, %v1884_v40  ;;  %9687 = vlog2.f32 %v1021_v62  ;;  %v12240_v42 = vmul.f32 -0.5, %v12182_v18  ;;  %vm12261_vm14 = vcmp.lt.f32.partialorder %v1018_v13, 0.0004427343 }
 0x199   : > { %v9672_v54 = vpop.eup %9671  ;;  %6032 = vst.msk [vmem:[#allocation3 + $0x288] sm:$0xff] %vm492_vm0, %v9670_v22  ;;  %v4502_v51 = vmul.f32 %v12150_v47, %v3313_v38  ;;  %v4503_v24 = vmul.f32 %v12153_v63, %v3313_v38  ;;  %v3317_v28 = vrot.slane %v1875_v23, %v11594_v58  ;;  %v3321_v10 = vrot.slane %v1876_v57, %v11594_v58 }
 0x19a   : > { %v9674_v39 = vpop.eup %9673  ;;  %6033 = vst.msk [vmem:[#allocation3 + $0x290] sm:$0xff] %vm492_vm0, %v9672_v54  ;;  %v1877_v21 = vcombine.high %v1875_v23, %v1875_v23  ;;  %v3329_v36 = vrot.slane %v1892_v8, %v11594_v58  ;;  %v1899_v31 = vrot.slane %v1885_v19, %v11597_v60  ;;  %v1900_v33 = vcombine.high %v1892_v8, %v1892_v8 }
 0x19b   : > { %v9676_v12 = vpop.eup %9675  ;;  %6034 = vst.msk [vmem:[#allocation3 + $0x298] sm:$0xff] %vm492_vm0, %v9674_v39  ;;  %v5102_v40 = vmul.f32 1.442695, %v4502_v51  ;;  %v5104_v17 = vmul.f32 1.442695, %v4503_v24  ;;  %v4504_v62 = vmul.f32 %v12161_v35, %v3317_v28  ;;  %v4505_v26 = vmul.f32 %v12164_v50, %v3317_v28 }
 0x19c   : > { %v9678_v38 = vpop.eup %9677  ;;  %6035 = vst.msk [vmem:[#allocation3 + $0x2a0] sm:$0xff] %vm492_vm0, %v9676_v12  ;;  %v4506_v23 = vmul.f32 %v12169_v20, %v3321_v10  ;;  %v4507_v57 = vmul.f32 %v12172_v55, %v3321_v10  ;;  %v3325_v8 = vrot.slane %v1877_v21, %v11594_v58  ;;  %v4510_v22 = vmul.f32 %v12150_v47, %v3329_v36 }
 0x19d   : > { %v9680_v19 = vpop.eup %9679  ;;  %6036 = vst.msk [vmem:[#allocation3 + $0x2a8] sm:$0xff] %vm492_vm0, %v9678_v38  ;;  %9689 = vpow2.f32 %v5102_v40  ;;  %v5106_v54 = vmul.f32 1.442695, %v4504_v62  ;;  %v5108_v51 = vmul.f32 1.442695, %v4505_v26  ;;  %v4511_v24 = vmul.f32 %v12153_v63, %v3329_v36 }
 0x19e   : > { %v9682_v39 = vpop.eup %9681  ;;  %6037 = vst.msk [vmem:[#allocation3 + $0x2b0] sm:$0xff] %vm492_vm0, %v9680_v19  ;;  %9691 = vpow2.f32 %v5104_v17  ;;  %v5110_v10 = vmul.f32 1.442695, %v4506_v23  ;;  %v5112_v21 = vmul.f32 1.442695, %v4507_v57  ;;  %v4508_v12 = vmul.f32 %v12179_v14, %v3325_v8 }
 0x19f   : > { %v9684_v38 = vpop.eup %9683  ;;  %6038 = vst.msk [vmem:[#allocation3 + $0x2b8] sm:$0xff] %vm492_vm0, %v9682_v39  ;;  %9693 = vpow2.f32 %v5106_v54  ;;  %v4509_v36 = vmul.f32 %v12184_v37, %v3325_v8  ;;  %v5118_v13 = vmul.f32 1.442695, %v4510_v22  ;;  %v5120_v40 = vmul.f32 1.442695, %v4511_v24 }
 0x1a0   : > { %v9686_v62 = vpop.eup %9685  ;;  %9695 = vpow2.f32 %v5108_v51  ;;  %v5114_v26 = vmul.f32 1.442695, %v4508_v12  ;;  %v3333_v19 = vrot.slane %v1899_v31, %v11594_v58  ;;  %v3337_v17 = vrot.slane %v1900_v33, %v11594_v58 }
 0x1a1   : > { %9697 = vpow2.f32 %v5110_v10  ;;  %v5116_v23 = vmul.f32 1.442695, %v4509_v36  ;;  %v1901_v57 = vcombine.high %v1899_v31, %v1899_v31  ;;  %v1005_v1 = vmul.f32 0.6931472, %v9684_v38 }
 0x1a2   : > { %v9688_v48 = vpop.eup %9687  ;;  %9699 = vpow2.f32 %v5112_v21  ;;  %v4512_v39 = vmul.f32 %v12161_v35, %v3333_v19  ;;  %v4513_v54 = vmul.f32 %v12164_v50, %v3333_v19  ;;  %v4514_v8 = vmul.f32 %v12169_v20, %v3337_v17 }
 0x1a3   : > { %9701 = vpow2.f32 %v5114_v26  ;;  %v4515_v22 = vmul.f32 %v12172_v55, %v3337_v17  ;;  %v3341_v51 = vrot.slane %v1901_v57, %v11594_v58  ;;  %v1011_v33 = vsel %vm12232_vm12, %v12218_v41, %v1005_v1 }
 0x1a4   : > { %9703 = vpow2.f32 %v5116_v23  ;;  %v5122_v31 = vmul.f32 1.442695, %v4512_v39  ;;  %v5124_v24 = vmul.f32 1.442695, %v4513_v54  ;;  %v5126_v10 = vmul.f32 1.442695, %v4514_v8 }
 0x1a5   : > { %9705 = vpow2.f32 %v5118_v13  ;;  %v5128_v21 = vmul.f32 1.442695, %v4515_v22  ;;  %v4516_v12 = vmul.f32 %v12179_v14, %v3341_v51  ;;  %v4517_v38 = vmul.f32 %v12184_v37, %v3341_v51 }
 0x1a6   : > { %9707 = vpow2.f32 %v5120_v40  ;;  %v12285_v36 = vsel %vm643_vm13, %v12056_v5, %v1011_v33  ;;  %v1014_v26 = vmul.f32 0.6931472, %v9686_v62  ;;  %v12287_v19 = vmul.f32 0.6931472, %v9688_v48 }
 0x1a7   : > { %16047 = vst [vmem:[#allocation42_spill] sm:$0xff] %v12285_v36  ;;  %v9690_v1 = vpop.eup %9689  ;;  %9709 = vpow2.f32 %v5122_v31  ;;  %v5130_v41 = vmul.f32 1.442695, %v4516_v12  ;;  %v5132_v53 = vmul.f32 1.442695, %v4517_v38  ;;  %v1908_v13 = vrot.slane %v12285_v36, %v11597_v60 }
 0x1a8   : > { %v9692_v17 = vpop.eup %9691  ;;  %6039 = vst.msk [vmem:[#allocation3 + $0x2c0] sm:$0xff] %vm492_vm0, %v9690_v1  ;;  %9711 = vpow2.f32 %v5124_v24  ;;  %v1020_v40 = vsel %vm12261_vm14, %v12237_v32, %v1014_v26  ;;  %v1025_v5 = vadd.f32 1.0, %v12240_v42  ;;  %v1027_v48 = vand.u32 2147483647, %v12182_v18 }
 0x1a9   : > { %v9694_v62 = vpop.eup %9693  ;;  %6040 = vst.msk [vmem:[#allocation3 + $0x2c8] sm:$0xff] %vm492_vm0, %v9692_v17  ;;  %9713 = vpow2.f32 %v5126_v10  ;;  %v1916_v23 = vrot.slane %v1908_v13, %v11597_v60  ;;  %v1909_v57 = vcombine.high %v1908_v13, %v1908_v13  ;;  %v12302_v39 = vsel %vm644_vm15, %v12069_v30, %v1020_v40 }
 0x1aa   : > { %16048 = vst [vmem:[#allocation43_spill] sm:$0xff] %v12302_v39  ;;  %v9696_v54 = vpop.eup %9695  ;;  %6041 = vst.msk [vmem:[#allocation3 + $0x2d0] sm:$0xff] %vm492_vm0, %v9694_v62  ;;  %9715 = vpow2.f32 %v5128_v21  ;;  %v1932_v32 = vrot.slane %v12302_v39, %v11597_v60  ;;  %v12309_v42 = vmul.f32 %v12182_v18, %v1025_v5  ;;  %vm12311_vm2 = vcmp.lt.f32.partialorder %v1027_v48, 0.0004427343 }
 0x1ab   : > { %v9698_v8 = vpop.eup %9697  ;;  %6042 = vst.msk [vmem:[#allocation3 + $0x2d8] sm:$0xff] %vm492_vm0, %v9696_v54  ;;  %9717 = vpow2.f32 %v5130_v41  ;;  %v3345_v30 = vrot.slane %v1916_v23, %v11594_v58  ;;  %v1923_v22 = vrot.slane %v1909_v57, %v11597_v60  ;;  %v1924_v51 = vcombine.high %v1916_v23, %v1916_v23 }
 0x1ac   : > { %v9700_v33 = vpop.eup %9699  ;;  %6043 = vst.msk [vmem:[#allocation3 + $0x2e0] sm:$0xff] %vm492_vm0, %v9698_v8  ;;  %9719 = vpow2.f32 %v5132_v53  ;;  %v1940_v18 = vrot.slane %v1932_v32, %v11597_v60  ;;  %v1933_v31 = vcombine.high %v1932_v32, %v1932_v32  ;;  %v1029_v24 = vsel %vm12311_vm2, %v12309_v42, %v12287_v19 }
 0x1ad   : > { %v9702_v10 = vpop.eup %9701  ;;  %6044 = vst.msk [vmem:[#allocation3 + $0x2e8] sm:$0xff] %vm492_vm0, %v9700_v33  ;;  %v4518_v21 = vmul.f32 %v12150_v47, %v3345_v30  ;;  %v4519_v12 = vmul.f32 %v12153_v63, %v3345_v30  ;;  %v3349_v38 = vrot.slane %v1923_v22, %v11594_v58  ;;  %v3353_v26 = vrot.slane %v1924_v51, %v11594_v58 }
 0x1ae   : > { %v9704_v1 = vpop.eup %9703  ;;  %6045 = vst.msk [vmem:[#allocation3 + $0x2f0] sm:$0xff] %vm492_vm0, %v9702_v10  ;;  %v1925_v41 = vcombine.high %v1923_v22, %v1923_v22  ;;  %v3361_v53 = vrot.slane %v1940_v18, %v11594_v58  ;;  %v1947_v13 = vrot.slane %v1933_v31, %v11597_v60  ;;  %v1948_v19 = vcombine.high %v1940_v18, %v1940_v18 }
 0x1af   : > { %v9706_v17 = vpop.eup %9705  ;;  %6046 = vst.msk [vmem:[#allocation3 + $0x2f8] sm:$0xff] %vm492_vm0, %v9704_v1  ;;  %v5134_v40 = vmul.f32 1.442695, %v4518_v21  ;;  %v5136_v5 = vmul.f32 1.442695, %v4519_v12  ;;  %v4520_v48 = vmul.f32 %v12161_v35, %v3349_v38  ;;  %v4521_v62 = vmul.f32 %v12164_v50, %v3349_v38 }
 0x1b0   : > { %v9708_v23 = vpop.eup %9707  ;;  %6047 = vst.msk [vmem:[#allocation3 + $0x300] sm:$0xff] %vm492_vm0, %v9706_v17  ;;  %v4522_v57 = vmul.f32 %v12169_v20, %v3353_v26  ;;  %v4523_v54 = vmul.f32 %v12172_v55, %v3353_v26  ;;  %v3357_v32 = vrot.slane %v1925_v41, %v11594_v58  ;;  %v4526_v42 = vmul.f32 %v12150_v47, %v3361_v53 }
 0x1b1   : > { %v9710_v28 = vpop.eup %9709  ;;  %6048 = vst.msk [vmem:[#allocation3 + $0x308] sm:$0xff] %vm492_vm0, %v9708_v23  ;;  %9721 = vpow2.f32 %v5134_v40  ;;  %v5138_v8 = vmul.f32 1.442695, %v4520_v48  ;;  %v5140_v30 = vmul.f32 1.442695, %v4521_v62  ;;  %v4527_v22 = vmul.f32 %v12153_v63, %v3361_v53 }
 0x1b2   : > { %v9712_v51 = vpop.eup %9711  ;;  %6049 = vst.msk [vmem:[#allocation3 + $0x310] sm:$0xff] %vm492_vm0, %v9710_v28  ;;  %9723 = vpow2.f32 %v5136_v5  ;;  %v5142_v33 = vmul.f32 1.442695, %v4522_v57  ;;  %v5144_v18 = vmul.f32 1.442695, %v4523_v54  ;;  %v4524_v31 = vmul.f32 %v12179_v14, %v3357_v32 }
 0x1b3   : > { %v9714_v10 = vpop.eup %9713  ;;  %6050 = vst.msk [vmem:[#allocation3 + $0x318] sm:$0xff] %vm492_vm0, %v9712_v51  ;;  %9725 = vpow2.f32 %v5138_v8  ;;  %v4525_v21 = vmul.f32 %v12184_v37, %v3357_v32  ;;  %v5150_v12 = vmul.f32 1.442695, %v4526_v42  ;;  %v5152_v38 = vmul.f32 1.442695, %v4527_v22 }
 0x1b4   : > { %v9716_v26 = vpop.eup %9715  ;;  %6051 = vst.msk [vmem:[#allocation3 + $0x320] sm:$0xff] %vm492_vm0, %v9714_v10  ;;  %9727 = vpow2.f32 %v5140_v30  ;;  %v5146_v1 = vmul.f32 1.442695, %v4524_v31  ;;  %v3365_v41 = vrot.slane %v1947_v13, %v11594_v58  ;;  %v3369_v53 = vrot.slane %v1948_v19, %v11594_v58 }
 0x1b5   : > { %v9718_v17 = vpop.eup %9717  ;;  %6052 = vst.msk [vmem:[#allocation3 + $0x328] sm:$0xff] %vm492_vm0, %v9716_v26  ;;  %9729 = vpow2.f32 %v5142_v33  ;;  %v5148_v40 = vmul.f32 1.442695, %v4525_v21  ;;  %v1949_v5 = vcombine.high %v1947_v13, %v1947_v13  ;;  %v12353_v48 = vsel %vm645_vm1, %v12088_v56, %v1029_v24 }
 0x1b6   : > { %16051 = vst [vmem:[#allocation44_spill] sm:$0xff] %v12353_v48  ;;  %v9720_v62 = vpop.eup %9719  ;;  %6053 = vst.msk [vmem:[#allocation3 + $0x330] sm:$0xff] %vm492_vm0, %v9718_v17  ;;  %9731 = vpow2.f32 %v5144_v18  ;;  %v4528_v23 = vmul.f32 %v12161_v35, %v3365_v41  ;;  %v4529_v57 = vmul.f32 %v12164_v50, %v3365_v41  ;;  %v4530_v19 = vmul.f32 %v12169_v20, %v3369_v53 }
 0x1b7   : > { %6054 = vst.msk [vmem:[#allocation3 + $0x338] sm:$0xff] %vm492_vm0, %v9720_v62  ;;  %9733 = vpow2.f32 %v5146_v1  ;;  %v4531_v13 = vmul.f32 %v12172_v55, %v3369_v53  ;;  %v3373_v54 = vrot.slane %v1949_v5, %v11594_v58  ;;  %v1956_v56 = vrot.slane %v12353_v48, %v11597_v60 }
 0x1b8   : > { %9735 = vpow2.f32 %v5148_v40  ;;  %v5154_v24 = vmul.f32 1.442695, %v4528_v23  ;;  %v5156_v32 = vmul.f32 1.442695, %v4529_v57  ;;  %v5158_v42 = vmul.f32 1.442695, %v4530_v19 }
 0x1b9   : > { %9737 = vpow2.f32 %v5150_v12  ;;  %v4532_v28 = vmul.f32 %v12179_v14, %v3373_v54  ;;  %v4533_v8 = vmul.f32 %v12184_v37, %v3373_v54  ;;  %v5160_v30 = vmul.f32 1.442695, %v4531_v13 }
 0x1ba   : > { %9739 = vpow2.f32 %v5152_v38  ;;  %v1964_v22 = vrot.slane %v1956_v56, %v11597_v60  ;;  %v1957_v51 = vcombine.high %v1956_v56, %v1956_v56  ;;  %vm646_vm3 = vcmp.gt.f32.partialorder %v12100_v16, 20.0 }
 0x1bb   : > { %v9722_v33 = vpop.eup %9721  ;;  %9741 = vpow2.f32 %v5154_v24  ;;  %v5162_v18 = vmul.f32 1.442695, %v4532_v28  ;;  %v5164_v31 = vmul.f32 1.442695, %v4533_v8  ;;  %vm647_vm4 = vcmp.gt.f32.partialorder %v12103_v45, 20.0 }
 0x1bc   : > { %v9724_v10 = vpop.eup %9723  ;;  %6055 = vst.msk [vmem:[#allocation3 + $0x340] sm:$0xff] %vm492_vm0, %v9722_v33  ;;  %9743 = vpow2.f32 %v5156_v32  ;;  %v3377_v21 = vrot.slane %v1964_v22, %v11594_v58  ;;  %v1971_v12 = vrot.slane %v1957_v51, %v11597_v60  ;;  %v1972_v26 = vcombine.high %v1964_v22, %v1964_v22 }
 0x1bd   : > { %v9726_v1 = vpop.eup %9725  ;;  %6056 = vst.msk [vmem:[#allocation3 + $0x348] sm:$0xff] %vm492_vm0, %v9724_v10  ;;  %9745 = vpow2.f32 %v5158_v42  ;;  %vm648_vm5 = vcmp.gt.f32.partialorder %v12108_v52, 20.0  ;;  %vm649_vm6 = vcmp.gt.f32.partialorder %v12130_v43, 20.0 }
 0x1be   : > { %v9728_v38 = vpop.eup %9727  ;;  %6057 = vst.msk [vmem:[#allocation3 + $0x350] sm:$0xff] %vm492_vm0, %v9726_v1  ;;  %9747 = vpow2.f32 %v5160_v30  ;;  %v4534_v41 = vmul.f32 %v12150_v47, %v3377_v21  ;;  %v4535_v53 = vmul.f32 %v12153_v63, %v3377_v21  ;;  %v3381_v17 = vrot.slane %v1971_v12, %v11594_v58  ;;  %v521_v30 = vld [vmem:[%s11502_s19 + $0x50] sm:$0xf] }
 0x1bf   : > { %v9730_v40 = vpop.eup %9729  ;;  %6058 = vst.msk [vmem:[#allocation3 + $0x358] sm:$0xff] %vm492_vm0, %v9728_v38  ;;  %9749 = vpow2.f32 %v5162_v18  ;;  %v3385_v5 = vrot.slane %v1972_v26, %v11594_v58  ;;  %v1973_v62 = vcombine.high %v1971_v12, %v1971_v12  ;;  %v1033_v26 = vmul.f32 -0.5, %v12193_v6 }
 0x1c0   : > { %v9732_v23 = vpop.eup %9731  ;;  %6059 = vst.msk [vmem:[#allocation3 + $0x360] sm:$0xff] %vm492_vm0, %v9730_v40  ;;  %9751 = vpow2.f32 %v5164_v31  ;;  %v5166_v57 = vmul.f32 1.442695, %v4534_v41  ;;  %v5168_v19 = vmul.f32 1.442695, %v4535_v53  ;;  %v4536_v13 = vmul.f32 %v12161_v35, %v3381_v17 }
 0x1c1   : > { %v9734_v54 = vpop.eup %9733  ;;  %6060 = vst.msk [vmem:[#allocation3 + $0x368] sm:$0xff] %vm492_vm0, %v9732_v23  ;;  %v4537_v56 = vmul.f32 %v12164_v50, %v3381_v17  ;;  %v4538_v24 = vmul.f32 %v12169_v20, %v3385_v5  ;;  %v4539_v32 = vmul.f32 %v12172_v55, %v3385_v5  ;;  %v3389_v42 = vrot.slane %v1973_v62, %v11594_v58  ;;  %v522_v62 = vld [vmem:[%s11502_s19 + $0x54] sm:$0xf] }
 0x1c2   : > { %v9736_v28 = vpop.eup %9735  ;;  %6061 = vst.msk [vmem:[#allocation3 + $0x370] sm:$0xff] %vm492_vm0, %v9734_v54  ;;  %9753 = vpow2.f32 %v5166_v57  ;;  %v5170_v8 = vmul.f32 1.442695, %v4536_v13  ;;  %v12393_v1 = vadd.f32 %v12053_v2, %v521_v30  ;;  %v1030_v17 = vadd.f32 1.0, %v12193_v6  ;;  %v524_v13 = vld [vmem:[%s11502_s19 + $0x5c] sm:$0xf] }
 0x1c3   : > { %v9738_v22 = vpop.eup %9737  ;;  %6062 = vst.msk [vmem:[#allocation3 + $0x378] sm:$0xff] %vm492_vm0, %v9736_v28  ;;  %9755 = vpow2.f32 %v5168_v19  ;;  %v5172_v51 = vmul.f32 1.442695, %v4537_v56  ;;  %v5174_v33 = vmul.f32 1.442695, %v4538_v24  ;;  %v4540_v10 = vmul.f32 %v12179_v14, %v3389_v42 }
 0x1c4   : > { %v5176_v18 = vmul.f32 1.442695, %v4539_v32  ;;  %v9740_v31 = vpop.eup %9739  ;;  %6063 = vst.msk [vmem:[#allocation3 + $0x380] sm:$0xff] %vm492_vm0, %v9738_v22  ;;  %9757 = vpow2.f32 %v5170_v8  ;;  %v4541_v21 = vmul.f32 %v12184_v37, %v3389_v42  ;;  %v1039_v5 = vadd.f32 1.0, %v12197_v15  ;;  %v523_v19 = vld [vmem:[%s11502_s19 + $0x58] sm:$0xf] }
 0x1c5   : > { %v9742_v12 = vpop.eup %9741  ;;  %6064 = vst.msk [vmem:[#allocation3 + $0x388] sm:$0xff] %vm492_vm0, %v9740_v31  ;;  %9759 = vpow2.f32 %v5172_v51  ;;  %v5178_v41 = vmul.f32 1.442695, %v4540_v10  ;;  %v1048_v57 = vadd.f32 1.0, %v12210_v49  ;;  %v1034_v56 = vadd.f32 1.0, %v1033_v26 }
 0x1c6   : > { %v9744_v38 = vpop.eup %9743  ;;  %6065 = vst.msk [vmem:[#allocation3 + $0x390] sm:$0xff] %vm492_vm0, %v9742_v12  ;;  %9761 = vpow2.f32 %v5174_v33  ;;  %v5180_v53 = vmul.f32 1.442695, %v4541_v21  ;;  %v1057_v24 = vadd.f32 1.0, %v12224_v3  ;;  %v714_v32 = vmin.f32 %v12393_v1, 20.0 }
 0x1c7   : > { %v9746_v40 = vpop.eup %9745  ;;  %6066 = vst.msk [vmem:[#allocation3 + $0x398] sm:$0xff] %vm492_vm0, %v9744_v38  ;;  %9763 = vpow2.f32 %v5176_v18  ;;  %v12409_v28 = vadd.f32 %v12053_v2, %v522_v62  ;;  %v525_v8 = vld [vmem:[%s11502_s19 + $0x60] sm:$0xf]  ;;  %v12414_v22 = vadd.f32 %v12053_v2, %v523_v19  ;;  %v12417_v51 = vadd.f32 %v12053_v2, %v524_v13  ;;  %v526_v33 = vld [vmem:[%s11502_s19 + $0x64] sm:$0xf] }
 0x1c8   : > { %v9748_v23 = vpop.eup %9747  ;;  %6067 = vst.msk [vmem:[#allocation3 + $0x3a0] sm:$0xff] %vm492_vm0, %v9746_v40  ;;  %9765 = vpow2.f32 %v5178_v41  ;;  %v798_v30 = vmul.f32 1.442695, %v714_v32  ;;  %v527_v18 = vld [vmem:[%s11502_s19 + $0x68] sm:$0xf]  ;;  %v1042_v21 = vmul.f32 -0.5, %v12197_v15  ;;  %v12428_v41 = vmul.f32 %v12193_v6, %v1034_v56 }
 0x1c9   : > { %v9750_v54 = vpop.eup %9749  ;;  %6068 = vst.msk [vmem:[#allocation3 + $0x3a8] sm:$0xff] %vm492_vm0, %v9748_v23  ;;  %9767 = vpow2.f32 %v5180_v53  ;;  %v1036_v10 = vand.u32 2147483647, %v12193_v6  ;;  %v715_v12 = vmin.f32 %v12409_v28, 20.0  ;;  %v528_v26 = vld [vmem:[%s11502_s19 + $0x6c] sm:$0xf] }
 0x1ca   : > { %v9752_v42 = vpop.eup %9751  ;;  %6069 = vst.msk [vmem:[#allocation3 + $0x3b0] sm:$0xff] %vm492_vm0, %v9750_v54  ;;  %9769 = vlog2.f32 %v1030_v17  ;;  %v1051_v2 = vmul.f32 -0.5, %v12210_v49  ;;  %v716_v53 = vmin.f32 %v12414_v22, 20.0  ;;  %v1060_v40 = vmul.f32 -0.5, %v12224_v3  ;;  %v10730_v62 = vld [vmem:[#allocation16] sm:$0xf] }
 0x1cb   : > { %6070 = vst.msk [vmem:[#allocation3 + $0x3b8] sm:$0xff] %vm492_vm0, %v9752_v42  ;;  %9771 = vlog2.f32 %v1039_v5  ;;  %v717_v5 = vmin.f32 %v12417_v51, 20.0  ;;  %v12436_v23 = vadd.f32 %v10730_v62, %v525_v8  ;;  %v12440_v19 = vadd.f32 %v10730_v62, %v526_v33 }
 0x1cc   : > { %v9754_v31 = vpop.eup %9753  ;;  %9773 = vlog2.f32 %v1048_v57  ;;  %v800_v57 = vmul.f32 1.442695, %v715_v12  ;;  %v12442_v13 = vadd.f32 %v10730_v62, %v527_v18  ;;  %v12444_v54 = vadd.f32 %v10730_v62, %v528_v26 }
 0x1cd   : > { %v9756_v38 = vpop.eup %9755  ;;  %6071 = vst.msk [vmem:[#allocation3 + $0x3c0] sm:$0xff] %vm492_vm0, %v9754_v31  ;;  %9775 = vlog2.f32 %v1057_v24  ;;  %v1043_v24 = vadd.f32 1.0, %v1042_v21  ;;  %v1045_v32 = vand.u32 2147483647, %v12197_v15  ;;  %v802_v42 = vmul.f32 1.442695, %v716_v53 }
 0x1ce   : > { %v9758_v17 = vpop.eup %9757  ;;  %6072 = vst.msk [vmem:[#allocation3 + $0x3c8] sm:$0xff] %vm492_vm0, %v9756_v38  ;;  %9777 = vpow2.f32 %v798_v30  ;;  %v718_v8 = vmin.f32 %v12436_v23, 20.0  ;;  %v1052_v33 = vadd.f32 1.0, %v1051_v2  ;;  %v1054_v18 = vand.u32 2147483647, %v12210_v49 }
 0x1cf   : > { %v9760_v6 = vpop.eup %9759  ;;  %6073 = vst.msk [vmem:[#allocation3 + $0x3d0] sm:$0xff] %vm492_vm0, %v9758_v17  ;;  %v804_v31 = vmul.f32 1.442695, %v717_v5  ;;  %v719_v12 = vmin.f32 %v12440_v19, 20.0  ;;  %vm12454_vm7 = vcmp.lt.f32.partialorder %v1036_v10, 0.0004427343  ;;  %9779 = vpow2.f32 %v800_v57 }
 0x1d0   : > { %v9762_v56 = vpop.eup %9761  ;;  %6074 = vst.msk [vmem:[#allocation3 + $0x3d8] sm:$0xff] %vm492_vm0, %v9760_v6  ;;  %v1061_v38 = vadd.f32 1.0, %v1060_v40  ;;  %v806_v53 = vmul.f32 1.442695, %v718_v8  ;;  %v720_v17 = vmin.f32 %v12442_v13, 20.0  ;;  %v721_v6 = vmin.f32 %v12444_v54, 20.0 }
 0x1d1   : > { %v9764_v30 = vpop.eup %9763  ;;  %6075 = vst.msk [vmem:[#allocation3 + $0x3e0] sm:$0xff] %vm492_vm0, %v9762_v56  ;;  %v1063_v2 = vand.u32 2147483647, %v12224_v3  ;;  %v808_v5 = vmul.f32 1.442695, %v719_v12  ;;  %v1044_v10 = vmul.f32 %v12197_v15, %v1043_v24  ;;  %9781 = vpow2.f32 %v802_v42 }
 0x1d2   : > { %v9766_v26 = vpop.eup %9765  ;;  %6076 = vst.msk [vmem:[#allocation3 + $0x3e8] sm:$0xff] %vm492_vm0, %v9764_v30  ;;  %vm12464_vm8 = vcmp.lt.f32.partialorder %v1045_v32, 0.0004427343  ;;  %v810_v40 = vmul.f32 1.442695, %v720_v17  ;;  %9783 = vpow2.f32 %v804_v31  ;;  %vm650_vm11 = vcmp.gt.f32.partialorder %v12393_v1, 20.0 }
 0x1d3   : > { %v9768_v62 = vpop.eup %9767  ;;  %6077 = vst.msk [vmem:[#allocation3 + $0x3f0] sm:$0xff] %vm492_vm0, %v9766_v26  ;;  %v1053_v26 = vmul.f32 %v12210_v49, %v1052_v33  ;;  %vm12469_vm9 = vcmp.lt.f32.partialorder %v1054_v18, 0.0004427343  ;;  %9785 = vpow2.f32 %v806_v53  ;;  %v812_v15 = vmul.f32 1.442695, %v721_v6 }
 0x1d4   : > { %v9770_v56 = vpop.eup %9769  ;;  %6078 = vst.msk [vmem:[#allocation3 + $0x3f8] sm:$0xff] %vm492_vm0, %v9768_v62  ;;  %v1062_v62 = vmul.f32 %v12224_v3, %v1061_v38  ;;  %vm12477_vm10 = vcmp.lt.f32.partialorder %v1063_v2, 0.0004427343  ;;  %9787 = vpow2.f32 %v808_v5  ;;  %vm651_vm14 = vcmp.gt.f32.partialorder %v12409_v28, 20.0 }
 0x1d5   : > { %v9772_v8 = vpop.eup %9771  ;;  %v1032_v48 = vmul.f32 0.6931472, %v9770_v56  ;;  %9789 = vpow2.f32 %v810_v40  ;;  %vm652_vm1 = vcmp.gt.f32.partialorder %v12414_v22, 20.0 }
 0x1d6   : > { %v9774_v12 = vpop.eup %9773  ;;  %v1041_v39 = vmul.f32 0.6931472, %v9772_v8  ;;  %9791 = vpow2.f32 %v812_v15 }
 0x1d7   : > { %v9776_v24 = vpop.eup %9775  ;;  %v1038_v32 = vsel %vm12454_vm7, %v12428_v41, %v1032_v48  ;;  %v1050_v42 = vmul.f32 0.6931472, %v9774_v12  ;;  %vm655_vm7 = vcmp.gt.f32.partialorder %v12440_v19, 20.0 }
 0x1d8   : > { %v12481_v49 = vpop.eup %9777  ;;  %v12486_v33 = vsel %vm646_vm3, %v12100_v16, %v1038_v32  ;;  %v1047_v3 = vsel %vm12464_vm8, %v1044_v10, %v1041_v39  ;;  %v1059_v18 = vmul.f32 0.6931472, %v9776_v24  ;;  %vm653_vm3 = vcmp.gt.f32.partialorder %v12417_v51, 20.0 }
 0x1d9   : > { %16060 = vst [vmem:[#allocation45_spill] sm:$0xff] %v12486_v33  ;;  %v1980_v48 = vrot.slane %v12486_v33, %v11597_v60  ;;  %v12495_v41 = vsel %vm647_vm4, %v12103_v45, %v1047_v3  ;;  %v1056_v31 = vsel %vm12469_vm9, %v1053_v26, %v1050_v42  ;;  %v1066_v21 = vadd.f32 1.0, %v12481_v49  ;;  %v12527_v30 = vpop.eup %9779 }
 0x1da   : > { %16061 = vst [vmem:[#allocation46_spill] sm:$0xff] %v12495_v41  ;;  %v2004_v16 = vrot.slane %v12495_v41, %v11597_v60  ;;  %v12505_v39 = vsel %vm648_vm5, %v12108_v52, %v1056_v31  ;;  %v1065_v38 = vsel %vm12477_vm10, %v1062_v62, %v1059_v18  ;;  %v12516_v5 = vmul.f32 -0.5, %v12481_v49 }
 0x1db   : > { %16062 = vst [vmem:[#allocation47_spill] sm:$0xff] %v12505_v39  ;;  %v1988_v45 = vrot.slane %v1980_v48, %v11597_v60  ;;  %v1981_v53 = vcombine.high %v1980_v48, %v1980_v48  ;;  %v12513_v2 = vsel %vm649_vm6, %v12130_v43, %v1065_v38  ;;  %v12521_v52 = vrot.slane %v12505_v39, %v11597_v60  ;;  %v12531_v26 = vpop.eup %9781 }
 0x1dc   : > { %16063 = vst [vmem:[#allocation48_spill] sm:$0xff] %v12513_v2  ;;  %v2012_v6 = vrot.slane %v2004_v16, %v11597_v60  ;;  %v2005_v56 = vcombine.high %v2004_v16, %v2004_v16  ;;  %v12525_v10 = vrot.slane %v12513_v2, %v11597_v60  ;;  %9793 = vlog2.f32 %v1066_v21  ;;  %v12539_v24 = vpop.eup %9783 }
 0x1dd   : > { %v3393_v40 = vrot.slane %v1988_v45, %v11594_v58  ;;  %v1995_v43 = vrot.slane %v1981_v53, %v11597_v60  ;;  %v1996_v8 = vcombine.high %v1988_v45, %v1988_v45  ;;  %v12537_v15 = vrot.slane %v12521_v52, %v11597_v60  ;;  %v12545_v18 = vpop.eup %9785 }
 0x1de   : > { %v3409_v57 = vrot.slane %v2012_v6, %v11594_v58  ;;  %v2019_v12 = vrot.slane %v2005_v56, %v11597_v60  ;;  %v2020_v62 = vcombine.high %v2012_v6, %v2012_v6  ;;  %v2029_v16 = vcombine.high %v12521_v52, %v12521_v52  ;;  %v12551_v38 = vpop.eup %9787 }
 0x1df   : > { %v4542_v32 = vmul.f32 %v12150_v47, %v3393_v40  ;;  %v4543_v42 = vmul.f32 %v12153_v63, %v3393_v40  ;;  %v3397_v17 = vrot.slane %v1995_v43, %v11594_v58  ;;  %v3401_v3 = vrot.slane %v1996_v8, %v11594_v58  ;;  %v12555_v40 = vpop.eup %9789 }
 0x1e0   : > { %v1997_v48 = vcombine.high %v1995_v43, %v1995_v43  ;;  %v4550_v31 = vmul.f32 %v12150_v47, %v3409_v57  ;;  %v3413_v21 = vrot.slane %v2019_v12, %v11594_v58  ;;  %v4551_v2 = vmul.f32 %v12153_v63, %v3409_v57 }
 0x1e1   : > { %v5182_v45 = vmul.f32 1.442695, %v4542_v32  ;;  %v5184_v53 = vmul.f32 1.442695, %v4543_v42  ;;  %v4544_v6 = vmul.f32 %v12161_v35, %v3397_v17  ;;  %v4545_v56 = vmul.f32 %v12164_v50, %v3397_v17  ;;  %v12561_v32 = vpop.eup %9791 }
 0x1e2   : > { %v4546_v8 = vmul.f32 %v12169_v20, %v3401_v3  ;;  %v4547_v43 = vmul.f32 %v12172_v55, %v3401_v3  ;;  %v3405_v47 = vrot.slane %v1997_v48, %v11594_v58  ;;  %v5198_v41 = vmul.f32 1.442695, %v4550_v31 }
 0x1e3   : > { %9795 = vpow2.f32 %v5182_v45  ;;  %v5186_v52 = vmul.f32 1.442695, %v4544_v6  ;;  %v5188_v39 = vmul.f32 1.442695, %v4545_v56  ;;  %v4552_v3 = vmul.f32 %v12161_v35, %v3413_v21 }
 0x1e4   : > { %9797 = vpow2.f32 %v5184_v53  ;;  %v5190_v42 = vmul.f32 1.442695, %v4546_v8  ;;  %v5192_v33 = vmul.f32 1.442695, %v4547_v43  ;;  %v4548_v17 = vmul.f32 %v12179_v14, %v3405_v47 }
 0x1e5   : > { %9799 = vpow2.f32 %v5186_v52  ;;  %v4549_v36 = vmul.f32 %v12184_v37, %v3405_v47  ;;  %v4553_v48 = vmul.f32 %v12164_v50, %v3413_v21  ;;  %v3417_v57 = vrot.slane %v2020_v62, %v11594_v58  ;;  %v12583_v47 = vld [vmem:[#allocation13 + $0x8] sm:$0xff] }
 0x1e6   : > { %9801 = vpow2.f32 %v5188_v39  ;;  %v5194_v63 = vmul.f32 1.442695, %v4548_v17  ;;  %v2021_v45 = vcombine.high %v2019_v12, %v2019_v12  ;;  %v12568_v31 = vpop.eup %9793  ;;  %v5200_v6 = vmul.f32 1.442695, %v4551_v2  ;;  %v12580_v2 = vld [vmem:[#allocation13] sm:$0xff] }
 0x1e7   : > { %9803 = vpow2.f32 %v5190_v42  ;;  %v5196_v53 = vmul.f32 1.442695, %v4549_v36  ;;  %v5202_v56 = vmul.f32 1.442695, %v4552_v3  ;;  %v4554_v8 = vmul.f32 %v12169_v20, %v3417_v57 }
 0x1e8   : > { %9805 = vpow2.f32 %v5192_v33  ;;  %v4555_v43 = vmul.f32 %v12172_v55, %v3417_v57  ;;  %v3421_v35 = vrot.slane %v2021_v45, %v11594_v58  ;;  %v5204_v50 = vmul.f32 1.442695, %v4553_v48  ;;  %v12595_v45 = vld [vmem:[#allocation13 + $0x20] sm:$0xff] }
 0x1e9   : > { %9807 = vpow2.f32 %v5194_v63  ;;  %v3425_v39 = vrot.slane %v12537_v15, %v11594_v58  ;;  %v2044_v12 = vcombine.high %v12537_v15, %v12537_v15  ;;  %v5206_v62 = vmul.f32 1.442695, %v4554_v8  ;;  %v12592_v63 = vld [vmem:[#allocation13 + $0x18] sm:$0xff] }
 0x1ea   : > { %9809 = vpow2.f32 %v5196_v53  ;;  %v4556_v36 = vmul.f32 %v12179_v14, %v3421_v35  ;;  %v2043_v33 = vrot.slane %v2029_v16, %v11597_v60  ;;  %v5208_v20 = vmul.f32 1.442695, %v4555_v43 }
 0x1eb   : > { %9811 = vpow2.f32 %v5198_v41  ;;  %v4557_v55 = vmul.f32 %v12184_v37, %v3421_v35  ;;  %v4558_v21 = vmul.f32 %v12580_v2, %v3425_v39  ;;  %v4559_v52 = vmul.f32 %v12583_v47, %v3425_v39  ;;  %v12589_v37 = vld [vmem:[#allocation13 + $0x10] sm:$0xff] }
 0x1ec   : > { %9813 = vpow2.f32 %v5200_v6  ;;  %v3429_v15 = vrot.slane %v2043_v33, %v11594_v58  ;;  %v3433_v42 = vrot.slane %v2044_v12, %v11594_v58  ;;  %v5210_v16 = vmul.f32 1.442695, %v4556_v36 }
 0x1ed   : > { %v9796_v14 = vpop.eup %9795  ;;  %9815 = vpow2.f32 %v5202_v56  ;;  %v5212_v41 = vmul.f32 1.442695, %v4557_v55  ;;  %v5214_v17 = vmul.f32 1.442695, %v4558_v21  ;;  %v12599_v56 = vld [vmem:[#allocation13 + $0x28] sm:$0xff]  ;;  %v2045_v43 = vcombine.high %v2043_v33, %v2043_v33 }
 0x1ee   : > { %v9798_v3 = vpop.eup %9797  ;;  %6079 = vst.msk [vmem:[#allocation3 + $0x400] sm:$0xff] %vm492_vm0, %v9796_v14  ;;  %9817 = vpow2.f32 %v5204_v50  ;;  %v4560_v48 = vmul.f32 %v12589_v37, %v3429_v15  ;;  %v4561_v57 = vmul.f32 %v12592_v63, %v3429_v15  ;;  %v4562_v53 = vmul.f32 %v12595_v45, %v3433_v42 }
 0x1ef   : > { %v9800_v6 = vpop.eup %9799  ;;  %6080 = vst.msk [vmem:[#allocation3 + $0x408] sm:$0xff] %vm492_vm0, %v9798_v3  ;;  %9819 = vpow2.f32 %v5206_v62  ;;  %v4563_v8 = vmul.f32 %v12599_v56, %v3433_v42  ;;  %v2060_v35 = vrot.slane %v12525_v10, %v11597_v60  ;;  %v5216_v39 = vmul.f32 1.442695, %v4559_v52  ;;  %v12612_v3 = vld [vmem:[#allocation13 + $0x30] sm:$0xff] }
 0x1f0   : > { %v9802_v50 = vpop.eup %9801  ;;  %6081 = vst.msk [vmem:[#allocation3 + $0x410] sm:$0xff] %vm492_vm0, %v9800_v6  ;;  %9821 = vpow2.f32 %v5208_v20  ;;  %v5218_v12 = vmul.f32 1.442695, %v4560_v48  ;;  %v5220_v36 = vmul.f32 1.442695, %v4561_v57  ;;  %v3437_v21 = vrot.slane %v2045_v43, %v11594_v58  ;;  %v12615_v48 = vld [vmem:[#allocation13 + $0x38] sm:$0xff] }
 0x1f1   : > { %v9804_v55 = vpop.eup %9803  ;;  %6082 = vst.msk [vmem:[#allocation3 + $0x418] sm:$0xff] %vm492_vm0, %v9802_v50  ;;  %9823 = vpow2.f32 %v5210_v16  ;;  %v5222_v62 = vmul.f32 1.442695, %v4562_v53  ;;  %v3441_v15 = vrot.slane %v2060_v35, %v11594_v58  ;;  %v5224_v42 = vmul.f32 1.442695, %v4563_v8 }
 0x1f2   : > { %v9806_v33 = vpop.eup %9805  ;;  %6083 = vst.msk [vmem:[#allocation3 + $0x420] sm:$0xff] %vm492_vm0, %v9804_v55  ;;  %9825 = vpow2.f32 %v5212_v41  ;;  %v2053_v20 = vcombine.high %v12525_v10, %v12525_v10  ;;  %v2068_v52 = vcombine.high %v2060_v35, %v2060_v35  ;;  %v4564_v16 = vmul.f32 %v12612_v3, %v3437_v21 }
 0x1f3   : > { %v9808_v14 = vpop.eup %9807  ;;  %6084 = vst.msk [vmem:[#allocation3 + $0x428] sm:$0xff] %vm492_vm0, %v9806_v33  ;;  %9827 = vpow2.f32 %v5214_v17  ;;  %v4565_v57 = vmul.f32 %v12615_v48, %v3437_v21  ;;  %v4566_v53 = vmul.f32 %v12580_v2, %v3441_v15  ;;  %v4567_v10 = vmul.f32 %v12583_v47, %v3441_v15 }
 0x1f4   : > { %v9810_v41 = vpop.eup %9809  ;;  %6085 = vst.msk [vmem:[#allocation3 + $0x430] sm:$0xff] %vm492_vm0, %v9808_v14  ;;  %9829 = vpow2.f32 %v5216_v39  ;;  %v2067_v6 = vrot.slane %v2053_v20, %v11597_v60  ;;  %v3449_v17 = vrot.slane %v2068_v52, %v11594_v58  ;;  %v5226_v43 = vmul.f32 1.442695, %v4564_v16 }
 0x1f5   : > { %v9812_v8 = vpop.eup %9811  ;;  %6086 = vst.msk [vmem:[#allocation3 + $0x438] sm:$0xff] %vm492_vm0, %v9810_v41  ;;  %9831 = vpow2.f32 %v5218_v12  ;;  %v5228_v35 = vmul.f32 1.442695, %v4565_v57  ;;  %v5230_v55 = vmul.f32 1.442695, %v4566_v53  ;;  %v1070_v12 = vadd.f32 1.0, %v12516_v5 }
 0x1f6   : > { %v9814_v50 = vpop.eup %9813  ;;  %6087 = vst.msk [vmem:[#allocation3 + $0x440] sm:$0xff] %vm492_vm0, %v9812_v8  ;;  %9833 = vpow2.f32 %v5220_v36  ;;  %v5232_v39 = vmul.f32 1.442695, %v4567_v10  ;;  %v3445_v21 = vrot.slane %v2067_v6, %v11594_v58  ;;  %v4570_v33 = vmul.f32 %v12595_v45, %v3449_v17 }
 0x1f7   : > { %v9816_v15 = vpop.eup %9815  ;;  %6088 = vst.msk [vmem:[#allocation3 + $0x448] sm:$0xff] %vm492_vm0, %v9814_v50  ;;  %9835 = vpow2.f32 %v5222_v62  ;;  %v2069_v20 = vcombine.high %v2067_v6, %v2067_v6  ;;  %v4571_v16 = vmul.f32 %v12599_v56, %v3449_v17  ;;  %v1068_v53 = vmul.f32 0.6931472, %v12568_v31 }
 0x1f8   : > { %v9818_v52 = vpop.eup %9817  ;;  %6089 = vst.msk [vmem:[#allocation3 + $0x450] sm:$0xff] %vm492_vm0, %v9816_v15  ;;  %9837 = vpow2.f32 %v5224_v42  ;;  %v4568_v14 = vmul.f32 %v12589_v37, %v3445_v21  ;;  %v4569_v36 = vmul.f32 %v12592_v63, %v3445_v21  ;;  %v1071_v5 = vmul.f32 %v12481_v49, %v1070_v12 }
 0x1f9   : > { %v9820_v57 = vpop.eup %9819  ;;  %6090 = vst.msk [vmem:[#allocation3 + $0x458] sm:$0xff] %vm492_vm0, %v9818_v52  ;;  %9839 = vpow2.f32 %v5226_v43  ;;  %v3453_v62 = vrot.slane %v2069_v20, %v11594_v58  ;;  %v1072_v6 = vand.u32 2147483647, %v12481_v49  ;;  %v5238_v17 = vmul.f32 1.442695, %v4570_v33 }
 0x1fa   : > { %v9822_v41 = vpop.eup %9821  ;;  %6091 = vst.msk [vmem:[#allocation3 + $0x460] sm:$0xff] %vm492_vm0, %v9820_v57  ;;  %9841 = vpow2.f32 %v5228_v35  ;;  %v5234_v42 = vmul.f32 1.442695, %v4568_v14  ;;  %v5236_v10 = vmul.f32 1.442695, %v4569_v36  ;;  %v1078_v35 = vmul.f32 -0.5, %v12527_v30 }
 0x1fb   : > { %v9824_v8 = vpop.eup %9823  ;;  %6092 = vst.msk [vmem:[#allocation3 + $0x468] sm:$0xff] %vm492_vm0, %v9822_v41  ;;  %9843 = vpow2.f32 %v5230_v55  ;;  %v4572_v43 = vmul.f32 %v12612_v3, %v3453_v62  ;;  %v4573_v50 = vmul.f32 %v12615_v48, %v3453_v62  ;;  %v5240_v21 = vmul.f32 1.442695, %v4571_v16 }
 0x1fc   : > { %v9826_v31 = vpop.eup %9825  ;;  %6093 = vst.msk [vmem:[#allocation3 + $0x470] sm:$0xff] %vm492_vm0, %v9824_v8  ;;  %9845 = vpow2.f32 %v5232_v39  ;;  %vm1073_vm12 = vcmp.lt.f32.partialorder %v1072_v6, 0.0004427343  ;;  %v1075_v14 = vadd.f32 1.0, %v12527_v30  ;;  %v1087_v36 = vmul.f32 -0.5, %v12531_v26 }
 0x1fd   : > { %v9828_v15 = vpop.eup %9827  ;;  %6094 = vst.msk [vmem:[#allocation3 + $0x478] sm:$0xff] %vm492_vm0, %v9826_v31  ;;  %9847 = vpow2.f32 %v5234_v42  ;;  %v5242_v49 = vmul.f32 1.442695, %v4572_v43  ;;  %v1074_v20 = vsel %vm1073_vm12, %v1071_v5, %v1068_v53  ;;  %v5244_v33 = vmul.f32 1.442695, %v4573_v50 }
 0x1fe   : > { %v9830_v55 = vpop.eup %9829  ;;  %6095 = vst.msk [vmem:[#allocation3 + $0x480] sm:$0xff] %vm492_vm0, %v9828_v15  ;;  %9849 = vpow2.f32 %v5236_v10  ;;  %v12650_v12 = vsel %vm650_vm11, %v12393_v1, %v1074_v20  ;;  %v1079_v57 = vadd.f32 1.0, %v1078_v35  ;;  %v1081_v62 = vand.u32 2147483647, %v12527_v30 }
 0x1ff   : > { %16064 = vst [vmem:[#allocation49_spill] sm:$0xff] %v12650_v12  ;;  %v9832_v39 = vpop.eup %9831  ;;  %6096 = vst.msk [vmem:[#allocation3 + $0x488] sm:$0xff] %vm492_vm0, %v9830_v55  ;;  %9851 = vpow2.f32 %v5238_v17  ;;  %v2076_v52 = vrot.slane %v12650_v12, %v11597_v60  ;;  %v1084_v1 = vadd.f32 1.0, %v12531_v26  ;;  %v1088_v42 = vadd.f32 1.0, %v1087_v36 }
 0x200   : > { %v9834_v16 = vpop.eup %9833  ;;  %6097 = vst.msk [vmem:[#allocation3 + $0x490] sm:$0xff] %vm492_vm0, %v9832_v39  ;;  %9853 = vpow2.f32 %v5240_v21  ;;  %v1090_v6 = vand.u32 2147483647, %v12531_v26  ;;  %v1093_v8 = vadd.f32 1.0, %v12539_v24  ;;  %v1096_v17 = vmul.f32 -0.5, %v12539_v24 }
 0x201   : > { %v9836_v53 = vpop.eup %9835  ;;  %6098 = vst.msk [vmem:[#allocation3 + $0x498] sm:$0xff] %vm492_vm0, %v9834_v16  ;;  %9855 = vpow2.f32 %v5242_v49  ;;  %v2084_v5 = vrot.slane %v2076_v52, %v11597_v60  ;;  %v2077_v41 = vcombine.high %v2076_v52, %v2076_v52  ;;  %v12671_v15 = vmul.f32 %v12527_v30, %v1079_v57 }
 0x202   : > { %v9838_v10 = vpop.eup %9837  ;;  %6099 = vst.msk [vmem:[#allocation3 + $0x4a0] sm:$0xff] %vm492_vm0, %v9836_v53  ;;  %9857 = vpow2.f32 %v5244_v33  ;;  %v12674_v49 = vmul.f32 %v12531_v26, %v1088_v42  ;;  %v1099_v20 = vand.u32 2147483647, %v12539_v24  ;;  %vm12682_vm13 = vcmp.lt.f32.partialorder %v1081_v62, 0.0004427343 }
 0x203   : > { %v9840_v43 = vpop.eup %9839  ;;  %6100 = vst.msk [vmem:[#allocation3 + $0x4a8] sm:$0xff] %vm492_vm0, %v9838_v10  ;;  %v3457_v50 = vrot.slane %v2084_v5, %v11594_v58  ;;  %v2091_v31 = vrot.slane %v2077_v41, %v11597_v60  ;;  %v2092_v21 = vcombine.high %v2084_v5, %v2084_v5  ;;  %9859 = vlog2.f32 %v1075_v14 }
 0x204   : > { %v9842_v35 = vpop.eup %9841  ;;  %6101 = vst.msk [vmem:[#allocation3 + $0x4b0] sm:$0xff] %vm492_vm0, %v9840_v43  ;;  %9861 = vlog2.f32 %v1084_v1  ;;  %vm12688_vm15 = vcmp.lt.f32.partialorder %v1090_v6, 0.0004427343  ;;  %v1097_v57 = vadd.f32 1.0, %v1096_v17  ;;  %v1102_v1 = vadd.f32 1.0, %v12545_v18 }
 0x205   : > { %v9844_v55 = vpop.eup %9843  ;;  %6102 = vst.msk [vmem:[#allocation3 + $0x4b8] sm:$0xff] %vm492_vm0, %v9842_v35  ;;  %v4574_v33 = vmul.f32 %v12580_v2, %v3457_v50  ;;  %v4575_v39 = vmul.f32 %v12583_v47, %v3457_v50  ;;  %v3461_v52 = vrot.slane %v2091_v31, %v11594_v58  ;;  %v3465_v14 = vrot.slane %v2092_v21, %v11594_v58 }
 0x206   : > { %v9846_v36 = vpop.eup %9845  ;;  %6103 = vst.msk [vmem:[#allocation3 + $0x4c0] sm:$0xff] %vm492_vm0, %v9844_v55  ;;  %v2093_v26 = vcombine.high %v2091_v31, %v2091_v31  ;;  %9863 = vlog2.f32 %v1093_v8  ;;  %vm12701_vm2 = vcmp.lt.f32.partialorder %v1099_v20, 0.0004427343  ;;  %v1105_v35 = vmul.f32 -0.5, %v12545_v18 }
 0x207   : > { %v9848_v53 = vpop.eup %9847  ;;  %6104 = vst.msk [vmem:[#allocation3 + $0x4c8] sm:$0xff] %vm492_vm0, %v9846_v36  ;;  %v5246_v62 = vmul.f32 1.442695, %v4574_v33  ;;  %v5248_v5 = vmul.f32 1.442695, %v4575_v39  ;;  %v4576_v41 = vmul.f32 %v12589_v37, %v3461_v52  ;;  %v4577_v42 = vmul.f32 %v12592_v63, %v3461_v52 }
 0x208   : > { %v9850_v10 = vpop.eup %9849  ;;  %6105 = vst.msk [vmem:[#allocation3 + $0x4d0] sm:$0xff] %vm492_vm0, %v9848_v53  ;;  %v4578_v6 = vmul.f32 %v12595_v45, %v3465_v14  ;;  %v4579_v8 = vmul.f32 %v12599_v56, %v3465_v14  ;;  %v3469_v17 = vrot.slane %v2093_v26, %v11594_v58  ;;  %9865 = vlog2.f32 %v1102_v1 }
 0x209   : > { %v9852_v50 = vpop.eup %9851  ;;  %6106 = vst.msk [vmem:[#allocation3 + $0x4d8] sm:$0xff] %vm492_vm0, %v9850_v10  ;;  %9867 = vpow2.f32 %v5246_v62  ;;  %v5250_v31 = vmul.f32 1.442695, %v4576_v41  ;;  %v5252_v21 = vmul.f32 1.442695, %v4577_v42  ;;  %vm654_vm4 = vcmp.gt.f32.partialorder %v12436_v23, 20.0 }
 0x20a   : > { %v9854_v55 = vpop.eup %9853  ;;  %6107 = vst.msk [vmem:[#allocation3 + $0x4e0] sm:$0xff] %vm492_vm0, %v9852_v50  ;;  %9869 = vpow2.f32 %v5248_v5  ;;  %v5254_v33 = vmul.f32 1.442695, %v4578_v6  ;;  %v5256_v20 = vmul.f32 1.442695, %v4579_v8  ;;  %v4580_v39 = vmul.f32 %v12612_v3, %v3469_v17 }
 0x20b   : > { %v9856_v52 = vpop.eup %9855  ;;  %6108 = vst.msk [vmem:[#allocation3 + $0x4e8] sm:$0xff] %vm492_vm0, %v9854_v55  ;;  %9871 = vpow2.f32 %v5250_v31  ;;  %v4581_v14 = vmul.f32 %v12615_v48, %v3469_v17  ;;  %v1106_v36 = vadd.f32 1.0, %v1105_v35  ;;  %v1108_v26 = vand.u32 2147483647, %v12545_v18 }
 0x20c   : > { %v9858_v1 = vpop.eup %9857  ;;  %6109 = vst.msk [vmem:[#allocation3 + $0x4f0] sm:$0xff] %vm492_vm0, %v9856_v52  ;;  %9873 = vpow2.f32 %v5252_v21  ;;  %v5258_v53 = vmul.f32 1.442695, %v4580_v39  ;;  %v1098_v62 = vmul.f32 %v12539_v24, %v1097_v57  ;;  %v1114_v5 = vmul.f32 -0.5, %v12551_v38 }
 0x20d   : > { %v9860_v41 = vpop.eup %9859  ;;  %6110 = vst.msk [vmem:[#allocation3 + $0x4f8] sm:$0xff] %vm492_vm0, %v9858_v1  ;;  %9875 = vpow2.f32 %v5254_v33  ;;  %v5260_v42 = vmul.f32 1.442695, %v4581_v14  ;;  %v1107_v10 = vmul.f32 %v12545_v18, %v1106_v36  ;;  %v1111_v6 = vadd.f32 1.0, %v12551_v38 }
 0x20e   : > { %v9862_v8 = vpop.eup %9861  ;;  %9877 = vpow2.f32 %v5256_v20  ;;  %v1077_v17 = vmul.f32 0.6931472, %v9860_v41  ;;  %vm12720_vm5 = vcmp.lt.f32.partialorder %v1108_v26, 0.0004427343  ;;  %v1115_v31 = vadd.f32 1.0, %v1114_v5 }
 0x20f   : > { %9879 = vpow2.f32 %v5258_v53  ;;  %v1086_v24 = vmul.f32 0.6931472, %v9862_v8  ;;  %v1120_v57 = vadd.f32 1.0, %v12555_v40  ;;  %v1123_v21 = vmul.f32 -0.5, %v12555_v40 }
 0x210   : > { %v9864_v35 = vpop.eup %9863  ;;  %9881 = vpow2.f32 %v5260_v42  ;;  %v1083_v18 = vsel %vm12682_vm13, %v12671_v15, %v1077_v17  ;;  %v12730_v55 = vmul.f32 %v12551_v38, %v1115_v31  ;;  %v1117_v33 = vand.u32 2147483647, %v12551_v38 }
 0x211   : > { %v12736_v20 = vsel %vm651_vm14, %v12409_v28, %v1083_v18  ;;  %v1092_v39 = vsel %vm12688_vm15, %v12674_v49, %v1086_v24  ;;  %v1095_v52 = vmul.f32 0.6931472, %v9864_v35  ;;  %9883 = vlog2.f32 %v1111_v6 }
 0x212   : > { %16073 = vst [vmem:[#allocation50_spill] sm:$0xff] %v12736_v20  ;;  %v9866_v14 = vpop.eup %9865  ;;  %v2100_v15 = vrot.slane %v12736_v20, %v11597_v60  ;;  %v12746_v30 = vsel %vm652_vm1, %v12414_v22, %v1092_v39  ;;  %9885 = vlog2.f32 %v1120_v57  ;;  %v1124_v36 = vadd.f32 1.0, %v1123_v21 }
 0x213   : > { %16074 = vst [vmem:[#allocation51_spill] sm:$0xff] %v12746_v30  ;;  %v9868_v26 = vpop.eup %9867  ;;  %v2124_v28 = vrot.slane %v12746_v30, %v11597_v60  ;;  %v1101_v49 = vsel %vm12701_vm2, %v1098_v62, %v1095_v52  ;;  %v1104_v16 = vmul.f32 0.6931472, %v9866_v14  ;;  %vm12822_vm6 = vcmp.lt.f32.partialorder %v1117_v33, 0.0004427343 }
 0x214   : > { %v9870_v53 = vpop.eup %9869  ;;  %6111 = vst.msk [vmem:[#allocation3 + $0x500] sm:$0xff] %vm492_vm0, %v9868_v26  ;;  %v2108_v5 = vrot.slane %v2100_v15, %v11597_v60  ;;  %v2101_v41 = vcombine.high %v2100_v15, %v2100_v15  ;;  %v12758_v22 = vsel %vm653_vm3, %v12417_v51, %v1101_v49  ;;  %v12761_v42 = vmul.f32 %v12555_v40, %v1124_v36 }
 0x215   : > { %16075 = vst [vmem:[#allocation52_spill] sm:$0xff] %v12758_v22  ;;  %v9872_v6 = vpop.eup %9871  ;;  %6112 = vst.msk [vmem:[#allocation3 + $0x508] sm:$0xff] %vm492_vm0, %v9870_v53  ;;  %v2132_v43 = vrot.slane %v2124_v28, %v11597_v60  ;;  %v2125_v62 = vcombine.high %v2124_v28, %v2124_v28  ;;  %v12767_v8 = vrot.slane %v12758_v22, %v11597_v60  ;;  %vm656_vm8 = vcmp.gt.f32.partialorder %v12442_v13, 20.0 }
 0x216   : > { %v1110_v17 = vsel %vm12720_vm5, %v1107_v10, %v1104_v16  ;;  %v9874_v31 = vpop.eup %9873  ;;  %6113 = vst.msk [vmem:[#allocation3 + $0x510] sm:$0xff] %vm492_vm0, %v9872_v6  ;;  %v3473_v51 = vrot.slane %v2108_v5, %v11594_v58  ;;  %v2115_v24 = vrot.slane %v2101_v41, %v11597_v60  ;;  %v2116_v57 = vcombine.high %v2108_v5, %v2108_v5 }
 0x217   : > { %v12777_v21 = vsel %vm654_vm4, %v12436_v23, %v1110_v17  ;;  %v9876_v35 = vpop.eup %9875  ;;  %6114 = vst.msk [vmem:[#allocation3 + $0x518] sm:$0xff] %vm492_vm0, %v9874_v31  ;;  %v3489_v18 = vrot.slane %v2132_v43, %v11594_v58  ;;  %v2139_v10 = vrot.slane %v2125_v62, %v11597_v60  ;;  %v2140_v50 = vcombine.high %v2132_v43, %v2132_v43 }
 0x218   : > { %16076 = vst [vmem:[#allocation53_spill] sm:$0xff] %v12777_v21  ;;  %v12784_v39 = vrot.slane %v12767_v8, %v11597_v60  ;;  %v9878_v52 = vpop.eup %9877  ;;  %6115 = vst.msk [vmem:[#allocation3 + $0x520] sm:$0xff] %vm492_vm0, %v9876_v35  ;;  %v4582_v14 = vmul.f32 %v12580_v2, %v3473_v51  ;;  %v4583_v23 = vmul.f32 %v12583_v47, %v3473_v51  ;;  %vm657_vm10 = vcmp.gt.f32.partialorder %v12444_v54, 20.0 }
 0x219   : > { %v3477_v15 = vrot.slane %v2115_v24, %v11594_v58  ;;  %v3481_v36 = vrot.slane %v2116_v57, %v11594_v58  ;;  %v9880_v26 = vpop.eup %9879  ;;  %6116 = vst.msk [vmem:[#allocation3 + $0x528] sm:$0xff] %vm492_vm0, %v9878_v52  ;;  %v2117_v28 = vcombine.high %v2115_v24, %v2115_v24  ;;  %v4590_v49 = vmul.f32 %v12580_v2, %v3489_v18 }
 0x21a   : > { %v4591_v16 = vmul.f32 %v12583_v47, %v3489_v18  ;;  %v3493_v53 = vrot.slane %v2139_v10, %v11594_v58  ;;  %v9882_v5 = vpop.eup %9881  ;;  %6117 = vst.msk [vmem:[#allocation3 + $0x530] sm:$0xff] %vm492_vm0, %v9880_v26  ;;  %v5262_v41 = vmul.f32 1.442695, %v4582_v14  ;;  %v5264_v6 = vmul.f32 1.442695, %v4583_v23 }
 0x21b   : > { %v4584_v43 = vmul.f32 %v12589_v37, %v3477_v15  ;;  %v4585_v62 = vmul.f32 %v12592_v63, %v3477_v15  ;;  %v12798_v17 = vpop.eup %9883  ;;  %6118 = vst.msk [vmem:[#allocation3 + $0x538] sm:$0xff] %vm492_vm0, %v9882_v5  ;;  %v4586_v31 = vmul.f32 %v12595_v45, %v3481_v36  ;;  %v4587_v51 = vmul.f32 %v12599_v56, %v3481_v36 }
 0x21c   : > { %v3485_v24 = vrot.slane %v2117_v28, %v11594_v58  ;;  %v5278_v57 = vmul.f32 1.442695, %v4590_v49  ;;  %v12804_v35 = vpop.eup %9885  ;;  %9887 = vpow2.f32 %v5262_v41  ;;  %v5280_v14 = vmul.f32 1.442695, %v4591_v16 }
 0x21d   : > { %v5266_v18 = vmul.f32 1.442695, %v4584_v43  ;;  %v5268_v52 = vmul.f32 1.442695, %v4585_v62  ;;  %9889 = vpow2.f32 %v5264_v6  ;;  %v5270_v23 = vmul.f32 1.442695, %v4586_v31 }
 0x21e   : > { %v5272_v15 = vmul.f32 1.442695, %v4587_v51  ;;  %v4588_v26 = vmul.f32 %v12612_v3, %v3485_v24  ;;  %v4589_v5 = vmul.f32 %v12615_v48, %v3485_v24  ;;  %v4592_v1 = vmul.f32 %v12589_v37, %v3493_v53 }
 0x21f   : > { %9891 = vpow2.f32 %v5266_v18  ;;  %v4593_v36 = vmul.f32 %v12592_v63, %v3493_v53  ;;  %v3497_v49 = vrot.slane %v2140_v50, %v11594_v58  ;;  %v2141_v41 = vcombine.high %v2139_v10, %v2139_v10 }
 0x220   : > { %9893 = vpow2.f32 %v5268_v52  ;;  %v5274_v28 = vmul.f32 1.442695, %v4588_v26  ;;  %v5276_v43 = vmul.f32 1.442695, %v4589_v5  ;;  %v5282_v16 = vmul.f32 1.442695, %v4592_v1 }
 0x221   : > { %9895 = vpow2.f32 %v5270_v23  ;;  %v5284_v6 = vmul.f32 1.442695, %v4593_v36  ;;  %v4594_v62 = vmul.f32 %v12595_v45, %v3497_v49  ;;  %v4595_v31 = vmul.f32 %v12599_v56, %v3497_v49 }
 0x222   : > { %9897 = vpow2.f32 %v5272_v15  ;;  %v3501_v51 = vrot.slane %v2141_v41, %v11594_v58  ;;  %v3505_v53 = vrot.slane %v12784_v39, %v11594_v58  ;;  %v2149_v24 = vcombine.high %v12767_v8, %v12767_v8 }
 0x223   : > { %9899 = vpow2.f32 %v5274_v28  ;;  %v2164_v10 = vcombine.high %v12784_v39, %v12784_v39  ;;  %v5286_v50 = vmul.f32 1.442695, %v4594_v62  ;;  %v5288_v18 = vmul.f32 1.442695, %v4595_v31 }
 0x224   : > { %9901 = vpow2.f32 %v5276_v43  ;;  %v4596_v52 = vmul.f32 %v12612_v3, %v3501_v51  ;;  %v4597_v23 = vmul.f32 %v12615_v48, %v3501_v51  ;;  %v4598_v15 = vmul.f32 %v12580_v2, %v3505_v53 }
 0x225   : > { %9903 = vpow2.f32 %v5278_v57  ;;  %v4599_v8 = vmul.f32 %v12583_v47, %v3505_v53  ;;  %v2163_v38 = vrot.slane %v2149_v24, %v11597_v60  ;;  %v3513_v33 = vrot.slane %v2164_v10, %v11594_v58 }
 0x226   : > { %9905 = vpow2.f32 %v5280_v14  ;;  %v5290_v39 = vmul.f32 1.442695, %v4596_v52  ;;  %v9888_v26 = vpop.eup %9887  ;;  %v5292_v5 = vmul.f32 1.442695, %v4597_v23  ;;  %v5294_v36 = vmul.f32 1.442695, %v4598_v15 }
 0x227   : > { %9907 = vpow2.f32 %v5282_v16  ;;  %v5296_v28 = vmul.f32 1.442695, %v4599_v8  ;;  %v9890_v57 = vpop.eup %9889  ;;  %6119 = vst.msk [vmem:[#allocation3 + $0x540] sm:$0xff] %vm492_vm0, %v9888_v26  ;;  %v3509_v49 = vrot.slane %v2163_v38, %v11594_v58  ;;  %v4602_v14 = vmul.f32 %v12595_v45, %v3513_v33 }
 0x228   : > { %9909 = vpow2.f32 %v5284_v6  ;;  %v4603_v41 = vmul.f32 %v12599_v56, %v3513_v33  ;;  %6120 = vst.msk [vmem:[#allocation3 + $0x548] sm:$0xff] %vm492_vm0, %v9890_v57  ;;  %v2165_v62 = vcombine.high %v2163_v38, %v2163_v38  ;;  %v2172_v16 = vrot.slane %v12777_v21, %v11597_v60 }
 0x229   : > { %v9892_v43 = vpop.eup %9891  ;;  %9911 = vpow2.f32 %v5286_v50  ;;  %v1113_v31 = vmul.f32 0.6931472, %v12798_v17  ;;  %v4600_v6 = vmul.f32 %v12589_v37, %v3509_v49  ;;  %v4601_v53 = vmul.f32 %v12592_v63, %v3509_v49 }
 0x22a   : > { %v9894_v51 = vpop.eup %9893  ;;  %6121 = vst.msk [vmem:[#allocation3 + $0x550] sm:$0xff] %vm492_vm0, %v9892_v43  ;;  %9913 = vpow2.f32 %v5288_v18  ;;  %v5302_v24 = vmul.f32 1.442695, %v4602_v14  ;;  %v5304_v50 = vmul.f32 1.442695, %v4603_v41  ;;  %v3517_v52 = vrot.slane %v2165_v62, %v11594_v58 }
 0x22b   : > { %v9896_v10 = vpop.eup %9895  ;;  %6122 = vst.msk [vmem:[#allocation3 + $0x558] sm:$0xff] %vm492_vm0, %v9894_v51  ;;  %9915 = vpow2.f32 %v5290_v39  ;;  %v2180_v23 = vrot.slane %v2172_v16, %v11597_v60  ;;  %v5298_v17 = vmul.f32 1.442695, %v4600_v6  ;;  %v5300_v18 = vmul.f32 1.442695, %v4601_v53 }
 0x22c   : > { %v9898_v15 = vpop.eup %9897  ;;  %6123 = vst.msk [vmem:[#allocation3 + $0x560] sm:$0xff] %vm492_vm0, %v9896_v10  ;;  %9917 = vpow2.f32 %v5292_v5  ;;  %v2173_v8 = vcombine.high %v2172_v16, %v2172_v16  ;;  %v4604_v33 = vmul.f32 %v12612_v3, %v3517_v52  ;;  %v4605_v39 = vmul.f32 %v12615_v48, %v3517_v52 }
 0x22d   : > { %v9900_v38 = vpop.eup %9899  ;;  %6124 = vst.msk [vmem:[#allocation3 + $0x568] sm:$0xff] %vm492_vm0, %v9898_v15  ;;  %9919 = vpow2.f32 %v5294_v36  ;;  %v3521_v26 = vrot.slane %v2180_v23, %v11594_v58  ;;  %v2188_v5 = vcombine.high %v2180_v23, %v2180_v23  ;;  %v1119_v14 = vsel %vm12822_vm6, %v12730_v55, %v1113_v31 }
 0x22e   : > { %v9902_v57 = vpop.eup %9901  ;;  %6125 = vst.msk [vmem:[#allocation3 + $0x570] sm:$0xff] %vm492_vm0, %v9900_v38  ;;  %9921 = vpow2.f32 %v5296_v28  ;;  %v2187_v49 = vrot.slane %v2173_v8, %v11597_v60  ;;  %v5306_v36 = vmul.f32 1.442695, %v4604_v33  ;;  %v5308_v43 = vmul.f32 1.442695, %v4605_v39 }
 0x22f   : > { %v9904_v41 = vpop.eup %9903  ;;  %6126 = vst.msk [vmem:[#allocation3 + $0x578] sm:$0xff] %vm492_vm0, %v9902_v57  ;;  %9923 = vpow2.f32 %v5298_v17  ;;  %v4606_v62 = vmul.f32 %v12580_v2, %v3521_v26  ;;  %v4607_v28 = vmul.f32 %v12583_v47, %v3521_v26  ;;  %v3529_v6 = vrot.slane %v2188_v5, %v11594_v58 }
 0x230   : > { %v9906_v16 = vpop.eup %9905  ;;  %6127 = vst.msk [vmem:[#allocation3 + $0x580] sm:$0xff] %vm492_vm0, %v9904_v41  ;;  %9925 = vpow2.f32 %v5300_v18  ;;  %v3525_v51 = vrot.slane %v2187_v49, %v11594_v58  ;;  %v2189_v31 = vcombine.high %v2187_v49, %v2187_v49  ;;  %v12868_v53 = vsel %vm655_vm7, %v12440_v19, %v1119_v14 }
 0x231   : > { %v9908_v55 = vpop.eup %9907  ;;  %6128 = vst.msk [vmem:[#allocation3 + $0x588] sm:$0xff] %vm492_vm0, %v9906_v16  ;;  %9927 = vpow2.f32 %v5302_v24  ;;  %v5310_v1 = vmul.f32 1.442695, %v4606_v62  ;;  %16079 = vst [vmem:[#allocation54_spill] sm:$0xff] %v12868_v53  ;;  %v5312_v52 = vmul.f32 1.442695, %v4607_v28  ;;  %v4610_v24 = vmul.f32 %v12595_v45, %v3529_v6 }
 0x232   : > { %v9910_v10 = vpop.eup %9909  ;;  %6129 = vst.msk [vmem:[#allocation3 + $0x590] sm:$0xff] %vm492_vm0, %v9908_v55  ;;  %9929 = vpow2.f32 %v5304_v50  ;;  %v4608_v23 = vmul.f32 %v12589_v37, %v3525_v51  ;;  %v4609_v15 = vmul.f32 %v12592_v63, %v3525_v51  ;;  %v4611_v18 = vmul.f32 %v12599_v56, %v3529_v6 }
 0x233   : > { %v9912_v17 = vpop.eup %9911  ;;  %6130 = vst.msk [vmem:[#allocation3 + $0x598] sm:$0xff] %vm492_vm0, %v9910_v10  ;;  %9931 = vpow2.f32 %v5306_v36  ;;  %v3533_v19 = vrot.slane %v2189_v31, %v11594_v58  ;;  %v2196_v33 = vrot.slane %v12868_v53, %v11597_v60  ;;  %v5318_v26 = vmul.f32 1.442695, %v4610_v24 }
 0x234   : > { %v9914_v8 = vpop.eup %9913  ;;  %6131 = vst.msk [vmem:[#allocation3 + $0x5a0] sm:$0xff] %vm492_vm0, %v9912_v17  ;;  %9933 = vpow2.f32 %v5308_v43  ;;  %v5314_v50 = vmul.f32 1.442695, %v4608_v23  ;;  %v5316_v38 = vmul.f32 1.442695, %v4609_v15 }
 0x235   : > { %v9916_v39 = vpop.eup %9915  ;;  %6132 = vst.msk [vmem:[#allocation3 + $0x5a8] sm:$0xff] %vm492_vm0, %v9914_v8  ;;  %9935 = vpow2.f32 %v5310_v1  ;;  %v5320_v57 = vmul.f32 1.442695, %v4611_v18  ;;  %v4612_v49 = vmul.f32 %v12612_v3, %v3533_v19  ;;  %v4613_v14 = vmul.f32 %v12615_v48, %v3533_v19  ;;  %v529_v43 = vld [vmem:[%s11502_s19 + $0x70] sm:$0xf] }
 0x236   : > { %v9918_v5 = vpop.eup %9917  ;;  %6133 = vst.msk [vmem:[#allocation3 + $0x5b0] sm:$0xff] %vm492_vm0, %v9916_v39  ;;  %9937 = vpow2.f32 %v5312_v52  ;;  %v2204_v41 = vrot.slane %v2196_v33, %v11597_v60  ;;  %v2197_v36 = vcombine.high %v2196_v33, %v2196_v33  ;;  %v1122_v28 = vmul.f32 0.6931472, %v12804_v35  ;;  %v12901_v23 = vld [vmem:[#allocation16] sm:$0xf] }
 0x237   : > { %v9920_v62 = vpop.eup %9919  ;;  %6134 = vst.msk [vmem:[#allocation3 + $0x5b8] sm:$0xff] %vm492_vm0, %v9918_v5  ;;  %9939 = vpow2.f32 %v5314_v50  ;;  %v5322_v16 = vmul.f32 1.442695, %v4612_v49  ;;  %v16080_v51 = vand.u32 2147483647, %v12555_v40  ;;  %v12904_v15 = vadd.f32 %v12901_v23, %v529_v43 }
 0x238   : > { %v9922_v55 = vpop.eup %9921  ;;  %6135 = vst.msk [vmem:[#allocation3 + $0x5c0] sm:$0xff] %vm492_vm0, %v9920_v62  ;;  %9941 = vpow2.f32 %v5316_v38  ;;  %v5324_v1 = vmul.f32 1.442695, %v4613_v14  ;;  %v3537_v31 = vrot.slane %v2204_v41, %v11594_v58  ;;  %v2211_v10 = vrot.slane %v2197_v36, %v11597_v60 }
 0x239   : > { %vm12890_vm9 = vcmp.lt.f32.partialorder %v16080_v51, 0.0004427343  ;;  %v9924_v52 = vpop.eup %9923  ;;  %6136 = vst.msk [vmem:[#allocation3 + $0x5c8] sm:$0xff] %vm492_vm0, %v9922_v55  ;;  %9943 = vpow2.f32 %v5318_v26  ;;  %v2212_v35 = vcombine.high %v2204_v41, %v2204_v41  ;;  %vm658_vm12 = vcmp.gt.f32.partialorder %v12904_v15, 20.0 }
 0x23a   : > { %v1128_v40 = vsel %vm12890_vm9, %v12761_v42, %v1122_v28  ;;  %v9926_v17 = vpop.eup %9925  ;;  %6137 = vst.msk [vmem:[#allocation3 + $0x5d0] sm:$0xff] %vm492_vm0, %v9924_v52  ;;  %9945 = vpow2.f32 %v5320_v57  ;;  %v4614_v24 = vmul.f32 %v12580_v2, %v3537_v31  ;;  %v4615_v18 = vmul.f32 %v12583_v47, %v3537_v31 }
 0x23b   : > { %v3541_v19 = vrot.slane %v2211_v10, %v11594_v58  ;;  %v9928_v8 = vpop.eup %9927  ;;  %6138 = vst.msk [vmem:[#allocation3 + $0x5d8] sm:$0xff] %vm492_vm0, %v9926_v17  ;;  %9947 = vpow2.f32 %v5322_v16  ;;  %v3545_v42 = vrot.slane %v2212_v35, %v11594_v58  ;;  %v2213_v50 = vcombine.high %v2211_v10, %v2211_v10  ;;  %v530_v35 = vld [vmem:[%s11502_s19 + $0x74] sm:$0xf] }
 0x23c   : > { %v12915_v38 = vsel %vm656_vm8, %v12442_v13, %v1128_v40  ;;  %v9930_v33 = vpop.eup %9929  ;;  %6139 = vst.msk [vmem:[#allocation3 + $0x5e0] sm:$0xff] %vm492_vm0, %v9928_v8  ;;  %9949 = vpow2.f32 %v5324_v1  ;;  %v5326_v39 = vmul.f32 1.442695, %v4614_v24  ;;  %v5328_v26 = vmul.f32 1.442695, %v4615_v18 }
 0x23d   : > { %16083 = vst [vmem:[#allocation55_spill] sm:$0xff] %v12915_v38  ;;  %v4616_v57 = vmul.f32 %v12589_v37, %v3541_v19  ;;  %v9932_v49 = vpop.eup %9931  ;;  %6140 = vst.msk [vmem:[#allocation3 + $0x5e8] sm:$0xff] %vm492_vm0, %v9930_v33  ;;  %v4617_v5 = vmul.f32 %v12592_v63, %v3541_v19  ;;  %v4618_v14 = vmul.f32 %v12595_v45, %v3545_v42  ;;  %v722_v16 = vmin.f32 %v12904_v15, 20.0 }
 0x23e   : > { %v4619_v41 = vmul.f32 %v12599_v56, %v3545_v42  ;;  %v3549_v13 = vrot.slane %v2213_v50, %v11594_v58  ;;  %v9934_v36 = vpop.eup %9933  ;;  %6141 = vst.msk [vmem:[#allocation3 + $0x5f0] sm:$0xff] %vm492_vm0, %v9932_v49  ;;  %9951 = vpow2.f32 %v5326_v39  ;;  %v2220_v62 = vrot.slane %v12915_v38, %v11597_v60 }
 0x23f   : > { %v5330_v43 = vmul.f32 1.442695, %v4616_v57  ;;  %v9936_v28 = vpop.eup %9935  ;;  %6142 = vst.msk [vmem:[#allocation3 + $0x5f8] sm:$0xff] %vm492_vm0, %v9934_v36  ;;  %9953 = vpow2.f32 %v5328_v26  ;;  %v5332_v51 = vmul.f32 1.442695, %v4617_v5  ;;  %v1129_v24 = vadd.f32 1.0, %v12561_v32 }
 0x240   : > { %v5334_v6 = vmul.f32 1.442695, %v4618_v14  ;;  %v5336_v55 = vmul.f32 1.442695, %v4619_v41  ;;  %v9938_v1 = vpop.eup %9937  ;;  %6143 = vst.msk [vmem:[#allocation3 + $0x600] sm:$0xff] %vm492_vm0, %v9936_v28  ;;  %v4620_v31 = vmul.f32 %v12612_v3, %v3549_v13  ;;  %v4621_v10 = vmul.f32 %v12615_v48, %v3549_v13 }
 0x241   : > { %9955 = vpow2.f32 %v5330_v43  ;;  %v2228_v52 = vrot.slane %v2220_v62, %v11597_v60  ;;  %v9940_v40 = vpop.eup %9939  ;;  %6144 = vst.msk [vmem:[#allocation3 + $0x608] sm:$0xff] %vm492_vm0, %v9938_v1  ;;  %v2221_v17 = vcombine.high %v2220_v62, %v2220_v62  ;;  %v12941_v26 = vadd.f32 %v12901_v23, %v530_v35  ;;  %v531_v62 = vld [vmem:[%s11502_s19 + $0x78] sm:$0xf] }
 0x242   : > { %9957 = vpow2.f32 %v5332_v51  ;;  %v9942_v18 = vpop.eup %9941  ;;  %6145 = vst.msk [vmem:[#allocation3 + $0x610] sm:$0xff] %vm492_vm0, %v9940_v40  ;;  %v5338_v19 = vmul.f32 1.442695, %v4620_v31  ;;  %v5340_v8 = vmul.f32 1.442695, %v4621_v10  ;;  %v12960_v35 = vadd.f32 %v12901_v23, %v531_v62 }
 0x243   : > { %9959 = vpow2.f32 %v5334_v6  ;;  %v3553_v42 = vrot.slane %v2228_v52, %v11594_v58  ;;  %v9944_v50 = vpop.eup %9943  ;;  %6146 = vst.msk [vmem:[#allocation3 + $0x618] sm:$0xff] %vm492_vm0, %v9942_v18  ;;  %v2235_v33 = vrot.slane %v2221_v17, %v11597_v60  ;;  %v2236_v39 = vcombine.high %v2228_v52, %v2228_v52  ;;  %v532_v40 = vld [vmem:[%s11502_s19 + $0x7c] sm:$0xf]  ;;  %v533_v17 = vld [vmem:[%s11502_s19 + $0x80] sm:$0xf] }
 0x244   : > { %9961 = vpow2.f32 %v5336_v55  ;;  %v9946_v57 = vpop.eup %9945  ;;  %6147 = vst.msk [vmem:[#allocation3 + $0x620] sm:$0xff] %vm492_vm0, %v9944_v50  ;;  %v814_v14 = vmul.f32 1.442695, %v722_v16  ;;  %v723_v52 = vmin.f32 %v12941_v26, 20.0  ;;  %v536_v62 = vld [vmem:[%s11502_s19 + $0x8c] sm:$0xf] }
 0x245   : > { %9963 = vpow2.f32 %v5338_v19  ;;  %v4622_v49 = vmul.f32 %v12580_v2, %v3553_v42  ;;  %v4623_v5 = vmul.f32 %v12583_v47, %v3553_v42  ;;  %v9948_v41 = vpop.eup %9947  ;;  %6148 = vst.msk [vmem:[#allocation3 + $0x628] sm:$0xff] %vm492_vm0, %v9946_v57  ;;  %v3557_v13 = vrot.slane %v2235_v33, %v11594_v58  ;;  %v534_v42 = vld [vmem:[%s11502_s19 + $0x84] sm:$0xf] }
 0x246   : > { %9965 = vpow2.f32 %v5340_v8  ;;  %v3561_v36 = vrot.slane %v2236_v39, %v11594_v58  ;;  %v2237_v43 = vcombine.high %v2235_v33, %v2235_v33  ;;  %v9950_v28 = vpop.eup %9949  ;;  %6149 = vst.msk [vmem:[#allocation3 + $0x630] sm:$0xff] %vm492_vm0, %v9948_v41  ;;  %v1132_v47 = vmul.f32 -0.5, %v12561_v32 }
 0x247   : > { %v5342_v51 = vmul.f32 1.442695, %v4622_v49  ;;  %v5344_v2 = vmul.f32 1.442695, %v4623_v5  ;;  %9967 = vlog2.f32 %v1129_v24  ;;  %6150 = vst.msk [vmem:[#allocation3 + $0x638] sm:$0xff] %vm492_vm0, %v9950_v28  ;;  %v4624_v16 = vmul.f32 %v12589_v37, %v3557_v13 }
 0x248   : > { %v4625_v6 = vmul.f32 %v12592_v63, %v3557_v13  ;;  %v4626_v55 = vmul.f32 %v12595_v45, %v3561_v36  ;;  %v4627_v1 = vmul.f32 %v12599_v56, %v3561_v36  ;;  %v9952_v31 = vpop.eup %9951  ;;  %v3565_v10 = vrot.slane %v2237_v43, %v11594_v58 }
 0x249   : > { %9969 = vpow2.f32 %v5342_v51  ;;  %v9954_v24 = vpop.eup %9953  ;;  %6151 = vst.msk [vmem:[#allocation3 + $0x640] sm:$0xff] %vm492_vm0, %v9952_v31  ;;  %v5346_v37 = vmul.f32 1.442695, %v4624_v16  ;;  %v1133_v33 = vadd.f32 1.0, %v1132_v47  ;;  %v1135_v39 = vand.u32 2147483647, %v12561_v32 }
 0x24a   : > { %9971 = vpow2.f32 %v5344_v2  ;;  %v5348_v63 = vmul.f32 1.442695, %v4625_v6  ;;  %v5350_v45 = vmul.f32 1.442695, %v4626_v55  ;;  %6152 = vst.msk [vmem:[#allocation3 + $0x648] sm:$0xff] %vm492_vm0, %v9954_v24  ;;  %v4628_v19 = vmul.f32 %v12612_v3, %v3565_v10  ;;  %v13033_v55 = vld [vmem:[#allocation13] sm:$0xff] }
 0x24b   : > { %v9956_v56 = vpop.eup %9955  ;;  %v5352_v18 = vmul.f32 1.442695, %v4627_v1  ;;  %v4629_v8 = vmul.f32 %v12615_v48, %v3565_v10  ;;  %9973 = vpow2.f32 %v814_v14  ;;  %v12972_v57 = vadd.f32 %v12901_v23, %v532_v40  ;;  %v535_v14 = vld [vmem:[%s11502_s19 + $0x88] sm:$0xf] }
 0x24c   : > { %v9958_v50 = vpop.eup %9957  ;;  %6153 = vst.msk [vmem:[#allocation3 + $0x650] sm:$0xff] %vm492_vm0, %v9956_v56  ;;  %9975 = vpow2.f32 %v5346_v37  ;;  %v5354_v3 = vmul.f32 1.442695, %v4628_v19  ;;  %v12976_v48 = vadd.f32 %v12901_v23, %v533_v17  ;;  %v816_v13 = vmul.f32 1.442695, %v723_v52 }
 0x24d   : > { %v9960_v49 = vpop.eup %9959  ;;  %6154 = vst.msk [vmem:[#allocation3 + $0x658] sm:$0xff] %vm492_vm0, %v9958_v50  ;;  %9977 = vpow2.f32 %v5348_v63  ;;  %v5356_v5 = vmul.f32 1.442695, %v4629_v8  ;;  %v724_v36 = vmin.f32 %v12960_v35, 20.0  ;;  %v12982_v43 = vadd.f32 %v12901_v23, %v534_v42 }
 0x24e   : > { %v9962_v41 = vpop.eup %9961  ;;  %6155 = vst.msk [vmem:[#allocation3 + $0x660] sm:$0xff] %vm492_vm0, %v9960_v49  ;;  %9979 = vpow2.f32 %v5350_v45  ;;  %v725_v51 = vmin.f32 %v12972_v57, 20.0  ;;  %v1134_v47 = vmul.f32 %v12561_v32, %v1133_v33  ;;  %v12991_v16 = vadd.f32 %v12901_v23, %v535_v14 }
 0x24f   : > { %v9964_v28 = vpop.eup %9963  ;;  %6156 = vst.msk [vmem:[#allocation3 + $0x668] sm:$0xff] %vm492_vm0, %v9962_v41  ;;  %9981 = vpow2.f32 %v5352_v18  ;;  %vm12994_vm11 = vcmp.lt.f32.partialorder %v1135_v39, 0.0004427343  ;;  %v726_v1 = vmin.f32 %v12976_v48, 20.0  ;;  %v13000_v31 = vadd.f32 %v12901_v23, %v536_v62 }
 0x250   : > { %v9966_v2 = vpop.eup %9965  ;;  %6157 = vst.msk [vmem:[#allocation3 + $0x670] sm:$0xff] %vm492_vm0, %v9964_v28  ;;  %9983 = vpow2.f32 %v5354_v3  ;;  %v818_v52 = vmul.f32 1.442695, %v724_v36  ;;  %v727_v32 = vmin.f32 %v12982_v43, 20.0  ;;  %v820_v17 = vmul.f32 1.442695, %v725_v51 }
 0x251   : > { %v9968_v6 = vpop.eup %9967  ;;  %6158 = vst.msk [vmem:[#allocation3 + $0x678] sm:$0xff] %vm492_vm0, %v9966_v2  ;;  %9985 = vpow2.f32 %v5356_v5  ;;  %v728_v24 = vmin.f32 %v12991_v16, 20.0  ;;  %v822_v56 = vmul.f32 1.442695, %v726_v1  ;;  %v729_v18 = vmin.f32 %v13000_v31, 20.0 }
 0x252   : > { %v1131_v10 = vmul.f32 0.6931472, %v9968_v6  ;;  %9987 = vpow2.f32 %v816_v13  ;;  %v824_v50 = vmul.f32 1.442695, %v727_v32  ;;  %vm659_vm14 = vcmp.gt.f32.partialorder %v12941_v26, 20.0 }
 0x253   : > { %v9970_v40 = vpop.eup %9969  ;;  %9989 = vpow2.f32 %v818_v52  ;;  %v826_v49 = vmul.f32 1.442695, %v728_v24  ;;  %v828_v41 = vmul.f32 1.442695, %v729_v18  ;;  %v13043_v18 = vld [vmem:[#allocation13 + $0x10] sm:$0xff]  ;;  %vm660_vm3 = vcmp.gt.f32.partialorder %v12960_v35, 20.0 }
 0x254   : > { %v9972_v37 = vpop.eup %9971  ;;  %6159 = vst.msk [vmem:[#allocation3 + $0x680] sm:$0xff] %vm492_vm0, %v9970_v40  ;;  %v1137_v63 = vsel %vm12994_vm11, %v1134_v47, %v1131_v10  ;;  %9991 = vpow2.f32 %v820_v17  ;;  %v13036_v10 = vld [vmem:[#allocation13 + $0x8] sm:$0xff]  ;;  %vm661_vm4 = vcmp.gt.f32.partialorder %v12972_v57, 20.0  ;;  %vm662_vm6 = vcmp.gt.f32.partialorder %v12976_v48, 20.0 }
 0x255   : > { %v13007_v45 = vpop.eup %9973  ;;  %6160 = vst.msk [vmem:[#allocation3 + $0x688] sm:$0xff] %vm492_vm0, %v9972_v37  ;;  %v13013_v23 = vsel %vm657_vm10, %v12444_v54, %v1137_v63  ;;  %vm663_vm7 = vcmp.gt.f32.partialorder %v12982_v43, 20.0  ;;  %vm664_vm9 = vcmp.gt.f32.partialorder %v12991_v16, 20.0 }
 0x256   : > { %16086 = vst [vmem:[#allocation56_spill] sm:$0xff] %v13013_v23  ;;  %v9976_v19 = vpop.eup %9975  ;;  %v2244_v8 = vrot.slane %v13013_v23, %v11597_v60  ;;  %v1138_v42 = vadd.f32 1.0, %v13007_v45  ;;  %v1141_v39 = vmul.f32 -0.5, %v13007_v45  ;;  %v1144_v47 = vand.u32 2147483647, %v13007_v45 }
 0x257   : > { %v9978_v33 = vpop.eup %9977  ;;  %6161 = vst.msk [vmem:[#allocation3 + $0x690] sm:$0xff] %vm492_vm0, %v9976_v19 }
 0x258   : > { %v9980_v54 = vpop.eup %9979  ;;  %6162 = vst.msk [vmem:[#allocation3 + $0x698] sm:$0xff] %vm492_vm0, %v9978_v33  ;;  %v2252_v3 = vrot.slane %v2244_v8, %v11597_v60  ;;  %v2245_v5 = vcombine.high %v2244_v8, %v2244_v8  ;;  %9993 = vlog2.f32 %v1138_v42  ;;  %v1142_v2 = vadd.f32 1.0, %v1141_v39  ;;  %v13046_v8 = vld [vmem:[#allocation13 + $0x18] sm:$0xff]  ;;  %v13052_v39 = vld [vmem:[#allocation13 + $0x28] sm:$0xff] }
 0x259   : > { %v9982_v14 = vpop.eup %9981  ;;  %6163 = vst.msk [vmem:[#allocation3 + $0x6a0] sm:$0xff] %vm492_vm0, %v9980_v54  ;;  %9995 = vpow2.f32 %v822_v56  ;;  %vm13063_vm13 = vcmp.lt.f32.partialorder %v1144_v47, 0.0004427343 }
 0x25a   : > { %v9984_v13 = vpop.eup %9983  ;;  %6164 = vst.msk [vmem:[#allocation3 + $0x6a8] sm:$0xff] %vm492_vm0, %v9982_v14  ;;  %v3569_v36 = vrot.slane %v2252_v3, %v11594_v58  ;;  %v2259_v62 = vrot.slane %v2245_v5, %v11597_v60  ;;  %v2260_v28 = vcombine.high %v2252_v3, %v2252_v3  ;;  %9997 = vpow2.f32 %v824_v50  ;;  %v13049_v50 = vld [vmem:[#allocation13 + $0x20] sm:$0xff] }
 0x25b   : > { %v9986_v51 = vpop.eup %9985  ;;  %6165 = vst.msk [vmem:[#allocation3 + $0x6b0] sm:$0xff] %vm492_vm0, %v9984_v13  ;;  %9999 = vpow2.f32 %v826_v49 }
 0x25c   : > { %v13030_v6 = vpop.eup %9987  ;;  %6166 = vst.msk [vmem:[#allocation3 + $0x6b8] sm:$0xff] %vm492_vm0, %v9986_v51  ;;  %v4630_v1 = vmul.f32 %v13033_v55, %v3569_v36  ;;  %v4631_v52 = vmul.f32 %v13036_v10, %v3569_v36  ;;  %v3573_v32 = vrot.slane %v2259_v62, %v11594_v58  ;;  %v3577_v40 = vrot.slane %v2260_v28, %v11594_v58  ;;  %v13057_v28 = vld [vmem:[#allocation13 + $0x30] sm:$0xff] }
 0x25d   : > { %v2261_v17 = vcombine.high %v2259_v62, %v2259_v62  ;;  %v1147_v24 = vadd.f32 1.0, %v13030_v6  ;;  %v1150_v37 = vmul.f32 -0.5, %v13030_v6  ;;  %10001 = vpow2.f32 %v828_v41  ;;  %v9990_v3 = vpop.eup %9989 }
 0x25e   : > { %v5358_v63 = vmul.f32 1.442695, %v4630_v1  ;;  %v5360_v56 = vmul.f32 1.442695, %v4631_v52  ;;  %v4632_v19 = vmul.f32 %v13043_v18, %v3573_v32  ;;  %v4633_v42 = vmul.f32 %v13046_v8, %v3573_v32  ;;  %v9992_v13 = vpop.eup %9991  ;;  %v13060_v52 = vld [vmem:[#allocation13 + $0x38] sm:$0xff] }
 0x25f   : > { %v4634_v33 = vmul.f32 %v13049_v50, %v3577_v40  ;;  %v4635_v49 = vmul.f32 %v13052_v39, %v3577_v40  ;;  %v3581_v54 = vrot.slane %v2261_v17, %v11594_v58  ;;  %10003 = vlog2.f32 %v1147_v24 }
 0x260   : > { %10005 = vpow2.f32 %v5358_v63  ;;  %v5362_v5 = vmul.f32 1.442695, %v4632_v19  ;;  %v5364_v14 = vmul.f32 1.442695, %v4633_v42  ;;  %v1143_v41 = vmul.f32 %v13007_v45, %v1142_v2 }
 0x261   : > { %10007 = vpow2.f32 %v5360_v56  ;;  %v5366_v36 = vmul.f32 1.442695, %v4634_v33  ;;  %v5368_v62 = vmul.f32 1.442695, %v4635_v49  ;;  %v4636_v51 = vmul.f32 %v13057_v28, %v3581_v54 }
 0x262   : > { %v9994_v1 = vpop.eup %9993  ;;  %10009 = vpow2.f32 %v5362_v5  ;;  %v4637_v32 = vmul.f32 %v13060_v52, %v3581_v54  ;;  %v1153_v45 = vand.u32 2147483647, %v13030_v6  ;;  %v1151_v63 = vadd.f32 1.0, %v1150_v37 }
 0x263   : > { %v13068_v2 = vpop.eup %9995  ;;  %10011 = vpow2.f32 %v5364_v14  ;;  %v5370_v17 = vmul.f32 1.442695, %v4636_v51  ;;  %v1140_v24 = vmul.f32 0.6931472, %v9994_v1  ;;  %v1156_v42 = vadd.f32 1.0, %v9990_v3 }
 0x264   : > { %v13071_v56 = vpop.eup %9997  ;;  %10013 = vpow2.f32 %v5366_v36  ;;  %v5372_v19 = vmul.f32 1.442695, %v4637_v32  ;;  %v1159_v33 = vmul.f32 -0.5, %v9990_v3  ;;  %v1165_v54 = vadd.f32 1.0, %v9992_v13 }
 0x265   : > { %v13073_v47 = vpop.eup %9999  ;;  %10015 = vpow2.f32 %v5368_v62  ;;  %v1146_v49 = vsel %vm13063_vm13, %v1143_v41, %v1140_v24  ;;  %v1168_v5 = vmul.f32 -0.5, %v9992_v13  ;;  %v1162_v51 = vand.u32 2147483647, %v9990_v3 }
 0x266   : > { %10017 = vpow2.f32 %v5370_v17  ;;  %v13080_v14 = vsel %vm658_vm12, %v12904_v15, %v1146_v49  ;;  %v1160_v37 = vadd.f32 1.0, %v1159_v33  ;;  %v1171_v32 = vand.u32 2147483647, %v9992_v13 }
 0x267   : > { %16089 = vst [vmem:[#allocation57_spill] sm:$0xff] %v13080_v14  ;;  %v13082_v36 = vpop.eup %10001  ;;  %10019 = vpow2.f32 %v5372_v19  ;;  %v2268_v1 = vrot.slane %v13080_v14, %v11597_v60  ;;  %v1169_v62 = vadd.f32 1.0, %v1168_v5  ;;  %v1152_v41 = vmul.f32 %v13030_v6, %v1151_v63 }
 0x268   : > { %10021 = vlog2.f32 %v1156_v42  ;;  %v1174_v40 = vadd.f32 1.0, %v13068_v2  ;;  %v1177_v17 = vmul.f32 -0.5, %v13068_v2  ;;  %vm13090_vm15 = vcmp.lt.f32.partialorder %v1153_v45, 0.0004427343 }
 0x269   : > { %v10004_v24 = vpop.eup %10003  ;;  %v2276_v15 = vrot.slane %v2268_v1, %v11597_v60  ;;  %v2269_v33 = vcombine.high %v2268_v1, %v2268_v1  ;;  %10023 = vlog2.f32 %v1165_v54  ;;  %v13094_v5 = vmul.f32 %v9990_v3, %v1160_v37 }
 0x26a   : > { %v10006_v19 = vpop.eup %10005  ;;  %v1149_v14 = vmul.f32 0.6931472, %v10004_v24  ;;  %v13096_v23 = vmul.f32 %v9992_v13, %v1169_v62  ;;  %v1178_v6 = vadd.f32 1.0, %v1177_v17  ;;  %vm13101_vm1 = vcmp.lt.f32.partialorder %v1162_v51, 0.0004427343 }
 0x26b   : > { %v10008_v63 = vpop.eup %10007  ;;  %6167 = vst.msk [vmem:[#allocation3 + $0x6c0] sm:$0xff] %vm492_vm0, %v10006_v19  ;;  %v3585_v42 = vrot.slane %v2276_v15, %v11594_v58  ;;  %v2283_v38 = vrot.slane %v2269_v33, %v11597_v60  ;;  %v2284_v1 = vcombine.high %v2276_v15, %v2276_v15  ;;  %vm13105_vm2 = vcmp.lt.f32.partialorder %v1171_v32, 0.0004427343 }
 0x26c   : > { %10025 = vlog2.f32 %v1174_v40  ;;  %v10010_v3 = vpop.eup %10009  ;;  %6168 = vst.msk [vmem:[#allocation3 + $0x6c8] sm:$0xff] %vm492_vm0, %v10008_v63  ;;  %v1155_v13 = vsel %vm13090_vm15, %v1152_v41, %v1149_v14  ;;  %v1183_v62 = vadd.f32 1.0, %v13071_v56  ;;  %v1186_v51 = vmul.f32 -0.5, %v13071_v56 }
 0x26d   : > { %v10012_v17 = vpop.eup %10011  ;;  %6169 = vst.msk [vmem:[#allocation3 + $0x6d0] sm:$0xff] %vm492_vm0, %v10010_v3  ;;  %v4638_v32 = vmul.f32 %v13033_v55, %v3585_v42  ;;  %v4639_v24 = vmul.f32 %v13036_v10, %v3585_v42  ;;  %v3589_v40 = vrot.slane %v2283_v38, %v11594_v58  ;;  %v3593_v15 = vrot.slane %v2284_v1, %v11594_v58 }
 0x26e   : > { %v10014_v14 = vpop.eup %10013  ;;  %6170 = vst.msk [vmem:[#allocation3 + $0x6d8] sm:$0xff] %vm492_vm0, %v10012_v17  ;;  %v2285_v41 = vcombine.high %v2283_v38, %v2283_v38  ;;  %v13125_v33 = vsel %vm659_vm14, %v12941_v26, %v1155_v13  ;;  %v13128_v49 = vmul.f32 %v13068_v2, %v1178_v6  ;;  %10027 = vlog2.f32 %v1183_v62 }
 0x26f   : > { %16096 = vst [vmem:[#allocation58_spill] sm:$0xff] %v13125_v33  ;;  %v10016_v19 = vpop.eup %10015  ;;  %6171 = vst.msk [vmem:[#allocation3 + $0x6e0] sm:$0xff] %vm492_vm0, %v10014_v14  ;;  %v5374_v63 = vmul.f32 1.442695, %v4638_v32  ;;  %v5376_v42 = vmul.f32 1.442695, %v4639_v24  ;;  %v4640_v1 = vmul.f32 %v13043_v18, %v3589_v40  ;;  %v4641_v3 = vmul.f32 %v13046_v8, %v3589_v40 }
 0x270   : > { %v10018_v17 = vpop.eup %10017  ;;  %6172 = vst.msk [vmem:[#allocation3 + $0x6e8] sm:$0xff] %vm492_vm0, %v10016_v19  ;;  %v4642_v38 = vmul.f32 %v13049_v50, %v3593_v15  ;;  %v4643_v26 = vmul.f32 %v13052_v39, %v3593_v15  ;;  %v3597_v6 = vrot.slane %v2285_v41, %v11594_v58  ;;  %v2292_v13 = vrot.slane %v13125_v33, %v11597_v60 }
 0x271   : > { %v10020_v62 = vpop.eup %10019  ;;  %6173 = vst.msk [vmem:[#allocation3 + $0x6f0] sm:$0xff] %vm492_vm0, %v10018_v17  ;;  %10029 = vpow2.f32 %v5374_v63  ;;  %v5378_v32 = vmul.f32 1.442695, %v4640_v1  ;;  %v5380_v24 = vmul.f32 1.442695, %v4641_v3  ;;  %v13141_v40 = vadd.f32 1.0, %v1186_v51 }
 0x272   : > { %v10022_v14 = vpop.eup %10021  ;;  %6174 = vst.msk [vmem:[#allocation3 + $0x6f8] sm:$0xff] %vm492_vm0, %v10020_v62  ;;  %10031 = vpow2.f32 %v5376_v42  ;;  %v5382_v15 = vmul.f32 1.442695, %v4642_v38  ;;  %v5384_v19 = vmul.f32 1.442695, %v4643_v26  ;;  %v4644_v41 = vmul.f32 %v13057_v28, %v3597_v6 }
 0x273   : > { %v10024_v37 = vpop.eup %10023  ;;  %10033 = vpow2.f32 %v5378_v32  ;;  %v4645_v33 = vmul.f32 %v13060_v52, %v3597_v6  ;;  %v2300_v53 = vrot.slane %v2292_v13, %v11597_v60  ;;  %v2293_v17 = vcombine.high %v2292_v13, %v2292_v13 }
 0x274   : > { %10035 = vpow2.f32 %v5380_v24  ;;  %v5386_v63 = vmul.f32 1.442695, %v4644_v41  ;;  %v1158_v1 = vmul.f32 0.6931472, %v10022_v14  ;;  %v1167_v51 = vmul.f32 0.6931472, %v10024_v37 }
 0x275   : > { %10037 = vpow2.f32 %v5382_v15  ;;  %v5388_v21 = vmul.f32 1.442695, %v4645_v33  ;;  %v3601_v42 = vrot.slane %v2300_v53, %v11594_v58  ;;  %v2307_v38 = vrot.slane %v2293_v17, %v11597_v60 }
 0x276   : > { %v10026_v3 = vpop.eup %10025  ;;  %10039 = vpow2.f32 %v5384_v19  ;;  %v2308_v26 = vcombine.high %v2300_v53, %v2300_v53  ;;  %v1164_v6 = vsel %vm13101_vm1, %v13094_v5, %v1158_v1  ;;  %v1173_v13 = vsel %vm13105_vm2, %v13096_v23, %v1167_v51 }
 0x277   : > { %10041 = vpow2.f32 %v5386_v63  ;;  %v4646_v37 = vmul.f32 %v13033_v55, %v3601_v42  ;;  %v4647_v62 = vmul.f32 %v13036_v10, %v3601_v42  ;;  %v3605_v33 = vrot.slane %v2307_v38, %v11594_v58 }
 0x278   : > { %v13158_v32 = vpop.eup %10027  ;;  %10043 = vpow2.f32 %v5388_v21  ;;  %v3609_v53 = vrot.slane %v2308_v26, %v11594_v58  ;;  %v2309_v24 = vcombine.high %v2307_v38, %v2307_v38  ;;  %v13164_v5 = vsel %vm660_vm3, %v12960_v35, %v1164_v6 }
 0x279   : > { %16097 = vst [vmem:[#allocation59_spill] sm:$0xff] %v13164_v5  ;;  %v5390_v45 = vmul.f32 1.442695, %v4646_v37  ;;  %v5392_v23 = vmul.f32 1.442695, %v4647_v62  ;;  %v4648_v54 = vmul.f32 %v13043_v18, %v3605_v33  ;;  %v4649_v14 = vmul.f32 %v13046_v8, %v3605_v33 }
 0x27a   : > { %v4650_v15 = vmul.f32 %v13049_v50, %v3609_v53  ;;  %v4651_v19 = vmul.f32 %v13052_v39, %v3609_v53  ;;  %v3613_v21 = vrot.slane %v2309_v24, %v11594_v58  ;;  %v2316_v41 = vrot.slane %v13164_v5, %v11597_v60 }
 0x27b   : > { %v10030_v17 = vpop.eup %10029  ;;  %10045 = vpow2.f32 %v5390_v45  ;;  %v5394_v63 = vmul.f32 1.442695, %v4648_v54  ;;  %v5396_v35 = vmul.f32 1.442695, %v4649_v14  ;;  %v13176_v1 = vsel %vm661_vm4, %v12972_v57, %v1173_v13 }
 0x27c   : > { %16098 = vst [vmem:[#allocation60_spill] sm:$0xff] %v13176_v1  ;;  %v10032_v51 = vpop.eup %10031  ;;  %6175 = vst.msk [vmem:[#allocation3 + $0x700] sm:$0xff] %vm492_vm0, %v10030_v17  ;;  %10047 = vpow2.f32 %v5392_v23  ;;  %v5398_v42 = vmul.f32 1.442695, %v4650_v15  ;;  %v5400_v38 = vmul.f32 1.442695, %v4651_v19  ;;  %v4652_v26 = vmul.f32 %v13057_v28, %v3613_v21 }
 0x27d   : > { %v10034_v6 = vpop.eup %10033  ;;  %6176 = vst.msk [vmem:[#allocation3 + $0x708] sm:$0xff] %vm492_vm0, %v10032_v51  ;;  %10049 = vpow2.f32 %v5394_v63  ;;  %v4653_v37 = vmul.f32 %v13060_v52, %v3613_v21  ;;  %v2324_v62 = vrot.slane %v2316_v41, %v11597_v60  ;;  %v2317_v33 = vcombine.high %v2316_v41, %v2316_v41 }
 0x27e   : > { %v10036_v53 = vpop.eup %10035  ;;  %6177 = vst.msk [vmem:[#allocation3 + $0x710] sm:$0xff] %vm492_vm0, %v10034_v6  ;;  %10051 = vpow2.f32 %v5396_v35  ;;  %v5402_v57 = vmul.f32 1.442695, %v4652_v26  ;;  %v2340_v13 = vrot.slane %v13176_v1, %v11597_v60  ;;  %v13186_v24 = vmul.f32 0.6931472, %v10026_v3  ;;  %v13469_v1 = vld [vmem:[#allocation13 + $0x18] sm:$0xff] }
 0x27f   : > { %v16099_v45 = vand.u32 2147483647, %v13068_v2  ;;  %v10038_v54 = vpop.eup %10037  ;;  %6178 = vst.msk [vmem:[#allocation3 + $0x718] sm:$0xff] %vm492_vm0, %v10036_v53  ;;  %10053 = vpow2.f32 %v5398_v42  ;;  %v5404_v14 = vmul.f32 1.442695, %v4653_v37  ;;  %v3617_v15 = vrot.slane %v2324_v62, %v11594_v58 }
 0x280   : > { %v2331_v19 = vrot.slane %v2317_v33, %v11597_v60  ;;  %v10040_v21 = vpop.eup %10039  ;;  %6179 = vst.msk [vmem:[#allocation3 + $0x720] sm:$0xff] %vm492_vm0, %v10038_v54  ;;  %10055 = vpow2.f32 %v5400_v38  ;;  %v2332_v3 = vcombine.high %v2324_v62, %v2324_v62  ;;  %v2348_v2 = vrot.slane %v2340_v13, %v11597_v60 }
 0x281   : > { %vm13190_vm5 = vcmp.lt.f32.partialorder %v16099_v45, 0.0004427343  ;;  %v2341_v41 = vcombine.high %v2340_v13, %v2340_v13  ;;  %v10042_v17 = vpop.eup %10041  ;;  %6180 = vst.msk [vmem:[#allocation3 + $0x728] sm:$0xff] %vm492_vm0, %v10040_v21  ;;  %10057 = vpow2.f32 %v5402_v57  ;;  %v4654_v63 = vmul.f32 %v13033_v55, %v3617_v15 }
 0x282   : > { %v4655_v35 = vmul.f32 %v13036_v10, %v3617_v15  ;;  %v3621_v51 = vrot.slane %v2331_v19, %v11594_v58  ;;  %v10044_v42 = vpop.eup %10043  ;;  %6181 = vst.msk [vmem:[#allocation3 + $0x730] sm:$0xff] %vm492_vm0, %v10042_v17  ;;  %10059 = vpow2.f32 %v5404_v14  ;;  %v3625_v38 = vrot.slane %v2332_v3, %v11594_v58 }
 0x283   : > { %v2333_v26 = vcombine.high %v2331_v19, %v2331_v19  ;;  %v3633_v6 = vrot.slane %v2348_v2, %v11594_v58  ;;  %6182 = vst.msk [vmem:[#allocation3 + $0x738] sm:$0xff] %vm492_vm0, %v10044_v42  ;;  %v5406_v37 = vmul.f32 1.442695, %v4654_v63  ;;  %vm665_vm12 = vcmp.gt.f32.partialorder %v13000_v31, 20.0 }
 0x284   : > { %v5408_v62 = vmul.f32 1.442695, %v4655_v35  ;;  %v4656_v33 = vmul.f32 %v13043_v18, %v3621_v51  ;;  %v4657_v53 = vmul.f32 %v13046_v8, %v3621_v51  ;;  %v4658_v57 = vmul.f32 %v13049_v50, %v3625_v38 }
 0x285   : > { %v4659_v13 = vmul.f32 %v13052_v39, %v3625_v38  ;;  %v3629_v45 = vrot.slane %v2333_v26, %v11594_v58  ;;  %v4662_v54 = vmul.f32 %v13033_v55, %v3633_v6  ;;  %v10046_v14 = vpop.eup %10045  ;;  %10061 = vpow2.f32 %v5406_v37 }
 0x286   : > { %v5410_v15 = vmul.f32 1.442695, %v4656_v33  ;;  %v5412_v19 = vmul.f32 1.442695, %v4657_v53  ;;  %v4663_v21 = vmul.f32 %v13036_v10, %v3633_v6  ;;  %v10048_v3 = vpop.eup %10047  ;;  %6183 = vst.msk [vmem:[#allocation3 + $0x740] sm:$0xff] %vm492_vm0, %v10046_v14  ;;  %10063 = vpow2.f32 %v5408_v62 }
 0x287   : > { %v5414_v17 = vmul.f32 1.442695, %v4658_v57  ;;  %v5416_v63 = vmul.f32 1.442695, %v4659_v13  ;;  %v4660_v35 = vmul.f32 %v13057_v28, %v3629_v45  ;;  %v10050_v51 = vpop.eup %10049  ;;  %6184 = vst.msk [vmem:[#allocation3 + $0x748] sm:$0xff] %vm492_vm0, %v10048_v3  ;;  %v4661_v42 = vmul.f32 %v13060_v52, %v3629_v45 }
 0x288   : > { %10065 = vpow2.f32 %v5410_v15  ;;  %v5422_v38 = vmul.f32 1.442695, %v4662_v54  ;;  %v5424_v26 = vmul.f32 1.442695, %v4663_v21  ;;  %v10052_v37 = vpop.eup %10051  ;;  %6185 = vst.msk [vmem:[#allocation3 + $0x750] sm:$0xff] %vm492_vm0, %v10050_v51  ;;  %v2355_v33 = vrot.slane %v2341_v41, %v11597_v60 }
 0x289   : > { %10067 = vpow2.f32 %v5412_v19  ;;  %v5418_v6 = vmul.f32 1.442695, %v4660_v35  ;;  %v2356_v62 = vcombine.high %v2348_v2, %v2348_v2  ;;  %v10054_v53 = vpop.eup %10053  ;;  %6186 = vst.msk [vmem:[#allocation3 + $0x758] sm:$0xff] %vm492_vm0, %v10052_v37  ;;  %v5420_v57 = vmul.f32 1.442695, %v4661_v42 }
 0x28a   : > { %10069 = vpow2.f32 %v5414_v17  ;;  %v1182_v13 = vsel %vm13190_vm5, %v13128_v49, %v13186_v24  ;;  %v1185_v45 = vmul.f32 0.6931472, %v13158_v32  ;;  %v10056_v54 = vpop.eup %10055  ;;  %6187 = vst.msk [vmem:[#allocation3 + $0x760] sm:$0xff] %vm492_vm0, %v10054_v53  ;;  %v3637_v14 = vrot.slane %v2355_v33, %v11594_v58 }
 0x28b   : > { %10071 = vpow2.f32 %v5416_v63  ;;  %v3641_v2 = vrot.slane %v2356_v62, %v11594_v58  ;;  %v2357_v41 = vcombine.high %v2355_v33, %v2355_v33  ;;  %v10058_v15 = vpop.eup %10057  ;;  %6188 = vst.msk [vmem:[#allocation3 + $0x768] sm:$0xff] %vm492_vm0, %v10056_v54  ;;  %v13234_v23 = vsel %vm662_vm6, %v12976_v48, %v1182_v13 }
 0x28c   : > { %10073 = vpow2.f32 %v5418_v6  ;;  %16102 = vst [vmem:[#allocation61_spill] sm:$0xff] %v13234_v23  ;;  %v1188_v49 = vmul.f32 %v13071_v56, %v13141_v40  ;;  %v1189_v32 = vand.u32 2147483647, %v13071_v56  ;;  %v10060_v24 = vpop.eup %10059  ;;  %6189 = vst.msk [vmem:[#allocation3 + $0x770] sm:$0xff] %vm492_vm0, %v10058_v15  ;;  %v4664_v19 = vmul.f32 %v13043_v18, %v3637_v14 }
 0x28d   : > { %10075 = vpow2.f32 %v5420_v57  ;;  %v4665_v21 = vmul.f32 %v13046_v8, %v3637_v14  ;;  %v4666_v3 = vmul.f32 %v13049_v50, %v3641_v2  ;;  %6190 = vst.msk [vmem:[#allocation3 + $0x778] sm:$0xff] %vm492_vm0, %v10060_v24  ;;  %v4667_v48 = vmul.f32 %v13052_v39, %v3641_v2 }
 0x28e   : > { %10077 = vpow2.f32 %v5422_v38  ;;  %v3645_v17 = vrot.slane %v2357_v41, %v11594_v58  ;;  %v2364_v56 = vrot.slane %v13234_v23, %v11597_v60  ;;  %v5426_v40 = vmul.f32 1.442695, %v4664_v19  ;;  %v13466_v23 = vld [vmem:[#allocation13 + $0x10] sm:$0xff] }
 0x28f   : > { %10079 = vpow2.f32 %v5424_v26  ;;  %v5428_v63 = vmul.f32 1.442695, %v4665_v21  ;;  %v5430_v35 = vmul.f32 1.442695, %v4666_v3  ;;  %v10062_v51 = vpop.eup %10061  ;;  %v5432_v42 = vmul.f32 1.442695, %v4667_v48 }
 0x290   : > { %v4668_v37 = vmul.f32 %v13057_v28, %v3645_v17  ;;  %v4669_v6 = vmul.f32 %v13060_v52, %v3645_v17  ;;  %v2372_v33 = vrot.slane %v2364_v56, %v11597_v60  ;;  %v10064_v38 = vpop.eup %10063  ;;  %6191 = vst.msk [vmem:[#allocation3 + $0x780] sm:$0xff] %vm492_vm0, %v10062_v51  ;;  %10081 = vpow2.f32 %v5426_v40  ;;  %v537_v26 = vld [vmem:[%s11502_s19 + $0x90] sm:$0xf] }
 0x291   : > { %v2365_v62 = vcombine.high %v2364_v56, %v2364_v56  ;;  %vm13253_vm8 = vcmp.lt.f32.partialorder %v1189_v32, 0.0004427343  ;;  %6192 = vst.msk [vmem:[#allocation3 + $0x788] sm:$0xff] %vm492_vm0, %v10064_v38  ;;  %10083 = vpow2.f32 %v5428_v63 }
 0x292   : > { %v10066_v53 = vpop.eup %10065  ;;  %v5434_v57 = vmul.f32 1.442695, %v4668_v37  ;;  %v5436_v13 = vmul.f32 1.442695, %v4669_v6  ;;  %v3649_v54 = vrot.slane %v2372_v33, %v11594_v58  ;;  %10085 = vpow2.f32 %v5430_v35 }
 0x293   : > { %v10068_v14 = vpop.eup %10067  ;;  %6193 = vst.msk [vmem:[#allocation3 + $0x790] sm:$0xff] %vm492_vm0, %v10066_v53  ;;  %v2379_v2 = vrot.slane %v2365_v62, %v11597_v60  ;;  %v2380_v41 = vcombine.high %v2372_v33, %v2372_v33  ;;  %v1191_v15 = vsel %vm13253_vm8, %v1188_v49, %v1185_v45  ;;  %10087 = vpow2.f32 %v5432_v42 }
 0x294   : > { %v10070_v32 = vpop.eup %10069  ;;  %6194 = vst.msk [vmem:[#allocation3 + $0x798] sm:$0xff] %vm492_vm0, %v10068_v14  ;;  %v4670_v24 = vmul.f32 %v13033_v55, %v3649_v54  ;;  %v4671_v19 = vmul.f32 %v13036_v10, %v3649_v54  ;;  %v13269_v21 = vsel %vm663_vm7, %v12982_v43, %v1191_v15  ;;  %10089 = vpow2.f32 %v5434_v57 }
 0x295   : > { %16105 = vst [vmem:[#allocation62_spill] sm:$0xff] %v13269_v21  ;;  %v10072_v3 = vpop.eup %10071  ;;  %6195 = vst.msk [vmem:[#allocation3 + $0x7a0] sm:$0xff] %vm492_vm0, %v10070_v32  ;;  %v3653_v48 = vrot.slane %v2379_v2, %v11594_v58  ;;  %v3657_v45 = vrot.slane %v2380_v41, %v11594_v58  ;;  %v2381_v49 = vcombine.high %v2379_v2, %v2379_v2  ;;  %10091 = vpow2.f32 %v5436_v13 }
 0x296   : > { %v10074_v17 = vpop.eup %10073  ;;  %6196 = vst.msk [vmem:[#allocation3 + $0x7a8] sm:$0xff] %vm492_vm0, %v10072_v3  ;;  %v5438_v56 = vmul.f32 1.442695, %v4670_v24  ;;  %v5440_v40 = vmul.f32 1.442695, %v4671_v19  ;;  %v2388_v43 = vrot.slane %v13269_v21, %v11597_v60 }
 0x297   : > { %v10076_v63 = vpop.eup %10075  ;;  %6197 = vst.msk [vmem:[#allocation3 + $0x7b0] sm:$0xff] %vm492_vm0, %v10074_v17  ;;  %v4672_v35 = vmul.f32 %v13043_v18, %v3653_v48  ;;  %v4673_v51 = vmul.f32 %v13046_v8, %v3653_v48  ;;  %v4674_v42 = vmul.f32 %v13049_v50, %v3657_v45  ;;  %v4675_v37 = vmul.f32 %v13052_v39, %v3657_v45  ;;  %v13292_v3 = vld [vmem:[#allocation16] sm:$0xf]  ;;  %v538_v45 = vld [vmem:[%s11502_s19 + $0x94] sm:$0xf] }
 0x298   : > { %v10078_v6 = vpop.eup %10077  ;;  %6198 = vst.msk [vmem:[#allocation3 + $0x7b8] sm:$0xff] %vm492_vm0, %v10076_v63  ;;  %10093 = vpow2.f32 %v5438_v56  ;;  %v3661_v33 = vrot.slane %v2381_v49, %v11594_v58  ;;  %v2396_v38 = vrot.slane %v2388_v43, %v11597_v60  ;;  %v2389_v62 = vcombine.high %v2388_v43, %v2388_v43 }
 0x299   : > { %v10080_v53 = vpop.eup %10079  ;;  %6199 = vst.msk [vmem:[#allocation3 + $0x7c0] sm:$0xff] %vm492_vm0, %v10078_v6  ;;  %10095 = vpow2.f32 %v5440_v40  ;;  %v5442_v57 = vmul.f32 1.442695, %v4672_v35  ;;  %v5444_v13 = vmul.f32 1.442695, %v4673_v51  ;;  %v13295_v48 = vadd.f32 %v13292_v3, %v537_v26 }
 0x29a   : > { %v5446_v54 = vmul.f32 1.442695, %v4674_v42  ;;  %6200 = vst.msk [vmem:[#allocation3 + $0x7c8] sm:$0xff] %vm492_vm0, %v10080_v53  ;;  %v5448_v14 = vmul.f32 1.442695, %v4675_v37  ;;  %v4676_v2 = vmul.f32 %v13057_v28, %v3661_v33  ;;  %v4677_v41 = vmul.f32 %v13060_v52, %v3661_v33  ;;  %v10082_v32 = vpop.eup %10081 }
 0x29b   : > { %v3665_v15 = vrot.slane %v2396_v38, %v11594_v58  ;;  %10097 = vpow2.f32 %v5442_v57  ;;  %v2403_v24 = vrot.slane %v2389_v62, %v11597_v60  ;;  %v2404_v19 = vcombine.high %v2396_v38, %v2396_v38  ;;  %v10084_v49 = vpop.eup %10083  ;;  %6201 = vst.msk [vmem:[#allocation3 + $0x7d0] sm:$0xff] %vm492_vm0, %v10082_v32  ;;  %v540_v32 = vld [vmem:[%s11502_s19 + $0x9c] sm:$0xf] }
 0x29c   : > { %10099 = vpow2.f32 %v5444_v13  ;;  %v5450_v17 = vmul.f32 1.442695, %v4676_v2  ;;  %v5452_v56 = vmul.f32 1.442695, %v4677_v41  ;;  %v10086_v43 = vpop.eup %10085  ;;  %6202 = vst.msk [vmem:[#allocation3 + $0x7d8] sm:$0xff] %vm492_vm0, %v10084_v49  ;;  %v13306_v33 = vadd.f32 %v13292_v3, %v538_v45 }
 0x29d   : > { %v4678_v40 = vmul.f32 %v13033_v55, %v3665_v15  ;;  %10101 = vpow2.f32 %v5446_v54  ;;  %v4679_v63 = vmul.f32 %v13036_v10, %v3665_v15  ;;  %v3669_v35 = vrot.slane %v2403_v24, %v11594_v58  ;;  %v10088_v42 = vpop.eup %10087  ;;  %6203 = vst.msk [vmem:[#allocation3 + $0x7e0] sm:$0xff] %vm492_vm0, %v10086_v43  ;;  %v539_v55 = vld [vmem:[%s11502_s19 + $0x98] sm:$0xf]  ;;  %v541_v45 = vld [vmem:[%s11502_s19 + $0xa0] sm:$0xf] }
 0x29e   : > { %v3673_v51 = vrot.slane %v2404_v19, %v11594_v58  ;;  %10103 = vpow2.f32 %v5448_v14  ;;  %v2405_v6 = vcombine.high %v2403_v24, %v2403_v24  ;;  %v10090_v38 = vpop.eup %10089  ;;  %6204 = vst.msk [vmem:[#allocation3 + $0x7e8] sm:$0xff] %vm492_vm0, %v10088_v42  ;;  %v730_v19 = vmin.f32 %v13295_v48, 20.0 }
 0x29f   : > { %v5454_v37 = vmul.f32 1.442695, %v4678_v40  ;;  %10105 = vpow2.f32 %v5450_v17  ;;  %v5456_v62 = vmul.f32 1.442695, %v4679_v63  ;;  %v4680_v10 = vmul.f32 %v13043_v18, %v3669_v35  ;;  %v10092_v53 = vpop.eup %10091  ;;  %6205 = vst.msk [vmem:[#allocation3 + $0x7f0] sm:$0xff] %vm492_vm0, %v10090_v38 }
 0x2a0   : > { %v4681_v26 = vmul.f32 %v13046_v8, %v3669_v35  ;;  %10107 = vpow2.f32 %v5452_v56  ;;  %v4682_v57 = vmul.f32 %v13049_v50, %v3673_v51  ;;  %v4683_v13 = vmul.f32 %v13052_v39, %v3673_v51  ;;  %6206 = vst.msk [vmem:[#allocation3 + $0x7f8] sm:$0xff] %vm492_vm0, %v10092_v53  ;;  %v542_v56 = vld [vmem:[%s11502_s19 + $0xa4] sm:$0xf] }
 0x2a1   : > { %v3677_v54 = vrot.slane %v2405_v6, %v11594_v58  ;;  %10109 = vpow2.f32 %v5454_v37  ;;  %v5458_v14 = vmul.f32 1.442695, %v4680_v10  ;;  %v13318_v18 = vadd.f32 %v13292_v3, %v539_v55  ;;  %v544_v37 = vld [vmem:[%s11502_s19 + $0xac] sm:$0xf] }
 0x2a2   : > { %v5460_v2 = vmul.f32 1.442695, %v4681_v26  ;;  %v10094_v8 = vpop.eup %10093  ;;  %10111 = vpow2.f32 %v5456_v62  ;;  %v5462_v41 = vmul.f32 1.442695, %v4682_v57  ;;  %v5464_v15 = vmul.f32 1.442695, %v4683_v13 }
 0x2a3   : > { %v4684_v50 = vmul.f32 %v13057_v28, %v3677_v54  ;;  %v10096_v39 = vpop.eup %10095  ;;  %6207 = vst.msk [vmem:[#allocation3 + $0x800] sm:$0xff] %vm492_vm0, %v10094_v8  ;;  %10113 = vpow2.f32 %v5458_v14  ;;  %v4685_v24 = vmul.f32 %v13060_v52, %v3677_v54  ;;  %v731_v17 = vmin.f32 %v13306_v33, 20.0  ;;  %v543_v52 = vld [vmem:[%s11502_s19 + $0xa8] sm:$0xf] }
 0x2a4   : > { %6208 = vst.msk [vmem:[#allocation3 + $0x808] sm:$0xff] %vm492_vm0, %v10096_v39  ;;  %10115 = vpow2.f32 %v5460_v2  ;;  %v1192_v43 = vadd.f32 1.0, %v13073_v47  ;;  %v13331_v63 = vadd.f32 %v13292_v3, %v540_v32  ;;  %v1201_v51 = vadd.f32 1.0, %v13082_v36  ;;  %v545_v2 = vld [vmem:[%s11502_s19 + $0xb0] sm:$0xf] }
 0x2a5   : > { %v5466_v49 = vmul.f32 1.442695, %v4684_v50  ;;  %v10098_v28 = vpop.eup %10097  ;;  %10117 = vpow2.f32 %v5462_v41  ;;  %v5468_v40 = vmul.f32 1.442695, %v4685_v24  ;;  %v732_v42 = vmin.f32 %v13318_v18, 20.0 }
 0x2a6   : > { %v10100_v35 = vpop.eup %10099  ;;  %6209 = vst.msk [vmem:[#allocation3 + $0x810] sm:$0xff] %vm492_vm0, %v10098_v28  ;;  %10119 = vpow2.f32 %v5464_v15  ;;  %v830_v55 = vmul.f32 1.442695, %v730_v19  ;;  %v13340_v38 = vadd.f32 %v13292_v3, %v541_v45  ;;  %v13343_v62 = vadd.f32 %v13292_v3, %v542_v56  ;;  %v546_v50 = vld [vmem:[%s11502_s19 + $0xb4] sm:$0xf] }
 0x2a7   : > { %v10102_v6 = vpop.eup %10101  ;;  %6210 = vst.msk [vmem:[#allocation3 + $0x818] sm:$0xff] %vm492_vm0, %v10100_v35  ;;  %10121 = vpow2.f32 %v5466_v49  ;;  %v832_v26 = vmul.f32 1.442695, %v731_v17  ;;  %v13347_v53 = vadd.f32 %v13292_v3, %v543_v52  ;;  %v1195_v13 = vmul.f32 -0.5, %v13073_v47  ;;  %v547_v52 = vld [vmem:[%s11502_s19 + $0xb8] sm:$0xf] }
 0x2a8   : > { %v10104_v10 = vpop.eup %10103  ;;  %6211 = vst.msk [vmem:[#allocation3 + $0x820] sm:$0xff] %vm492_vm0, %v10102_v6  ;;  %10123 = vpow2.f32 %v5468_v40  ;;  %v733_v54 = vmin.f32 %v13331_v63, 20.0  ;;  %v13353_v14 = vadd.f32 %v13292_v3, %v544_v37  ;;  %v834_v41 = vmul.f32 1.442695, %v732_v42 }
 0x2a9   : > { %v10106_v57 = vpop.eup %10105  ;;  %6212 = vst.msk [vmem:[#allocation3 + $0x828] sm:$0xff] %vm492_vm0, %v10104_v10  ;;  %10125 = vlog2.f32 %v1192_v43  ;;  %v734_v15 = vmin.f32 %v13340_v38, 20.0  ;;  %v1204_v39 = vmul.f32 -0.5, %v13082_v36  ;;  %v735_v24 = vmin.f32 %v13343_v62, 20.0 }
 0x2aa   : > { %v10108_v8 = vpop.eup %10107  ;;  %6213 = vst.msk [vmem:[#allocation3 + $0x830] sm:$0xff] %vm492_vm0, %v10106_v57  ;;  %10127 = vlog2.f32 %v1201_v51  ;;  %v736_v45 = vmin.f32 %v13347_v53, 20.0  ;;  %v13365_v49 = vadd.f32 %v13292_v3, %v545_v2  ;;  %v1196_v56 = vadd.f32 1.0, %v1195_v13 }
 0x2ab   : > { %v10110_v32 = vpop.eup %10109  ;;  %6214 = vst.msk [vmem:[#allocation3 + $0x838] sm:$0xff] %vm492_vm0, %v10108_v8  ;;  %10129 = vpow2.f32 %v830_v55  ;;  %v836_v28 = vmul.f32 1.442695, %v733_v54  ;;  %v737_v40 = vmin.f32 %v13353_v14, 20.0  ;;  %v13370_v43 = vadd.f32 %v13292_v3, %v546_v50 }
 0x2ac   : > { %v10112_v19 = vpop.eup %10111  ;;  %6215 = vst.msk [vmem:[#allocation3 + $0x840] sm:$0xff] %vm492_vm0, %v10110_v32  ;;  %10131 = vpow2.f32 %v832_v26  ;;  %v1198_v51 = vand.u32 2147483647, %v13073_v47  ;;  %v838_v42 = vmul.f32 1.442695, %v734_v15  ;;  %v738_v37 = vmin.f32 %v13365_v49, 20.0 }
 0x2ad   : > { %v10114_v17 = vpop.eup %10113  ;;  %6216 = vst.msk [vmem:[#allocation3 + $0x848] sm:$0xff] %vm492_vm0, %v10112_v19  ;;  %10133 = vpow2.f32 %v834_v41  ;;  %v1205_v55 = vadd.f32 1.0, %v1204_v39  ;;  %v1207_v10 = vand.u32 2147483647, %v13082_v36  ;;  %v840_v26 = vmul.f32 1.442695, %v735_v24 }
 0x2ae   : > { %v10116_v35 = vpop.eup %10115  ;;  %6217 = vst.msk [vmem:[#allocation3 + $0x850] sm:$0xff] %vm492_vm0, %v10114_v17  ;;  %v842_v13 = vmul.f32 1.442695, %v736_v45  ;;  %v739_v54 = vmin.f32 %v13370_v43, 20.0  ;;  %v13381_v2 = vadd.f32 %v13292_v3, %v547_v52  ;;  %10135 = vpow2.f32 %v836_v28  ;;  %v548_v39 = vld [vmem:[%s11502_s19 + $0xbc] sm:$0xf] }
 0x2af   : > { %v10118_v6 = vpop.eup %10117  ;;  %6218 = vst.msk [vmem:[#allocation3 + $0x858] sm:$0xff] %vm492_vm0, %v10116_v35  ;;  %v844_v41 = vmul.f32 1.442695, %v737_v40  ;;  %v1197_v50 = vmul.f32 %v13073_v47, %v1196_v56  ;;  %10137 = vpow2.f32 %v838_v42  ;;  %v846_v32 = vmul.f32 1.442695, %v738_v37 }
 0x2b0   : > { %v10120_v57 = vpop.eup %10119  ;;  %6219 = vst.msk [vmem:[#allocation3 + $0x860] sm:$0xff] %vm492_vm0, %v10118_v6  ;;  %vm13389_vm10 = vcmp.lt.f32.partialorder %v1198_v51, 0.0004427343  ;;  %v1206_v45 = vmul.f32 %v13082_v36, %v1205_v55  ;;  %vm13394_vm11 = vcmp.lt.f32.partialorder %v1207_v10, 0.0004427343  ;;  %10139 = vpow2.f32 %v840_v26 }
 0x2b1   : > { %v10122_v8 = vpop.eup %10121  ;;  %6220 = vst.msk [vmem:[#allocation3 + $0x868] sm:$0xff] %vm492_vm0, %v10120_v57  ;;  %10141 = vpow2.f32 %v842_v13  ;;  %v848_v47 = vmul.f32 1.442695, %v739_v54  ;;  %v740_v56 = vmin.f32 %v13381_v2, 20.0  ;;  %v13401_v51 = vadd.f32 %v13292_v3, %v548_v39 }
 0x2b2   : > { %v10124_v15 = vpop.eup %10123  ;;  %6221 = vst.msk [vmem:[#allocation3 + $0x870] sm:$0xff] %vm492_vm0, %v10122_v8  ;;  %10143 = vpow2.f32 %v844_v41  ;;  %vm666_vm15 = vcmp.gt.f32.partialorder %v13295_v48, 20.0  ;;  %vm667_vm1 = vcmp.gt.f32.partialorder %v13306_v33, 20.0  ;;  %vm668_vm3 = vcmp.gt.f32.partialorder %v13318_v18, 20.0 }
 0x2b3   : > { %v10126_v24 = vpop.eup %10125  ;;  %6222 = vst.msk [vmem:[#allocation3 + $0x878] sm:$0xff] %vm492_vm0, %v10124_v15  ;;  %10145 = vpow2.f32 %v846_v32  ;;  %v850_v41 = vmul.f32 1.442695, %v740_v56  ;;  %vm669_vm5 = vcmp.gt.f32.partialorder %v13331_v63, 20.0  ;;  %vm670_vm6 = vcmp.gt.f32.partialorder %v13340_v38, 20.0 }
 0x2b4   : > { %v10128_v28 = vpop.eup %10127  ;;  %v1194_v40 = vmul.f32 0.6931472, %v10126_v24  ;;  %10147 = vpow2.f32 %v848_v47 }
 0x2b5   : > { %v10130_v52 = vpop.eup %10129  ;;  %v1203_v35 = vmul.f32 0.6931472, %v10128_v28 }
 0x2b6   : > { %v10132_v36 = vpop.eup %10131  ;;  %v1200_v42 = vsel %vm13389_vm10, %v1197_v50, %v1194_v40  ;;  %v1210_v37 = vadd.f32 1.0, %v10130_v52  ;;  %v1213_v6 = vmul.f32 -0.5, %v10130_v52  ;;  %v1216_v24 = vand.u32 2147483647, %v10130_v52 }
 0x2b7   : > { %v13408_v55 = vsel %vm664_vm9, %v12991_v16, %v1200_v42  ;;  %v1209_v10 = vsel %vm13394_vm11, %v1206_v45, %v1203_v35  ;;  %v1219_v26 = vadd.f32 1.0, %v10132_v36  ;;  %v1222_v57 = vmul.f32 -0.5, %v10132_v36  ;;  %v13412_v13 = vpop.eup %10133 }
 0x2b8   : > { %16110 = vst [vmem:[#allocation63_spill] sm:$0xff] %v13408_v55  ;;  %v2412_v54 = vrot.slane %v13408_v55, %v11597_v60  ;;  %v13417_v8 = vsel %vm665_vm12, %v13000_v31, %v1209_v10  ;;  %10149 = vlog2.f32 %v1210_v37  ;;  %v1214_v16 = vadd.f32 1.0, %v1213_v6  ;;  %v13422_v19 = vpop.eup %10135 }
 0x2b9   : > { %16111 = vst [vmem:[#allocation64_spill] sm:$0xff] %v13417_v8  ;;  %v2436_v15 = vrot.slane %v13417_v8, %v11597_v60  ;;  %v1223_v50 = vadd.f32 1.0, %v1222_v57  ;;  %10151 = vlog2.f32 %v1219_v26  ;;  %v1225_v17 = vand.u32 2147483647, %v10132_v36  ;;  %v13428_v40 = vpop.eup %10137 }
 0x2ba   : > { %v2420_v32 = vrot.slane %v2412_v54, %v11597_v60  ;;  %v2413_v39 = vcombine.high %v2412_v54, %v2412_v54  ;;  %v1228_v28 = vadd.f32 1.0, %v13412_v13  ;;  %10153 = vpow2.f32 %v850_v41  ;;  %v13432_v42 = vpop.eup %10139  ;;  %v13443_v54 = vld [vmem:[#allocation13] sm:$0xff] }
 0x2bb   : > { %v13425_v45 = vrot.slane %v2436_v15, %v11597_v60  ;;  %v2437_v31 = vcombine.high %v2436_v15, %v2436_v15  ;;  %v13437_v10 = vmul.f32 %v10130_v52, %v1214_v16  ;;  %v13439_v26 = vmul.f32 %v10132_v36, %v1223_v50  ;;  %v13441_v57 = vpop.eup %10141 }
 0x2bc   : > { %v3681_v47 = vrot.slane %v2420_v32, %v11594_v58  ;;  %v2427_v56 = vrot.slane %v2413_v39, %v11597_v60  ;;  %v2428_v35 = vcombine.high %v2420_v32, %v2420_v32  ;;  %v13446_v39 = vld [vmem:[#allocation13 + $0x8] sm:$0xff]  ;;  %v13451_v55 = vpop.eup %10143  ;;  %vm13456_vm13 = vcmp.lt.f32.partialorder %v1216_v24, 0.0004427343 }
 0x2bd   : > { %v3697_v37 = vrot.slane %v13425_v45, %v11594_v58  ;;  %v2451_v6 = vrot.slane %v2437_v31, %v11597_v60  ;;  %v2452_v16 = vcombine.high %v13425_v45, %v13425_v45  ;;  %vm13460_vm14 = vcmp.lt.f32.partialorder %v1225_v17, 0.0004427343  ;;  %v13474_v45 = vld [vmem:[#allocation13 + $0x20] sm:$0xff] }
 0x2be   : > { %v4686_v15 = vmul.f32 %v13443_v54, %v3681_v47  ;;  %v4687_v41 = vmul.f32 %v13446_v39, %v3681_v47  ;;  %v3685_v32 = vrot.slane %v2427_v56, %v11594_v58  ;;  %v3689_v8 = vrot.slane %v2428_v35, %v11594_v58  ;;  %v13464_v47 = vpop.eup %10145 }
 0x2bf   : > { %v2429_v52 = vcombine.high %v2427_v56, %v2427_v56  ;;  %v3701_v36 = vrot.slane %v2451_v6, %v11594_v58  ;;  %10155 = vlog2.f32 %v1228_v28  ;;  %v13477_v28 = vld [vmem:[#allocation13 + $0x28] sm:$0xff]  ;;  %v4694_v5 = vmul.f32 %v13443_v54, %v3697_v37  ;;  %v13482_v22 = vpop.eup %10147 }
 0x2c0   : > { %v5470_v35 = vmul.f32 1.442695, %v4686_v15  ;;  %v5472_v21 = vmul.f32 1.442695, %v4687_v41  ;;  %v4688_v56 = vmul.f32 %v13466_v23, %v3685_v32  ;;  %v4689_v24 = vmul.f32 %v13469_v1, %v3685_v32 }
 0x2c1   : > { %v4690_v17 = vmul.f32 %v13474_v45, %v3689_v8  ;;  %v4691_v15 = vmul.f32 %v13477_v28, %v3689_v8  ;;  %v3693_v41 = vrot.slane %v2429_v52, %v11594_v58  ;;  %v4695_v20 = vmul.f32 %v13446_v39, %v3697_v37  ;;  %v13488_v52 = vld [vmem:[#allocation13 + $0x38] sm:$0xff] }
 0x2c2   : > { %10157 = vpow2.f32 %v5470_v35  ;;  %v5474_v32 = vmul.f32 1.442695, %v4688_v56  ;;  %v5476_v30 = vmul.f32 1.442695, %v4689_v24  ;;  %v10150_v12 = vpop.eup %10149  ;;  %v4696_v35 = vmul.f32 %v13466_v23, %v3701_v36 }
 0x2c3   : > { %10159 = vpow2.f32 %v5472_v21  ;;  %v5478_v61 = vmul.f32 1.442695, %v4690_v17  ;;  %v5480_v9 = vmul.f32 1.442695, %v4691_v15  ;;  %v4692_v44 = vmul.f32 %v13485_v27, %v3693_v41  ;;  %v10152_v8 = vpop.eup %10151 }
 0x2c4   : > { %10161 = vpow2.f32 %v5474_v32  ;;  %v4693_v7 = vmul.f32 %v13488_v52, %v3693_v41  ;;  %v4697_v56 = vmul.f32 %v13469_v1, %v3701_v36  ;;  %v3705_v21 = vrot.slane %v2452_v16, %v11594_v58  ;;  %v13494_v17 = vpop.eup %10153 }
 0x2c5   : > { %10163 = vpow2.f32 %v5476_v30  ;;  %v5482_v37 = vmul.f32 1.442695, %v4692_v44  ;;  %v2453_v24 = vcombine.high %v2451_v6, %v2451_v6  ;;  %v5486_v4 = vmul.f32 1.442695, %v4694_v5  ;;  %v549_v5 = vld [vmem:[%s11502_s19 + $0xc0] sm:$0xf] }
 0x2c6   : > { %10165 = vpow2.f32 %v5478_v61  ;;  %v5484_v15 = vmul.f32 1.442695, %v4693_v7  ;;  %v5488_v59 = vmul.f32 1.442695, %v4695_v20  ;;  %v4698_v32 = vmul.f32 %v13474_v45, %v3705_v21 }
 0x2c7   : > { %10167 = vpow2.f32 %v5480_v9  ;;  %v4699_v41 = vmul.f32 %v13477_v28, %v3705_v21  ;;  %v3709_v29 = vrot.slane %v2453_v24, %v11594_v58  ;;  %v5490_v30 = vmul.f32 1.442695, %v4696_v35 }
 0x2c8   : > { %10169 = vpow2.f32 %v5482_v37  ;;  %v1212_v44 = vmul.f32 0.6931472, %v10150_v12  ;;  %v1221_v36 = vmul.f32 0.6931472, %v10152_v8  ;;  %v5492_v6 = vmul.f32 1.442695, %v4697_v56 }
 0x2c9   : > { %v10156_v16 = vpop.eup %10155  ;;  %10171 = vpow2.f32 %v5484_v15  ;;  %v5494_v25 = vmul.f32 1.442695, %v4698_v32  ;;  %v4700_v7 = vmul.f32 %v13485_v27, %v3709_v29  ;;  %v4701_v9 = vmul.f32 %v13488_v52, %v3709_v29 }
 0x2ca   : > { %10173 = vpow2.f32 %v5486_v4  ;;  %v1218_v61 = vsel %vm13456_vm13, %v13437_v10, %v1212_v44  ;;  %v1227_v20 = vsel %vm13460_vm14, %v13439_v26, %v1221_v36  ;;  %v5496_v12 = vmul.f32 1.442695, %v4699_v41 }
 0x2cb   : > { %10175 = vpow2.f32 %v5488_v59  ;;  %v13511_v8 = vsel %vm666_vm15, %v13295_v48, %v1218_v61  ;;  %v13516_v29 = vsel %vm667_vm1, %v13306_v33, %v1227_v20  ;;  %v5498_v10 = vmul.f32 1.442695, %v4700_v7 }
 0x2cc   : > { %v10158_v4 = vpop.eup %10157  ;;  %10177 = vpow2.f32 %v5490_v30  ;;  %v2460_v50 = vrot.slane %v13511_v8, %v11597_v60  ;;  %v2484_v59 = vrot.slane %v13516_v29, %v11597_v60  ;;  %v5500_v48 = vmul.f32 1.442695, %v4701_v9 }
 0x2cd   : > { %v10160_v26 = vpop.eup %10159  ;;  %6223 = vst.msk [vmem:[#allocation3 + $0x880] sm:$0xff] %vm492_vm0, %v10158_v4  ;;  %10179 = vpow2.f32 %v5492_v6  ;;  %v1231_v31 = vmul.f32 -0.5, %v13412_v13  ;;  %v13525_v35 = vadd.f32 %v13292_v3, %v549_v5  ;;  %v13529_v21 = vmul.f32 0.6931472, %v10156_v16 }
 0x2ce   : > { %v10162_v33 = vpop.eup %10161  ;;  %6224 = vst.msk [vmem:[#allocation3 + $0x888] sm:$0xff] %vm492_vm0, %v10160_v26  ;;  %10181 = vpow2.f32 %v5494_v25  ;;  %v2468_v56 = vrot.slane %v2460_v50, %v11597_v60  ;;  %v2461_v37 = vcombine.high %v2460_v50, %v2460_v50  ;;  %v2492_v15 = vrot.slane %v2484_v59, %v11597_v60 }
 0x2cf   : > { %v10164_v24 = vpop.eup %10163  ;;  %6225 = vst.msk [vmem:[#allocation3 + $0x890] sm:$0xff] %vm492_vm0, %v10162_v33  ;;  %10183 = vpow2.f32 %v5496_v12  ;;  %v2485_v32 = vcombine.high %v2484_v59, %v2484_v59  ;;  %v1234_v41 = vand.u32 2147483647, %v13412_v13  ;;  %v13540_v7 = vadd.f32 1.0, %v1231_v31 }
 0x2d0   : > { %v10166_v3 = vpop.eup %10165  ;;  %6226 = vst.msk [vmem:[#allocation3 + $0x898] sm:$0xff] %vm492_vm0, %v10164_v24  ;;  %10185 = vpow2.f32 %v5498_v10  ;;  %v3713_v25 = vrot.slane %v2468_v56, %v11594_v58  ;;  %v2475_v30 = vrot.slane %v2461_v37, %v11597_v60  ;;  %v2476_v44 = vcombine.high %v2468_v56, %v2468_v56 }
 0x2d1   : > { %v10168_v36 = vpop.eup %10167  ;;  %6227 = vst.msk [vmem:[#allocation3 + $0x8a0] sm:$0xff] %vm492_vm0, %v10166_v3  ;;  %10187 = vpow2.f32 %v5500_v48  ;;  %v3729_v16 = vrot.slane %v2492_v15, %v11594_v58  ;;  %v2499_v6 = vrot.slane %v2485_v32, %v11597_v60  ;;  %v2500_v59 = vcombine.high %v2492_v15, %v2492_v15 }
 0x2d2   : > { %v10170_v9 = vpop.eup %10169  ;;  %6228 = vst.msk [vmem:[#allocation3 + $0x8a8] sm:$0xff] %vm492_vm0, %v10168_v36  ;;  %v4702_v61 = vmul.f32 %v13443_v54, %v3713_v25  ;;  %v4703_v20 = vmul.f32 %v13446_v39, %v3713_v25  ;;  %v3717_v5 = vrot.slane %v2475_v30, %v11594_v58  ;;  %v3721_v12 = vrot.slane %v2476_v44, %v11594_v58 }
 0x2d3   : > { %v10172_v4 = vpop.eup %10171  ;;  %6229 = vst.msk [vmem:[#allocation3 + $0x8b0] sm:$0xff] %vm492_vm0, %v10170_v9  ;;  %v2477_v10 = vcombine.high %v2475_v30, %v2475_v30  ;;  %v3733_v50 = vrot.slane %v2499_v6, %v11594_v58  ;;  %vm13549_vm2 = vcmp.lt.f32.partialorder %v1234_v41, 0.0004427343  ;;  %v4710_v3 = vmul.f32 %v13443_v54, %v3729_v16 }
 0x2d4   : > { %v10174_v48 = vpop.eup %10173  ;;  %6230 = vst.msk [vmem:[#allocation3 + $0x8b8] sm:$0xff] %vm492_vm0, %v10172_v4  ;;  %v5502_v31 = vmul.f32 1.442695, %v4702_v61  ;;  %v5504_v33 = vmul.f32 1.442695, %v4703_v20  ;;  %v4704_v56 = vmul.f32 %v13466_v23, %v3717_v5  ;;  %v4705_v37 = vmul.f32 %v13469_v1, %v3717_v5 }
 0x2d5   : > { %v10176_v24 = vpop.eup %10175  ;;  %6231 = vst.msk [vmem:[#allocation3 + $0x8c0] sm:$0xff] %vm492_vm0, %v10174_v48  ;;  %v4706_v32 = vmul.f32 %v13474_v45, %v3721_v12  ;;  %v4707_v15 = vmul.f32 %v13477_v28, %v3721_v12  ;;  %v3725_v41 = vrot.slane %v2477_v10, %v11594_v58  ;;  %v4711_v36 = vmul.f32 %v13446_v39, %v3729_v16 }
 0x2d6   : > { %v10178_v25 = vpop.eup %10177  ;;  %6232 = vst.msk [vmem:[#allocation3 + $0x8c8] sm:$0xff] %vm492_vm0, %v10176_v24  ;;  %10189 = vpow2.f32 %v5502_v31  ;;  %v5506_v30 = vmul.f32 1.442695, %v4704_v56  ;;  %v5508_v44 = vmul.f32 1.442695, %v4705_v37  ;;  %v4712_v10 = vmul.f32 %v13466_v23, %v3733_v50 }
 0x2d7   : > { %v10180_v9 = vpop.eup %10179  ;;  %6233 = vst.msk [vmem:[#allocation3 + $0x8d0] sm:$0xff] %vm492_vm0, %v10178_v25  ;;  %10191 = vpow2.f32 %v5504_v33  ;;  %v5510_v61 = vmul.f32 1.442695, %v4706_v32  ;;  %v5512_v20 = vmul.f32 1.442695, %v4707_v15  ;;  %v4708_v5 = vmul.f32 %v13485_v27, %v3725_v41 }
 0x2d8   : > { %v10182_v12 = vpop.eup %10181  ;;  %6234 = vst.msk [vmem:[#allocation3 + $0x8d8] sm:$0xff] %vm492_vm0, %v10180_v9  ;;  %10193 = vpow2.f32 %v5506_v30  ;;  %v4709_v4 = vmul.f32 %v13488_v52, %v3725_v41  ;;  %v4713_v48 = vmul.f32 %v13469_v1, %v3733_v50  ;;  %v3737_v33 = vrot.slane %v2500_v59, %v11594_v58 }
 0x2d9   : > { %v10184_v31 = vpop.eup %10183  ;;  %6235 = vst.msk [vmem:[#allocation3 + $0x8e0] sm:$0xff] %vm492_vm0, %v10182_v12  ;;  %10195 = vpow2.f32 %v5508_v44  ;;  %v5514_v16 = vmul.f32 1.442695, %v4708_v5  ;;  %v2501_v56 = vcombine.high %v2499_v6, %v2499_v6  ;;  %v5518_v32 = vmul.f32 1.442695, %v4710_v3 }
 0x2da   : > { %v10186_v37 = vpop.eup %10185  ;;  %6236 = vst.msk [vmem:[#allocation3 + $0x8e8] sm:$0xff] %vm492_vm0, %v10184_v31  ;;  %10197 = vpow2.f32 %v5510_v61  ;;  %v5516_v24 = vmul.f32 1.442695, %v4709_v4  ;;  %v5520_v15 = vmul.f32 1.442695, %v4711_v36  ;;  %v4714_v50 = vmul.f32 %v13474_v45, %v3737_v33 }
 0x2db   : > { %v10188_v41 = vpop.eup %10187  ;;  %6237 = vst.msk [vmem:[#allocation3 + $0x8f0] sm:$0xff] %vm492_vm0, %v10186_v37  ;;  %10199 = vpow2.f32 %v5512_v20  ;;  %v4715_v25 = vmul.f32 %v13477_v28, %v3737_v33  ;;  %v3741_v30 = vrot.slane %v2501_v56, %v11594_v58  ;;  %v5522_v6 = vmul.f32 1.442695, %v4712_v10 }
 0x2dc   : > { %6238 = vst.msk [vmem:[#allocation3 + $0x8f8] sm:$0xff] %vm492_vm0, %v10188_v41  ;;  %10201 = vpow2.f32 %v5514_v16  ;;  %v1233_v59 = vmul.f32 %v13412_v13, %v13540_v7  ;;  %v5524_v3 = vmul.f32 1.442695, %v4713_v48  ;;  %v741_v36 = vmin.f32 %v13401_v51, 20.0 }
 0x2dd   : > { %10203 = vpow2.f32 %v5516_v24  ;;  %v4716_v44 = vmul.f32 %v13485_v27, %v3741_v30  ;;  %v5526_v9 = vmul.f32 1.442695, %v4714_v50  ;;  %v4717_v61 = vmul.f32 %v13488_v52, %v3741_v30 }
 0x2de   : > { %10205 = vpow2.f32 %v5518_v32  ;;  %v1236_v20 = vsel %vm13549_vm2, %v1233_v59, %v13529_v21  ;;  %v5528_v5 = vmul.f32 1.442695, %v4715_v25  ;;  %v742_v13 = vmin.f32 %v13525_v35, 20.0 }
 0x2df   : > { %10207 = vpow2.f32 %v5520_v15  ;;  %v13587_v12 = vsel %vm668_vm3, %v13318_v18, %v1236_v20  ;;  %v5530_v4 = vmul.f32 1.442695, %v4716_v44  ;;  %v5532_v31 = vmul.f32 1.442695, %v4717_v61 }
 0x2e0   : > { %v10190_v7 = vpop.eup %10189  ;;  %10209 = vpow2.f32 %v5522_v6  ;;  %v2508_v10 = vrot.slane %v13587_v12, %v11597_v60  ;;  %v1240_v21 = vmul.f32 -0.5, %v13422_v19  ;;  %v13596_v33 = vmul.f32 1.442695, %v741_v36 }
 0x2e1   : > { %v10192_v48 = vpop.eup %10191  ;;  %6239 = vst.msk [vmem:[#allocation3 + $0x900] sm:$0xff] %vm492_vm0, %v10190_v7  ;;  %10211 = vpow2.f32 %v5524_v3  ;;  %v1237_v37 = vadd.f32 1.0, %v13422_v19  ;;  %v1243_v24 = vand.u32 2147483647, %v13422_v19  ;;  %v13601_v32 = vmul.f32 1.442695, %v742_v13 }
 0x2e2   : > { %v10194_v26 = vpop.eup %10193  ;;  %6240 = vst.msk [vmem:[#allocation3 + $0x908] sm:$0xff] %vm492_vm0, %v10192_v48  ;;  %10213 = vpow2.f32 %v5526_v9  ;;  %v2516_v18 = vrot.slane %v2508_v10, %v11597_v60  ;;  %v2509_v16 = vcombine.high %v2508_v10, %v2508_v10  ;;  %v1241_v6 = vadd.f32 1.0, %v1240_v21 }
 0x2e3   : > { %v10196_v56 = vpop.eup %10195  ;;  %6241 = vst.msk [vmem:[#allocation3 + $0x910] sm:$0xff] %vm492_vm0, %v10194_v26  ;;  %10215 = vpow2.f32 %v5528_v5  ;;  %v1246_v59 = vadd.f32 1.0, %v13428_v40  ;;  %v1249_v3 = vmul.f32 -0.5, %v13428_v40  ;;  %v1252_v7 = vand.u32 2147483647, %v13428_v40 }
 0x2e4   : > { %v10198_v15 = vpop.eup %10197  ;;  %6242 = vst.msk [vmem:[#allocation3 + $0x918] sm:$0xff] %vm492_vm0, %v10196_v56  ;;  %10217 = vpow2.f32 %v5530_v4  ;;  %v3745_v41 = vrot.slane %v2516_v18, %v11594_v58  ;;  %v2523_v50 = vrot.slane %v2509_v16, %v11597_v60  ;;  %v2524_v25 = vcombine.high %v2516_v18, %v2516_v18 }
 0x2e5   : > { %v10200_v30 = vpop.eup %10199  ;;  %6243 = vst.msk [vmem:[#allocation3 + $0x920] sm:$0xff] %vm492_vm0, %v10198_v15  ;;  %10219 = vpow2.f32 %v5532_v31  ;;  %v1258_v4 = vmul.f32 -0.5, %v13432_v42  ;;  %vm13624_vm4 = vcmp.lt.f32.partialorder %v1243_v24, 0.0004427343  ;;  %vm13640_vm7 = vcmp.lt.f32.partialorder %v1252_v7, 0.0004427343 }
 0x2e6   : > { %v10202_v44 = vpop.eup %10201  ;;  %6244 = vst.msk [vmem:[#allocation3 + $0x928] sm:$0xff] %vm492_vm0, %v10200_v30  ;;  %v4718_v36 = vmul.f32 %v13443_v54, %v3745_v41  ;;  %v4719_v9 = vmul.f32 %v13446_v39, %v3745_v41  ;;  %v3749_v61 = vrot.slane %v2523_v50, %v11594_v58  ;;  %v3753_v20 = vrot.slane %v2524_v25, %v11594_v58 }
 0x2e7   : > { %v10204_v5 = vpop.eup %10203  ;;  %6245 = vst.msk [vmem:[#allocation3 + $0x930] sm:$0xff] %vm492_vm0, %v10202_v44  ;;  %v2525_v13 = vcombine.high %v2523_v50, %v2523_v50  ;;  %10221 = vlog2.f32 %v1237_v37  ;;  %v1250_v30 = vadd.f32 1.0, %v1249_v3  ;;  %vm671_vm9 = vcmp.gt.f32.partialorder %v13343_v62, 20.0 }
 0x2e8   : > { %v10206_v10 = vpop.eup %10205  ;;  %6246 = vst.msk [vmem:[#allocation3 + $0x938] sm:$0xff] %vm492_vm0, %v10204_v5  ;;  %v5534_v48 = vmul.f32 1.442695, %v4718_v36  ;;  %v5536_v31 = vmul.f32 1.442695, %v4719_v9  ;;  %v4720_v21 = vmul.f32 %v13466_v23, %v3749_v61  ;;  %v4721_v26 = vmul.f32 %v13469_v1, %v3749_v61 }
 0x2e9   : > { %v10208_v18 = vpop.eup %10207  ;;  %6247 = vst.msk [vmem:[#allocation3 + $0x940] sm:$0xff] %vm492_vm0, %v10206_v10  ;;  %v4722_v16 = vmul.f32 %v13474_v45, %v3753_v20  ;;  %v4723_v56 = vmul.f32 %v13477_v28, %v3753_v20  ;;  %v3757_v37 = vrot.slane %v2525_v13, %v11594_v58  ;;  %10223 = vlog2.f32 %v1246_v59 }
 0x2ea   : > { %v10210_v41 = vpop.eup %10209  ;;  %6248 = vst.msk [vmem:[#allocation3 + $0x948] sm:$0xff] %vm492_vm0, %v10208_v18  ;;  %10225 = vpow2.f32 %v5534_v48  ;;  %v5538_v50 = vmul.f32 1.442695, %v4720_v21  ;;  %v5540_v25 = vmul.f32 1.442695, %v4721_v26  ;;  %v1259_v20 = vadd.f32 1.0, %v1258_v4 }
 0x2eb   : > { %v10212_v44 = vpop.eup %10211  ;;  %6249 = vst.msk [vmem:[#allocation3 + $0x950] sm:$0xff] %vm492_vm0, %v10210_v41  ;;  %10227 = vpow2.f32 %v5536_v31  ;;  %v5542_v36 = vmul.f32 1.442695, %v4722_v16  ;;  %v5544_v9 = vmul.f32 1.442695, %v4723_v56  ;;  %v4724_v24 = vmul.f32 %v13485_v27, %v3757_v37 }
 0x2ec   : > { %v10214_v61 = vpop.eup %10213  ;;  %6250 = vst.msk [vmem:[#allocation3 + $0x958] sm:$0xff] %vm492_vm0, %v10212_v44  ;;  %10229 = vpow2.f32 %v5538_v50  ;;  %v4725_v59 = vmul.f32 %v13488_v52, %v3757_v37  ;;  %v1267_v5 = vmul.f32 -0.5, %v13441_v57  ;;  %v1242_v10 = vmul.f32 %v13422_v19, %v1241_v6 }
 0x2ed   : > { %v10216_v3 = vpop.eup %10215  ;;  %6251 = vst.msk [vmem:[#allocation3 + $0x960] sm:$0xff] %vm492_vm0, %v10214_v61  ;;  %10231 = vpow2.f32 %v5540_v25  ;;  %v5546_v13 = vmul.f32 1.442695, %v4724_v24  ;;  %v1255_v48 = vadd.f32 1.0, %v13432_v42  ;;  %v1276_v4 = vmul.f32 -0.5, %v13451_v55 }
 0x2ee   : > { %v10218_v31 = vpop.eup %10217  ;;  %6252 = vst.msk [vmem:[#allocation3 + $0x968] sm:$0xff] %vm492_vm0, %v10216_v3  ;;  %10233 = vpow2.f32 %v5542_v36  ;;  %v5548_v21 = vmul.f32 1.442695, %v4725_v59  ;;  %v1251_v16 = vmul.f32 %v13428_v40, %v1250_v30  ;;  %v1261_v19 = vand.u32 2147483647, %v13432_v42 }
 0x2ef   : > { %v10220_v18 = vpop.eup %10219  ;;  %6253 = vst.msk [vmem:[#allocation3 + $0x970] sm:$0xff] %vm492_vm0, %v10218_v31  ;;  %10235 = vpow2.f32 %v5544_v9  ;;  %v1264_v6 = vadd.f32 1.0, %v13441_v57  ;;  %v13651_v7 = vmul.f32 %v13432_v42, %v1259_v20  ;;  %v1268_v56 = vadd.f32 1.0, %v1267_v5 }
 0x2f0   : > { %6254 = vst.msk [vmem:[#allocation3 + $0x978] sm:$0xff] %vm492_vm0, %v10220_v18  ;;  %10237 = vpow2.f32 %v5546_v13  ;;  %v1273_v37 = vadd.f32 1.0, %v13451_v55  ;;  %v1270_v50 = vand.u32 2147483647, %v13441_v57  ;;  %v1282_v25 = vadd.f32 1.0, %v13464_v47 }
 0x2f1   : > { %v10222_v41 = vpop.eup %10221  ;;  %10239 = vpow2.f32 %v5548_v21  ;;  %v1285_v40 = vmul.f32 -0.5, %v13464_v47  ;;  %v1277_v44 = vadd.f32 1.0, %v1276_v4  ;;  %v1291_v36 = vadd.f32 1.0, %v13482_v22 }
 0x2f2   : > { %v1239_v30 = vmul.f32 0.6931472, %v10222_v41  ;;  %10241 = vlog2.f32 %v1255_v48  ;;  %v1279_v24 = vand.u32 2147483647, %v13451_v55  ;;  %v1294_v61 = vmul.f32 -0.5, %v13482_v22 }
 0x2f3   : > { %v10224_v9 = vpop.eup %10223  ;;  %10243 = vlog2.f32 %v1264_v6  ;;  %v1300_v59 = vadd.f32 1.0, %v13494_v17  ;;  %v13664_v13 = vmul.f32 %v13441_v57, %v1268_v56  ;;  %v1286_v21 = vadd.f32 1.0, %v1285_v40 }
 0x2f4   : > { %v10226_v20 = vpop.eup %10225  ;;  %v1245_v5 = vsel %vm13624_vm4, %v1242_v10, %v1239_v30  ;;  %v1248_v3 = vmul.f32 0.6931472, %v10224_v9  ;;  %10245 = vlog2.f32 %v1273_v37  ;;  %v1295_v4 = vadd.f32 1.0, %v1294_v61 }
 0x2f5   : > { %v10228_v48 = vpop.eup %10227  ;;  %6255 = vst.msk [vmem:[#allocation3 + $0x980] sm:$0xff] %vm492_vm0, %v10226_v20  ;;  %v13670_v31 = vsel %vm669_vm5, %v13331_v63, %v1245_v5  ;;  %10247 = vlog2.f32 %v1282_v25  ;;  %v1303_v6 = vmul.f32 -0.5, %v13494_v17  ;;  %v13685_v37 = vmul.f32 %v13451_v55, %v1277_v44 }
 0x2f6   : > { %v10230_v18 = vpop.eup %10229  ;;  %6256 = vst.msk [vmem:[#allocation3 + $0x988] sm:$0xff] %vm492_vm0, %v10228_v48  ;;  %v2532_v15 = vrot.slane %v13670_v31, %v11597_v60  ;;  %v1254_v10 = vsel %vm13640_vm7, %v1251_v16, %v1248_v3  ;;  %10249 = vlog2.f32 %v1291_v36  ;;  %v1288_v41 = vand.u32 2147483647, %v13464_v47 }
 0x2f7   : > { %v10232_v56 = vpop.eup %10231  ;;  %6257 = vst.msk [vmem:[#allocation3 + $0x990] sm:$0xff] %vm492_vm0, %v10230_v18  ;;  %v13682_v63 = vsel %vm670_vm6, %v13340_v38, %v1254_v10  ;;  %10251 = vlog2.f32 %v1300_v59  ;;  %v1304_v30 = vadd.f32 1.0, %v1303_v6  ;;  %v13694_v38 = vmul.f32 %v13464_v47, %v1286_v21 }
 0x2f8   : > { %16122 = vst [vmem:[#allocation65_spill] sm:$0xff] %v13682_v63  ;;  %v10234_v25 = vpop.eup %10233  ;;  %6258 = vst.msk [vmem:[#allocation3 + $0x998] sm:$0xff] %vm492_vm0, %v10232_v56  ;;  %v2540_v26 = vrot.slane %v2532_v15, %v11597_v60  ;;  %v2533_v16 = vcombine.high %v2532_v15, %v2532_v15  ;;  %v2556_v40 = vrot.slane %v13682_v63, %v11597_v60  ;;  %10253 = vpow2.f32 %v13596_v33 }
 0x2f9   : > { %v10236_v36 = vpop.eup %10235  ;;  %6259 = vst.msk [vmem:[#allocation3 + $0x9a0] sm:$0xff] %vm492_vm0, %v10234_v25  ;;  %v13697_v44 = vmul.f32 %v13482_v22, %v1295_v4  ;;  %vm13708_vm8 = vcmp.lt.f32.partialorder %v1261_v19, 0.0004427343  ;;  %v13713_v33 = vmul.f32 %v13494_v17, %v1304_v30  ;;  %10255 = vpow2.f32 %v13601_v32 }
 0x2fa   : > { %v10238_v61 = vpop.eup %10237  ;;  %6260 = vst.msk [vmem:[#allocation3 + $0x9a8] sm:$0xff] %vm492_vm0, %v10236_v36  ;;  %v3761_v59 = vrot.slane %v2540_v26, %v11594_v58  ;;  %v2547_v20 = vrot.slane %v2533_v16, %v11597_v60  ;;  %v2548_v5 = vcombine.high %v2540_v26, %v2540_v26  ;;  %v2564_v3 = vrot.slane %v2556_v40, %v11597_v60 }
 0x2fb   : > { %v10240_v48 = vpop.eup %10239  ;;  %6261 = vst.msk [vmem:[#allocation3 + $0x9b0] sm:$0xff] %vm492_vm0, %v10238_v61  ;;  %v2557_v21 = vcombine.high %v2556_v40, %v2556_v40  ;;  %vm13740_vm10 = vcmp.lt.f32.partialorder %v1270_v50, 0.0004427343  ;;  %vm13746_vm11 = vcmp.lt.f32.partialorder %v1279_v24, 0.0004427343  ;;  %vm672_vm12 = vcmp.gt.f32.partialorder %v13347_v53, 20.0 }
 0x2fc   : > { %v10242_v15 = vpop.eup %10241  ;;  %6262 = vst.msk [vmem:[#allocation3 + $0x9b8] sm:$0xff] %vm492_vm0, %v10240_v48  ;;  %v4726_v10 = vmul.f32 %v13443_v54, %v3761_v59  ;;  %v4727_v6 = vmul.f32 %v13446_v39, %v3761_v59  ;;  %v3765_v42 = vrot.slane %v2547_v20, %v11594_v58  ;;  %v3769_v19 = vrot.slane %v2548_v5, %v11594_v58 }
 0x2fd   : > { %v13722_v56 = vpop.eup %10243  ;;  %v2549_v25 = vcombine.high %v2547_v20, %v2547_v20  ;;  %v3777_v26 = vrot.slane %v2564_v3, %v11594_v58  ;;  %v2571_v16 = vrot.slane %v2557_v21, %v11597_v60  ;;  %v2572_v40 = vcombine.high %v2564_v3, %v2564_v3 }
 0x2fe   : > { %v10246_v32 = vpop.eup %10245  ;;  %v5550_v30 = vmul.f32 1.442695, %v4726_v10  ;;  %v5552_v36 = vmul.f32 1.442695, %v4727_v6  ;;  %v4728_v61 = vmul.f32 %v13466_v23, %v3765_v42  ;;  %v4729_v48 = vmul.f32 %v13469_v1, %v3765_v42 }
 0x2ff   : > { %v13729_v59 = vpop.eup %10247  ;;  %v4730_v5 = vmul.f32 %v13474_v45, %v3769_v19  ;;  %v4731_v20 = vmul.f32 %v13477_v28, %v3769_v19  ;;  %v3773_v18 = vrot.slane %v2549_v25, %v11594_v58  ;;  %v4734_v21 = vmul.f32 %v13443_v54, %v3777_v26 }
 0x300   : > { %v13735_v3 = vpop.eup %10249  ;;  %10257 = vpow2.f32 %v5550_v30  ;;  %v5554_v10 = vmul.f32 1.442695, %v4728_v61  ;;  %v5556_v6 = vmul.f32 1.442695, %v4729_v48  ;;  %v4735_v9 = vmul.f32 %v13446_v39, %v3777_v26 }
 0x301   : > { %v13750_v25 = vpop.eup %10251  ;;  %10259 = vpow2.f32 %v5552_v36  ;;  %v5558_v30 = vmul.f32 1.442695, %v4730_v5  ;;  %v5560_v61 = vmul.f32 1.442695, %v4731_v20  ;;  %v4732_v48 = vmul.f32 %v13485_v27, %v3773_v18 }
 0x302   : > { %10261 = vpow2.f32 %v5554_v10  ;;  %v4733_v57 = vmul.f32 %v13488_v52, %v3773_v18  ;;  %v5566_v50 = vmul.f32 1.442695, %v4734_v21  ;;  %v5568_v26 = vmul.f32 1.442695, %v4735_v9  ;;  %v13762_v24 = vpop.eup %10253 }
 0x303   : > { %vm673_vm13 = vcmp.gt.f32.partialorder %v13353_v14, 20.0  ;;  %vm13758_vm14 = vcmp.lt.f32.partialorder %v1288_v41, 0.0004427343  ;;  %10263 = vpow2.f32 %v5556_v6  ;;  %v5562_v36 = vmul.f32 1.442695, %v4732_v48  ;;  %v13766_v10 = vpop.eup %10255 }
 0x304   : > { %v3781_v5 = vrot.slane %v2571_v16, %v11594_v58  ;;  %v3785_v20 = vrot.slane %v2572_v40, %v11594_v58  ;;  %10265 = vpow2.f32 %v5558_v30  ;;  %v5564_v18 = vmul.f32 1.442695, %v4733_v57 }
 0x305   : > { %v2573_v21 = vcombine.high %v2571_v16, %v2571_v16  ;;  %v1257_v9 = vmul.f32 0.6931472, %v10242_v15  ;;  %10267 = vpow2.f32 %v5560_v61  ;;  %v1275_v4 = vmul.f32 0.6931472, %v10246_v32 }
 0x306   : > { %v4736_v47 = vmul.f32 %v13466_v23, %v3781_v5  ;;  %v4737_v41 = vmul.f32 %v13469_v1, %v3781_v5  ;;  %v4738_v63 = vmul.f32 %v13474_v45, %v3785_v20  ;;  %10269 = vpow2.f32 %v5562_v36 }
 0x307   : > { %v4739_v6 = vmul.f32 %v13477_v28, %v3785_v20  ;;  %v3789_v48 = vrot.slane %v2573_v21, %v11594_v58  ;;  %v1263_v40 = vsel %vm13708_vm8, %v13651_v7, %v1257_v9  ;;  %10271 = vpow2.f32 %v5564_v18 }
 0x308   : > { %v5570_v15 = vmul.f32 1.442695, %v4736_v47  ;;  %v5572_v16 = vmul.f32 1.442695, %v4737_v41  ;;  %v5574_v30 = vmul.f32 1.442695, %v4738_v63  ;;  %10273 = vpow2.f32 %v5566_v50 }
 0x309   : > { %v5576_v61 = vmul.f32 1.442695, %v4739_v6  ;;  %v4740_v57 = vmul.f32 %v13485_v27, %v3789_v48  ;;  %v4741_v5 = vmul.f32 %v13488_v52, %v3789_v48  ;;  %10275 = vpow2.f32 %v5568_v26 }
 0x30a   : > { %v13781_v36 = vsel %vm671_vm9, %v13343_v62, %v1263_v40  ;;  %v1266_v20 = vmul.f32 0.6931472, %v13722_v56  ;;  %v10258_v7 = vpop.eup %10257  ;;  %10277 = vpow2.f32 %v5570_v15  ;;  %v1281_v62 = vsel %vm13746_vm11, %v13685_v37, %v1275_v4 }
 0x30b   : > { %16131 = vst [vmem:[#allocation66_spill] sm:$0xff] %v13781_v36  ;;  %v5578_v18 = vmul.f32 1.442695, %v4740_v57  ;;  %v5580_v21 = vmul.f32 1.442695, %v4741_v5  ;;  %v2580_v63 = vrot.slane %v13781_v36, %v11597_v60  ;;  %v10260_v50 = vpop.eup %10259  ;;  %6263 = vst.msk [vmem:[#allocation3 + $0x9c0] sm:$0xff] %vm492_vm0, %v10258_v7  ;;  %10279 = vpow2.f32 %v5572_v16 }
 0x30c   : > { %v1272_v26 = vsel %vm13740_vm10, %v13664_v13, %v1266_v20  ;;  %v13794_v56 = vmul.f32 0.6931472, %v13729_v59  ;;  %v10262_v32 = vpop.eup %10261  ;;  %6264 = vst.msk [vmem:[#allocation3 + $0x9c8] sm:$0xff] %vm492_vm0, %v10260_v50  ;;  %10281 = vpow2.f32 %v5574_v30  ;;  %v13809_v59 = vsel %vm673_vm13, %v13353_v14, %v1281_v62 }
 0x30d   : > { %v2588_v9 = vrot.slane %v2580_v63, %v11597_v60  ;;  %v2581_v47 = vcombine.high %v2580_v63, %v2580_v63  ;;  %v13801_v41 = vsel %vm672_vm12, %v13347_v53, %v1272_v26  ;;  %v10264_v13 = vpop.eup %10263  ;;  %6265 = vst.msk [vmem:[#allocation3 + $0x9d0] sm:$0xff] %vm492_vm0, %v10262_v32  ;;  %10283 = vpow2.f32 %v5576_v61  ;;  %16133 = vst [vmem:[#allocation68_spill] sm:$0xff] %v13809_v59 }
 0x30e   : > { %16132 = vst [vmem:[#allocation67_spill] sm:$0xff] %v13801_v41  ;;  %v2604_v37 = vrot.slane %v13801_v41, %v11597_v60  ;;  %v1290_v42 = vsel %vm13758_vm14, %v13694_v38, %v13794_v56  ;;  %v10266_v19 = vpop.eup %10265  ;;  %6266 = vst.msk [vmem:[#allocation3 + $0x9d8] sm:$0xff] %vm492_vm0, %v10264_v13  ;;  %10285 = vpow2.f32 %v5578_v18  ;;  %v13822_v16 = vrot.slane %v13809_v59, %v11597_v60  ;;  %v13898_v38 = vld [vmem:[#allocation13 + $0x20] sm:$0xff]  ;;  %v13901_v56 = vld [vmem:[#allocation13 + $0x28] sm:$0xff] }
 0x30f   : > { %v3793_v53 = vrot.slane %v2588_v9, %v11594_v58  ;;  %v2595_v6 = vrot.slane %v2581_v47, %v11597_v60  ;;  %v2596_v48 = vcombine.high %v2588_v9, %v2588_v9  ;;  %v10268_v40 = vpop.eup %10267  ;;  %6267 = vst.msk [vmem:[#allocation3 + $0x9e0] sm:$0xff] %vm492_vm0, %v10266_v19  ;;  %10287 = vpow2.f32 %v5580_v21 }
 0x310   : > { %v2612_v14 = vrot.slane %v2604_v37, %v11597_v60  ;;  %v2605_v15 = vcombine.high %v2604_v37, %v2604_v37  ;;  %v10270_v30 = vpop.eup %10269  ;;  %6268 = vst.msk [vmem:[#allocation3 + $0x9e8] sm:$0xff] %vm492_vm0, %v10268_v40  ;;  %vm674_vm15 = vcmp.gt.f32.partialorder %v13365_v49, 20.0  ;;  %vm675_vm2 = vcmp.gt.f32.partialorder %v13370_v43, 20.0 }
 0x311   : > { %v4742_v61 = vmul.f32 %v13443_v54, %v3793_v53  ;;  %v4743_v57 = vmul.f32 %v13446_v39, %v3793_v53  ;;  %v3797_v5 = vrot.slane %v2595_v6, %v11594_v58  ;;  %v3801_v20 = vrot.slane %v2596_v48, %v11594_v58  ;;  %v10272_v4 = vpop.eup %10271  ;;  %6269 = vst.msk [vmem:[#allocation3 + $0x9f0] sm:$0xff] %vm492_vm0, %v10270_v30 }
 0x312   : > { %v2597_v7 = vcombine.high %v2595_v6, %v2595_v6  ;;  %v3809_v18 = vrot.slane %v2612_v14, %v11594_v58  ;;  %v2619_v21 = vrot.slane %v2605_v15, %v11597_v60  ;;  %v2620_v63 = vcombine.high %v2612_v14, %v2612_v14  ;;  %v10274_v50 = vpop.eup %10273  ;;  %6270 = vst.msk [vmem:[#allocation3 + $0x9f8] sm:$0xff] %vm492_vm0, %v10272_v4 }
 0x313   : > { %v5582_v26 = vmul.f32 1.442695, %v4742_v61  ;;  %v5584_v62 = vmul.f32 1.442695, %v4743_v57  ;;  %v4744_v32 = vmul.f32 %v13466_v23, %v3797_v5  ;;  %v4745_v9 = vmul.f32 %v13469_v1, %v3797_v5  ;;  %v10276_v47 = vpop.eup %10275  ;;  %6271 = vst.msk [vmem:[#allocation3 + $0xa00] sm:$0xff] %vm492_vm0, %v10274_v50 }
 0x314   : > { %v4746_v13 = vmul.f32 %v13474_v45, %v3801_v20  ;;  %v4747_v37 = vmul.f32 %v13477_v28, %v3801_v20  ;;  %v3805_v19 = vrot.slane %v2597_v7, %v11594_v58  ;;  %v4750_v53 = vmul.f32 %v13443_v54, %v3809_v18  ;;  %v10278_v6 = vpop.eup %10277  ;;  %6272 = vst.msk [vmem:[#allocation3 + $0xa08] sm:$0xff] %vm492_vm0, %v10276_v47 }
 0x315   : > { %10289 = vpow2.f32 %v5582_v26  ;;  %v5586_v48 = vmul.f32 1.442695, %v4744_v32  ;;  %v5588_v40 = vmul.f32 1.442695, %v4745_v9  ;;  %v4751_v14 = vmul.f32 %v13446_v39, %v3809_v18  ;;  %v10280_v15 = vpop.eup %10279  ;;  %6273 = vst.msk [vmem:[#allocation3 + $0xa10] sm:$0xff] %vm492_vm0, %v10278_v6 }
 0x316   : > { %10291 = vpow2.f32 %v5584_v62  ;;  %v5590_v30 = vmul.f32 1.442695, %v4746_v13  ;;  %v5592_v61 = vmul.f32 1.442695, %v4747_v37  ;;  %v4748_v57 = vmul.f32 %v13485_v27, %v3805_v19  ;;  %v10282_v5 = vpop.eup %10281  ;;  %6274 = vst.msk [vmem:[#allocation3 + $0xa18] sm:$0xff] %vm492_vm0, %v10280_v15 }
 0x317   : > { %10293 = vpow2.f32 %v5586_v48  ;;  %v4749_v54 = vmul.f32 %v13488_v52, %v3805_v19  ;;  %v5598_v20 = vmul.f32 1.442695, %v4750_v53  ;;  %v5600_v4 = vmul.f32 1.442695, %v4751_v14  ;;  %v10284_v7 = vpop.eup %10283  ;;  %6275 = vst.msk [vmem:[#allocation3 + $0xa20] sm:$0xff] %vm492_vm0, %v10282_v5 }
 0x318   : > { %10295 = vpow2.f32 %v5588_v40  ;;  %v5594_v39 = vmul.f32 1.442695, %v4748_v57  ;;  %v3813_v18 = vrot.slane %v2619_v21, %v11594_v58  ;;  %v3817_v50 = vrot.slane %v2620_v63, %v11594_v58  ;;  %v10286_v32 = vpop.eup %10285  ;;  %6276 = vst.msk [vmem:[#allocation3 + $0xa28] sm:$0xff] %vm492_vm0, %v10284_v7 }
 0x319   : > { %v16134_v26 = vand.u32 2147483647, %v13482_v22  ;;  %10297 = vpow2.f32 %v5590_v30  ;;  %v5596_v9 = vmul.f32 1.442695, %v4749_v54  ;;  %v2621_v47 = vcombine.high %v2619_v21, %v2619_v21  ;;  %v10288_v37 = vpop.eup %10287  ;;  %6277 = vst.msk [vmem:[#allocation3 + $0xa30] sm:$0xff] %vm492_vm0, %v10286_v32  ;;  %v13873_v30 = vld [vmem:[#allocation13 + $0x8] sm:$0xff] }
 0x31a   : > { %v2636_v13 = vrot.slane %v13822_v16, %v11597_v60  ;;  %10299 = vpow2.f32 %v5592_v61  ;;  %v4752_v63 = vmul.f32 %v13466_v23, %v3813_v18  ;;  %v4753_v22 = vmul.f32 %v13469_v1, %v3813_v18  ;;  %6278 = vst.msk [vmem:[#allocation3 + $0xa38] sm:$0xff] %vm492_vm0, %v10288_v37 }
 0x31b   : > { %vm13852_vm1 = vcmp.lt.f32.partialorder %v16134_v26, 0.0004427343  ;;  %v4754_v19 = vmul.f32 %v13474_v45, %v3817_v50  ;;  %10301 = vpow2.f32 %v5594_v39  ;;  %v4755_v53 = vmul.f32 %v13477_v28, %v3817_v50  ;;  %v13870_v45 = vld [vmem:[#allocation13] sm:$0xff] }
 0x31c   : > { %v3821_v21 = vrot.slane %v2621_v47, %v11594_v58  ;;  %v3825_v6 = vrot.slane %v2636_v13, %v11594_v58  ;;  %10303 = vpow2.f32 %v5596_v9  ;;  %v5602_v48 = vmul.f32 1.442695, %v4752_v63  ;;  %v13908_v63 = vld [vmem:[#allocation13 + $0x10] sm:$0xff] }
 0x31d   : > { %v5604_v40 = vmul.f32 1.442695, %v4753_v22  ;;  %v5606_v14 = vmul.f32 1.442695, %v4754_v19  ;;  %10305 = vpow2.f32 %v5598_v20  ;;  %v5608_v15 = vmul.f32 1.442695, %v4755_v53 }
 0x31e   : > { %v4756_v23 = vmul.f32 %v13485_v27, %v3821_v21  ;;  %v4757_v1 = vmul.f32 %v13488_v52, %v3821_v21  ;;  %10307 = vpow2.f32 %v5600_v4  ;;  %v4758_v28 = vmul.f32 %v13870_v45, %v3825_v6  ;;  %v13911_v19 = vld [vmem:[#allocation13 + $0x18] sm:$0xff] }
 0x31f   : > { %v4759_v61 = vmul.f32 %v13873_v30, %v3825_v6  ;;  %v2629_v57 = vcombine.high %v13822_v16, %v13822_v16  ;;  %v10290_v5 = vpop.eup %10289  ;;  %10309 = vpow2.f32 %v5602_v48  ;;  %v2644_v20 = vcombine.high %v2636_v13, %v2636_v13 }
 0x320   : > { %v5610_v54 = vmul.f32 1.442695, %v4756_v23  ;;  %v5612_v27 = vmul.f32 1.442695, %v4757_v1  ;;  %v10292_v52 = vpop.eup %10291  ;;  %6279 = vst.msk [vmem:[#allocation3 + $0xa40] sm:$0xff] %vm492_vm0, %v10290_v5  ;;  %10311 = vpow2.f32 %v5604_v40  ;;  %v13890_v16 = vsel %vm674_vm15, %v13365_v49, %v1290_v42  ;;  %v13918_v23 = vld [vmem:[#allocation13 + $0x30] sm:$0xff] }
 0x321   : > { %v5614_v4 = vmul.f32 1.442695, %v4758_v28  ;;  %v5616_v7 = vmul.f32 1.442695, %v4759_v61  ;;  %v2643_v39 = vrot.slane %v2629_v57, %v11597_v60  ;;  %v10294_v18 = vpop.eup %10293  ;;  %6280 = vst.msk [vmem:[#allocation3 + $0xa48] sm:$0xff] %vm492_vm0, %v10292_v52  ;;  %10313 = vpow2.f32 %v5606_v14  ;;  %16137 = vst [vmem:[#allocation69_spill] sm:$0xff] %v13890_v16 }
 0x322   : > { %v3833_v50 = vrot.slane %v2644_v20, %v11594_v58  ;;  %v1293_v26 = vmul.f32 0.6931472, %v13735_v3  ;;  %v10296_v32 = vpop.eup %10295  ;;  %6281 = vst.msk [vmem:[#allocation3 + $0xa50] sm:$0xff] %vm492_vm0, %v10294_v18  ;;  %10315 = vpow2.f32 %v5608_v15  ;;  %v2652_v55 = vrot.slane %v13890_v16, %v11597_v60  ;;  %v13922_v61 = vld [vmem:[#allocation13 + $0x38] sm:$0xff] }
 0x323   : > { %v3829_v9 = vrot.slane %v2643_v39, %v11594_v58  ;;  %v2645_v47 = vcombine.high %v2643_v39, %v2643_v39  ;;  %v10298_v13 = vpop.eup %10297  ;;  %6282 = vst.msk [vmem:[#allocation3 + $0xa58] sm:$0xff] %vm492_vm0, %v10296_v32  ;;  %10317 = vpow2.f32 %v5610_v54  ;;  %vm676_vm4 = vcmp.gt.f32.partialorder %v13381_v2, 20.0 }
 0x324   : > { %v4762_v49 = vmul.f32 %v13898_v38, %v3833_v50  ;;  %v4763_v3 = vmul.f32 %v13901_v56, %v3833_v50  ;;  %v1299_v42 = vsel %vm13852_vm1, %v13697_v44, %v1293_v26  ;;  %v10300_v37 = vpop.eup %10299  ;;  %6283 = vst.msk [vmem:[#allocation3 + $0xa60] sm:$0xff] %vm492_vm0, %v10298_v13  ;;  %10319 = vpow2.f32 %v5612_v27 }
 0x325   : > { %v4760_v22 = vmul.f32 %v13908_v63, %v3829_v9  ;;  %v4761_v53 = vmul.f32 %v13911_v19, %v3829_v9  ;;  %v3837_v21 = vrot.slane %v2645_v47, %v11594_v58  ;;  %v10302_v6 = vpop.eup %10301  ;;  %6284 = vst.msk [vmem:[#allocation3 + $0xa68] sm:$0xff] %vm492_vm0, %v10300_v37  ;;  %10321 = vpow2.f32 %v5614_v4 }
 0x326   : > { %v5622_v62 = vmul.f32 1.442695, %v4762_v49  ;;  %v5624_v44 = vmul.f32 1.442695, %v4763_v3  ;;  %v2660_v48 = vrot.slane %v2652_v55, %v11597_v60  ;;  %v10304_v40 = vpop.eup %10303  ;;  %6285 = vst.msk [vmem:[#allocation3 + $0xa70] sm:$0xff] %vm492_vm0, %v10302_v6  ;;  %10323 = vpow2.f32 %v5616_v7 }
 0x327   : > { %v5618_v14 = vmul.f32 1.442695, %v4760_v22  ;;  %v5620_v15 = vmul.f32 1.442695, %v4761_v53  ;;  %v4764_v1 = vmul.f32 %v13918_v23, %v3837_v21  ;;  %v10306_v28 = vpop.eup %10305  ;;  %6286 = vst.msk [vmem:[#allocation3 + $0xa78] sm:$0xff] %vm492_vm0, %v10304_v40  ;;  %v4765_v57 = vmul.f32 %v13922_v61, %v3837_v21 }
 0x328   : > { %10325 = vpow2.f32 %v5622_v62  ;;  %v3841_v5 = vrot.slane %v2660_v48, %v11594_v58  ;;  %v2653_v54 = vcombine.high %v2652_v55, %v2652_v55  ;;  %v10308_v27 = vpop.eup %10307  ;;  %6287 = vst.msk [vmem:[#allocation3 + $0xa80] sm:$0xff] %vm492_vm0, %v10306_v28  ;;  %v2668_v52 = vcombine.high %v2660_v48, %v2660_v48 }
 0x329   : > { %10327 = vpow2.f32 %v5618_v14  ;;  %v5626_v20 = vmul.f32 1.442695, %v4764_v1  ;;  %v13930_v4 = vsel %vm675_vm2, %v13370_v43, %v1299_v42  ;;  %v10310_v7 = vpop.eup %10309  ;;  %6288 = vst.msk [vmem:[#allocation3 + $0xa88] sm:$0xff] %vm492_vm0, %v10308_v27  ;;  %v5628_v39 = vmul.f32 1.442695, %v4765_v57 }
 0x32a   : > { %16138 = vst [vmem:[#allocation70_spill] sm:$0xff] %v13930_v4  ;;  %10329 = vpow2.f32 %v5620_v15  ;;  %v4766_v18 = vmul.f32 %v13870_v45, %v3841_v5  ;;  %v4767_v50 = vmul.f32 %v13873_v30, %v3841_v5  ;;  %v10312_v26 = vpop.eup %10311  ;;  %6289 = vst.msk [vmem:[#allocation3 + $0xa90] sm:$0xff] %vm492_vm0, %v10310_v7  ;;  %v2667_v32 = vrot.slane %v2653_v54, %v11597_v60 }
 0x32b   : > { %10331 = vpow2.f32 %v5624_v44  ;;  %v3849_v9 = vrot.slane %v2668_v52, %v11594_v58  ;;  %v2676_v43 = vrot.slane %v13930_v4, %v11597_v60  ;;  %v16139_v47 = vand.u32 2147483647, %v13494_v17  ;;  %v10314_v13 = vpop.eup %10313  ;;  %6290 = vst.msk [vmem:[#allocation3 + $0xa98] sm:$0xff] %vm492_vm0, %v10312_v26  ;;  %v563_v4 = vld [vmem:[%s11502_s19 + $0xf8] sm:$0xf] }
 0x32c   : > { %10333 = vpow2.f32 %v5626_v20  ;;  %v5630_v49 = vmul.f32 1.442695, %v4766_v18  ;;  %v5632_v3 = vmul.f32 1.442695, %v4767_v50  ;;  %v13948_v42 = vmul.f32 0.6931472, %v13750_v25  ;;  %v10316_v37 = vpop.eup %10315 }
 0x32d   : > { %vm13942_vm3 = vcmp.lt.f32.partialorder %v16139_v47, 0.0004427343  ;;  %6291 = vst.msk [vmem:[#allocation3 + $0xaa0] sm:$0xff] %vm492_vm0, %v10314_v13  ;;  %10335 = vpow2.f32 %v5628_v39  ;;  %v3845_v22 = vrot.slane %v2667_v32, %v11594_v58  ;;  %v4770_v17 = vmul.f32 %v13898_v38, %v3849_v9  ;;  %v10318_v21 = vpop.eup %10317  ;;  %6292 = vst.msk [vmem:[#allocation3 + $0xaa8] sm:$0xff] %vm492_vm0, %v10316_v37 }
 0x32e   : > { %v4771_v53 = vmul.f32 %v13901_v56, %v3849_v9  ;;  %10337 = vpow2.f32 %v5630_v49  ;;  %v2669_v6 = vcombine.high %v2667_v32, %v2667_v32  ;;  %v2684_v25 = vrot.slane %v2676_v43, %v11597_v60  ;;  %v10320_v44 = vpop.eup %10319  ;;  %6293 = vst.msk [vmem:[#allocation3 + $0xab0] sm:$0xff] %vm492_vm0, %v10318_v21 }
 0x32f   : > { %v2677_v62 = vcombine.high %v2676_v43, %v2676_v43  ;;  %10339 = vpow2.f32 %v5632_v3  ;;  %v4768_v48 = vmul.f32 %v13908_v63, %v3845_v22  ;;  %v4769_v40 = vmul.f32 %v13911_v19, %v3845_v22  ;;  %v10322_v15 = vpop.eup %10321  ;;  %6294 = vst.msk [vmem:[#allocation3 + $0xab8] sm:$0xff] %vm492_vm0, %v10320_v44 }
 0x330   : > { %v5638_v14 = vmul.f32 1.442695, %v4770_v17  ;;  %v5640_v1 = vmul.f32 1.442695, %v4771_v53  ;;  %v3853_v28 = vrot.slane %v2669_v6, %v11594_v58  ;;  %v3857_v57 = vrot.slane %v2684_v25, %v11594_v58  ;;  %v10324_v54 = vpop.eup %10323  ;;  %6295 = vst.msk [vmem:[#allocation3 + $0xac0] sm:$0xff] %vm492_vm0, %v10322_v15 }
 0x331   : > { %v2691_v5 = vrot.slane %v2677_v62, %v11597_v60  ;;  %v5634_v27 = vmul.f32 1.442695, %v4768_v48  ;;  %v5636_v20 = vmul.f32 1.442695, %v4769_v40  ;;  %v2692_v52 = vcombine.high %v2684_v25, %v2684_v25  ;;  %6296 = vst.msk [vmem:[#allocation3 + $0xac8] sm:$0xff] %vm492_vm0, %v10324_v54 }
 0x332   : > { %10341 = vpow2.f32 %v5638_v14  ;;  %v10326_v7 = vpop.eup %10325  ;;  %v4772_v39 = vmul.f32 %v13918_v23, %v3853_v28  ;;  %v4773_v18 = vmul.f32 %v13922_v61, %v3853_v28  ;;  %v4774_v50 = vmul.f32 %v13870_v45, %v3857_v57 }
 0x333   : > { %10343 = vpow2.f32 %v5640_v1  ;;  %v10328_v26 = vpop.eup %10327  ;;  %6299 = vst.msk [vmem:[#allocation3 + $0xae0] sm:$0xff] %vm492_vm0, %v10326_v7  ;;  %v4775_v32 = vmul.f32 %v13873_v30, %v3857_v57  ;;  %v3861_v9 = vrot.slane %v2691_v5, %v11594_v58  ;;  %v3865_v43 = vrot.slane %v2692_v52, %v11594_v58  ;;  %v550_v7 = vld [vmem:[%s11502_s19 + $0xc4] sm:$0xf] }
 0x334   : > { %10345 = vpow2.f32 %v5634_v27  ;;  %v10330_v47 = vpop.eup %10329  ;;  %6297 = vst.msk [vmem:[#allocation3 + $0xad0] sm:$0xff] %vm492_vm0, %v10328_v26  ;;  %v5642_v13 = vmul.f32 1.442695, %v4772_v39  ;;  %v5644_v49 = vmul.f32 1.442695, %v4773_v18  ;;  %v2693_v62 = vcombine.high %v2691_v5, %v2691_v5 }
 0x335   : > { %10347 = vpow2.f32 %v5636_v20  ;;  %v5646_v3 = vmul.f32 1.442695, %v4774_v50  ;;  %v10332_v37 = vpop.eup %10331  ;;  %6298 = vst.msk [vmem:[#allocation3 + $0xad8] sm:$0xff] %vm492_vm0, %v10330_v47  ;;  %v5648_v22 = vmul.f32 1.442695, %v4775_v32  ;;  %v4776_v17 = vmul.f32 %v13908_v63, %v3861_v9 }
 0x336   : > { %v4777_v53 = vmul.f32 %v13911_v19, %v3861_v9  ;;  %v4778_v21 = vmul.f32 %v13898_v38, %v3865_v43  ;;  %v10334_v6 = vpop.eup %10333  ;;  %6300 = vst.msk [vmem:[#allocation3 + $0xae8] sm:$0xff] %vm492_vm0, %v10332_v37  ;;  %10349 = vpow2.f32 %v5642_v13  ;;  %v4779_v25 = vmul.f32 %v13901_v56, %v3865_v43 }
 0x337   : > { %v1308_v44 = vsel %vm13942_vm3, %v13713_v33, %v13948_v42  ;;  %v10336_v48 = vpop.eup %10335  ;;  %6301 = vst.msk [vmem:[#allocation3 + $0xaf0] sm:$0xff] %vm492_vm0, %v10334_v6  ;;  %10351 = vpow2.f32 %v5644_v49  ;;  %v5650_v40 = vmul.f32 1.442695, %v4776_v17  ;;  %v3869_v28 = vrot.slane %v2693_v62, %v11594_v58 }
 0x338   : > { %v5652_v14 = vmul.f32 1.442695, %v4777_v53  ;;  %v10338_v15 = vpop.eup %10337  ;;  %6302 = vst.msk [vmem:[#allocation3 + $0xaf8] sm:$0xff] %vm492_vm0, %v10336_v48  ;;  %10353 = vpow2.f32 %v5646_v3  ;;  %v5654_v1 = vmul.f32 1.442695, %v4778_v21  ;;  %v13990_v57 = vsel %vm676_vm4, %v13381_v2, %v1308_v44 }
 0x339   : > { %16142 = vst [vmem:[#allocation71_spill] sm:$0xff] %v13990_v57  ;;  %v10340_v33 = vpop.eup %10339  ;;  %6303 = vst.msk [vmem:[#allocation3 + $0xb00] sm:$0xff] %vm492_vm0, %v10338_v15  ;;  %10355 = vpow2.f32 %v5648_v22  ;;  %v5656_v55 = vmul.f32 1.442695, %v4779_v25  ;;  %v2700_v42 = vrot.slane %v13990_v57, %v11597_v60  ;;  %v4780_v5 = vmul.f32 %v13918_v23, %v3869_v28  ;;  %v14008_v3 = vld [vmem:[#allocation16] sm:$0xf] }
 0x33a   : > { %6304 = vst.msk [vmem:[#allocation3 + $0xb08] sm:$0xff] %vm492_vm0, %v10340_v33  ;;  %10357 = vpow2.f32 %v5650_v40  ;;  %v4781_v54 = vmul.f32 %v13922_v61, %v3869_v28  ;;  %v1309_v52 = vadd.f32 1.0, %v13762_v24  ;;  %v1312_v26 = vmul.f32 -0.5, %v13762_v24 }
 0x33b   : > { %10359 = vpow2.f32 %v5652_v14  ;;  %v2708_v2 = vrot.slane %v2700_v42, %v11597_v60  ;;  %v2701_v20 = vcombine.high %v2700_v42, %v2700_v42  ;;  %v5658_v18 = vmul.f32 1.442695, %v4780_v5  ;;  %v551_v42 = vld [vmem:[%s11502_s19 + $0xc8] sm:$0xf] }
 0x33c   : > { %v10342_v27 = vpop.eup %10341  ;;  %10361 = vpow2.f32 %v5654_v1  ;;  %v5660_v50 = vmul.f32 1.442695, %v4781_v54  ;;  %v1318_v49 = vadd.f32 1.0, %v13766_v10  ;;  %v14011_v37 = vadd.f32 %v14008_v3, %v550_v7 }
 0x33d   : > { %v10344_v39 = vpop.eup %10343  ;;  %6307 = vst.msk [vmem:[#allocation3 + $0xb20] sm:$0xff] %vm492_vm0, %v10342_v27  ;;  %10363 = vpow2.f32 %v5656_v55  ;;  %v3873_v9 = vrot.slane %v2708_v2, %v11594_v58  ;;  %v2715_v43 = vrot.slane %v2701_v20, %v11597_v60  ;;  %v2716_v47 = vcombine.high %v2708_v2, %v2708_v2 }
 0x33e   : > { %v10346_v32 = vpop.eup %10345  ;;  %6308 = vst.msk [vmem:[#allocation3 + $0xb28] sm:$0xff] %vm492_vm0, %v10344_v39  ;;  %10365 = vpow2.f32 %v5658_v18  ;;  %v1313_v62 = vadd.f32 1.0, %v1312_v26  ;;  %v1321_v2 = vmul.f32 -0.5, %v13766_v10  ;;  %v552_v18 = vld [vmem:[%s11502_s19 + $0xcc] sm:$0xf]  ;;  %vm677_vm6 = vcmp.gt.f32.partialorder %v13401_v51, 20.0 }
 0x33f   : > { %v10348_v13 = vpop.eup %10347  ;;  %6305 = vst.msk [vmem:[#allocation3 + $0xb10] sm:$0xff] %vm492_vm0, %v10346_v32  ;;  %10367 = vpow2.f32 %v5660_v50  ;;  %v4782_v22 = vmul.f32 %v13870_v45, %v3873_v9  ;;  %v4783_v17 = vmul.f32 %v13873_v30, %v3873_v9  ;;  %v3877_v53 = vrot.slane %v2715_v43, %v11594_v58  ;;  %v553_v9 = vld [vmem:[%s11502_s19 + $0xd0] sm:$0xf] }
 0x340   : > { %6306 = vst.msk [vmem:[#allocation3 + $0xb18] sm:$0xff] %vm492_vm0, %v10348_v13  ;;  %v10350_v21 = vpop.eup %10349  ;;  %v3881_v6 = vrot.slane %v2716_v47, %v11594_v58  ;;  %v2717_v25 = vcombine.high %v2715_v43, %v2715_v43  ;;  %10369 = vlog2.f32 %v1309_v52  ;;  %v1315_v32 = vand.u32 2147483647, %v13762_v24 }
 0x341   : > { %v10352_v44 = vpop.eup %10351  ;;  %6309 = vst.msk [vmem:[#allocation3 + $0xb30] sm:$0xff] %vm492_vm0, %v10350_v21  ;;  %v5662_v48 = vmul.f32 1.442695, %v4782_v22  ;;  %v5664_v40 = vmul.f32 1.442695, %v4783_v17  ;;  %v4784_v14 = vmul.f32 %v13908_v63, %v3877_v53  ;;  %v4785_v15 = vmul.f32 %v13911_v19, %v3877_v53 }
 0x342   : > { %v10354_v1 = vpop.eup %10353  ;;  %6310 = vst.msk [vmem:[#allocation3 + $0xb38] sm:$0xff] %vm492_vm0, %v10352_v44  ;;  %v4786_v28 = vmul.f32 %v13898_v38, %v3881_v6  ;;  %v4787_v33 = vmul.f32 %v13901_v56, %v3881_v6  ;;  %v3885_v55 = vrot.slane %v2717_v25, %v11594_v58  ;;  %10371 = vlog2.f32 %v1318_v49  ;;  %v554_v22 = vld [vmem:[%s11502_s19 + $0xd4] sm:$0xf]  ;;  %v555_v25 = vld [vmem:[%s11502_s19 + $0xd8] sm:$0xf] }
 0x343   : > { %v10356_v5 = vpop.eup %10355  ;;  %6311 = vst.msk [vmem:[#allocation3 + $0xb40] sm:$0xff] %vm492_vm0, %v10354_v1  ;;  %10373 = vpow2.f32 %v5662_v48  ;;  %v5666_v54 = vmul.f32 1.442695, %v4784_v14  ;;  %v5668_v27 = vmul.f32 1.442695, %v4785_v15  ;;  %v743_v13 = vmin.f32 %v14011_v37, 20.0 }
 0x344   : > { %v10358_v20 = vpop.eup %10357  ;;  %6312 = vst.msk [vmem:[#allocation3 + $0xb48] sm:$0xff] %vm492_vm0, %v10356_v5  ;;  %10375 = vpow2.f32 %v5664_v40  ;;  %v5670_v52 = vmul.f32 1.442695, %v4786_v28  ;;  %v5672_v7 = vmul.f32 1.442695, %v4787_v33  ;;  %v4788_v39 = vmul.f32 %v13918_v23, %v3885_v55 }
 0x345   : > { %v10360_v50 = vpop.eup %10359  ;;  %6313 = vst.msk [vmem:[#allocation3 + $0xb50] sm:$0xff] %vm492_vm0, %v10358_v20  ;;  %10377 = vpow2.f32 %v5666_v54  ;;  %v4789_v26 = vmul.f32 %v13922_v61, %v3885_v55  ;;  %v14038_v49 = vadd.f32 %v14008_v3, %v551_v42  ;;  %v1322_v21 = vadd.f32 1.0, %v1321_v2 }
 0x346   : > { %v10362_v43 = vpop.eup %10361  ;;  %6314 = vst.msk [vmem:[#allocation3 + $0xb58] sm:$0xff] %vm492_vm0, %v10360_v50  ;;  %10379 = vpow2.f32 %v5668_v27  ;;  %v5674_v47 = vmul.f32 1.442695, %v4788_v39  ;;  %v14043_v6 = vadd.f32 %v14008_v3, %v552_v18  ;;  %v1314_v48 = vmul.f32 %v13762_v24, %v1313_v62 }
 0x347   : > { %v10364_v17 = vpop.eup %10363  ;;  %6315 = vst.msk [vmem:[#allocation3 + $0xb60] sm:$0xff] %vm492_vm0, %v10362_v43  ;;  %10381 = vpow2.f32 %v5670_v52  ;;  %v5676_v53 = vmul.f32 1.442695, %v4789_v26  ;;  %v1324_v40 = vand.u32 2147483647, %v13766_v10  ;;  %v744_v14 = vmin.f32 %v14038_v49, 20.0 }
 0x348   : > { %v10366_v44 = vpop.eup %10365  ;;  %6316 = vst.msk [vmem:[#allocation3 + $0xb68] sm:$0xff] %vm492_vm0, %v10364_v17  ;;  %10383 = vpow2.f32 %v5672_v7  ;;  %v856_v1 = vmul.f32 1.442695, %v743_v13  ;;  %v745_v28 = vmin.f32 %v14043_v6, 20.0  ;;  %v14053_v33 = vadd.f32 %v14008_v3, %v553_v9 }
 0x349   : > { %v10368_v15 = vpop.eup %10367  ;;  %6317 = vst.msk [vmem:[#allocation3 + $0xb70] sm:$0xff] %vm492_vm0, %v10366_v44  ;;  %10385 = vpow2.f32 %v5674_v47  ;;  %vm14056_vm5 = vcmp.lt.f32.partialorder %v1315_v32, 0.0004427343  ;;  %v14061_v62 = vadd.f32 %v14008_v3, %v554_v22  ;;  %v14064_v42 = vadd.f32 %v14008_v3, %v555_v25 }
 0x34a   : > { %v10370_v55 = vpop.eup %10369  ;;  %6318 = vst.msk [vmem:[#allocation3 + $0xb78] sm:$0xff] %vm492_vm0, %v10368_v15  ;;  %10387 = vpow2.f32 %v5676_v53  ;;  %v1323_v54 = vmul.f32 %v13766_v10, %v1322_v21  ;;  %v858_v27 = vmul.f32 1.442695, %v744_v14  ;;  %vm14068_vm7 = vcmp.lt.f32.partialorder %v1324_v40, 0.0004427343 }
 0x34b   : > { %v1311_v5 = vmul.f32 0.6931472, %v10370_v55  ;;  %v860_v52 = vmul.f32 1.442695, %v745_v28  ;;  %v746_v7 = vmin.f32 %v14053_v33, 20.0  ;;  %v747_v39 = vmin.f32 %v14061_v62, 20.0 }
 0x34c   : > { %v10372_v2 = vpop.eup %10371  ;;  %vm678_vm8 = vcmp.gt.f32.partialorder %v13525_v35, 20.0  ;;  %10389 = vpow2.f32 %v856_v1  ;;  %v748_v47 = vmin.f32 %v14064_v42, 20.0  ;;  %vm679_vm10 = vcmp.gt.f32.partialorder %v14011_v37, 20.0 }
 0x34d   : > { %v10374_v18 = vpop.eup %10373  ;;  %v1317_v50 = vsel %vm14056_vm5, %v1314_v48, %v1311_v5  ;;  %v1320_v26 = vmul.f32 0.6931472, %v10372_v2  ;;  %v862_v9 = vmul.f32 1.442695, %v746_v7  ;;  %v864_v43 = vmul.f32 1.442695, %v747_v39 }
 0x34e   : > { %v10376_v10 = vpop.eup %10375  ;;  %6319 = vst.msk [vmem:[#allocation3 + $0xb80] sm:$0xff] %vm492_vm0, %v10374_v18  ;;  %v14081_v32 = vsel %vm677_vm6, %v13401_v51, %v1317_v50  ;;  %10391 = vpow2.f32 %v858_v27  ;;  %v866_v21 = vmul.f32 1.442695, %v748_v47  ;;  %vm680_vm12 = vcmp.gt.f32.partialorder %v14038_v49, 20.0 }
 0x34f   : > { %16147 = vst [vmem:[#allocation72_spill] sm:$0xff] %v14081_v32  ;;  %v10378_v13 = vpop.eup %10377  ;;  %6320 = vst.msk [vmem:[#allocation3 + $0xb88] sm:$0xff] %vm492_vm0, %v10376_v10  ;;  %v2724_v22 = vrot.slane %v14081_v32, %v11597_v60  ;;  %v1326_v17 = vsel %vm14068_vm7, %v1323_v54, %v1320_v26  ;;  %10393 = vpow2.f32 %v860_v52  ;;  %vm681_vm13 = vcmp.gt.f32.partialorder %v14043_v6, 20.0 }
 0x350   : > { %v10380_v53 = vpop.eup %10379  ;;  %6321 = vst.msk [vmem:[#allocation3 + $0xb90] sm:$0xff] %vm492_vm0, %v10378_v13  ;;  %v14093_v51 = vsel %vm678_vm8, %v13525_v35, %v1326_v17  ;;  %10395 = vpow2.f32 %v862_v9  ;;  %vm682_vm14 = vcmp.gt.f32.partialorder %v14053_v33, 20.0  ;;  %vm683_vm3 = vcmp.gt.f32.partialorder %v14061_v62, 20.0 }
 0x351   : > { %16148 = vst [vmem:[#allocation73_spill] sm:$0xff] %v14093_v51  ;;  %v10382_v25 = vpop.eup %10381  ;;  %6322 = vst.msk [vmem:[#allocation3 + $0xb98] sm:$0xff] %vm492_vm0, %v10380_v53  ;;  %v2732_v44 = vrot.slane %v2724_v22, %v11597_v60  ;;  %v2725_v48 = vcombine.high %v2724_v22, %v2724_v22  ;;  %v2748_v40 = vrot.slane %v14093_v51, %v11597_v60  ;;  %10397 = vpow2.f32 %v864_v43 }
 0x352   : > { %v10384_v14 = vpop.eup %10383  ;;  %6323 = vst.msk [vmem:[#allocation3 + $0xba0] sm:$0xff] %vm492_vm0, %v10382_v25  ;;  %10399 = vpow2.f32 %v866_v21  ;;  %vm684_vm5 = vcmp.gt.f32.partialorder %v14064_v42, 20.0 }
 0x353   : > { %v10386_v15 = vpop.eup %10385  ;;  %6324 = vst.msk [vmem:[#allocation3 + $0xba8] sm:$0xff] %vm492_vm0, %v10384_v14  ;;  %v3889_v35 = vrot.slane %v2732_v44, %v11594_v58  ;;  %v2739_v1 = vrot.slane %v2725_v48, %v11597_v60  ;;  %v2740_v28 = vcombine.high %v2732_v44, %v2732_v44  ;;  %v2756_v55 = vrot.slane %v2748_v40, %v11597_v60 }
 0x354   : > { %v10388_v24 = vpop.eup %10387  ;;  %6325 = vst.msk [vmem:[#allocation3 + $0xbb0] sm:$0xff] %vm492_vm0, %v10386_v15  ;;  %v2749_v5 = vcombine.high %v2748_v40, %v2748_v40 }
 0x355   : > { %6326 = vst.msk [vmem:[#allocation3 + $0xbb8] sm:$0xff] %vm492_vm0, %v10388_v24  ;;  %v4790_v54 = vmul.f32 %v13870_v45, %v3889_v35  ;;  %v4791_v27 = vmul.f32 %v13873_v30, %v3889_v35  ;;  %v3893_v2 = vrot.slane %v2739_v1, %v11594_v58  ;;  %v3897_v20 = vrot.slane %v2740_v28, %v11594_v58 }
 0x356   : > { %v2741_v52 = vcombine.high %v2739_v1, %v2739_v1  ;;  %v3905_v7 = vrot.slane %v2756_v55, %v11594_v58  ;;  %v2763_v39 = vrot.slane %v2749_v5, %v11597_v60  ;;  %v2764_v18 = vcombine.high %v2756_v55, %v2756_v55  ;;  %v14112_v50 = vpop.eup %10389 }
 0x357   : > { %v5678_v26 = vmul.f32 1.442695, %v4790_v54  ;;  %v5680_v10 = vmul.f32 1.442695, %v4791_v27  ;;  %v4792_v9 = vmul.f32 %v13908_v63, %v3893_v2  ;;  %v4793_v43 = vmul.f32 %v13911_v19, %v3893_v2  ;;  %v556_v2 = vld [vmem:[%s11502_s19 + $0xdc] sm:$0xf] }
 0x358   : > { %v4794_v47 = vmul.f32 %v13898_v38, %v3897_v20  ;;  %v4795_v13 = vmul.f32 %v13901_v56, %v3897_v20  ;;  %v3901_v22 = vrot.slane %v2741_v52, %v11594_v58  ;;  %v4798_v17 = vmul.f32 %v13870_v45, %v3905_v7  ;;  %v14120_v53 = vpop.eup %10391 }
 0x359   : > { %10401 = vpow2.f32 %v5678_v26  ;;  %v5682_v21 = vmul.f32 1.442695, %v4792_v9  ;;  %v5684_v25 = vmul.f32 1.442695, %v4793_v43  ;;  %v4799_v44 = vmul.f32 %v13873_v30, %v3905_v7  ;;  %v14123_v48 = vpop.eup %10393 }
 0x35a   : > { %10403 = vpow2.f32 %v5680_v10  ;;  %v5686_v40 = vmul.f32 1.442695, %v4794_v47  ;;  %v5688_v14 = vmul.f32 1.442695, %v4795_v13  ;;  %v4796_v15 = vmul.f32 %v13918_v23, %v3901_v22  ;;  %v14126_v35 = vpop.eup %10395 }
 0x35b   : > { %10405 = vpow2.f32 %v5682_v21  ;;  %v4797_v45 = vmul.f32 %v13922_v61, %v3901_v22  ;;  %v5694_v1 = vmul.f32 1.442695, %v4798_v17  ;;  %v14129_v28 = vpop.eup %10397  ;;  %v3909_v30 = vrot.slane %v2763_v39, %v11594_v58 }
 0x35c   : > { %10407 = vpow2.f32 %v5684_v25  ;;  %v5690_v55 = vmul.f32 1.442695, %v4796_v15  ;;  %v3913_v24 = vrot.slane %v2764_v18, %v11594_v58  ;;  %v5696_v54 = vmul.f32 1.442695, %v4799_v44  ;;  %v14134_v20 = vpop.eup %10399 }
 0x35d   : > { %10409 = vpow2.f32 %v5686_v40  ;;  %v5692_v5 = vmul.f32 1.442695, %v4797_v45  ;;  %v2765_v27 = vcombine.high %v2763_v39, %v2763_v39  ;;  %v4800_v52 = vmul.f32 %v13908_v63, %v3909_v30  ;;  %v557_v40 = vld [vmem:[%s11502_s19 + $0xe0] sm:$0xf] }
 0x35e   : > { %10411 = vpow2.f32 %v5688_v14  ;;  %v4801_v7 = vmul.f32 %v13911_v19, %v3909_v30  ;;  %v4802_v26 = vmul.f32 %v13898_v38, %v3913_v24  ;;  %v4803_v10 = vmul.f32 %v13901_v56, %v3913_v24 }
 0x35f   : > { %10413 = vpow2.f32 %v5690_v55  ;;  %v3917_v18 = vrot.slane %v2765_v27, %v11594_v58  ;;  %v5698_v9 = vmul.f32 1.442695, %v4800_v52  ;;  %v14142_v39 = vadd.f32 %v14008_v3, %v556_v2  ;;  %v558_v27 = vld [vmem:[%s11502_s19 + $0xe4] sm:$0xf] }
 0x360   : > { %10415 = vpow2.f32 %v5692_v5  ;;  %v5700_v43 = vmul.f32 1.442695, %v4801_v7  ;;  %v5702_v47 = vmul.f32 1.442695, %v4802_v26  ;;  %v5704_v17 = vmul.f32 1.442695, %v4803_v10 }
 0x361   : > { %10417 = vpow2.f32 %v5694_v1  ;;  %v4804_v13 = vmul.f32 %v13918_v23, %v3917_v18  ;;  %v4805_v22 = vmul.f32 %v13922_v61, %v3917_v18  ;;  %v1330_v21 = vmul.f32 -0.5, %v14112_v50 }
 0x362   : > { %10419 = vpow2.f32 %v5696_v54  ;;  %v1327_v1 = vadd.f32 1.0, %v14112_v50  ;;  %v749_v55 = vmin.f32 %v14142_v39, 20.0  ;;  %v1336_v5 = vadd.f32 1.0, %v14120_v53 }
 0x363   : > { %v10402_v25 = vpop.eup %10401  ;;  %10421 = vpow2.f32 %v5698_v9  ;;  %v5706_v44 = vmul.f32 1.442695, %v4804_v13  ;;  %v5708_v15 = vmul.f32 1.442695, %v4805_v22  ;;  %v1331_v24 = vadd.f32 1.0, %v1330_v21 }
 0x364   : > { %v10404_v14 = vpop.eup %10403  ;;  %6327 = vst.msk [vmem:[#allocation3 + $0xbc0] sm:$0xff] %vm492_vm0, %v10402_v25  ;;  %10423 = vpow2.f32 %v5700_v43  ;;  %v14155_v54 = vadd.f32 %v14008_v3, %v557_v40  ;;  %v1333_v52 = vand.u32 2147483647, %v14112_v50  ;;  %v1339_v7 = vmul.f32 -0.5, %v14120_v53 }
 0x365   : > { %v10406_v45 = vpop.eup %10405  ;;  %6328 = vst.msk [vmem:[#allocation3 + $0xbc8] sm:$0xff] %vm492_vm0, %v10404_v14  ;;  %10425 = vpow2.f32 %v5702_v47  ;;  %v1345_v26 = vadd.f32 1.0, %v14123_v48  ;;  %v1342_v18 = vand.u32 2147483647, %v14120_v53  ;;  %v1348_v9 = vmul.f32 -0.5, %v14123_v48 }
 0x366   : > { %v10408_v30 = vpop.eup %10407  ;;  %6329 = vst.msk [vmem:[#allocation3 + $0xbd0] sm:$0xff] %vm492_vm0, %v10406_v45  ;;  %10427 = vpow2.f32 %v5704_v17  ;;  %v1354_v43 = vadd.f32 1.0, %v14126_v35  ;;  %v1363_v13 = vadd.f32 1.0, %v14129_v28  ;;  %v868_v22 = vmul.f32 1.442695, %v749_v55 }
 0x367   : > { %v10410_v2 = vpop.eup %10409  ;;  %6330 = vst.msk [vmem:[#allocation3 + $0xbd8] sm:$0xff] %vm492_vm0, %v10408_v30  ;;  %10429 = vpow2.f32 %v5706_v44  ;;  %v14169_v17 = vadd.f32 %v14008_v3, %v558_v27  ;;  %v14173_v25 = vmul.f32 %v14112_v50, %v1331_v24  ;;  %v1372_v44 = vadd.f32 1.0, %v14134_v20  ;;  %v559_v14 = vld [vmem:[%s11502_s19 + $0xe8] sm:$0xf]  ;;  %v560_v50 = vld [vmem:[%s11502_s19 + $0xec] sm:$0xf] }
 0x368   : > { %v10412_v10 = vpop.eup %10411  ;;  %6331 = vst.msk [vmem:[#allocation3 + $0xbe0] sm:$0xff] %vm492_vm0, %v10410_v2  ;;  %10431 = vpow2.f32 %v5708_v15  ;;  %v750_v40 = vmin.f32 %v14155_v54, 20.0  ;;  %vm14179_vm9 = vcmp.lt.f32.partialorder %v1333_v52, 0.0004427343  ;;  %v1357_v55 = vmul.f32 -0.5, %v14126_v35 }
 0x369   : > { %v10414_v47 = vpop.eup %10413  ;;  %6332 = vst.msk [vmem:[#allocation3 + $0xbe8] sm:$0xff] %vm492_vm0, %v10412_v10  ;;  %10433 = vlog2.f32 %v1327_v1  ;;  %v1340_v1 = vadd.f32 1.0, %v1339_v7  ;;  %vm14187_vm11 = vcmp.lt.f32.partialorder %v1342_v18, 0.0004427343  ;;  %v1351_v27 = vand.u32 2147483647, %v14123_v48 }
 0x36a   : > { %v10416_v21 = vpop.eup %10415  ;;  %6333 = vst.msk [vmem:[#allocation3 + $0xbf0] sm:$0xff] %vm492_vm0, %v10414_v47  ;;  %10435 = vlog2.f32 %v1336_v5  ;;  %v1349_v5 = vadd.f32 1.0, %v1348_v9  ;;  %v1366_v2 = vmul.f32 -0.5, %v14129_v28  ;;  %v561_v52 = vld [vmem:[%s11502_s19 + $0xf0] sm:$0xf]  ;;  %v1375_v10 = vmul.f32 -0.5, %v14134_v20 }
 0x36b   : > { %v10418_v15 = vpop.eup %10417  ;;  %6334 = vst.msk [vmem:[#allocation3 + $0xbf8] sm:$0xff] %vm492_vm0, %v10416_v21  ;;  %10437 = vlog2.f32 %v1345_v26  ;;  %v1360_v26 = vand.u32 2147483647, %v14126_v35  ;;  %v751_v18 = vmin.f32 %v14169_v17, 20.0  ;;  %v1369_v9 = vand.u32 2147483647, %v14129_v28 }
 0x36c   : > { %v10420_v30 = vpop.eup %10419  ;;  %6335 = vst.msk [vmem:[#allocation3 + $0xc00] sm:$0xff] %vm492_vm0, %v10418_v15  ;;  %10439 = vlog2.f32 %v1354_v43  ;;  %v14203_v43 = vadd.f32 %v14008_v3, %v559_v14  ;;  %v14206_v21 = vadd.f32 %v14008_v3, %v560_v50  ;;  %v14212_v51 = vadd.f32 %v14008_v3, %v561_v52 }
 0x36d   : > { %v10422_v7 = vpop.eup %10421  ;;  %6336 = vst.msk [vmem:[#allocation3 + $0xc08] sm:$0xff] %vm492_vm0, %v10420_v30  ;;  %10441 = vlog2.f32 %v1363_v13  ;;  %v1341_v13 = vmul.f32 %v14120_v53, %v1340_v1  ;;  %v1358_v30 = vadd.f32 1.0, %v1357_v55  ;;  %vm14215_vm15 = vcmp.lt.f32.partialorder %v1351_v27, 0.0004427343 }
 0x36e   : > { %v10424_v47 = vpop.eup %10423  ;;  %6337 = vst.msk [vmem:[#allocation3 + $0xc10] sm:$0xff] %vm492_vm0, %v10422_v7  ;;  %10443 = vlog2.f32 %v1372_v44  ;;  %v870_v7 = vmul.f32 1.442695, %v750_v40  ;;  %v1367_v50 = vadd.f32 1.0, %v1366_v2  ;;  %v872_v32 = vmul.f32 1.442695, %v751_v18 }
 0x36f   : > { %v10426_v15 = vpop.eup %10425  ;;  %6338 = vst.msk [vmem:[#allocation3 + $0xc18] sm:$0xff] %vm492_vm0, %v10424_v47  ;;  %v752_v47 = vmin.f32 %v14203_v43, 20.0  ;;  %v1350_v1 = vmul.f32 %v14123_v48, %v1349_v5  ;;  %v1376_v40 = vadd.f32 1.0, %v1375_v10  ;;  %v753_v55 = vmin.f32 %v14206_v21, 20.0 }
 0x370   : > { %v10428_v44 = vpop.eup %10427  ;;  %6339 = vst.msk [vmem:[#allocation3 + $0xc20] sm:$0xff] %vm492_vm0, %v10426_v15  ;;  %v754_v52 = vmin.f32 %v14212_v51, 20.0  ;;  %v562_v15 = vld [vmem:[%s11502_s19 + $0xf4] sm:$0xf]  ;;  %vm14226_vm1 = vcmp.lt.f32.partialorder %v1360_v26, 0.0004427343  ;;  %10445 = vpow2.f32 %v868_v22  ;;  %v1359_v10 = vmul.f32 %v14126_v35, %v1358_v30 }
 0x371   : > { %v10430_v53 = vpop.eup %10429  ;;  %6340 = vst.msk [vmem:[#allocation3 + $0xc28] sm:$0xff] %vm492_vm0, %v10428_v44  ;;  %vm14230_vm2 = vcmp.lt.f32.partialorder %v1369_v9, 0.0004427343  ;;  %v874_v48 = vmul.f32 1.442695, %v752_v47  ;;  %10447 = vpow2.f32 %v870_v7  ;;  %v14238_v16 = vmul.f32 %v14129_v28, %v1367_v50 }
 0x372   : > { %v10432_v27 = vpop.eup %10431  ;;  %6341 = vst.msk [vmem:[#allocation3 + $0xc30] sm:$0xff] %vm492_vm0, %v10430_v53  ;;  %v876_v44 = vmul.f32 1.442695, %v753_v55  ;;  %v878_v57 = vmul.f32 1.442695, %v754_v52  ;;  %10449 = vpow2.f32 %v872_v32  ;;  %v14242_v47 = vmul.f32 %v14134_v20, %v1376_v40 }
 0x373   : > { %v10434_v5 = vpop.eup %10433  ;;  %6342 = vst.msk [vmem:[#allocation3 + $0xc38] sm:$0xff] %vm492_vm0, %v10432_v27  ;;  %10451 = vpow2.f32 %v874_v48  ;;  %v14245_v35 = vadd.f32 %v14008_v3, %v562_v15  ;;  %v14251_v28 = vadd.f32 %v14008_v3, %v563_v4  ;;  %vm685_vm7 = vcmp.gt.f32.partialorder %v14142_v39, 20.0 }
 0x374   : > { %v10436_v53 = vpop.eup %10435  ;;  %v1329_v26 = vmul.f32 0.6931472, %v10434_v5  ;;  %10453 = vpow2.f32 %v876_v44 }
 0x375   : > { %v10438_v59 = vpop.eup %10437  ;;  %v1338_v22 = vmul.f32 0.6931472, %v10436_v53  ;;  %10455 = vpow2.f32 %v878_v57 }
 0x376   : > { %v10440_v30 = vpop.eup %10439  ;;  %v1335_v7 = vsel %vm14179_vm9, %v14173_v25, %v1329_v26  ;;  %v1347_v55 = vmul.f32 0.6931472, %v10438_v59  ;;  %vm686_vm9 = vcmp.gt.f32.partialorder %v14155_v54, 20.0 }
 0x377   : > { %v10442_v32 = vpop.eup %10441  ;;  %v14256_v50 = vsel %vm679_vm10, %v14011_v37, %v1335_v7  ;;  %v1344_v40 = vsel %vm14187_vm11, %v1341_v13, %v1338_v22  ;;  %v1356_v52 = vmul.f32 0.6931472, %v10440_v30  ;;  %vm687_vm11 = vcmp.gt.f32.partialorder %v14169_v17, 20.0 }
 0x378   : > { %16159 = vst [vmem:[#allocation74_spill] sm:$0xff] %v14256_v50  ;;  %v10444_v15 = vpop.eup %10443  ;;  %v2772_v25 = vrot.slane %v14256_v50, %v11597_v60  ;;  %v14265_v59 = vsel %vm680_vm12, %v14038_v49, %v1344_v40  ;;  %v1353_v4 = vsel %vm14215_vm15, %v1350_v1, %v1347_v55  ;;  %v14269_v3 = vmul.f32 0.6931472, %v10442_v32  ;;  %v14317_v40 = vld [vmem:[#allocation13] sm:$0xff] }
 0x379   : > { %16160 = vst [vmem:[#allocation75_spill] sm:$0xff] %v14265_v59  ;;  %v2796_v37 = vrot.slane %v14265_v59, %v11597_v60  ;;  %v14276_v57 = vsel %vm681_vm13, %v14043_v6, %v1353_v4  ;;  %v1362_v45 = vsel %vm14226_vm1, %v1359_v10, %v1356_v52  ;;  %v14280_v24 = vmul.f32 0.6931472, %v10444_v15  ;;  %v14320_v15 = vld [vmem:[#allocation13 + $0x8] sm:$0xff] }
 0x37a   : > { %16161 = vst [vmem:[#allocation76_spill] sm:$0xff] %v14276_v57  ;;  %v2780_v49 = vrot.slane %v2772_v25, %v11597_v60  ;;  %v2773_v13 = vcombine.high %v2772_v25, %v2772_v25  ;;  %v14285_v14 = vrot.slane %v14276_v57, %v11597_v60  ;;  %v14290_v1 = vsel %vm682_vm14, %v14053_v33, %v1362_v45  ;;  %v14301_v5 = vpop.eup %10445 }
 0x37b   : > { %16162 = vst [vmem:[#allocation77_spill] sm:$0xff] %v14290_v1  ;;  %v2804_v6 = vrot.slane %v2796_v37, %v11597_v60  ;;  %v2797_v27 = vcombine.high %v2796_v37, %v2796_v37  ;;  %v14295_v2 = vrot.slane %v14290_v1, %v11597_v60  ;;  %v14309_v26 = vpop.eup %10447  ;;  %vm688_vm13 = vcmp.gt.f32.partialorder %v14203_v43, 20.0 }
 0x37c   : > { %v3921_v10 = vrot.slane %v2780_v49, %v11594_v58  ;;  %v2787_v44 = vrot.slane %v2773_v13, %v11597_v60  ;;  %v2788_v33 = vcombine.high %v2780_v49, %v2780_v49  ;;  %v14307_v53 = vrot.slane %v14285_v14, %v11597_v60  ;;  %v14315_v32 = vpop.eup %10449 }
 0x37d   : > { %v3937_v22 = vrot.slane %v2804_v6, %v11594_v58  ;;  %v2811_v30 = vrot.slane %v2797_v27, %v11597_v60  ;;  %v2812_v7 = vcombine.high %v2804_v6, %v2804_v6  ;;  %v2821_v55 = vcombine.high %v14285_v14, %v14285_v14  ;;  %v14325_v45 = vpop.eup %10451 }
 0x37e   : > { %v4806_v52 = vmul.f32 %v14317_v40, %v3921_v10  ;;  %v4807_v25 = vmul.f32 %v14320_v15, %v3921_v10  ;;  %v3925_v4 = vrot.slane %v2787_v44, %v11594_v58  ;;  %v3929_v37 = vrot.slane %v2788_v33, %v11594_v58  ;;  %v14330_v27 = vpop.eup %10453 }
 0x37f   : > { %v2789_v49 = vcombine.high %v2787_v44, %v2787_v44  ;;  %v4814_v13 = vmul.f32 %v14317_v40, %v3937_v22  ;;  %v4815_v14 = vmul.f32 %v14320_v15, %v3937_v22  ;;  %v3941_v6 = vrot.slane %v2811_v30, %v11594_v58  ;;  %v14334_v57 = vpop.eup %10455 }
 0x380   : > { %v5710_v48 = vmul.f32 1.442695, %v4806_v52  ;;  %v5712_v9 = vmul.f32 1.442695, %v4807_v25  ;;  %v4808_v1 = vmul.f32 %v13908_v63, %v3925_v4  ;;  %v4809_v10 = vmul.f32 %v13911_v19, %v3925_v4  ;;  %v14341_v4 = vld [vmem:[#allocation13 + $0x10] sm:$0xff] }
 0x381   : > { %v4810_v33 = vmul.f32 %v13898_v38, %v3929_v37  ;;  %v4811_v44 = vmul.f32 %v13901_v56, %v3929_v37  ;;  %v3933_v59 = vrot.slane %v2789_v49, %v11594_v58  ;;  %v5726_v50 = vmul.f32 1.442695, %v4814_v13  ;;  %v14344_v56 = vld [vmem:[#allocation13 + $0x18] sm:$0xff] }
 0x382   : > { %10457 = vpow2.f32 %v5710_v48  ;;  %v5714_v22 = vmul.f32 1.442695, %v4808_v1  ;;  %v5716_v41 = vmul.f32 1.442695, %v4809_v10  ;;  %v5728_v36 = vmul.f32 1.442695, %v4815_v14 }
 0x383   : > { %10459 = vpow2.f32 %v5712_v9  ;;  %v5718_v52 = vmul.f32 1.442695, %v4810_v33  ;;  %v5720_v25 = vmul.f32 1.442695, %v4811_v44  ;;  %v4812_v63 = vmul.f32 %v13918_v23, %v3933_v59  ;;  %v14352_v14 = vld [vmem:[#allocation13 + $0x28] sm:$0xff] }
 0x384   : > { %10461 = vpow2.f32 %v5714_v22  ;;  %v4813_v19 = vmul.f32 %v13922_v61, %v3933_v59  ;;  %v4816_v38 = vmul.f32 %v14341_v4, %v3941_v6  ;;  %v4817_v37 = vmul.f32 %v14344_v56, %v3941_v6  ;;  %v14349_v61 = vld [vmem:[#allocation13 + $0x20] sm:$0xff]  ;;  %v14361_v22 = vld [vmem:[#allocation13 + $0x30] sm:$0xff] }
 0x385   : > { %10463 = vpow2.f32 %v5716_v41  ;;  %v5722_v1 = vmul.f32 1.442695, %v4812_v63  ;;  %v3945_v48 = vrot.slane %v2812_v7, %v11594_v58  ;;  %v2813_v9 = vcombine.high %v2811_v30, %v2811_v30 }
 0x386   : > { %10465 = vpow2.f32 %v5718_v52  ;;  %v5724_v49 = vmul.f32 1.442695, %v4813_v19  ;;  %v5730_v13 = vmul.f32 1.442695, %v4816_v38  ;;  %v5732_v23 = vmul.f32 1.442695, %v4817_v37 }
 0x387   : > { %10467 = vpow2.f32 %v5720_v25  ;;  %v4818_v59 = vmul.f32 %v14349_v61, %v3945_v48  ;;  %v4819_v6 = vmul.f32 %v14352_v14, %v3945_v48  ;;  %v3949_v41 = vrot.slane %v2813_v9, %v11594_v58  ;;  %v14364_v25 = vld [vmem:[#allocation13 + $0x38] sm:$0xff] }
 0x388   : > { %10469 = vpow2.f32 %v5722_v1  ;;  %v3953_v30 = vrot.slane %v14307_v53, %v11594_v58  ;;  %v2835_v7 = vrot.slane %v2821_v55, %v11597_v60  ;;  %v2836_v10 = vcombine.high %v14307_v53, %v14307_v53 }
 0x389   : > { %10471 = vpow2.f32 %v5724_v49  ;;  %v5734_v33 = vmul.f32 1.442695, %v4818_v59  ;;  %v5736_v44 = vmul.f32 1.442695, %v4819_v6  ;;  %v4820_v52 = vmul.f32 %v14361_v22, %v3949_v41 }
 0x38a   : > { %10473 = vpow2.f32 %v5726_v50  ;;  %v4821_v63 = vmul.f32 %v14364_v25, %v3949_v41  ;;  %v4822_v19 = vmul.f32 %v14317_v40, %v3953_v30  ;;  %v4823_v38 = vmul.f32 %v14320_v15, %v3953_v30 }
 0x38b   : > { %10475 = vpow2.f32 %v5728_v36  ;;  %v5738_v55 = vmul.f32 1.442695, %v4820_v52  ;;  %v3957_v53 = vrot.slane %v2835_v7, %v11594_v58  ;;  %v3961_v37 = vrot.slane %v2836_v10, %v11594_v58 }
 0x38c   : > { %v10458_v1 = vpop.eup %10457  ;;  %10477 = vpow2.f32 %v5730_v13  ;;  %v5740_v48 = vmul.f32 1.442695, %v4821_v63  ;;  %v5742_v9 = vmul.f32 1.442695, %v4822_v19  ;;  %v5744_v49 = vmul.f32 1.442695, %v4823_v38 }
 0x38d   : > { %v10460_v50 = vpop.eup %10459  ;;  %6343 = vst.msk [vmem:[#allocation3 + $0xc40] sm:$0xff] %vm492_vm0, %v10458_v1  ;;  %10479 = vpow2.f32 %v5732_v23  ;;  %v4824_v59 = vmul.f32 %v14341_v4, %v3957_v53  ;;  %v4825_v6 = vmul.f32 %v14344_v56, %v3957_v53  ;;  %v4826_v36 = vmul.f32 %v14349_v61, %v3961_v37 }
 0x38e   : > { %v10462_v41 = vpop.eup %10461  ;;  %6344 = vst.msk [vmem:[#allocation3 + $0xc48] sm:$0xff] %vm492_vm0, %v10460_v50  ;;  %10481 = vpow2.f32 %v5734_v33  ;;  %v4827_v30 = vmul.f32 %v14352_v14, %v3961_v37  ;;  %v2837_v13 = vcombine.high %v2835_v7, %v2835_v7  ;;  %v2852_v10 = vrot.slane %v14295_v2, %v11597_v60 }
 0x38f   : > { %v10464_v52 = vpop.eup %10463  ;;  %6345 = vst.msk [vmem:[#allocation3 + $0xc50] sm:$0xff] %vm492_vm0, %v10462_v41  ;;  %10483 = vpow2.f32 %v5736_v44  ;;  %v5746_v23 = vmul.f32 1.442695, %v4824_v59  ;;  %v5748_v63 = vmul.f32 1.442695, %v4825_v6  ;;  %v2845_v44 = vcombine.high %v14295_v2, %v14295_v2 }
 0x390   : > { %v5750_v19 = vmul.f32 1.442695, %v4826_v36  ;;  %v10466_v38 = vpop.eup %10465  ;;  %6346 = vst.msk [vmem:[#allocation3 + $0xc58] sm:$0xff] %vm492_vm0, %v10464_v52  ;;  %10485 = vpow2.f32 %v5738_v55  ;;  %v5752_v53 = vmul.f32 1.442695, %v4827_v30  ;;  %v3965_v33 = vrot.slane %v2837_v13, %v11594_v58 }
 0x391   : > { %v3969_v37 = vrot.slane %v2852_v10, %v11594_v58  ;;  %v16163_v7 = vand.u32 2147483647, %v14134_v20  ;;  %v10468_v50 = vpop.eup %10467  ;;  %6347 = vst.msk [vmem:[#allocation3 + $0xc60] sm:$0xff] %vm492_vm0, %v10466_v38  ;;  %10487 = vpow2.f32 %v5740_v48  ;;  %v2860_v59 = vcombine.high %v2852_v10, %v2852_v10 }
 0x392   : > { %v16166_v55 = vsel %vm14230_vm2, %v14238_v16, %v14269_v3  ;;  %v10470_v6 = vpop.eup %10469  ;;  %6348 = vst.msk [vmem:[#allocation3 + $0xc68] sm:$0xff] %vm492_vm0, %v10468_v50  ;;  %10489 = vpow2.f32 %v5742_v9  ;;  %v4828_v48 = vmul.f32 %v14361_v22, %v3965_v33  ;;  %v4829_v36 = vmul.f32 %v14364_v25, %v3965_v33 }
 0x393   : > { %vm14385_vm4 = vcmp.lt.f32.partialorder %v16163_v7, 0.0004427343  ;;  %v14400_v20 = vsel %vm683_vm3, %v14061_v62, %v16166_v55  ;;  %v4830_v2 = vmul.f32 %v14317_v40, %v3969_v37  ;;  %v10472_v41 = vpop.eup %10471  ;;  %6349 = vst.msk [vmem:[#allocation3 + $0xc70] sm:$0xff] %vm492_vm0, %v10470_v6  ;;  %10491 = vpow2.f32 %v5744_v49 }
 0x394   : > { %v4831_v16 = vmul.f32 %v14320_v15, %v3969_v37  ;;  %v2859_v18 = vrot.slane %v2845_v44, %v11597_v60  ;;  %v3977_v62 = vrot.slane %v2860_v59, %v11594_v58  ;;  %v10474_v3 = vpop.eup %10473  ;;  %6350 = vst.msk [vmem:[#allocation3 + $0xc78] sm:$0xff] %vm492_vm0, %v10472_v41  ;;  %10493 = vpow2.f32 %v5746_v23 }
 0x395   : > { %v5754_v9 = vmul.f32 1.442695, %v4828_v48  ;;  %v5756_v30 = vmul.f32 1.442695, %v4829_v36  ;;  %v5758_v13 = vmul.f32 1.442695, %v4830_v2  ;;  %v10476_v10 = vpop.eup %10475  ;;  %10495 = vpow2.f32 %v5748_v63 }
 0x396   : > { %6351 = vst.msk [vmem:[#allocation3 + $0xc80] sm:$0xff] %vm492_vm0, %v10474_v3  ;;  %v5760_v49 = vmul.f32 1.442695, %v4831_v16  ;;  %v3973_v52 = vrot.slane %v2859_v18, %v11594_v58  ;;  %v4834_v38 = vmul.f32 %v14349_v61, %v3977_v62  ;;  %v10478_v33 = vpop.eup %10477  ;;  %6352 = vst.msk [vmem:[#allocation3 + $0xc88] sm:$0xff] %vm492_vm0, %v10476_v10  ;;  %10497 = vpow2.f32 %v5750_v19 }
 0x397   : > { %v4835_v37 = vmul.f32 %v14352_v14, %v3977_v62  ;;  %v2861_v7 = vcombine.high %v2859_v18, %v2859_v18  ;;  %v2868_v23 = vrot.slane %v14400_v20, %v11597_v60  ;;  %v10480_v50 = vpop.eup %10479  ;;  %6353 = vst.msk [vmem:[#allocation3 + $0xc90] sm:$0xff] %vm492_vm0, %v10478_v33  ;;  %10499 = vpow2.f32 %v5752_v53 }
 0x398   : > { %v4832_v63 = vmul.f32 %v14341_v4, %v3973_v52  ;;  %v4833_v44 = vmul.f32 %v14344_v56, %v3973_v52  ;;  %v5766_v59 = vmul.f32 1.442695, %v4834_v38  ;;  %v10482_v55 = vpop.eup %10481  ;;  %6354 = vst.msk [vmem:[#allocation3 + $0xc98] sm:$0xff] %vm492_vm0, %v10480_v50  ;;  %10501 = vpow2.f32 %v5754_v9 }
 0x399   : > { %v5768_v19 = vmul.f32 1.442695, %v4835_v37  ;;  %v3981_v6 = vrot.slane %v2861_v7, %v11594_v58  ;;  %v2876_v48 = vrot.slane %v2868_v23, %v11597_v60  ;;  %v10484_v36 = vpop.eup %10483  ;;  %6355 = vst.msk [vmem:[#allocation3 + $0xca0] sm:$0xff] %vm492_vm0, %v10482_v55  ;;  %10503 = vpow2.f32 %v5756_v30 }
 0x39a   : > { %v5762_v2 = vmul.f32 1.442695, %v4832_v63  ;;  %v5764_v53 = vmul.f32 1.442695, %v4833_v44  ;;  %v2869_v41 = vcombine.high %v2868_v23, %v2868_v23  ;;  %v10486_v16 = vpop.eup %10485  ;;  %6356 = vst.msk [vmem:[#allocation3 + $0xca8] sm:$0xff] %vm492_vm0, %v10484_v36  ;;  %10505 = vpow2.f32 %v5758_v13 }
 0x39b   : > { %v4836_v18 = vmul.f32 %v14361_v22, %v3981_v6  ;;  %v4837_v62 = vmul.f32 %v14364_v25, %v3981_v6  ;;  %v3985_v3 = vrot.slane %v2876_v48, %v11594_v58  ;;  %v10488_v9 = vpop.eup %10487  ;;  %6357 = vst.msk [vmem:[#allocation3 + $0xcb0] sm:$0xff] %vm492_vm0, %v10486_v16  ;;  %10507 = vpow2.f32 %v5760_v49 }
 0x39c   : > { %v2883_v10 = vrot.slane %v2869_v41, %v11597_v60  ;;  %v2884_v30 = vcombine.high %v2876_v48, %v2876_v48  ;;  %v1380_v52 = vsel %vm14385_vm4, %v14242_v47, %v14280_v24  ;;  %v10490_v38 = vpop.eup %10489  ;;  %6358 = vst.msk [vmem:[#allocation3 + $0xcb8] sm:$0xff] %vm492_vm0, %v10488_v9  ;;  %10509 = vpow2.f32 %v5762_v2 }
 0x39d   : > { %v5770_v13 = vmul.f32 1.442695, %v4836_v18  ;;  %v5772_v33 = vmul.f32 1.442695, %v4837_v62  ;;  %v4838_v37 = vmul.f32 %v14317_v40, %v3985_v3  ;;  %v10492_v7 = vpop.eup %10491  ;;  %6359 = vst.msk [vmem:[#allocation3 + $0xcc0] sm:$0xff] %vm492_vm0, %v10490_v38  ;;  %10511 = vpow2.f32 %v5764_v53 }
 0x39e   : > { %v4839_v49 = vmul.f32 %v14320_v15, %v3985_v3  ;;  %v3989_v23 = vrot.slane %v2883_v10, %v11594_v58  ;;  %v3993_v50 = vrot.slane %v2884_v30, %v11594_v58  ;;  %v10494_v1 = vpop.eup %10493  ;;  %6360 = vst.msk [vmem:[#allocation3 + $0xcc8] sm:$0xff] %vm492_vm0, %v10492_v7  ;;  %10513 = vpow2.f32 %v5766_v59 }
 0x39f   : > { %v5774_v47 = vmul.f32 1.442695, %v4838_v37  ;;  %v2885_v24 = vcombine.high %v2883_v10, %v2883_v10  ;;  %v14446_v63 = vsel %vm684_vm5, %v14064_v42, %v1380_v52  ;;  %v10496_v44 = vpop.eup %10495  ;;  %6361 = vst.msk [vmem:[#allocation3 + $0xcd0] sm:$0xff] %vm492_vm0, %v10494_v1  ;;  %10515 = vpow2.f32 %v5768_v19 }
 0x3a0   : > { %v5776_v55 = vmul.f32 1.442695, %v4839_v49  ;;  %v4840_v6 = vmul.f32 %v14341_v4, %v3989_v23  ;;  %v4841_v48 = vmul.f32 %v14344_v56, %v3989_v23  ;;  %v10498_v36 = vpop.eup %10497  ;;  %6362 = vst.msk [vmem:[#allocation3 + $0xcd8] sm:$0xff] %vm492_vm0, %v10496_v44  ;;  %10517 = vpow2.f32 %v5770_v13 }
 0x3a1   : > { %v4842_v59 = vmul.f32 %v14349_v61, %v3993_v50  ;;  %v4843_v2 = vmul.f32 %v14352_v14, %v3993_v50  ;;  %v3997_v42 = vrot.slane %v2885_v24, %v11594_v58  ;;  %v10500_v53 = vpop.eup %10499  ;;  %6363 = vst.msk [vmem:[#allocation3 + $0xce0] sm:$0xff] %vm492_vm0, %v10498_v36  ;;  %10519 = vpow2.f32 %v5772_v33  ;;  %v564_v50 = vld [vmem:[%s11502_s19 + $0xfc] sm:$0xf] }
 0x3a2   : > { %v5778_v19 = vmul.f32 1.442695, %v4840_v6  ;;  %v5780_v41 = vmul.f32 1.442695, %v4841_v48  ;;  %v2892_v16 = vrot.slane %v14446_v63, %v11597_v60  ;;  %v10502_v18 = vpop.eup %10501  ;;  %6364 = vst.msk [vmem:[#allocation3 + $0xce8] sm:$0xff] %vm492_vm0, %v10500_v53  ;;  %10521 = vpow2.f32 %v5774_v47 }
 0x3a3   : > { %v5782_v62 = vmul.f32 1.442695, %v4842_v59  ;;  %v5784_v3 = vmul.f32 1.442695, %v4843_v2  ;;  %v4844_v9 = vmul.f32 %v14361_v22, %v3997_v42  ;;  %v10504_v10 = vpop.eup %10503  ;;  %6365 = vst.msk [vmem:[#allocation3 + $0xcf0] sm:$0xff] %vm492_vm0, %v10502_v18  ;;  %10523 = vpow2.f32 %v5776_v55 }
 0x3a4   : > { %v4845_v30 = vmul.f32 %v14364_v25, %v3997_v42  ;;  %v2900_v52 = vrot.slane %v2892_v16, %v11597_v60  ;;  %v2893_v38 = vcombine.high %v2892_v16, %v2892_v16  ;;  %v10506_v13 = vpop.eup %10505  ;;  %6366 = vst.msk [vmem:[#allocation3 + $0xcf8] sm:$0xff] %vm492_vm0, %v10504_v10  ;;  %10525 = vpow2.f32 %v5778_v19  ;;  %v10774_v53 = vld [vmem:[#allocation16] sm:$0xf] }
 0x3a5   : > { %v5786_v33 = vmul.f32 1.442695, %v4844_v9  ;;  %v10508_v37 = vpop.eup %10507  ;;  %6367 = vst.msk [vmem:[#allocation3 + $0xd00] sm:$0xff] %vm492_vm0, %v10506_v13  ;;  %10527 = vpow2.f32 %v5780_v41  ;;  %v755_v24 = vmin.f32 %v14245_v35, 20.0  ;;  %v756_v44 = vmin.f32 %v14251_v28, 20.0 }
 0x3a6   : > { %v5788_v7 = vmul.f32 1.442695, %v4845_v30  ;;  %v4001_v49 = vrot.slane %v2900_v52, %v11594_v58  ;;  %v2907_v23 = vrot.slane %v2893_v38, %v11597_v60  ;;  %v10510_v1 = vpop.eup %10509  ;;  %6368 = vst.msk [vmem:[#allocation3 + $0xd08] sm:$0xff] %vm492_vm0, %v10508_v37  ;;  %10529 = vpow2.f32 %v5782_v62 }
 0x3a7   : > { %v2908_v47 = vcombine.high %v2900_v52, %v2900_v52  ;;  %v10512_v55 = vpop.eup %10511  ;;  %6369 = vst.msk [vmem:[#allocation3 + $0xd10] sm:$0xff] %vm492_vm0, %v10510_v1  ;;  %10531 = vpow2.f32 %v5784_v3  ;;  %v14477_v19 = vadd.f32 %v10774_v53, %v564_v50  ;;  %v14488_v37 = vmul.f32 1.442695, %v755_v24 }
 0x3a8   : > { %v4846_v6 = vmul.f32 %v14317_v40, %v4001_v49  ;;  %v4847_v48 = vmul.f32 %v14320_v15, %v4001_v49  ;;  %v4005_v36 = vrot.slane %v2907_v23, %v11594_v58  ;;  %v10514_v59 = vpop.eup %10513  ;;  %6370 = vst.msk [vmem:[#allocation3 + $0xd18] sm:$0xff] %vm492_vm0, %v10512_v55  ;;  %10533 = vpow2.f32 %v5786_v33 }
 0x3a9   : > { %v4009_v2 = vrot.slane %v2908_v47, %v11594_v58  ;;  %v2909_v42 = vcombine.high %v2907_v23, %v2907_v23  ;;  %v10516_v41 = vpop.eup %10515  ;;  %6371 = vst.msk [vmem:[#allocation3 + $0xd20] sm:$0xff] %vm492_vm0, %v10514_v59  ;;  %10535 = vpow2.f32 %v5788_v7  ;;  %v1384_v33 = vmul.f32 -0.5, %v14301_v5 }
 0x3aa   : > { %v5790_v16 = vmul.f32 1.442695, %v4846_v6  ;;  %v5792_v18 = vmul.f32 1.442695, %v4847_v48  ;;  %v4848_v62 = vmul.f32 %v14341_v4, %v4005_v36  ;;  %v10518_v3 = vpop.eup %10517  ;;  %6372 = vst.msk [vmem:[#allocation3 + $0xd28] sm:$0xff] %vm492_vm0, %v10516_v41  ;;  %v4849_v9 = vmul.f32 %v14344_v56, %v4005_v36 }
 0x3ab   : > { %v4850_v10 = vmul.f32 %v14349_v61, %v4009_v2  ;;  %v4851_v30 = vmul.f32 %v14352_v14, %v4009_v2  ;;  %v4013_v52 = vrot.slane %v2909_v42, %v11594_v58  ;;  %v10520_v38 = vpop.eup %10519  ;;  %6373 = vst.msk [vmem:[#allocation3 + $0xd30] sm:$0xff] %vm492_vm0, %v10518_v3  ;;  %v1393_v6 = vmul.f32 -0.5, %v14309_v26 }
 0x3ac   : > { %10537 = vpow2.f32 %v5790_v16  ;;  %v5794_v13 = vmul.f32 1.442695, %v4848_v62  ;;  %v10522_v7 = vpop.eup %10521  ;;  %6374 = vst.msk [vmem:[#allocation3 + $0xd38] sm:$0xff] %vm492_vm0, %v10520_v38  ;;  %v5796_v49 = vmul.f32 1.442695, %v4849_v9  ;;  %v1381_v24 = vadd.f32 1.0, %v14301_v5 }
 0x3ad   : > { %10539 = vpow2.f32 %v5792_v18  ;;  %v5798_v23 = vmul.f32 1.442695, %v4850_v10  ;;  %v5800_v50 = vmul.f32 1.442695, %v4851_v30  ;;  %v10524_v1 = vpop.eup %10523  ;;  %6375 = vst.msk [vmem:[#allocation3 + $0xd40] sm:$0xff] %vm492_vm0, %v10522_v7  ;;  %v4852_v47 = vmul.f32 %v14361_v22, %v4013_v52 }
 0x3ae   : > { %10541 = vpow2.f32 %v5794_v13  ;;  %v4853_v55 = vmul.f32 %v14364_v25, %v4013_v52  ;;  %v10526_v48 = vpop.eup %10525  ;;  %6376 = vst.msk [vmem:[#allocation3 + $0xd48] sm:$0xff] %vm492_vm0, %v10524_v1  ;;  %v1402_v36 = vmul.f32 -0.5, %v14315_v32  ;;  %v14498_v59 = vmul.f32 1.442695, %v756_v44 }
 0x3af   : > { %10543 = vpow2.f32 %v5796_v49  ;;  %v10528_v2 = vpop.eup %10527  ;;  %6377 = vst.msk [vmem:[#allocation3 + $0xd50] sm:$0xff] %vm492_vm0, %v10526_v48  ;;  %v5802_v42 = vmul.f32 1.442695, %v4852_v47  ;;  %v1385_v41 = vadd.f32 1.0, %v1384_v33  ;;  %v1387_v18 = vand.u32 2147483647, %v14301_v5 }
 0x3b0   : > { %10545 = vpow2.f32 %v5798_v23  ;;  %v5804_v53 = vmul.f32 1.442695, %v4853_v55  ;;  %v10530_v16 = vpop.eup %10529  ;;  %6378 = vst.msk [vmem:[#allocation3 + $0xd58] sm:$0xff] %vm492_vm0, %v10528_v2  ;;  %v1390_v62 = vadd.f32 1.0, %v14309_v26  ;;  %v1396_v3 = vand.u32 2147483647, %v14309_v26 }
 0x3b1   : > { %10547 = vpow2.f32 %v5800_v50  ;;  %v10532_v9 = vpop.eup %10531  ;;  %6379 = vst.msk [vmem:[#allocation3 + $0xd60] sm:$0xff] %vm492_vm0, %v10530_v16  ;;  %v1394_v44 = vadd.f32 1.0, %v1393_v6  ;;  %v1399_v10 = vadd.f32 1.0, %v14315_v32  ;;  %v1411_v30 = vmul.f32 -0.5, %v14325_v45  ;;  %v6463_v2 = vld [vmem:[%s11494_s24] sm:$0xf] }
 0x3b2   : > { %10549 = vpow2.f32 %v5802_v42  ;;  %v10534_v52 = vpop.eup %10533  ;;  %6380 = vst.msk [vmem:[#allocation3 + $0xd68] sm:$0xff] %vm492_vm0, %v10532_v9  ;;  %v1403_v38 = vadd.f32 1.0, %v1402_v36  ;;  %v1405_v13 = vand.u32 2147483647, %v14315_v32  ;;  %v1408_v33 = vadd.f32 1.0, %v14325_v45 }
 0x3b3   : > { %10551 = vpow2.f32 %v5804_v53  ;;  %v10536_v7 = vpop.eup %10535  ;;  %6381 = vst.msk [vmem:[#allocation3 + $0xd70] sm:$0xff] %vm492_vm0, %v10534_v52  ;;  %v1412_v49 = vadd.f32 1.0, %v1411_v30  ;;  %v1417_v23 = vadd.f32 1.0, %v14330_v27  ;;  %v1420_v50 = vmul.f32 -0.5, %v14330_v27  ;;  %v6464_v16 = vld [vmem:[%s11494_s24 + $0x4] sm:$0xf] }
 0x3b4   : > { %10553 = vlog2.f32 %v1381_v24  ;;  %6382 = vst.msk [vmem:[#allocation3 + $0xd78] sm:$0xff] %vm492_vm0, %v10536_v7  ;;  %v14516_v1 = vmul.f32 %v14301_v5, %v1385_v41  ;;  %v1414_v47 = vand.u32 2147483647, %v14325_v45  ;;  %v1426_v55 = vadd.f32 1.0, %v14334_v57 }
 0x3b5   : > { %10555 = vlog2.f32 %v1390_v62  ;;  %vm14520_vm6 = vcmp.lt.f32.partialorder %v1387_v18, 0.0004427343  ;;  %v1421_v24 = vadd.f32 1.0, %v1420_v50  ;;  %v1429_v36 = vmul.f32 -0.5, %v14334_v57  ;;  %v6468_v50 = vld [vmem:[%s11494_s24 + $0x14] sm:$0xf] }
 0x3b6   : > { %v10538_v6 = vpop.eup %10537  ;;  %10557 = vlog2.f32 %v1399_v10  ;;  %v14529_v5 = vmul.f32 %v14309_v26, %v1394_v44  ;;  %vm14531_vm8 = vcmp.lt.f32.partialorder %v1396_v3, 0.0004427343  ;;  %v1423_v41 = vand.u32 2147483647, %v14330_v27  ;;  %v6465_v44 = vld [vmem:[%s11494_s24 + $0x8] sm:$0xf] }
 0x3b7   : > { %v10540_v42 = vpop.eup %10539  ;;  %6383 = vst.msk [vmem:[#allocation3 + $0xd80] sm:$0xff] %vm492_vm0, %v10538_v6  ;;  %10559 = vlog2.f32 %v1408_v33  ;;  %v14540_v62 = vmul.f32 %v14315_v32, %v1403_v38  ;;  %vm14542_vm10 = vcmp.lt.f32.partialorder %v1405_v13, 0.0004427343  ;;  %v14547_v3 = vmul.f32 %v14325_v45, %v1412_v49  ;;  %v6466_v10 = vld [vmem:[%s11494_s24 + $0xc] sm:$0xf] }
 0x3b8   : > { %v10542_v18 = vpop.eup %10541  ;;  %6384 = vst.msk [vmem:[#allocation3 + $0xd88] sm:$0xff] %vm492_vm0, %v10540_v42  ;;  %10561 = vlog2.f32 %v1417_v23  ;;  %v1430_v9 = vadd.f32 1.0, %v1429_v36  ;;  %vm14553_vm12 = vcmp.lt.f32.partialorder %v1414_v47, 0.0004427343  ;;  %v1432_v52 = vand.u32 2147483647, %v14334_v57 }
 0x3b9   : > { %v10544_v30 = vpop.eup %10543  ;;  %6385 = vst.msk [vmem:[#allocation3 + $0xd90] sm:$0xff] %vm492_vm0, %v10542_v18  ;;  %10563 = vlog2.f32 %v1426_v55  ;;  %v757_v45 = vmin.f32 %v14477_v19, 20.0  ;;  %v6527_v38 = vmul.f32 %v6463_v2, %v11662_v11  ;;  %v6467_v13 = vld [vmem:[%s11494_s24 + $0x10] sm:$0xf]  ;;  %v14564_v7 = vmul.f32 %v14330_v27, %v1421_v24  ;;  %v6469_v47 = vld [vmem:[%s11494_s24 + $0x18] sm:$0xf] }
 0x3ba   : > { %v10546_v33 = vpop.eup %10545  ;;  %6386 = vst.msk [vmem:[#allocation3 + $0xd98] sm:$0xff] %vm492_vm0, %v10544_v30  ;;  %v14567_v49 = vmul.f32 %v14334_v57, %v1430_v9  ;;  %vm6591_vm14 = vcmask 519168   ;;  %v6528_v23 = vmul.f32 %v6464_v16, %v11681_v34  ;;  %vm14573_vm15 = vcmp.lt.f32.partialorder %v1423_v41, 0.0004427343  ;;  %v6470_v24 = vld [vmem:[%s11494_s24 + $0x1c] sm:$0xf] }
 0x3bb   : > { %v10548_v11 = vpop.eup %10547  ;;  %6387 = vst.msk [vmem:[#allocation3 + $0xda0] sm:$0xff] %vm492_vm0, %v10546_v33  ;;  %10565 = vpow2.f32 %v14488_v37  ;;  %v884_v27 = vmul.f32 1.442695, %v757_v45  ;;  %v6529_v6 = vmul.f32 %v6465_v44, %v11694_v46  ;;  %v6530_v34 = vmul.f32 %v6466_v10, %v11716_v0  ;;  %v6471_v36 = vld [vmem:[%s11494_s24 + $0x20] sm:$0xf]  ;;  %v16177_v42 = vld [vmem:[#allocation33_spill] sm:$0xff] }
 0x3bc   : > { %6592 = vst.msk [vmem:[#allocation4] sm:$0xf] %vm6591_vm14, %v6527_v38  ;;  %v10550_v2 = vpop.eup %10549  ;;  %6593 = vst.msk [vmem:[#allocation4 + $0x4] sm:$0xf] %vm6591_vm14, %v6528_v23  ;;  %v6531_v41 = vmul.f32 %v6467_v13, %v16177_v42  ;;  %v16178_v16 = vld [vmem:[#allocation34_spill] sm:$0xff]  ;;  %v16179_v18 = vld [vmem:[#allocation35_spill] sm:$0xff]  ;;  %10567 = vpow2.f32 %v14498_v59 }
 0x3bd   : > { %6388 = vst.msk [vmem:[#allocation3 + $0xda8] sm:$0xff] %vm492_vm0, %v10548_v11  ;;  %v6532_v37 = vmul.f32 %v6468_v50, %v16178_v16  ;;  %v6533_v9 = vmul.f32 %v6469_v47, %v16179_v18  ;;  %v16180_v30 = vld [vmem:[#allocation36_spill] sm:$0xff]  ;;  %v6472_v44 = vld [vmem:[%s11494_s24 + $0x24] sm:$0xf]  ;;  %v6473_v0 = vld [vmem:[%s11494_s24 + $0x28] sm:$0xf]  ;;  %v10552_v45 = vpop.eup %10551  ;;  %10569 = vpow2.f32 %v884_v27 }
 0x3be   : > { %v6534_v46 = vmul.f32 %v6470_v24, %v16180_v30  ;;  %v6474_v10 = vld [vmem:[%s11494_s24 + $0x2c] sm:$0xf]  ;;  %6389 = vst.msk [vmem:[#allocation3 + $0xdb0] sm:$0xff] %vm492_vm0, %v10550_v2  ;;  %v16181_v38 = vld [vmem:[#allocation37_spill] sm:$0xff]  ;;  %v16182_v33 = vld [vmem:[#allocation38_spill] sm:$0xff]  ;;  %v10554_v16 = vpop.eup %10553  ;;  %vm689_vm1 = vcmp.gt.f32.partialorder %v14206_v21, 20.0 }
 0x3bf   : > { %6594 = vst.msk [vmem:[#allocation4 + $0x8] sm:$0xf] %vm6591_vm14, %v6529_v6  ;;  %6595 = vst.msk [vmem:[#allocation4 + $0xc] sm:$0xf] %vm6591_vm14, %v6530_v34  ;;  %v6535_v13 = vmul.f32 %v6471_v36, %v16181_v38  ;;  %v6536_v23 = vmul.f32 %v6472_v44, %v16182_v33  ;;  %v16183_v50 = vld [vmem:[#allocation39_spill] sm:$0xff]  ;;  %v16184_v59 = vld [vmem:[#allocation40_spill] sm:$0xff] }
 0x3c0   : > { %v6537_v47 = vmul.f32 %v6473_v0, %v16183_v50  ;;  %v6475_v11 = vld [vmem:[%s11494_s24 + $0x30] sm:$0xf]  ;;  %v6476_v24 = vld [vmem:[%s11494_s24 + $0x34] sm:$0xf]  ;;  %v6477_v42 = vld [vmem:[%s11494_s24 + $0x38] sm:$0xf]  ;;  %v6538_v6 = vmul.f32 %v6474_v10, %v16184_v59 }
 0x3c1   : > { %6390 = vst.msk [vmem:[#allocation3 + $0xdb8] sm:$0xff] %vm492_vm0, %v10552_v45  ;;  %v16185_v34 = vld [vmem:[#allocation41_spill] sm:$0xff]  ;;  %v16186_v2 = vld [vmem:[#allocation42_spill] sm:$0xff]  ;;  %v16187_v30 = vld [vmem:[#allocation43_spill] sm:$0xff]  ;;  %v1383_v33 = vmul.f32 0.6931472, %v10554_v16 }
 0x3c2   : > { %6596 = vst.msk [vmem:[#allocation4 + $0x10] sm:$0xf] %vm6591_vm14, %v6531_v41  ;;  %6597 = vst.msk [vmem:[#allocation4 + $0x14] sm:$0xf] %vm6591_vm14, %v6532_v37  ;;  %v6539_v36 = vmul.f32 %v6475_v11, %v16185_v34  ;;  %v6540_v18 = vmul.f32 %v6476_v24, %v16186_v2  ;;  %v6541_v44 = vmul.f32 %v6477_v42, %v16187_v30  ;;  %v6478_v0 = vld [vmem:[%s11494_s24 + $0x3c] sm:$0xf]  ;;  %v10556_v41 = vpop.eup %10555 }
 0x3c3   : > { %6598 = vst.msk [vmem:[#allocation4 + $0x18] sm:$0xf] %vm6591_vm14, %v6533_v9  ;;  %6599 = vst.msk [vmem:[#allocation4 + $0x1c] sm:$0xf] %vm6591_vm14, %v6534_v46  ;;  %v6479_v45 = vld [vmem:[%s11494_s24 + $0x40] sm:$0xf]  ;;  %v10558_v59 = vpop.eup %10557  ;;  %v1389_v27 = vsel %vm14520_vm6, %v14516_v1, %v1383_v33 }
 0x3c4   : > { %v6480_v38 = vld [vmem:[%s11494_s24 + $0x44] sm:$0xf]  ;;  %6600 = vst.msk [vmem:[#allocation4 + $0x20] sm:$0xf] %vm6591_vm14, %v6535_v13  ;;  %6601 = vst.msk [vmem:[#allocation4 + $0x24] sm:$0xf] %vm6591_vm14, %v6536_v23 }
 0x3c5   : > { %6602 = vst.msk [vmem:[#allocation4 + $0x28] sm:$0xf] %vm6591_vm14, %v6537_v47  ;;  %v16188_v37 = vld [vmem:[#allocation44_spill] sm:$0xff]  ;;  %v16189_v46 = vld [vmem:[#allocation45_spill] sm:$0xff]  ;;  %v16190_v50 = vld [vmem:[#allocation46_spill] sm:$0xff]  ;;  %vm690_vm3 = vcmp.gt.f32.partialorder %v14212_v51, 20.0 }
 0x3c6   : > { %v6542_v9 = vmul.f32 %v6478_v0, %v16188_v37  ;;  %v6543_v10 = vmul.f32 %v6479_v45, %v16189_v46  ;;  %v6544_v11 = vmul.f32 %v6480_v38, %v16190_v50  ;;  %v6481_v24 = vld [vmem:[%s11494_s24 + $0x48] sm:$0xf]  ;;  %v6482_v42 = vld [vmem:[%s11494_s24 + $0x4c] sm:$0xf]  ;;  %v1392_v34 = vmul.f32 0.6931472, %v10556_v41  ;;  %v10560_v0 = vpop.eup %10559 }
 0x3c7   : > { %6603 = vst.msk [vmem:[#allocation4 + $0x2c] sm:$0xf] %vm6591_vm14, %v6538_v6  ;;  %6604 = vst.msk [vmem:[#allocation4 + $0x30] sm:$0xf] %vm6591_vm14, %v6539_v36  ;;  %v16191_v13 = vld [vmem:[#allocation47_spill] sm:$0xff]  ;;  %v16192_v47 = vld [vmem:[#allocation48_spill] sm:$0xff]  ;;  %v10562_v41 = vpop.eup %10561  ;;  %v14642_v37 = vsel %vm685_vm7, %v14142_v39, %v1389_v27 }
 0x3c8   : > { %6605 = vst.msk [vmem:[#allocation4 + $0x34] sm:$0xf] %vm6591_vm14, %v6540_v18  ;;  %6606 = vst.msk [vmem:[#allocation4 + $0x38] sm:$0xf] %vm6591_vm14, %v6541_v44  ;;  %v6545_v23 = vmul.f32 %v6481_v24, %v16191_v13  ;;  %v6546_v16 = vmul.f32 %v6482_v42, %v16192_v47  ;;  %v6483_v2 = vld [vmem:[%s11494_s24 + $0x50] sm:$0xf]  ;;  %v1398_v1 = vsel %vm14531_vm8, %v14529_v5, %v1392_v34  ;;  %v10564_v46 = vpop.eup %10563 }
 0x3c9   : > { %v6484_v30 = vld [vmem:[%s11494_s24 + $0x54] sm:$0xf]  ;;  %v1401_v45 = vmul.f32 0.6931472, %v10558_v59  ;;  %6607 = vst.msk [vmem:[#allocation4 + $0x3c] sm:$0xf] %vm6591_vm14, %v6542_v9  ;;  %v14655_v39 = vsel %vm686_vm9, %v14155_v54, %v1398_v1 }
 0x3ca   : > { %6608 = vst.msk [vmem:[#allocation4 + $0x40] sm:$0xf] %vm6591_vm14, %v6543_v10  ;;  %6609 = vst.msk [vmem:[#allocation4 + $0x44] sm:$0xf] %vm6591_vm14, %v6544_v11  ;;  %v16193_v6 = vld [vmem:[#allocation49_spill] sm:$0xff]  ;;  %v16194_v18 = vld [vmem:[#allocation50_spill] sm:$0xff]  ;;  %v2916_v10 = vrot.slane %v14642_v37, %v11597_v60  ;;  %v2940_v50 = vrot.slane %v14655_v39, %v11597_v60 }
 0x3cb   : > { %v6547_v36 = vmul.f32 %v6483_v2, %v16193_v6  ;;  %v6548_v44 = vmul.f32 %v6484_v30, %v16194_v18  ;;  %v6485_v38 = vld [vmem:[%s11494_s24 + $0x58] sm:$0xf]  ;;  %v1410_v48 = vmul.f32 0.6931472, %v10560_v0  ;;  %6610 = vst.msk [vmem:[#allocation4 + $0x48] sm:$0xf] %vm6591_vm14, %v6545_v23  ;;  %v1407_v5 = vsel %vm14542_vm10, %v14540_v62, %v1401_v45  ;;  %v14677_v62 = vpop.eup %10565 }
 0x3cc   : > { %6611 = vst.msk [vmem:[#allocation4 + $0x4c] sm:$0xf] %vm6591_vm14, %v6546_v16  ;;  %v16195_v33 = vld [vmem:[#allocation51_spill] sm:$0xff]  ;;  %v14660_v53 = vmul.f32 0.6931472, %v10562_v41  ;;  %v14669_v11 = vsel %vm687_vm11, %v14169_v17, %v1407_v5  ;;  %v2924_v24 = vrot.slane %v2916_v10, %v11597_v60  ;;  %v2917_v42 = vcombine.high %v2916_v10, %v2916_v10  ;;  %v14696_v23 = vpop.eup %10567 }
 0x3cd   : > { %v6549_v9 = vmul.f32 %v6485_v38, %v16195_v33  ;;  %6612 = vst.msk [vmem:[#allocation4 + $0x50] sm:$0xf] %vm6591_vm14, %v6547_v36  ;;  %6613 = vst.msk [vmem:[#allocation4 + $0x54] sm:$0xf] %vm6591_vm14, %v6548_v44  ;;  %v1416_v54 = vsel %vm14553_vm12, %v14547_v3, %v1410_v48  ;;  %v14674_v26 = vmul.f32 0.6931472, %v10564_v46  ;;  %v2964_v59 = vrot.slane %v14669_v11, %v11597_v60  ;;  %v14709_v38 = vpop.eup %10569 }
 0x3ce   : > { %v14685_v17 = vsel %vm688_vm13, %v14203_v43, %v1416_v54  ;;  %v2948_v32 = vrot.slane %v2940_v50, %v11597_v60  ;;  %v2941_v3 = vcombine.high %v2940_v50, %v2940_v50  ;;  %v1425_v13 = vsel %vm14573_vm15, %v14564_v7, %v14660_v53  ;;  %v14777_v7 = vld [vmem:[#allocation13 + $0x8] sm:$0xff] }
 0x3cf   : > { %6614 = vst.msk [vmem:[#allocation4 + $0x58] sm:$0xf] %vm6591_vm14, %v6549_v9  ;;  %v14690_v34 = vrot.slane %v14685_v17, %v11597_v60  ;;  %v4017_v47 = vrot.slane %v2924_v24, %v11594_v58  ;;  %v2931_v16 = vrot.slane %v2917_v42, %v11597_v60  ;;  %v2932_v43 = vcombine.high %v2924_v24, %v2924_v24 }
 0x3d0   : > { %v14701_v2 = vrot.slane %v2964_v59, %v11597_v60  ;;  %v4033_v30 = vrot.slane %v2948_v32, %v11594_v58  ;;  %v2955_v0 = vrot.slane %v2941_v3, %v11597_v60  ;;  %v2956_v27 = vcombine.high %v2948_v32, %v2948_v32 }
 0x3d1   : > { %v2965_v45 = vcombine.high %v2964_v59, %v2964_v59  ;;  %v4854_v6 = vmul.f32 %v14317_v40, %v4017_v47  ;;  %v4855_v36 = vmul.f32 %v14320_v15, %v4017_v47  ;;  %v4021_v18 = vrot.slane %v2931_v16, %v11594_v58 }
 0x3d2   : > { %v4025_v44 = vrot.slane %v2932_v43, %v11594_v58  ;;  %v2933_v41 = vcombine.high %v2931_v16, %v2931_v16  ;;  %v4862_v1 = vmul.f32 %v14317_v40, %v4033_v30  ;;  %v4863_v48 = vmul.f32 %v14320_v15, %v4033_v30 }
 0x3d3   : > { %v4037_v33 = vrot.slane %v2955_v0, %v11594_v58  ;;  %v5806_v9 = vmul.f32 1.442695, %v4854_v6  ;;  %v5808_v46 = vmul.f32 1.442695, %v4855_v36  ;;  %v4856_v10 = vmul.f32 %v14341_v4, %v4021_v18 }
 0x3d4   : > { %v4857_v5 = vmul.f32 %v14344_v56, %v4021_v18  ;;  %v4858_v50 = vmul.f32 %v14349_v61, %v4025_v44  ;;  %v4859_v54 = vmul.f32 %v14352_v14, %v4025_v44  ;;  %v4029_v24 = vrot.slane %v2933_v41, %v11594_v58 }
 0x3d5   : > { %v5822_v42 = vmul.f32 1.442695, %v4862_v1  ;;  %10571 = vpow2.f32 %v5806_v9  ;;  %v5810_v59 = vmul.f32 1.442695, %v4856_v10  ;;  %v5824_v3 = vmul.f32 1.442695, %v4863_v48 }
 0x3d6   : > { %v5812_v32 = vmul.f32 1.442695, %v4857_v5  ;;  %10573 = vpow2.f32 %v5808_v46  ;;  %v5814_v47 = vmul.f32 1.442695, %v4858_v50  ;;  %v5816_v16 = vmul.f32 1.442695, %v4859_v54 }
 0x3d7   : > { %v4860_v43 = vmul.f32 %v14361_v22, %v4029_v24  ;;  %10575 = vpow2.f32 %v5810_v59  ;;  %v4861_v30 = vmul.f32 %v14364_v25, %v4029_v24  ;;  %v4864_v6 = vmul.f32 %v14341_v4, %v4037_v33 }
 0x3d8   : > { %v4865_v36 = vmul.f32 %v14344_v56, %v4037_v33  ;;  %10577 = vpow2.f32 %v5812_v32  ;;  %v4041_v44 = vrot.slane %v2956_v27, %v11594_v58  ;;  %v2957_v41 = vcombine.high %v2955_v0, %v2955_v0 }
 0x3d9   : > { %v5818_v18 = vmul.f32 1.442695, %v4860_v43  ;;  %10579 = vpow2.f32 %v5814_v47  ;;  %v5820_v1 = vmul.f32 1.442695, %v4861_v30  ;;  %v5826_v48 = vmul.f32 1.442695, %v4864_v6 }
 0x3da   : > { %v5828_v9 = vmul.f32 1.442695, %v4865_v36  ;;  %10581 = vpow2.f32 %v5816_v16  ;;  %v4866_v46 = vmul.f32 %v14349_v61, %v4041_v44  ;;  %v4867_v10 = vmul.f32 %v14352_v14, %v4041_v44 }
 0x3db   : > { %v4045_v5 = vrot.slane %v2957_v41, %v11594_v58  ;;  %10583 = vpow2.f32 %v5818_v18  ;;  %v4049_v33 = vrot.slane %v14701_v2, %v11594_v58  ;;  %v2979_v27 = vrot.slane %v2965_v45, %v11597_v60 }
 0x3dc   : > { %v2980_v0 = vcombine.high %v14701_v2, %v14701_v2  ;;  %10585 = vpow2.f32 %v5820_v1  ;;  %v5830_v50 = vmul.f32 1.442695, %v4866_v46  ;;  %v5832_v54 = vmul.f32 1.442695, %v4867_v10 }
 0x3dd   : > { %v4868_v24 = vmul.f32 %v14361_v22, %v4045_v5  ;;  %10587 = vpow2.f32 %v5822_v42  ;;  %v4869_v59 = vmul.f32 %v14364_v25, %v4045_v5  ;;  %v4870_v32 = vmul.f32 %v14317_v40, %v4049_v33 }
 0x3de   : > { %v4871_v47 = vmul.f32 %v14320_v15, %v4049_v33  ;;  %10589 = vpow2.f32 %v5824_v3  ;;  %v4053_v43 = vrot.slane %v2979_v27, %v11594_v58  ;;  %v4057_v45 = vrot.slane %v2980_v0, %v11594_v58 }
 0x3df   : > { %v5834_v16 = vmul.f32 1.442695, %v4868_v24  ;;  %v10572_v30 = vpop.eup %10571  ;;  %10591 = vpow2.f32 %v5826_v48  ;;  %v5836_v2 = vmul.f32 1.442695, %v4869_v59  ;;  %v5838_v6 = vmul.f32 1.442695, %v4870_v32 }
 0x3e0   : > { %v5840_v36 = vmul.f32 1.442695, %v4871_v47  ;;  %v10574_v18 = vpop.eup %10573  ;;  %6391 = vst.msk [vmem:[#allocation3 + $0xdc0] sm:$0xff] %vm492_vm0, %v10572_v30  ;;  %10593 = vpow2.f32 %v5828_v9  ;;  %v4872_v42 = vmul.f32 %v14341_v4, %v4053_v43  ;;  %v4873_v40 = vmul.f32 %v14344_v56, %v4053_v43 }
 0x3e1   : > { %v4874_v15 = vmul.f32 %v14349_v61, %v4057_v45  ;;  %v10576_v3 = vpop.eup %10575  ;;  %6392 = vst.msk [vmem:[#allocation3 + $0xdc8] sm:$0xff] %vm492_vm0, %v10574_v18  ;;  %10595 = vpow2.f32 %v5830_v50  ;;  %v4875_v44 = vmul.f32 %v14352_v14, %v4057_v45  ;;  %v2981_v41 = vcombine.high %v2979_v27, %v2979_v27  ;;  %v14786_v45 = vld [vmem:[#allocation13 + $0x20] sm:$0xff] }
 0x3e2   : > { %v2996_v1 = vrot.slane %v14690_v34, %v11597_v60  ;;  %v10578_v48 = vpop.eup %10577  ;;  %6393 = vst.msk [vmem:[#allocation3 + $0xdd0] sm:$0xff] %vm492_vm0, %v10576_v3  ;;  %10597 = vpow2.f32 %v5832_v54  ;;  %v5842_v9 = vmul.f32 1.442695, %v4872_v42  ;;  %v5844_v4 = vmul.f32 1.442695, %v4873_v40 }
 0x3e3   : > { %v5846_v46 = vmul.f32 1.442695, %v4874_v15  ;;  %v10580_v56 = vpop.eup %10579  ;;  %6394 = vst.msk [vmem:[#allocation3 + $0xdd8] sm:$0xff] %vm492_vm0, %v10578_v48  ;;  %10599 = vpow2.f32 %v5834_v16  ;;  %v5848_v61 = vmul.f32 1.442695, %v4875_v44  ;;  %v4061_v10 = vrot.slane %v2981_v41, %v11594_v58  ;;  %v14796_v15 = vld [vmem:[#allocation13 + $0x10] sm:$0xff] }
 0x3e4   : > { %v4065_v14 = vrot.slane %v2996_v1, %v11594_v58  ;;  %vm14753_vm2 = vcmp.lt.f32.partialorder %v1432_v52, 0.0004427343  ;;  %v10582_v33 = vpop.eup %10581  ;;  %6395 = vst.msk [vmem:[#allocation3 + $0xde0] sm:$0xff] %vm492_vm0, %v10580_v56  ;;  %10601 = vpow2.f32 %v5836_v2  ;;  %v2989_v27 = vcombine.high %v14690_v34, %v14690_v34  ;;  %v14773_v34 = vld [vmem:[#allocation13] sm:$0xff]  ;;  %v14799_v44 = vld [vmem:[#allocation13 + $0x18] sm:$0xff] }
 0x3e5   : > { %v3004_v0 = vcombine.high %v2996_v1, %v2996_v1  ;;  %v14768_v57 = vsel %vm689_vm1, %v14206_v21, %v1425_v13  ;;  %v10584_v52 = vpop.eup %10583  ;;  %6396 = vst.msk [vmem:[#allocation3 + $0xde8] sm:$0xff] %vm492_vm0, %v10582_v33  ;;  %10603 = vpow2.f32 %v5838_v6  ;;  %v4876_v50 = vmul.f32 %v14361_v22, %v4061_v10  ;;  %v14790_v6 = vld [vmem:[#allocation13 + $0x28] sm:$0xff] }
 0x3e6   : > { %v4877_v54 = vmul.f32 %v14364_v25, %v4061_v10  ;;  %v4878_v55 = vmul.f32 %v14773_v34, %v4065_v14  ;;  %v10586_v24 = vpop.eup %10585  ;;  %6397 = vst.msk [vmem:[#allocation3 + $0xdf0] sm:$0xff] %vm492_vm0, %v10584_v52  ;;  %10605 = vpow2.f32 %v5840_v36  ;;  %v4879_v21 = vmul.f32 %v14777_v7, %v4065_v14  ;;  %v14810_v52 = vld [vmem:[#allocation13 + $0x38] sm:$0xff] }
 0x3e7   : > { %v3003_v53 = vrot.slane %v2989_v27, %v11597_v60  ;;  %v4073_v13 = vrot.slane %v3004_v0, %v11594_v58  ;;  %v10588_v22 = vpop.eup %10587  ;;  %6398 = vst.msk [vmem:[#allocation3 + $0xdf8] sm:$0xff] %vm492_vm0, %v10586_v24  ;;  %10607 = vpow2.f32 %v5842_v9  ;;  %v5850_v25 = vmul.f32 1.442695, %v4876_v50  ;;  %v14807_v27 = vld [vmem:[#allocation13 + $0x30] sm:$0xff] }
 0x3e8   : > { %v5852_v59 = vmul.f32 1.442695, %v4877_v54  ;;  %v5854_v32 = vmul.f32 1.442695, %v4878_v55  ;;  %v10590_v47 = vpop.eup %10589  ;;  %6399 = vst.msk [vmem:[#allocation3 + $0xe00] sm:$0xff] %vm492_vm0, %v10588_v22  ;;  %10609 = vpow2.f32 %v5844_v4  ;;  %v3012_v42 = vrot.slane %v14768_v57, %v11597_v60 }
 0x3e9   : > { %v5856_v16 = vmul.f32 1.442695, %v4879_v21  ;;  %v4069_v43 = vrot.slane %v3003_v53, %v11594_v58  ;;  %v4882_v30 = vmul.f32 %v14786_v45, %v4073_v13  ;;  %v10592_v2 = vpop.eup %10591  ;;  %6400 = vst.msk [vmem:[#allocation3 + $0xe08] sm:$0xff] %vm492_vm0, %v10590_v47  ;;  %10611 = vpow2.f32 %v5846_v46 }
 0x3ea   : > { %v4883_v36 = vmul.f32 %v14790_v6, %v4073_v13  ;;  %v3005_v18 = vcombine.high %v3003_v53, %v3003_v53  ;;  %v10594_v40 = vpop.eup %10593  ;;  %6401 = vst.msk [vmem:[#allocation3 + $0xe10] sm:$0xff] %vm492_vm0, %v10592_v2  ;;  %10613 = vpow2.f32 %v5848_v61  ;;  %v3020_v46 = vrot.slane %v3012_v42, %v11597_v60 }
 0x3eb   : > { %v4880_v3 = vmul.f32 %v14796_v15, %v4069_v43  ;;  %v4881_v41 = vmul.f32 %v14799_v44, %v4069_v43  ;;  %v5862_v1 = vmul.f32 1.442695, %v4882_v30  ;;  %v10596_v48 = vpop.eup %10595  ;;  %6402 = vst.msk [vmem:[#allocation3 + $0xe18] sm:$0xff] %vm492_vm0, %v10594_v40  ;;  %10615 = vpow2.f32 %v5850_v25 }
 0x3ec   : > { %v5864_v9 = vmul.f32 1.442695, %v4883_v36  ;;  %v4077_v4 = vrot.slane %v3005_v18, %v11594_v58  ;;  %v10598_v56 = vpop.eup %10597  ;;  %6403 = vst.msk [vmem:[#allocation3 + $0xe20] sm:$0xff] %vm492_vm0, %v10596_v48  ;;  %10617 = vpow2.f32 %v5852_v59  ;;  %v3013_v14 = vcombine.high %v3012_v42, %v3012_v42 }
 0x3ed   : > { %v5858_v61 = vmul.f32 1.442695, %v4880_v3  ;;  %v5860_v10 = vmul.f32 1.442695, %v4881_v41  ;;  %v10600_v33 = vpop.eup %10599  ;;  %6404 = vst.msk [vmem:[#allocation3 + $0xe28] sm:$0xff] %vm492_vm0, %v10598_v56  ;;  %10619 = vpow2.f32 %v5854_v32  ;;  %v4081_v54 = vrot.slane %v3020_v46, %v11594_v58 }
 0x3ee   : > { %v4884_v0 = vmul.f32 %v14807_v27, %v4077_v4  ;;  %v4885_v50 = vmul.f32 %v14810_v52, %v4077_v4  ;;  %v10602_v55 = vpop.eup %10601  ;;  %6405 = vst.msk [vmem:[#allocation3 + $0xe30] sm:$0xff] %vm492_vm0, %v10600_v33  ;;  %10621 = vpow2.f32 %v5856_v16  ;;  %v3027_v24 = vrot.slane %v3013_v14, %v11597_v60 }
 0x3ef   : > { %v3028_v21 = vcombine.high %v3020_v46, %v3020_v46  ;;  %v1434_v53 = vsel %vm14753_vm2, %v14567_v49, %v14674_v26  ;;  %v10604_v13 = vpop.eup %10603  ;;  %6406 = vst.msk [vmem:[#allocation3 + $0xe38] sm:$0xff] %vm492_vm0, %v10602_v55  ;;  %10623 = vpow2.f32 %v5858_v61  ;;  %v4886_v59 = vmul.f32 %v14773_v34, %v4081_v54 }
 0x3f0   : > { %v5866_v22 = vmul.f32 1.442695, %v4884_v0  ;;  %v5868_v25 = vmul.f32 1.442695, %v4885_v50  ;;  %v10606_v32 = vpop.eup %10605  ;;  %6407 = vst.msk [vmem:[#allocation3 + $0xe40] sm:$0xff] %vm492_vm0, %v10604_v13  ;;  %10625 = vpow2.f32 %v5860_v10  ;;  %v4887_v47 = vmul.f32 %v14777_v7, %v4081_v54 }
 0x3f1   : > { %v4085_v16 = vrot.slane %v3027_v24, %v11594_v58  ;;  %v4089_v43 = vrot.slane %v3028_v21, %v11594_v58  ;;  %v10608_v5 = vpop.eup %10607  ;;  %6408 = vst.msk [vmem:[#allocation3 + $0xe48] sm:$0xff] %vm492_vm0, %v10606_v32  ;;  %10627 = vpow2.f32 %v5862_v1  ;;  %v5870_v49 = vmul.f32 1.442695, %v4886_v59 }
 0x3f2   : > { %v3029_v26 = vcombine.high %v3027_v24, %v3027_v24  ;;  %v14830_v30 = vsel %vm690_vm3, %v14212_v51, %v1434_v53  ;;  %v10610_v2 = vpop.eup %10609  ;;  %6409 = vst.msk [vmem:[#allocation3 + $0xe50] sm:$0xff] %vm492_vm0, %v10608_v5  ;;  %10629 = vpow2.f32 %v5864_v9  ;;  %v5872_v36 = vmul.f32 1.442695, %v4887_v47 }
 0x3f3   : > { %v4888_v18 = vmul.f32 %v14796_v15, %v4085_v16  ;;  %v4889_v42 = vmul.f32 %v14799_v44, %v4085_v16  ;;  %v10612_v40 = vpop.eup %10611  ;;  %6410 = vst.msk [vmem:[#allocation3 + $0xe58] sm:$0xff] %vm492_vm0, %v10610_v2  ;;  %10631 = vpow2.f32 %v5866_v22  ;;  %v4890_v3 = vmul.f32 %v14786_v45, %v4089_v43 }
 0x3f4   : > { %v4891_v41 = vmul.f32 %v14790_v6, %v4089_v43  ;;  %v4093_v51 = vrot.slane %v3029_v26, %v11594_v58  ;;  %v10614_v1 = vpop.eup %10613  ;;  %6411 = vst.msk [vmem:[#allocation3 + $0xe60] sm:$0xff] %vm492_vm0, %v10612_v40  ;;  %10633 = vpow2.f32 %v5868_v25  ;;  %v3036_v4 = vrot.slane %v14830_v30, %v11597_v60 }
 0x3f5   : > { %v5874_v48 = vmul.f32 1.442695, %v4888_v18  ;;  %v5876_v9 = vmul.f32 1.442695, %v4889_v42  ;;  %v10616_v46 = vpop.eup %10615  ;;  %6412 = vst.msk [vmem:[#allocation3 + $0xe68] sm:$0xff] %vm492_vm0, %v10614_v1  ;;  %10635 = vpow2.f32 %v5870_v49  ;;  %v1438_v26 = vmul.f32 -0.5, %v14677_v62 }
 0x3f6   : > { %v5878_v56 = vmul.f32 1.442695, %v4890_v3  ;;  %v5880_v61 = vmul.f32 1.442695, %v4891_v41  ;;  %v4892_v10 = vmul.f32 %v14807_v27, %v4093_v51  ;;  %v10618_v14 = vpop.eup %10617  ;;  %6413 = vst.msk [vmem:[#allocation3 + $0xe70] sm:$0xff] %vm492_vm0, %v10616_v46  ;;  %10637 = vpow2.f32 %v5872_v36 }
 0x3f7   : > { %v4893_v33 = vmul.f32 %v14810_v52, %v4093_v51  ;;  %v3044_v0 = vrot.slane %v3036_v4, %v11597_v60  ;;  %v3037_v50 = vcombine.high %v3036_v4, %v3036_v4  ;;  %v10620_v54 = vpop.eup %10619  ;;  %6414 = vst.msk [vmem:[#allocation3 + $0xe78] sm:$0xff] %vm492_vm0, %v10618_v14  ;;  %10639 = vpow2.f32 %v5874_v48 }
 0x3f8   : > { %v5882_v55 = vmul.f32 1.442695, %v4892_v10  ;;  %v10622_v24 = vpop.eup %10621  ;;  %6415 = vst.msk [vmem:[#allocation3 + $0xe80] sm:$0xff] %vm492_vm0, %v10620_v54  ;;  %10641 = vpow2.f32 %v5876_v9  ;;  %v6486_v10 = vld [vmem:[%s11494_s24 + $0x5c] sm:$0xf]  ;;  %vm691_vm4 = vcmp.gt.f32.partialorder %v14245_v35, 20.0 }
 0x3f9   : > { %v5884_v21 = vmul.f32 1.442695, %v4893_v33  ;;  %v4097_v53 = vrot.slane %v3044_v0, %v11594_v58  ;;  %v3051_v13 = vrot.slane %v3037_v50, %v11597_v60  ;;  %v10624_v22 = vpop.eup %10623  ;;  %6416 = vst.msk [vmem:[#allocation3 + $0xe88] sm:$0xff] %vm492_vm0, %v10622_v24  ;;  %10643 = vpow2.f32 %v5878_v56  ;;  %v6487_v54 = vld [vmem:[%s11494_s24 + $0x60] sm:$0xf] }
 0x3fa   : > { %v3052_v25 = vcombine.high %v3044_v0, %v3044_v0  ;;  %v10626_v59 = vpop.eup %10625  ;;  %6417 = vst.msk [vmem:[#allocation3 + $0xe90] sm:$0xff] %vm492_vm0, %v10624_v22  ;;  %10645 = vpow2.f32 %v5880_v61  ;;  %v1447_v50 = vmul.f32 -0.5, %v14696_v23  ;;  %v6489_v22 = vld [vmem:[%s11494_s24 + $0x68] sm:$0xf]  ;;  %vm692_vm6 = vcmp.gt.f32.partialorder %v14251_v28, 20.0 }
 0x3fb   : > { %v4894_v32 = vmul.f32 %v14773_v34, %v4097_v53  ;;  %v4895_v47 = vmul.f32 %v14777_v7, %v4097_v53  ;;  %v4101_v16 = vrot.slane %v3051_v13, %v11594_v58  ;;  %v10628_v43 = vpop.eup %10627  ;;  %6418 = vst.msk [vmem:[#allocation3 + $0xe98] sm:$0xff] %vm492_vm0, %v10626_v59  ;;  %10647 = vpow2.f32 %v5882_v55  ;;  %v6488_v55 = vld [vmem:[%s11494_s24 + $0x64] sm:$0xf]  ;;  %v6491_v59 = vld [vmem:[%s11494_s24 + $0x70] sm:$0xf] }
 0x3fc   : > { %v4105_v5 = vrot.slane %v3052_v25, %v11594_v58  ;;  %v3053_v49 = vcombine.high %v3051_v13, %v3051_v13  ;;  %v10630_v2 = vpop.eup %10629  ;;  %6419 = vst.msk [vmem:[#allocation3 + $0xea0] sm:$0xff] %vm492_vm0, %v10628_v43  ;;  %10649 = vpow2.f32 %v5884_v21  ;;  %v1435_v21 = vadd.f32 1.0, %v14677_v62  ;;  %v6490_v25 = vld [vmem:[%s11494_s24 + $0x6c] sm:$0xf] }
 0x3fd   : > { %v5886_v36 = vmul.f32 1.442695, %v4894_v32  ;;  %v5888_v18 = vmul.f32 1.442695, %v4895_v47  ;;  %v4896_v42 = vmul.f32 %v14796_v15, %v4101_v16  ;;  %v10632_v40 = vpop.eup %10631  ;;  %6420 = vst.msk [vmem:[#allocation3 + $0xea8] sm:$0xff] %vm492_vm0, %v10630_v2  ;;  %v4897_v3 = vmul.f32 %v14799_v44, %v4101_v16 }
 0x3fe   : > { %v4898_v41 = vmul.f32 %v14786_v45, %v4105_v5  ;;  %v4899_v51 = vmul.f32 %v14790_v6, %v4105_v5  ;;  %v4109_v1 = vrot.slane %v3053_v49, %v11594_v58  ;;  %v10634_v48 = vpop.eup %10633  ;;  %6421 = vst.msk [vmem:[#allocation3 + $0xeb0] sm:$0xff] %vm492_vm0, %v10632_v40  ;;  %v14877_v53 = vadd.f32 1.0, %v1438_v26  ;;  %v6492_v5 = vld [vmem:[%s11494_s24 + $0x74] sm:$0xf]  ;;  %v6493_v49 = vld [vmem:[%s11494_s24 + $0x78] sm:$0xf] }
 0x3ff   : > { %10651 = vpow2.f32 %v5886_v36  ;;  %v5890_v9 = vmul.f32 1.442695, %v4896_v42  ;;  %v10636_v4 = vpop.eup %10635  ;;  %6422 = vst.msk [vmem:[#allocation3 + $0xeb8] sm:$0xff] %vm492_vm0, %v10634_v48  ;;  %v5892_v46 = vmul.f32 1.442695, %v4897_v3  ;;  %v1456_v13 = vmul.f32 -0.5, %v14709_v38 }
 0x400   : > { %10653 = vpow2.f32 %v5888_v18  ;;  %v5894_v56 = vmul.f32 1.442695, %v4898_v41  ;;  %v5896_v61 = vmul.f32 1.442695, %v4899_v51  ;;  %v10638_v14 = vpop.eup %10637  ;;  %6423 = vst.msk [vmem:[#allocation3 + $0xec0] sm:$0xff] %vm492_vm0, %v10636_v4  ;;  %v4900_v33 = vmul.f32 %v14807_v27, %v4109_v1  ;;  %v16198_v48 = vld [vmem:[#allocation52_spill] sm:$0xff] }
 0x401   : > { %10655 = vpow2.f32 %v5890_v9  ;;  %v4901_v0 = vmul.f32 %v14810_v52, %v4109_v1  ;;  %v10640_v24 = vpop.eup %10639  ;;  %6424 = vst.msk [vmem:[#allocation3 + $0xec8] sm:$0xff] %vm492_vm0, %v10638_v14  ;;  %v6494_v26 = vld [vmem:[%s11494_s24 + $0x7c] sm:$0xf]  ;;  %v1444_v36 = vadd.f32 1.0, %v14696_v23  ;;  %v1453_v42 = vadd.f32 1.0, %v14709_v38 }
 0x402   : > { %10657 = vpow2.f32 %v5892_v46  ;;  %v10642_v32 = vpop.eup %10641  ;;  %6425 = vst.msk [vmem:[#allocation3 + $0xed0] sm:$0xff] %vm492_vm0, %v10640_v24  ;;  %v5898_v47 = vmul.f32 1.442695, %v4900_v33  ;;  %v6495_v40 = vld [vmem:[%s11494_s24 + $0x80] sm:$0xf]  ;;  %v14896_v1 = vadd.f32 1.0, %v1447_v50  ;;  %v6550_v9 = vmul.f32 %v6486_v10, %v16198_v48 }
 0x403   : > { %10659 = vpow2.f32 %v5894_v56  ;;  %v5900_v16 = vmul.f32 1.442695, %v4901_v0  ;;  %v10644_v2 = vpop.eup %10643  ;;  %6426 = vst.msk [vmem:[#allocation3 + $0xed8] sm:$0xff] %vm492_vm0, %v10642_v32  ;;  %v6496_v3 = vld [vmem:[%s11494_s24 + $0x84] sm:$0xf]  ;;  %v16199_v4 = vld [vmem:[#allocation53_spill] sm:$0xff] }
 0x404   : > { %10661 = vpow2.f32 %v5896_v61  ;;  %v6497_v41 = vld [vmem:[%s11494_s24 + $0x88] sm:$0xf]  ;;  %v10646_v51 = vpop.eup %10645  ;;  %6427 = vst.msk [vmem:[#allocation3 + $0xee0] sm:$0xff] %vm492_vm0, %v10644_v2  ;;  %v6551_v46 = vmul.f32 %v6487_v54, %v16199_v4  ;;  %v6498_v56 = vld [vmem:[%s11494_s24 + $0x8c] sm:$0xf]  ;;  %v14905_v24 = vadd.f32 1.0, %v1456_v13 }
 0x405   : > { %10663 = vpow2.f32 %v5898_v47  ;;  %v6499_v61 = vld [vmem:[%s11494_s24 + $0x90] sm:$0xf]  ;;  %v6500_v14 = vld [vmem:[%s11494_s24 + $0x94] sm:$0xf]  ;;  %v6501_v33 = vld [vmem:[%s11494_s24 + $0x98] sm:$0xf]  ;;  %v10648_v0 = vpop.eup %10647 }
 0x406   : > { %6428 = vst.msk [vmem:[#allocation3 + $0xee8] sm:$0xff] %vm492_vm0, %v10646_v51  ;;  %10665 = vpow2.f32 %v5900_v16  ;;  %v16200_v32 = vld [vmem:[#allocation54_spill] sm:$0xff]  ;;  %v6502_v10 = vld [vmem:[%s11494_s24 + $0x9c] sm:$0xf]  ;;  %v10650_v54 = vpop.eup %10649  ;;  %6429 = vst.msk [vmem:[#allocation3 + $0xef0] sm:$0xff] %vm492_vm0, %v10648_v0  ;;  %vm693_vm9 = vcmp.gt.f32.partialorder %v14477_v19, 20.0 }
 0x407   : > { %v6552_v47 = vmul.f32 %v6488_v55, %v16200_v32  ;;  %v6503_v2 = vld [vmem:[%s11494_s24 + $0xa0] sm:$0xf]  ;;  %10667 = vlog2.f32 %v1435_v21  ;;  %6615 = vst.msk [vmem:[#allocation4 + $0x5c] sm:$0xf] %vm6591_vm14, %v6550_v9  ;;  %6616 = vst.msk [vmem:[#allocation4 + $0x60] sm:$0xf] %vm6591_vm14, %v6551_v46 }
 0x408   : > { %v16201_v16 = vld [vmem:[#allocation55_spill] sm:$0xff]  ;;  %v16202_v51 = vld [vmem:[#allocation56_spill] sm:$0xff]  ;;  %v16203_v4 = vld [vmem:[#allocation57_spill] sm:$0xff]  ;;  %6430 = vst.msk [vmem:[#allocation3 + $0xef8] sm:$0xff] %vm492_vm0, %v10650_v54  ;;  %10669 = vlog2.f32 %v1444_v36 }
 0x409   : > { %v6553_v13 = vmul.f32 %v6489_v22, %v16201_v16  ;;  %v6554_v48 = vmul.f32 %v6490_v25, %v16202_v51  ;;  %v6555_v50 = vmul.f32 %v6491_v59, %v16203_v4  ;;  %v6504_v55 = vld [vmem:[%s11494_s24 + $0xa4] sm:$0xf]  ;;  %v6505_v32 = vld [vmem:[%s11494_s24 + $0xa8] sm:$0xf]  ;;  %v6506_v18 = vld [vmem:[%s11494_s24 + $0xac] sm:$0xf]  ;;  %v10652_v4 = vpop.eup %10651  ;;  %10671 = vlog2.f32 %v1453_v42 }
 0x40a   : > { %6617 = vst.msk [vmem:[#allocation4 + $0x64] sm:$0xf] %vm6591_vm14, %v6552_v47  ;;  %v16204_v21 = vld [vmem:[#allocation58_spill] sm:$0xff]  ;;  %v16205_v0 = vld [vmem:[#allocation59_spill] sm:$0xff]  ;;  %v16206_v22 = vld [vmem:[#allocation60_spill] sm:$0xff]  ;;  %v10654_v43 = vpop.eup %10653 }
 0x40b   : > { %v6556_v9 = vmul.f32 %v6492_v5, %v16204_v21  ;;  %v6557_v46 = vmul.f32 %v6493_v49, %v16205_v0  ;;  %v6558_v16 = vmul.f32 %v6494_v26, %v16206_v22  ;;  %v6507_v25 = vld [vmem:[%s11494_s24 + $0xb0] sm:$0xf]  ;;  %v6508_v51 = vld [vmem:[%s11494_s24 + $0xb4] sm:$0xf]  ;;  %v6509_v59 = vld [vmem:[%s11494_s24 + $0xb8] sm:$0xf] }
 0x40c   : > { %6618 = vst.msk [vmem:[#allocation4 + $0x68] sm:$0xf] %vm6591_vm14, %v6553_v13  ;;  %6619 = vst.msk [vmem:[#allocation4 + $0x6c] sm:$0xf] %vm6591_vm14, %v6554_v48  ;;  %v16207_v36 = vld [vmem:[#allocation61_spill] sm:$0xff]  ;;  %v16208_v5 = vld [vmem:[#allocation62_spill] sm:$0xff] }
 0x40d   : > { %6620 = vst.msk [vmem:[#allocation4 + $0x70] sm:$0xf] %vm6591_vm14, %v6555_v50  ;;  %v6559_v47 = vmul.f32 %v6495_v40, %v16207_v36  ;;  %v6560_v54 = vmul.f32 %v6496_v3, %v16208_v5  ;;  %v16209_v49 = vld [vmem:[#allocation63_spill] sm:$0xff]  ;;  %v6510_v21 = vld [vmem:[%s11494_s24 + $0xbc] sm:$0xf]  ;;  %v16210_v42 = vld [vmem:[#allocation64_spill] sm:$0xff]  ;;  %v6563_v3 = vmul.f32 %v6499_v61, %v13511_v8  ;;  %v6565_v50 = vmul.f32 %v6501_v33, %v13587_v12  ;;  %v10656_v36 = vpop.eup %10655 }
 0x40e   : > { %v6561_v26 = vmul.f32 %v6497_v41, %v16209_v49  ;;  %v6511_v0 = vld [vmem:[%s11494_s24 + $0xc0] sm:$0xf]  ;;  %v6512_v22 = vld [vmem:[%s11494_s24 + $0xc4] sm:$0xf]  ;;  %6431 = vst.msk [vmem:[#allocation3 + $0xf00] sm:$0xff] %vm492_vm0, %v10652_v4  ;;  %v6562_v40 = vmul.f32 %v6498_v56, %v16210_v42  ;;  %v6564_v41 = vmul.f32 %v6500_v14, %v13516_v29  ;;  %6432 = vst.msk [vmem:[#allocation3 + $0xf08] sm:$0xff] %vm492_vm0, %v10654_v43 }
 0x40f   : > { %6621 = vst.msk [vmem:[#allocation4 + $0x74] sm:$0xf] %vm6591_vm14, %v6556_v9  ;;  %6622 = vst.msk [vmem:[#allocation4 + $0x78] sm:$0xf] %vm6591_vm14, %v6557_v46  ;;  %v6513_v13 = vld [vmem:[%s11494_s24 + $0xc8] sm:$0xf]  ;;  %v6566_v8 = vmul.f32 %v6502_v10, %v13670_v31 }
 0x410   : > { %6623 = vst.msk [vmem:[#allocation4 + $0x7c] sm:$0xf] %vm6591_vm14, %v6558_v16  ;;  %v6514_v48 = vld [vmem:[%s11494_s24 + $0xcc] sm:$0xf]  ;;  %v6515_v4 = vld [vmem:[%s11494_s24 + $0xd0] sm:$0xf]  ;;  %v10658_v16 = vpop.eup %10657 }
 0x411   : > { %6624 = vst.msk [vmem:[#allocation4 + $0x80] sm:$0xf] %vm6591_vm14, %v6559_v47  ;;  %6625 = vst.msk [vmem:[#allocation4 + $0x84] sm:$0xf] %vm6591_vm14, %v6560_v54  ;;  %v16211_v56 = vld [vmem:[#allocation65_spill] sm:$0xff]  ;;  %v16212_v29 = vld [vmem:[#allocation66_spill] sm:$0xff] }
 0x412   : > { %6626 = vst.msk [vmem:[#allocation4 + $0x88] sm:$0xf] %vm6591_vm14, %v6561_v26  ;;  %v6567_v61 = vmul.f32 %v6503_v2, %v16211_v56  ;;  %v6568_v14 = vmul.f32 %v6504_v55, %v16212_v29  ;;  %v16213_v12 = vld [vmem:[#allocation67_spill] sm:$0xff]  ;;  %v6516_v9 = vld [vmem:[%s11494_s24 + $0xd4] sm:$0xf]  ;;  %v16215_v2 = vld [vmem:[#allocation69_spill] sm:$0xff] }
 0x413   : > { %v6569_v33 = vmul.f32 %v6505_v32, %v16213_v12  ;;  %v6517_v46 = vld [vmem:[%s11494_s24 + $0xd8] sm:$0xf]  ;;  %v6518_v43 = vld [vmem:[%s11494_s24 + $0xdc] sm:$0xf]  ;;  %6433 = vst.msk [vmem:[#allocation3 + $0xf10] sm:$0xff] %vm492_vm0, %v10656_v36  ;;  %v16214_v31 = vld [vmem:[#allocation68_spill] sm:$0xff]  ;;  %v6571_v55 = vmul.f32 %v6507_v25, %v16215_v2 }
 0x414   : > { %6627 = vst.msk [vmem:[#allocation4 + $0x8c] sm:$0xf] %vm6591_vm14, %v6562_v40  ;;  %6628 = vst.msk [vmem:[#allocation4 + $0x90] sm:$0xf] %vm6591_vm14, %v6563_v3  ;;  %v6570_v10 = vmul.f32 %v6506_v18, %v16214_v31  ;;  %v16216_v32 = vld [vmem:[#allocation70_spill] sm:$0xff]  ;;  %v16217_v5 = vld [vmem:[#allocation71_spill] sm:$0xff]  ;;  %v10660_v40 = vpop.eup %10659 }
 0x415   : > { %6629 = vst.msk [vmem:[#allocation4 + $0x94] sm:$0xf] %vm6591_vm14, %v6564_v41  ;;  %6630 = vst.msk [vmem:[#allocation4 + $0x98] sm:$0xf] %vm6591_vm14, %v6565_v50  ;;  %v6572_v47 = vmul.f32 %v6508_v51, %v16216_v32  ;;  %v6573_v54 = vmul.f32 %v6509_v59, %v16217_v5  ;;  %v6519_v49 = vld [vmem:[%s11494_s24 + $0xe0] sm:$0xf]  ;;  %v10662_v12 = vpop.eup %10661 }
 0x416   : > { %v6520_v26 = vld [vmem:[%s11494_s24 + $0xe4] sm:$0xf]  ;;  %v6521_v42 = vld [vmem:[%s11494_s24 + $0xe8] sm:$0xf]  ;;  %6434 = vst.msk [vmem:[#allocation3 + $0xf18] sm:$0xff] %vm492_vm0, %v10658_v16  ;;  %v16218_v18 = vld [vmem:[#allocation72_spill] sm:$0xff] }
 0x417   : > { %6631 = vst.msk [vmem:[#allocation4 + $0x9c] sm:$0xf] %vm6591_vm14, %v6566_v8  ;;  %6632 = vst.msk [vmem:[#allocation4 + $0xa0] sm:$0xf] %vm6591_vm14, %v6567_v61  ;;  %v6574_v25 = vmul.f32 %v6510_v21, %v16218_v18  ;;  %v16219_v51 = vld [vmem:[#allocation73_spill] sm:$0xff]  ;;  %v16220_v41 = vld [vmem:[#allocation74_spill] sm:$0xff] }
 0x418   : > { %6633 = vst.msk [vmem:[#allocation4 + $0xa4] sm:$0xf] %vm6591_vm14, %v6568_v14  ;;  %6634 = vst.msk [vmem:[#allocation4 + $0xa8] sm:$0xf] %vm6591_vm14, %v6569_v33  ;;  %v6575_v3 = vmul.f32 %v6511_v0, %v16219_v51  ;;  %v6576_v59 = vmul.f32 %v6512_v22, %v16220_v41  ;;  %v16221_v50 = vld [vmem:[#allocation75_spill] sm:$0xff]  ;;  %v16222_v21 = vld [vmem:[#allocation76_spill] sm:$0xff]  ;;  %v6580_v22 = vmul.f32 %v6516_v9, %v14400_v20  ;;  %v10664_v14 = vpop.eup %10663 }
 0x419   : > { %v6577_v36 = vmul.f32 %v6513_v13, %v16221_v50  ;;  %v6522_v56 = vld [vmem:[%s11494_s24 + $0xec] sm:$0xf]  ;;  %v6523_v29 = vld [vmem:[%s11494_s24 + $0xf0] sm:$0xf]  ;;  %6435 = vst.msk [vmem:[#allocation3 + $0xf20] sm:$0xff] %vm492_vm0, %v10660_v40  ;;  %v6578_v8 = vmul.f32 %v6514_v48, %v16222_v21  ;;  %v16223_v0 = vld [vmem:[#allocation77_spill] sm:$0xff]  ;;  %v6581_v13 = vmul.f32 %v6517_v46, %v14446_v63  ;;  %v6582_v33 = vmul.f32 %v6518_v43, %v14642_v37  ;;  %v10666_v63 = vpop.eup %10665 }
 0x41a   : > { %6635 = vst.msk [vmem:[#allocation4 + $0xac] sm:$0xf] %vm6591_vm14, %v6570_v10  ;;  %6636 = vst.msk [vmem:[#allocation4 + $0xb0] sm:$0xf] %vm6591_vm14, %v6571_v55  ;;  %v6579_v61 = vmul.f32 %v6515_v4, %v16223_v0  ;;  %v6583_v48 = vmul.f32 %v6519_v49, %v14655_v39  ;;  %v6584_v4 = vmul.f32 %v6520_v26, %v14669_v11  ;;  %v10668_v11 = vpop.eup %10667  ;;  %v16230_v10 = vand.u32 2147483647, %v14709_v38 }
 0x41b   : > { %6637 = vst.msk [vmem:[#allocation4 + $0xb4] sm:$0xf] %vm6591_vm14, %v6572_v47  ;;  %6638 = vst.msk [vmem:[#allocation4 + $0xb8] sm:$0xf] %vm6591_vm14, %v6573_v54  ;;  %v6585_v20 = vmul.f32 %v6521_v42, %v14685_v17  ;;  %v1440_v9 = vmul.f32 %v14677_v62, %v14877_v53  ;;  %v6586_v37 = vmul.f32 %v6522_v56, %v14768_v57  ;;  %v16224_v17 = vand.u32 2147483647, %v14677_v62  ;;  %v10670_v57 = vpop.eup %10669 }
 0x41c   : > { %6436 = vst.msk [vmem:[#allocation3 + $0xf28] sm:$0xff] %vm492_vm0, %v10662_v12  ;;  %6437 = vst.msk [vmem:[#allocation3 + $0xf30] sm:$0xff] %vm492_vm0, %v10664_v14  ;;  %v6587_v39 = vmul.f32 %v6523_v29, %v14830_v30  ;;  %v1449_v46 = vmul.f32 %v14696_v23, %v14896_v1  ;;  %v1437_v30 = vmul.f32 0.6931472, %v10668_v11  ;;  %v16227_v62 = vand.u32 2147483647, %v14696_v23  ;;  %v10672_v16 = vpop.eup %10671 }
 0x41d   : > { %6639 = vst.msk [vmem:[#allocation4 + $0xbc] sm:$0xf] %vm6591_vm14, %v6574_v25  ;;  %6640 = vst.msk [vmem:[#allocation4 + $0xc0] sm:$0xf] %vm6591_vm14, %v6575_v3  ;;  %vm15013_vm5 = vcmp.lt.f32.partialorder %v16224_v17, 0.0004427343  ;;  %v1458_v1 = vmul.f32 %v14709_v38, %v14905_v24 }
 0x41e   : > { %6641 = vst.msk [vmem:[#allocation4 + $0xc4] sm:$0xf] %vm6591_vm14, %v6576_v59  ;;  %6642 = vst.msk [vmem:[#allocation4 + $0xc8] sm:$0xf] %vm6591_vm14, %v6577_v36  ;;  %vm15026_vm7 = vcmp.lt.f32.partialorder %v16227_v62, 0.0004427343  ;;  %v1443_v23 = vsel %vm15013_vm5, %v1440_v9, %v1437_v30 }
 0x41f   : > { %6643 = vst.msk [vmem:[#allocation4 + $0xcc] sm:$0xf] %vm6591_vm14, %v6578_v8  ;;  %6644 = vst.msk [vmem:[#allocation4 + $0xd0] sm:$0xf] %vm6591_vm14, %v6579_v61  ;;  %v1446_v31 = vmul.f32 0.6931472, %v10670_v57  ;;  %v1523_v24 = vsel %vm691_vm4, %v14245_v35, %v1443_v23 }
 0x420   : > { %6645 = vst.msk [vmem:[#allocation4 + $0xd4] sm:$0xf] %vm6591_vm14, %v6580_v22  ;;  %6646 = vst.msk [vmem:[#allocation4 + $0xd8] sm:$0xf] %vm6591_vm14, %v6581_v13  ;;  %vm1460_vm8 = vcmp.lt.f32.partialorder %v16230_v10, 0.0004427343  ;;  %v3060_v54 = vrot.slane %v1523_v24, %v11597_v60 }
 0x421   : > { %6438 = vst.msk [vmem:[#allocation3 + $0xf38] sm:$0xff] %vm492_vm0, %v10666_v63  ;;  %v6524_v2 = vld [vmem:[%s11494_s24 + $0xf4] sm:$0xf]  ;;  %v1455_v55 = vmul.f32 0.6931472, %v10672_v16  ;;  %v1452_v47 = vsel %vm15026_vm7, %v1449_v46, %v1446_v31 }
 0x422   : > { %6647 = vst.msk [vmem:[#allocation4 + $0xdc] sm:$0xf] %vm6591_vm14, %v6582_v33  ;;  %6648 = vst.msk [vmem:[#allocation4 + $0xe0] sm:$0xf] %vm6591_vm14, %v6583_v48  ;;  %v6525_v32 = vld [vmem:[%s11494_s24 + $0xf8] sm:$0xf]  ;;  %v1524_v38 = vsel %vm692_vm6, %v14251_v28, %v1452_v47  ;;  %v6588_v26 = vmul.f32 %v6524_v2, %v1523_v24  ;;  %v3068_v25 = vrot.slane %v3060_v54, %v11597_v60 }
 0x423   : > { %6649 = vst.msk [vmem:[#allocation4 + $0xe4] sm:$0xf] %vm6591_vm14, %v6584_v4  ;;  %6650 = vst.msk [vmem:[#allocation4 + $0xe8] sm:$0xf] %vm6591_vm14, %v6585_v20  ;;  %v6526_v5 = vld [vmem:[%s11494_s24 + $0xfc] sm:$0xf]  ;;  %v1461_v49 = vsel %vm1460_vm8, %v1458_v1, %v1455_v55  ;;  %v3084_v42 = vrot.slane %v1524_v38, %v11597_v60  ;;  %v6589_v18 = vmul.f32 %v6525_v32, %v1524_v38 }
 0x424   : > { %6651 = vst.msk [vmem:[#allocation4 + $0xec] sm:$0xf] %vm6591_vm14, %v6586_v37  ;;  %6652 = vst.msk [vmem:[#allocation4 + $0xf0] sm:$0xf] %vm6591_vm14, %v6587_v39  ;;  %v1525_v40 = vsel %vm693_vm9, %v14477_v19, %v1461_v49  ;;  %v3061_v35 = vcombine.high %v3060_v54, %v3060_v54  ;;  %v4113_v28 = vrot.slane %v3068_v25, %v11594_v58 }
 0x425   : > { %6653 = vst.msk [vmem:[#allocation4 + $0xf4] sm:$0xf] %vm6591_vm14, %v6588_v26  ;;  %v6590_v51 = vmul.f32 %v6526_v5, %v1525_v40  ;;  %v3092_v3 = vrot.slane %v3084_v42, %v11597_v60  ;;  %v3085_v41 = vcombine.high %v3084_v42, %v3084_v42  ;;  %v3108_v59 = vrot.slane %v1525_v40, %v11597_v60 }
 0x426   : > { %6654 = vst.msk [vmem:[#allocation4 + $0xf8] sm:$0xf] %vm6591_vm14, %v6589_v18  ;;  %v3075_v50 = vrot.slane %v3061_v35, %v11597_v60  ;;  %v3076_v36 = vcombine.high %v3068_v25, %v3068_v25  ;;  %v4902_v21 = vmul.f32 %v14773_v34, %v4113_v28  ;;  %v4903_v8 = vmul.f32 %v14777_v7, %v4113_v28 }
 0x427   : > { %6655 = vst.msk [vmem:[#allocation4 + $0xfc] sm:$0xf] %vm6591_vm14, %v6590_v51  ;;  %v4129_v19 = vrot.slane %v3092_v3, %v11594_v58  ;;  %v3099_v56 = vrot.slane %v3085_v41, %v11597_v60  ;;  %v3100_v29 = vcombine.high %v3092_v3, %v3092_v3  ;;  %v3116_v12 = vrot.slane %v3108_v59, %v11597_v60 }
 0x428   : > { %v4117_v0 = vrot.slane %v3075_v50, %v11594_v58  ;;  %v4121_v61 = vrot.slane %v3076_v36, %v11594_v58  ;;  %v3077_v22 = vcombine.high %v3075_v50, %v3075_v50  ;;  %v3109_v33 = vcombine.high %v3108_v59, %v3108_v59 }
 0x429   : > { %v4910_v13 = vmul.f32 %v14773_v34, %v4129_v19  ;;  %v4133_v14 = vrot.slane %v3099_v56, %v11594_v58  ;;  %v5902_v48 = vmul.f32 1.442695, %v4902_v21  ;;  %v5904_v4 = vmul.f32 1.442695, %v4903_v8 }
 0x42a   : > { %v4904_v20 = vmul.f32 %v14796_v15, %v4117_v0  ;;  %v4905_v63 = vmul.f32 %v14799_v44, %v4117_v0  ;;  %v4906_v9 = vmul.f32 %v14786_v45, %v4121_v61  ;;  %v4907_v37 = vmul.f32 %v14790_v6, %v4121_v61 }
 0x42b   : > { %v4125_v39 = vrot.slane %v3077_v22, %v11594_v58  ;;  %v4911_v11 = vmul.f32 %v14777_v7, %v4129_v19  ;;  %10673 = vpow2.f32 %v5902_v48  ;;  %v5918_v46 = vmul.f32 1.442695, %v4910_v13 }
 0x42c   : > { %v5906_v17 = vmul.f32 1.442695, %v4904_v20  ;;  %v5908_v53 = vmul.f32 1.442695, %v4905_v63  ;;  %10675 = vpow2.f32 %v5904_v4  ;;  %v5910_v57 = vmul.f32 1.442695, %v4906_v9 }
 0x42d   : > { %v5912_v30 = vmul.f32 1.442695, %v4907_v37  ;;  %v4908_v62 = vmul.f32 %v14807_v27, %v4125_v39  ;;  %v4909_v43 = vmul.f32 %v14810_v52, %v4125_v39  ;;  %v4912_v1 = vmul.f32 %v14796_v15, %v4133_v14 }
 0x42e   : > { %10677 = vpow2.f32 %v5906_v17  ;;  %v4913_v16 = vmul.f32 %v14799_v44, %v4133_v14  ;;  %v4137_v10 = vrot.slane %v3100_v29, %v11594_v58  ;;  %v3101_v2 = vcombine.high %v3099_v56, %v3099_v56 }
 0x42f   : > { %10679 = vpow2.f32 %v5908_v53  ;;  %v5914_v31 = vmul.f32 1.442695, %v4908_v62  ;;  %v5916_v23 = vmul.f32 1.442695, %v4909_v43  ;;  %v5920_v55 = vmul.f32 1.442695, %v4911_v11 }
 0x430   : > { %10681 = vpow2.f32 %v5910_v57  ;;  %v5922_v32 = vmul.f32 1.442695, %v4912_v1  ;;  %v4914_v24 = vmul.f32 %v14786_v45, %v4137_v10  ;;  %v4915_v47 = vmul.f32 %v14790_v6, %v4137_v10 }
 0x431   : > { %10683 = vpow2.f32 %v5912_v30  ;;  %v4141_v5 = vrot.slane %v3101_v2, %v11594_v58  ;;  %v5924_v54 = vmul.f32 1.442695, %v4913_v16  ;;  %v4145_v38 = vrot.slane %v3116_v12, %v11594_v58 }
 0x432   : > { %10685 = vpow2.f32 %v5914_v31  ;;  %v3124_v49 = vcombine.high %v3116_v12, %v3116_v12  ;;  %v5926_v26 = vmul.f32 1.442695, %v4914_v24  ;;  %v3123_v40 = vrot.slane %v3109_v33, %v11597_v60 }
 0x433   : > { %10687 = vpow2.f32 %v5916_v23  ;;  %v4916_v42 = vmul.f32 %v14807_v27, %v4141_v5  ;;  %v5928_v18 = vmul.f32 1.442695, %v4915_v47  ;;  %v4917_v25 = vmul.f32 %v14810_v52, %v4141_v5 }
 0x434   : > { %10689 = vpow2.f32 %v5918_v46  ;;  %v4918_v35 = vmul.f32 %v14773_v34, %v4145_v38  ;;  %v4919_v51 = vmul.f32 %v14777_v7, %v4145_v38  ;;  %v4149_v3 = vrot.slane %v3123_v40, %v11594_v58 }
 0x435   : > { %10691 = vpow2.f32 %v5920_v55  ;;  %v4153_v41 = vrot.slane %v3124_v49, %v11594_v58  ;;  %v10674_v59 = vpop.eup %10673  ;;  %v5930_v28 = vmul.f32 1.442695, %v4916_v42  ;;  %v5932_v36 = vmul.f32 1.442695, %v4917_v25 }
 0x436   : > { %10693 = vpow2.f32 %v5922_v32  ;;  %v10676_v50 = vpop.eup %10675  ;;  %6439 = vst.msk [vmem:[#allocation3 + $0xf40] sm:$0xff] %vm492_vm0, %v10674_v59  ;;  %v4920_v19 = vmul.f32 %v14796_v15, %v4149_v3  ;;  %v4921_v56 = vmul.f32 %v14799_v44, %v4149_v3  ;;  %v5934_v7 = vmul.f32 1.442695, %v4918_v35 }
 0x437   : > { %10695 = vpow2.f32 %v5924_v54  ;;  %6440 = vst.msk [vmem:[#allocation3 + $0xf48] sm:$0xff] %vm492_vm0, %v10676_v50  ;;  %v4922_v29 = vmul.f32 %v14786_v45, %v4153_v41  ;;  %v3125_v12 = vcombine.high %v3123_v40, %v3123_v40  ;;  %v5936_v8 = vmul.f32 1.442695, %v4919_v51 }
 0x438   : > { %v10678_v34 = vpop.eup %10677  ;;  %10697 = vpow2.f32 %v5926_v26  ;;  %v4923_v0 = vmul.f32 %v14790_v6, %v4153_v41  ;;  %v5938_v15 = vmul.f32 1.442695, %v4920_v19  ;;  %v5940_v45 = vmul.f32 1.442695, %v4921_v56 }
 0x439   : > { %v10680_v21 = vpop.eup %10679  ;;  %6441 = vst.msk [vmem:[#allocation3 + $0xf50] sm:$0xff] %vm492_vm0, %v10678_v34  ;;  %10699 = vpow2.f32 %v5928_v18  ;;  %v4157_v44 = vrot.slane %v3125_v12, %v11594_v58  ;;  %v5942_v14 = vmul.f32 1.442695, %v4922_v29 }
 0x43a   : > { %v10682_v61 = vpop.eup %10681  ;;  %6442 = vst.msk [vmem:[#allocation3 + $0xf58] sm:$0xff] %vm492_vm0, %v10680_v21  ;;  %10701 = vpow2.f32 %v5930_v28  ;;  %v5944_v4 = vmul.f32 1.442695, %v4923_v0 }
 0x43b   : > { %v10684_v22 = vpop.eup %10683  ;;  %6443 = vst.msk [vmem:[#allocation3 + $0xf60] sm:$0xff] %vm492_vm0, %v10682_v61  ;;  %10703 = vpow2.f32 %v5932_v36  ;;  %v4924_v33 = vmul.f32 %v14807_v27, %v4157_v44  ;;  %v4925_v6 = vmul.f32 %v14810_v52, %v4157_v44 }
 0x43c   : > { %v10686_v13 = vpop.eup %10685  ;;  %6444 = vst.msk [vmem:[#allocation3 + $0xf68] sm:$0xff] %vm492_vm0, %v10684_v22  ;;  %10705 = vpow2.f32 %v5934_v7 }
 0x43d   : > { %v10688_v48 = vpop.eup %10687  ;;  %6445 = vst.msk [vmem:[#allocation3 + $0xf70] sm:$0xff] %vm492_vm0, %v10686_v13  ;;  %10707 = vpow2.f32 %v5936_v8  ;;  %v5946_v63 = vmul.f32 1.442695, %v4924_v33  ;;  %v5948_v37 = vmul.f32 1.442695, %v4925_v6 }
 0x43e   : > { %v10690_v20 = vpop.eup %10689  ;;  %6446 = vst.msk [vmem:[#allocation3 + $0xf78] sm:$0xff] %vm492_vm0, %v10688_v48  ;;  %10709 = vpow2.f32 %v5938_v15 }
 0x43f   : > { %v10692_v9 = vpop.eup %10691  ;;  %6447 = vst.msk [vmem:[#allocation3 + $0xf80] sm:$0xff] %vm492_vm0, %v10690_v20  ;;  %10711 = vpow2.f32 %v5940_v45 }
 0x440   : > { %v10694_v39 = vpop.eup %10693  ;;  %6448 = vst.msk [vmem:[#allocation3 + $0xf88] sm:$0xff] %vm492_vm0, %v10692_v9  ;;  %10713 = vpow2.f32 %v5942_v14 }
 0x441   : > { %v10696_v27 = vpop.eup %10695  ;;  %6449 = vst.msk [vmem:[#allocation3 + $0xf90] sm:$0xff] %vm492_vm0, %v10694_v39  ;;  %10715 = vpow2.f32 %v5944_v4 }
 0x442   : > { %v10698_v52 = vpop.eup %10697  ;;  %6450 = vst.msk [vmem:[#allocation3 + $0xf98] sm:$0xff] %vm492_vm0, %v10696_v27  ;;  %10717 = vpow2.f32 %v5946_v63 }
 0x443   : > { %v10700_v11 = vpop.eup %10699  ;;  %6451 = vst.msk [vmem:[#allocation3 + $0xfa0] sm:$0xff] %vm492_vm0, %v10698_v52  ;;  %10719 = vpow2.f32 %v5948_v37 }
 0x444   : > { %v10702_v17 = vpop.eup %10701  ;;  %6452 = vst.msk [vmem:[#allocation3 + $0xfa8] sm:$0xff] %vm492_vm0, %v10700_v11 }
 0x445   : > { %v10704_v53 = vpop.eup %10703  ;;  %6453 = vst.msk [vmem:[#allocation3 + $0xfb0] sm:$0xff] %vm492_vm0, %v10702_v17 }
 0x446   : > { %v10706_v46 = vpop.eup %10705  ;;  %6454 = vst.msk [vmem:[#allocation3 + $0xfb8] sm:$0xff] %vm492_vm0, %v10704_v53 }
 0x447   : > { %v10708_v57 = vpop.eup %10707  ;;  %6455 = vst.msk [vmem:[#allocation3 + $0xfc0] sm:$0xff] %vm492_vm0, %v10706_v46 }
 0x448   : > { %v10710_v30 = vpop.eup %10709  ;;  %6456 = vst.msk [vmem:[#allocation3 + $0xfc8] sm:$0xff] %vm492_vm0, %v10708_v57 }
 0x449   : > { %v10712_v62 = vpop.eup %10711  ;;  %6457 = vst.msk [vmem:[#allocation3 + $0xfd0] sm:$0xff] %vm492_vm0, %v10710_v30 }
 0x44a   : > { %v10714_v43 = vpop.eup %10713  ;;  %6458 = vst.msk [vmem:[#allocation3 + $0xfd8] sm:$0xff] %vm492_vm0, %v10712_v62 }
 0x44b   : > { %v10716_v1 = vpop.eup %10715  ;;  %6459 = vst.msk [vmem:[#allocation3 + $0xfe0] sm:$0xff] %vm492_vm0, %v10714_v43 }
 0x44c   : > { %v10718_v16 = vpop.eup %10717  ;;  %6460 = vst.msk [vmem:[#allocation3 + $0xfe8] sm:$0xff] %vm492_vm0, %v10716_v1 }
 0x44d   : > { %v10720_v31 = vpop.eup %10719  ;;  %6461 = vst.msk [vmem:[#allocation3 + $0xff0] sm:$0xff] %vm492_vm0, %v10718_v16 }
 0x44e   : > { %6462 = vst.msk [vmem:[#allocation3 + $0xff8] sm:$0xff] %vm492_vm0, %v10720_v31 }
 0x44f LB: >> { %v16231_v10 = vld [vmem:[#allocation32_spill] sm:$0xff]  ;;  %s15133_s27 = sshll.u32 %s11093_s11, 5  ;;  %s9273_s15 = sshll.u32 %s11093_s11, 9  ;;  %v6665_v46 = vld [vmem:[#allocation2 + $0x8] sm:$0xff]  ;;  %v6664_v43 = vld [vmem:[#allocation2] sm:$0xff]  ;;  %vm6910_vm10 = vcmask 1041409   ;;  %s11093_s11 = sphi %s15124_s11, %s6662_s11  }
 0x450   : >> { %v15130_v2 = vsub.s32 1, %v16231_v10  ;;  %s15138_s28 = scalar_lea.vmem %s416_s1, %s15133_s27 [#allocation10]  ;;  %v15144_v24 = vsub.s32 2, %v16231_v10  ;;  %v15148_v5 = vsub.s32 3, %v16231_v10  ;;  %s15153_s13 = scalar_lea.vmem %s425_s16, %s15133_s27 [#allocation11]  ;;  %vm6913_vm11 = vcmask 1042434  }
 0x451   : >> { %v6701_v23 = vld [vmem:[%s15138_s28] sm:$0xf]  ;;  %v9087_v18 = vld [vmem:[%s15138_s28 + $0x4] sm:$0xf]  ;;  %v9113_v19 = vld [vmem:[%s15138_s28 + $0x8] sm:$0xf]  ;;  %s15248_s22 = scalar_lea.vmem %s11494_s24, %s15133_s27 [#allocation5]  ;;  %s15295_s9 = scalar_lea.vmem %s482_s30, %s15133_s27 [#allocation17] }
 0x452   : >> { %v6716_v55 = vrot.slane %v6701_v23, %v15130_v2  ;;  %v6705_v32 = vrot.slane %v6701_v23, %v11594_v58  ;;  %v6727_v47 = vrot.slane %v6701_v23, %v15144_v24  ;;  %v6738_v54 = vrot.slane %v6701_v23, %v15148_v5  ;;  %v6801_v38 = vld [vmem:[%s15153_s13] sm:$0xf]  ;;  %v9100_v41 = vld [vmem:[%s15153_s13 + $0x4] sm:$0xf]  ;;  %v9126_v12 = vld [vmem:[%s15153_s13 + $0x8] sm:$0xf] }
 0x453   : >> { %v6805_v49 = vrot.slane %v6801_v38, %v11594_v58  ;;  %v6816_v26 = vrot.slane %v6801_v38, %v15130_v2  ;;  %v6827_v42 = vrot.slane %v6801_v38, %v15144_v24  ;;  %v6838_v40 = vrot.slane %v6801_v38, %v15148_v5  ;;  %v9139_v15 = vld [vmem:[%s15138_s28 + $0xc] sm:$0xf]  ;;  %s15190_s21 = scalar_lea.vmem [#allocation4], %s15133_s27  ;;  %v15200_v53 = vld [vmem:[%s15138_s28 + $0x10] sm:$0xf]  ;;  %s15202_s4 = scalar_lea.vmem [#allocation3], %s9273_s15 }
 0x454   : >> { %6718 = vbcast.lane.b32.xlu1 %v6716_v55, 256  ;;  %6707 = vbcast.lane.b32.xlu0 %v6705_v32, 256  ;;  %v6955_v25 = vrot.slane %v9087_v18, %v11594_v58  ;;  %v6966_v35 = vrot.slane %v9087_v18, %v15130_v2  ;;  %v6977_v51 = vrot.slane %v9087_v18, %v15144_v24  ;;  %v9152_v14 = vld [vmem:[%s15153_s13 + $0xc] sm:$0xf]  ;;  %vm6916_vm12 = vcmask 1043459   ;;  %s6662_s11 = sadd.s32 1, %s11093_s11  }
 0x455   : >> { %v6988_v3 = vrot.slane %v9087_v18, %v15148_v5  ;;  %v7055_v59 = vrot.slane %v9100_v41, %v11594_v58  ;;  %v7066_v28 = vrot.slane %v9100_v41, %v15130_v2  ;;  %v7077_v50 = vrot.slane %v9100_v41, %v15144_v24  ;;  %v9079_v4 = vld.sshfl [vmem:[%s15190_s21] sm:$0x33 pattern:$0x75316420]  ;;  %v6777_v57 = vld [vmem:[%s15202_s4 + $0x8] sm:$0xff]  ;;  %p6659_p7 = scmp.ge.s32.totalorder %s6662_s11, 8  }
 0x456   : >> { %v7088_v36 = vrot.slane %v9100_v41, %v15148_v5  ;;  %v7202_v56 = vrot.slane %v9113_v19, %v11594_v58  ;;  %v7213_v34 = vrot.slane %v9113_v19, %v15130_v2  ;;  %v7224_v7 = vrot.slane %v9113_v19, %v15144_v24  ;;  %v6776_v1 = vld [vmem:[%s15202_s4] sm:$0xff]  ;;  %s16233_s20 = sld [smem:[#allocation25_spill]] (%p6659_p7)  ;;  %s16234_s23 = sld [smem:[#allocation27_spill]] (%p6659_p7) }
 0x457   : >> { %v7235_v29 = vrot.slane %v9113_v19, %v15148_v5  ;;  %v7302_v21 = vrot.slane %v9126_v12, %v11594_v58  ;;  %v7313_v8 = vrot.slane %v9126_v12, %v15130_v2  ;;  %v7324_v0 = vrot.slane %v9126_v12, %v15144_v24  ;;  %s16235_s14 = sld [smem:[#allocation81_spill]] (%p6659_p7)  ;;  %s8674_s19 = sshll.u32 (%p6659_p7), %s482_s30, 4  ;;  %s15841_s19 = int_to_ptr.vmem [resolvable:$true] %s8674_s19 }
 0x458   : >> { %6722 = vbcast.lane.b32.xlu1 %v6716_v55, 264  ;;  %6711 = vbcast.lane.b32.xlu0 %v6705_v32, 264  ;;  %v7335_v61 = vrot.slane %v9126_v12, %v15148_v5  ;;  %v7449_v44 = vrot.slane %v9139_v15, %v11594_v58  ;;  %v7460_v22 = vrot.slane %v9139_v15, %v15130_v2  ;;  %v6667_v55 = vld [vmem:[#allocation2 + $0x18] sm:$0xff]  ;;  %s8659_s10 = scalar_lea.sflag (%p6659_p7), [#allocation7], %s11487_s18  ;;  %s10987_s11 = scalar_lea.vmem (%p6659_p7), %s15841_s19, 4096 }
 0x459   : >> { %v7471_v45 = vrot.slane %v9139_v15, %v15144_v24  ;;  %v7482_v13 = vrot.slane %v9139_v15, %v15148_v5  ;;  %v7549_v33 = vrot.slane %v9152_v14, %v11594_v58  ;;  %v7560_v6 = vrot.slane %v9152_v14, %v15130_v2  ;;  %p10988_p8 = scmp.ne.s32.totalorder (%p6659_p7), %s15841_s19, %s10987_s11  ;;  %s11108_s24 = smov (%p6659_p7), [#allocation17]  }
 0x45a   : >> { %v7571_v63 = vrot.slane %v9152_v14, %v15144_v24  ;;  %v6683_v9 = vcombine.high %v9079_v4, %v9079_v4  ;;  %v6690_v37 = vrot.slane %v9079_v4, %v11597_v60  ;;  %v7582_v52 = vrot.slane %v9152_v14, %v15148_v5  ;;  %v6783_v14 = vld [vmem:[%s15202_s4 + $0x38] sm:$0xff]  ;;  %s10991_s1 = sshll.u32 (%p6659_p7), %s11108_s24, 4  ;;  %s10992_s1 = int_to_ptr.vmem [resolvable:$false] %s10991_s1 }
 0x45b   : >> { %v7696_v31 = vrot.slane %v15200_v53, %v11594_v58  ;;  %v6785_v23 = vmul.f32 %v6777_v57, %v6665_v46  ;;  %v6784_v38 = vmul.f32 %v6776_v1, %v6664_v43  ;;  %s10993_s16 = scalar_lea.vmem (%p6659_p7), %s10992_s1, 8192  ;;  %p10994_p13 = scmp.lt.s32.totalorder (%p6659_p7), %s15841_s19, %s10992_s1 }
 0x45c   : >> { %6733 = vbcast.lane.b32.xlu1 %v6727_v47, 264  ;;  %6729 = vbcast.lane.b32.xlu0 %v6727_v47, 256  ;;  %v6697_v11 = vrot.slane %v6683_v9, %v11597_v60  ;;  %v6749_v17 = vrot.slane %v6690_v37, %v11594_v58  ;;  %v6698_v16 = vcombine.high %v6690_v37, %v6690_v37  ;;  %s9316_s17 = sshll.u32 (%p6659_p7), %s16233_s20, 12  ;;  %p16236_p10 = scmp.ne.s32.totalorder (%p6659_p7), %s16234_s23, 0 }
 0x45d   : > { %s15837_s5 = scalar_lea.hbm (%p6659_p7), %s16235_s14, %s9316_s17  ;;  %p10995_p3 = scmp.lt.s32.totalorder (%p6659_p7), %s10993_s16, %s10987_s11 }
 0x45e   : >> { %v6753_v32 = vrot.slane %v6697_v11, %v11594_v58  ;;  %p10989_p5 = pnand (%p6659_p7), %p10988_p8, %p16236_p10 }
 0x45f   : > { %p10996_p12 = por (%p6659_p7), %p10995_p3, %p10994_p13 }
 0x460   : >> { %6744 = vbcast.lane.b32.xlu1 %v6738_v54, 264  ;;  %6740 = vbcast.lane.b32.xlu0 %v6738_v54, 256  ;;  %p10990_p9 = pneg (%p6659_p7), %p10989_p5 }
 0x462   : > { %p10997_p11 = pnand (%p6659_p7), %p10996_p12, %p10990_p9 }
 0x464   : >> { %6811 = vbcast.lane.b32.xlu1 %v6805_v49, 264  ;;  %6807 = vbcast.lane.b32.xlu0 %v6805_v49, 256  ;;  %v6779_v49 = vld [vmem:[%s15202_s4 + $0x18] sm:$0xff] }
 0x468   : >> { %6822 = vbcast.lane.b32.xlu1 %v6816_v26, 264  ;;  %6818 = vbcast.lane.b32.xlu0 %v6816_v26, 256  ;;  %v6666_v26 = vld [vmem:[#allocation2 + $0x10] sm:$0xff] }
 0x46c   : >> { %6833 = vbcast.lane.b32.xlu1 %v6827_v42, 264  ;;  %6829 = vbcast.lane.b32.xlu0 %v6827_v42, 256  ;;  %v6778_v42 = vld [vmem:[%s15202_s4 + $0x10] sm:$0xff] }
 0x46d   : >> { %v6786_v41 = vmul.f32 %v6778_v42, %v6666_v26 }
 0x470   : >> { %6844 = vbcast.lane.b32.xlu1 %v6838_v40, 264  ;;  %6840 = vbcast.lane.b32.xlu0 %v6838_v40, 256 }
 0x474   : >> { %6961 = vbcast.lane.b32.xlu1 %v6955_v25, 264  ;;  %6957 = vbcast.lane.b32.xlu0 %v6955_v25, 256  ;;  %v6699_v25 = vcombine.high %v6697_v11, %v6697_v11  ;;  %v7729_v11 = vrot.slane %v15200_v53, %v15148_v5 }
 0x478   : >> { %6972 = vbcast.lane.b32.xlu1 %v6966_v35, 264  ;;  %6968 = vbcast.lane.b32.xlu0 %v6966_v35, 256  ;;  %v7707_v35 = vrot.slane %v15200_v53, %v15130_v2 }
 0x47c   : >> { %6983 = vbcast.lane.b32.xlu1 %v6977_v51, 264  ;;  %6979 = vbcast.lane.b32.xlu0 %v6977_v51, 256  ;;  %v6757_v51 = vrot.slane %v6698_v16, %v11594_v58 }
 0x480   : >> { %6994 = vbcast.lane.b32.xlu1 %v6988_v3, 264  ;;  %6990 = vbcast.lane.b32.xlu0 %v6988_v3, 256  ;;  %v6787_v3 = vmul.f32 %v6779_v49, %v6667_v55 }
 0x484   : >> { %7061 = vbcast.lane.b32.xlu1 %v7055_v59, 264  ;;  %7057 = vbcast.lane.b32.xlu0 %v7055_v59, 256  ;;  %v6669_v59 = vld [vmem:[#allocation2 + $0x28] sm:$0xff] }
 0x488   : >> { %7072 = vbcast.lane.b32.xlu1 %v7066_v28, 264  ;;  %7068 = vbcast.lane.b32.xlu0 %v7066_v28, 256  ;;  %v6781_v28 = vld [vmem:[%s15202_s4 + $0x28] sm:$0xff] }
 0x489   : >> { %v6789_v15 = vmul.f32 %v6781_v28, %v6669_v59  ;;  %v6891_v59 = vld [vmem:[%s15248_s22] sm:$0xf] }
 0x48c   : >> { %7083 = vbcast.lane.b32.xlu1 %v7077_v50, 264  ;;  %7079 = vbcast.lane.b32.xlu0 %v7077_v50, 256 }
 0x490   : >> { %7094 = vbcast.lane.b32.xlu1 %v7088_v36, 264  ;;  %7090 = vbcast.lane.b32.xlu0 %v7088_v36, 256 }
 0x494   : >> { %7208 = vbcast.lane.b32.xlu1 %v7202_v56, 264  ;;  %7204 = vbcast.lane.b32.xlu0 %v7202_v56, 256 }
 0x498   : >> { %7219 = vbcast.lane.b32.xlu1 %v7213_v34, 264  ;;  %7215 = vbcast.lane.b32.xlu0 %v7213_v34, 256  ;;  %v6668_v34 = vld [vmem:[#allocation2 + $0x20] sm:$0xff] }
 0x49c   : >> { %7230 = vbcast.lane.b32.xlu1 %v7224_v7, 264  ;;  %7226 = vbcast.lane.b32.xlu0 %v7224_v7, 256  ;;  %v6780_v7 = vld [vmem:[%s15202_s4 + $0x20] sm:$0xff] }
 0x4a0   : >> { %7241 = vbcast.lane.b32.xlu1 %v7235_v29, 264  ;;  %7237 = vbcast.lane.b32.xlu0 %v7235_v29, 256 }
 0x4a4   : >> { %7308 = vbcast.lane.b32.xlu1 %v7302_v21, 264  ;;  %7304 = vbcast.lane.b32.xlu0 %v7302_v21, 256  ;;  %v7718_v21 = vrot.slane %v15200_v53, %v15144_v24 }
 0x4a8   : >> { %7319 = vbcast.lane.b32.xlu1 %v7313_v8, 264  ;;  %7315 = vbcast.lane.b32.xlu0 %v7313_v8, 256  ;;  %v6761_v8 = vrot.slane %v6699_v25, %v11594_v58 }
 0x4ac   : >> { %7330 = vbcast.lane.b32.xlu1 %v7324_v0, 264  ;;  %7326 = vbcast.lane.b32.xlu0 %v7324_v0, 256 }
 0x4b0   : >> { %7341 = vbcast.lane.b32.xlu1 %v7335_v61, 264  ;;  %7337 = vbcast.lane.b32.xlu0 %v7335_v61, 256 }
 0x4b4   : >> { %7455 = vbcast.lane.b32.xlu1 %v7449_v44, 264  ;;  %7451 = vbcast.lane.b32.xlu0 %v7449_v44, 256 }
 0x4b8   : >> { %7466 = vbcast.lane.b32.xlu1 %v7460_v22, 264  ;;  %7462 = vbcast.lane.b32.xlu0 %v7460_v22, 256 }
 0x4bc   : >> { %7477 = vbcast.lane.b32.xlu1 %v7471_v45, 264  ;;  %7473 = vbcast.lane.b32.xlu0 %v7471_v45, 256  ;;  %v6788_v45 = vmul.f32 %v6780_v7, %v6668_v34 }
 0x4c0   : >> { %7488 = vbcast.lane.b32.xlu1 %v7482_v13, 264  ;;  %7484 = vbcast.lane.b32.xlu0 %v7482_v13, 256  ;;  %v6671_v13 = vld [vmem:[#allocation2 + $0x38] sm:$0xff] }
 0x4c4   : >> { %7555 = vbcast.lane.b32.xlu1 %v7549_v33, 264  ;;  %7551 = vbcast.lane.b32.xlu0 %v7549_v33, 256 }
 0x4c6   : >> { %v6719_v48 = vpop.permute.xlu1 %6718  ;;  %v6708_v20 = vpop.permute.xlu0 %6707 }
 0x4c7   : >> { %v6766_v47 = vmul.f32 %v6749_v17, %v6708_v20  ;;  %v6768_v50 = vmul.f32 %v6753_v32, %v6719_v48  ;;  %v6670_v20 = vld [vmem:[#allocation2 + $0x30] sm:$0xff] }
 0x4c8   : >> { %7566 = vbcast.lane.b32.xlu1 %v7560_v6, 264  ;;  %7562 = vbcast.lane.b32.xlu0 %v7560_v6, 256 }
 0x4c9   : >> { %v15217_v56 = vadd.f32 %v6784_v38, %v6766_v47  ;;  %v15230_v4 = vadd.f32 %v6786_v41, %v6768_v50 }
 0x4ca   : >> { %v6723_v39 = vpop.permute.xlu1 %6722  ;;  %v6712_v27 = vpop.permute.xlu0 %6711 }
 0x4cb   : >> { %v6767_v54 = vmul.f32 %v6749_v17, %v6712_v27  ;;  %v6769_v36 = vmul.f32 %v6753_v32, %v6723_v39  ;;  %v6791_v17 = vmul.f32 %v6783_v14, %v6671_v13 }
 0x4cc   : >> { %7577 = vbcast.lane.b32.xlu1 %v7571_v63, 264  ;;  %7573 = vbcast.lane.b32.xlu0 %v7571_v63, 256  ;;  %v6782_v63 = vld [vmem:[%s15202_s4 + $0x30] sm:$0xff] }
 0x4cd   : >> { %v15215_v19 = vadd.f32 %v6785_v23, %v6767_v54  ;;  %v15228_v48 = vadd.f32 %v6787_v3, %v6769_v36  ;;  %v9178_v23 = vld [vmem:[%s15153_s13 + $0x10] sm:$0xf] }
 0x4ce   : >> { %v6734_v30 = vpop.permute.xlu1 %6733  ;;  %v6730_v62 = vpop.permute.xlu0 %6729  ;;  %v7796_v26 = vrot.slane %v9178_v23, %v11594_v58  ;;  %v7818_v14 = vrot.slane %v9178_v23, %v15144_v24 }
 0x4cf   : >> { %v6771_v44 = vmul.f32 %v6757_v51, %v6734_v30  ;;  %v6770_v22 = vmul.f32 %v6757_v51, %v6730_v62  ;;  %v6790_v62 = vmul.f32 %v6782_v63, %v6670_v20 }
 0x4d0   : >> { %7588 = vbcast.lane.b32.xlu1 %v7582_v52, 264  ;;  %7584 = vbcast.lane.b32.xlu0 %v7582_v52, 256 }
 0x4d1   : >> { %v15237_v57 = vadd.f32 %v6789_v15, %v6771_v44  ;;  %v15239_v30 = vadd.f32 %v6788_v45, %v6770_v22  ;;  %v9084_v44 = vld.sshfl [vmem:[%s15190_s21 + $0x4] sm:$0x33 pattern:$0x75316420]  ;;  %v16232_v45 = vld [vmem:[#allocation31_spill] sm:$0xff] }
 0x4d2   : >> { %v6745_v40 = vpop.permute.xlu1 %6744  ;;  %v6741_v18 = vpop.permute.xlu0 %6740  ;;  %v6892_v13 = vmul.f32 %v6891_v59, %v16232_v45  ;;  %v9091_v59 = vld [vmem:[%s15202_s4 + $0x48] sm:$0xff] }
 0x4d3   : >> { %v6773_v43 = vmul.f32 %v6761_v8, %v6745_v40  ;;  %v6772_v1 = vmul.f32 %v6761_v8, %v6741_v18 }
 0x4d4   : >> { %7702 = vbcast.lane.b32.xlu1 %v7696_v31, 264  ;;  %7698 = vbcast.lane.b32.xlu0 %v7696_v31, 256 }
 0x4d5   : >> { %v15253_v18 = vadd.f32 %v6791_v17, %v6773_v43  ;;  %v15255_v25 = vadd.f32 %v6790_v62, %v6772_v1  ;;  %v6895_v62 = vrot.slane %v6892_v13, 2  ;;  %v15268_v43 = vld [vmem:[%s15138_s28 + $0x14] sm:$0xf] }
 0x4d6   : >> { %v6812_v29 = vpop.permute.xlu1 %6811  ;;  %v6808_v12 = vpop.permute.xlu0 %6807 }
 0x4d7   : >> { %v6847_v0 = vmul.f32 %v6812_v29, %v15215_v19  ;;  %v6846_v61 = vmul.f32 %v6808_v12, %v15217_v56  ;;  %v7807_v29 = vrot.slane %v9178_v23, %v15130_v2 }
 0x4d8   : >> { %7713 = vbcast.lane.b32.xlu1 %v7707_v35, 264  ;;  %7709 = vbcast.lane.b32.xlu0 %v7707_v35, 256 }
 0x4d9   : >> { %v6855_v33 = vsel %vm492_vm0, %v6847_v0, 0.0  ;;  %v6854_v6 = vsel %vm492_vm0, %v6846_v61, 0.0 }
 0x4da   : >> { %v6856_v9 = vadd.f32 %v6855_v33, %v6854_v6  ;;  %v6823_v37 = vpop.permute.xlu1 %6822  ;;  %v6819_v39 = vpop.permute.xlu0 %6818 }
 0x4db   : >> { %v6849_v27 = vmul.f32 %v6823_v37, %v15228_v48  ;;  %v6848_v52 = vmul.f32 %v6819_v39, %v15230_v4  ;;  %v6933_v37 = vcombine.high %v9084_v44, %v9084_v44  ;;  %v6894_v39 = vrot.slane %v6892_v13, 1 }
 0x4dc   : >> { %v6857_v46 = vrot.slane %v6856_v9, 4  ;;  %7724 = vbcast.lane.b32.xlu1 %v7718_v21, 264  ;;  %7720 = vbcast.lane.b32.xlu0 %v7718_v21, 256 }
 0x4dd   : >> { %v6864_v16 = vsel %vm492_vm0, %v6849_v27, 0.0  ;;  %v6863_v31 = vsel %vm492_vm0, %v6848_v52, 0.0 }
 0x4de   : >> { %v6865_v55 = vadd.f32 %v6864_v16, %v6863_v31  ;;  %v6834_v53 = vpop.permute.xlu1 %6833  ;;  %v6830_v32 = vpop.permute.xlu0 %6829  ;;  %v6858_v38 = vadd.f32 %v6857_v46, %v6856_v9  ;;  %v6940_v9 = vrot.slane %v9084_v44, %v11597_v60  ;;  %v7035_v44 = vmul.f32 %v9091_v59, %v15215_v19 }
 0x4df   : >> { %v6851_v47 = vmul.f32 %v6834_v53, %v15237_v57  ;;  %v6850_v54 = vmul.f32 %v6830_v32, %v15239_v30  ;;  %v6947_v32 = vrot.slane %v6933_v37, %v11597_v60 }
 0x4e0   : >> { %v6866_v49 = vrot.slane %v6865_v55, 4  ;;  %7735 = vbcast.lane.b32.xlu1 %v7729_v11, 264  ;;  %7731 = vbcast.lane.b32.xlu0 %v7729_v11, 256  ;;  %v6859_v36 = vrot.slane %v6858_v38, 2  ;;  %v6999_v53 = vrot.slane %v6940_v9, %v11594_v58 }
 0x4e1   : >> { %v6873_v42 = vsel %vm492_vm0, %v6851_v47, 0.0  ;;  %v6872_v40 = vsel %vm492_vm0, %v6850_v54, 0.0 }
 0x4e2   : >> { %v6867_v35 = vadd.f32 %v6866_v49, %v6865_v55  ;;  %v6874_v51 = vadd.f32 %v6873_v42, %v6872_v40  ;;  %v6845_v3 = vpop.permute.xlu1 %6844  ;;  %v6841_v41 = vpop.permute.xlu0 %6840  ;;  %v6860_v33 = vadd.f32 %v6859_v36, %v6858_v38  ;;  %v7829_v55 = vrot.slane %v9178_v23, %v15148_v5 }
 0x4e3   : >> { %v6853_v28 = vmul.f32 %v6845_v3, %v15253_v18  ;;  %v6852_v50 = vmul.f32 %v6841_v41, %v15255_v25  ;;  %v6896_v40 = vrot.slane %v6892_v13, 3  ;;  %v7943_v23 = vrot.slane %v15268_v43, %v11594_v58 }
 0x4e4   : >> { %v6868_v34 = vrot.slane %v6867_v35, 2  ;;  %v6875_v7 = vrot.slane %v6874_v51, 4  ;;  %7802 = vbcast.lane.b32.xlu1 %v7796_v26, 264  ;;  %7798 = vbcast.lane.b32.xlu0 %v7796_v26, 256  ;;  %v6861_v1 = vrot.slane %v6860_v33, 1  ;;  %v6948_v26 = vcombine.high %v6940_v9, %v6940_v9 }
 0x4e5   : >> { %v6882_v12 = vsel %vm492_vm0, %v6853_v28, 0.0  ;;  %v6881_v21 = vsel %vm492_vm0, %v6852_v50, 0.0  ;;  %v9090_v28 = vld [vmem:[%s15202_s4 + $0x40] sm:$0xff] }
 0x4e6   : >> { %v6869_v8 = vadd.f32 %v6868_v34, %v6867_v35  ;;  %v6876_v0 = vadd.f32 %v6875_v7, %v6874_v51  ;;  %v6883_v61 = vadd.f32 %v6882_v12, %v6881_v21  ;;  %v6962_v15 = vpop.permute.xlu1 %6961  ;;  %v6958_v22 = vpop.permute.xlu0 %6957  ;;  %v7954_v35 = vrot.slane %v15268_v43, %v15130_v2 }
 0x4e7   : >> { %v6862_v51 = vadd.f32 %v6861_v1, %v6860_v33  ;;  %v7017_v50 = vmul.f32 %v6999_v53, %v6962_v15  ;;  %v7016_v36 = vmul.f32 %v6999_v53, %v6958_v22  ;;  %v7003_v34 = vrot.slane %v6947_v32, %v11594_v58  ;;  %v9092_v15 = vld [vmem:[%s15202_s4 + $0x50] sm:$0xff] }
 0x4e8   : >> { %v6870_v6 = vrot.slane %v6869_v8, 1  ;;  %v6877_v20 = vrot.slane %v6876_v0, 2  ;;  %v6884_v63 = vrot.slane %v6883_v61, 4  ;;  %7813 = vbcast.lane.b32.xlu1 %v7807_v29, 264  ;;  %7809 = vbcast.lane.b32.xlu0 %v7807_v29, 256  ;;  %v7007_v12 = vrot.slane %v6948_v26, %v11594_v58 }
 0x4e9   : >> { %v6901_v22 = vadd.f32 %v6892_v13, %v6862_v51  ;;  %v15287_v37 = vadd.f32 %v7035_v44, %v7017_v50  ;;  %v9097_v50 = vld [vmem:[%s15202_s4 + $0x78] sm:$0xff] }
 0x4ea   : >> { %v6871_v27 = vadd.f32 %v6870_v6, %v6869_v8  ;;  %v6878_v52 = vadd.f32 %v6877_v20, %v6876_v0  ;;  %v6885_v11 = vadd.f32 %v6884_v63, %v6883_v61  ;;  %v6973_v17 = vpop.permute.xlu1 %6972  ;;  %v6969_v46 = vpop.permute.xlu0 %6968  ;;  %v6949_v8 = vcombine.high %v6947_v32, %v6947_v32  ;;  %v9093_v20 = vld [vmem:[%s15202_s4 + $0x58] sm:$0xff] }
 0x4eb   : >> { %v7965_v6 = vrot.slane %v15268_v43, %v15144_v24  ;;  %v7019_v63 = vmul.f32 %v7003_v34, %v6973_v17  ;;  %v7018_v9 = vmul.f32 %v7003_v34, %v6969_v46  ;;  %v7037_v1 = vmul.f32 %v9093_v20, %v15228_v48 }
 0x4ec   : >> { %v6879_v16 = vrot.slane %v6878_v52, 1  ;;  %v6886_v31 = vrot.slane %v6885_v11, 2  ;;  %7824 = vbcast.lane.b32.xlu1 %v7818_v14, 264  ;;  %7820 = vbcast.lane.b32.xlu0 %v7818_v14, 256  ;;  %v6902_v47 = vadd.f32 %v6894_v39, %v6871_v27  ;;  %v7034_v14 = vmul.f32 %v9090_v28, %v15217_v56 }
 0x4ed   : >> { %v7011_v13 = vrot.slane %v6949_v8, %v11594_v58  ;;  %v7976_v28 = vrot.slane %v15268_v43, %v15148_v5 }
 0x4ee   : >> { %v6880_v54 = vadd.f32 %v6879_v16, %v6878_v52  ;;  %v6887_v38 = vadd.f32 %v6886_v31, %v6885_v11  ;;  %v6984_v49 = vpop.permute.xlu1 %6983  ;;  %v6980_v42 = vpop.permute.xlu0 %6979  ;;  %v6909_v7 = vrot.slane %v6902_v47, 7  ;;  %v15289_v39 = vadd.f32 %v7034_v14, %v7016_v36  ;;  %v9095_v16 = vld [vmem:[%s15202_s4 + $0x68] sm:$0xff]  ;;  %v9094_v31 = vld [vmem:[%s15202_s4 + $0x60] sm:$0xff]  ;;  %v9096_v36 = vld [vmem:[%s15202_s4 + $0x70] sm:$0xff] }
 0x4ef   : >> { %v7036_v11 = vmul.f32 %v9092_v15, %v15230_v4  ;;  %v7021_v53 = vmul.f32 %v7007_v12, %v6984_v49  ;;  %v7020_v32 = vmul.f32 %v7007_v12, %v6980_v42  ;;  %v7039_v49 = vmul.f32 %v9095_v16, %v15237_v57 }
 0x4f0   : >> { %v6903_v3 = vadd.f32 %v6895_v62, %v6880_v54  ;;  %v6888_v41 = vrot.slane %v6887_v38, 1  ;;  %7835 = vbcast.lane.b32.xlu1 %v7829_v55, 264  ;;  %7831 = vbcast.lane.b32.xlu0 %v7829_v55, 256  ;;  %v6911_v19 = vsel %vm6910_vm10, %v6909_v7, %v6901_v22  ;;  %v15310_v54 = vadd.f32 %v7037_v1, %v7019_v63 }
 0x4f1   : >> { %v7038_v42 = vmul.f32 %v9094_v31, %v15239_v30  ;;  %v7041_v14 = vmul.f32 %v9097_v50, %v15253_v18  ;;  %v7040_v43 = vmul.f32 %v9096_v36, %v15255_v25  ;;  %v9103_v25 = vld [vmem:[%s15248_s22 + $0x4] sm:$0xf] }
 0x4f2   : >> { %v6889_v29 = vadd.f32 %v6888_v41, %v6887_v38  ;;  %v6995_v21 = vpop.permute.xlu1 %6994  ;;  %v6991_v0 = vpop.permute.xlu0 %6990  ;;  %v6912_v61 = vrot.slane %v6903_v3, 6  ;;  %v15312_v38 = vadd.f32 %v7036_v11, %v7018_v9  ;;  %v15318_v41 = vadd.f32 %v7039_v49, %v7021_v53  ;;  %v9110_v53 = vld.sshfl [vmem:[%s15190_s21 + $0x8] sm:$0x33 pattern:$0x75316420] }
 0x4f3   : >> { %v15320_v59 = vadd.f32 %v7038_v42, %v7020_v32  ;;  %v7023_v57 = vmul.f32 %v7011_v13, %v6995_v21  ;;  %v7022_v34 = vmul.f32 %v7011_v13, %v6991_v0  ;;  %v7187_v42 = vrot.slane %v9110_v53, %v11597_v60 }
 0x4f4   : >> { %v6904_v33 = vadd.f32 %v6896_v40, %v6889_v29  ;;  %7956 = vbcast.lane.b32.xlu1 %v7954_v35, 256  ;;  %7945 = vbcast.lane.b32.xlu0 %v7943_v23, 256  ;;  %v6914_v17 = vsel %vm6913_vm11, %v6912_v61, %v6911_v19  ;;  %v9217_v29 = vld [vmem:[%s15138_s28 + $0x18] sm:$0xf] }
 0x4f5   : >> { %v8201_v0 = vrot.slane %v9217_v29, %v15130_v2  ;;  %v15338_v20 = vadd.f32 %v7040_v43, %v7022_v34 }
 0x4f6   : >> { %v6915_v56 = vrot.slane %v6904_v33, 5  ;;  %v7062_v27 = vpop.permute.xlu1 %7061  ;;  %v7058_v52 = vpop.permute.xlu0 %7057 }
 0x4f7   : >> { %v7097_v46 = vmul.f32 %v7062_v27, %v15287_v37  ;;  %v7096_v62 = vmul.f32 %v7058_v52, %v15289_v39 }
 0x4f8   : >> { %v6917_v55 = vsel %vm6916_vm12, %v6915_v56, %v6914_v17  ;;  %7967 = vbcast.lane.b32.xlu1 %v7965_v6, 256  ;;  %7960 = vbcast.lane.b32.xlu0 %v7954_v35, 264  ;;  %v8212_v17 = vrot.slane %v9217_v29, %v15144_v24 }
 0x4f9   : >> { %6920 = vst.msk [vmem:[%s15295_s9] sm:$0xf] %vm6591_vm14, %v6917_v55  ;;  %v7105_v4 = vsel %vm492_vm0, %v7097_v46, 0.0  ;;  %v7104_v47 = vsel %vm492_vm0, %v7096_v62, 0.0 }
 0x4fa   : >> { %v7106_v48 = vadd.f32 %v7105_v4, %v7104_v47  ;;  %v7073_v26 = vpop.permute.xlu1 %7072  ;;  %v7069_v40 = vpop.permute.xlu0 %7068  ;;  %v7142_v4 = vmul.f32 %v9103_v25, %v16232_v45  ;;  %v8190_v47 = vrot.slane %v9217_v29, %v11594_v58  ;;  %v9117_v25 = vld [vmem:[%s15202_s4 + $0x88] sm:$0xff] }
 0x4fb   : >> { %v7099_v35 = vmul.f32 %v7073_v26, %v15310_v54  ;;  %v7098_v51 = vmul.f32 %v7069_v40, %v15312_v38 }
 0x4fc   : >> { %v7107_v3 = vrot.slane %v7106_v48, 4  ;;  %7949 = vbcast.lane.b32.xlu1 %v7943_v23, 264  ;;  %7971 = vbcast.lane.b32.xlu0 %v7965_v6, 264  ;;  %v15336_v6 = vadd.f32 %v7041_v14, %v7023_v57  ;;  %v7145_v34 = vrot.slane %v7142_v4, 2 }
 0x4fd   : >> { %v7114_v30 = vsel %vm492_vm0, %v7099_v35, 0.0  ;;  %v7113_v7 = vsel %vm492_vm0, %v7098_v51, 0.0  ;;  %v7180_v35 = vcombine.high %v9110_v53, %v9110_v53  ;;  %v7144_v51 = vrot.slane %v7142_v4, 1 }
 0x4fe   : >> { %v7115_v12 = vadd.f32 %v7114_v30, %v7113_v7  ;;  %v7084_v8 = vpop.permute.xlu1 %7083  ;;  %v7080_v23 = vpop.permute.xlu0 %7079  ;;  %v7108_v15 = vadd.f32 %v7107_v3, %v7106_v48  ;;  %v7282_v53 = vmul.f32 %v9117_v25, %v15287_v37 }
 0x4ff   : >> { %v7101_v61 = vmul.f32 %v7084_v8, %v15318_v41  ;;  %v7100_v44 = vmul.f32 %v7080_v23, %v15320_v59  ;;  %v8223_v8 = vrot.slane %v9217_v29, %v15148_v5  ;;  %v7246_v23 = vrot.slane %v7187_v42, %v11594_v58 }
 0x500   : >> { %v7116_v21 = vrot.slane %v7115_v12, 4  ;;  %7982 = vbcast.lane.b32.xlu1 %v7976_v28, 264  ;;  %7978 = vbcast.lane.b32.xlu0 %v7976_v28, 256  ;;  %v7109_v27 = vrot.slane %v7108_v15, 2 }
 0x501   : >> { %v7123_v22 = vsel %vm492_vm0, %v7101_v61, 0.0  ;;  %v7122_v33 = vsel %vm492_vm0, %v7100_v44, 0.0  ;;  %v7194_v61 = vrot.slane %v7180_v35, %v11597_v60  ;;  %v15354_v44 = vld [vmem:[%s15138_s28 + $0x1c] sm:$0xf] }
 0x502   : >> { %v7117_v63 = vadd.f32 %v7116_v21, %v7115_v12  ;;  %v7124_v9 = vadd.f32 %v7123_v22, %v7122_v33  ;;  %v7095_v19 = vpop.permute.xlu1 %7094  ;;  %v7091_v18 = vpop.permute.xlu0 %7090  ;;  %v7110_v48 = vadd.f32 %v7109_v27, %v7108_v15  ;;  %v7146_v33 = vrot.slane %v7142_v4, 3 }
 0x503   : >> { %v7103_v56 = vmul.f32 %v7095_v19, %v15336_v6  ;;  %v7102_v13 = vmul.f32 %v7091_v18, %v15338_v20  ;;  %v8448_v29 = vrot.slane %v15354_v44, %v15130_v2  ;;  %v8470_v25 = vrot.slane %v15354_v44, %v15148_v5 }
 0x504   : >> { %v7118_v52 = vrot.slane %v7117_v63, 2  ;;  %v7125_v11 = vrot.slane %v7124_v9, 4  ;;  %8207 = vbcast.lane.b32.xlu1 %v8201_v0, 264  ;;  %8203 = vbcast.lane.b32.xlu0 %v8201_v0, 256  ;;  %v7111_v30 = vrot.slane %v7110_v48, 1  ;;  %v7195_v0 = vcombine.high %v7187_v42, %v7187_v42 }
 0x505   : >> { %v7132_v46 = vsel %vm492_vm0, %v7103_v56, 0.0  ;;  %v7131_v62 = vsel %vm492_vm0, %v7102_v13, 0.0  ;;  %v9116_v56 = vld [vmem:[%s15202_s4 + $0x80] sm:$0xff] }
 0x506   : >> { %v7119_v1 = vadd.f32 %v7118_v52, %v7117_v63  ;;  %v7126_v16 = vadd.f32 %v7125_v11, %v7124_v9  ;;  %v7133_v31 = vadd.f32 %v7132_v46, %v7131_v62  ;;  %v7209_v55 = vpop.permute.xlu1 %7208  ;;  %v7205_v32 = vpop.permute.xlu0 %7204  ;;  %v7196_v63 = vcombine.high %v7194_v61, %v7194_v61 }
 0x507   : >> { %v7112_v9 = vadd.f32 %v7111_v30, %v7110_v48  ;;  %v7264_v13 = vmul.f32 %v7246_v23, %v7209_v55  ;;  %v7263_v27 = vmul.f32 %v7246_v23, %v7205_v32  ;;  %v7250_v52 = vrot.slane %v7194_v61, %v11594_v58  ;;  %v9119_v48 = vld [vmem:[%s15202_s4 + $0x98] sm:$0xff] }
 0x508   : >> { %v7120_v26 = vrot.slane %v7119_v1, 1  ;;  %v7127_v40 = vrot.slane %v7126_v16, 2  ;;  %v7134_v49 = vrot.slane %v7133_v31, 4  ;;  %8218 = vbcast.lane.b32.xlu1 %v8212_v17, 264  ;;  %8214 = vbcast.lane.b32.xlu0 %v8212_v17, 256  ;;  %v7254_v46 = vrot.slane %v7195_v0, %v11594_v58 }
 0x509   : >> { %v8459_v32 = vrot.slane %v15354_v44, %v15144_v24  ;;  %v15369_v35 = vadd.f32 %v7282_v53, %v7264_v13  ;;  %v9122_v13 = vld [vmem:[%s15202_s4 + $0xb0] sm:$0xff] }
 0x50a   : >> { %v7121_v3 = vadd.f32 %v7120_v26, %v7119_v1  ;;  %v7128_v28 = vadd.f32 %v7127_v40, %v7126_v16  ;;  %v7135_v50 = vadd.f32 %v7134_v49, %v7133_v31  ;;  %v7220_v36 = vpop.permute.xlu1 %7219  ;;  %v7216_v57 = vpop.permute.xlu0 %7215  ;;  %v7258_v31 = vrot.slane %v7196_v63, %v11594_v58  ;;  %v9118_v40 = vld [vmem:[%s15202_s4 + $0x90] sm:$0xff] }
 0x50b   : >> { %v7151_v26 = vadd.f32 %v7142_v4, %v7112_v9  ;;  %v7266_v49 = vmul.f32 %v7250_v52, %v7220_v36  ;;  %v7265_v42 = vmul.f32 %v7250_v52, %v7216_v57  ;;  %v7283_v30 = vmul.f32 %v9118_v40, %v15312_v38 }
 0x50c   : >> { %v7129_v7 = vrot.slane %v7128_v28, 1  ;;  %v7136_v12 = vrot.slane %v7135_v50, 2  ;;  %8196 = vbcast.lane.b32.xlu1 %v8190_v47, 264  ;;  %8192 = vbcast.lane.b32.xlu0 %v8190_v47, 256  ;;  %v7152_v14 = vadd.f32 %v7144_v51, %v7121_v3  ;;  %v7281_v47 = vmul.f32 %v9116_v56, %v15289_v39  ;;  %v9123_v56 = vld [vmem:[%s15202_s4 + $0xb8] sm:$0xff] }
 0x50e   : >> { %v7130_v43 = vadd.f32 %v7129_v7, %v7128_v28  ;;  %v7137_v15 = vadd.f32 %v7136_v12, %v7135_v50  ;;  %v7231_v21 = vpop.permute.xlu1 %7230  ;;  %v7227_v22 = vpop.permute.xlu0 %7226  ;;  %v7159_v11 = vrot.slane %v7152_v14, 7  ;;  %v15371_v51 = vadd.f32 %v7281_v47, %v7263_v27  ;;  %v9121_v7 = vld [vmem:[%s15202_s4 + $0xa8] sm:$0xff]  ;;  %v9120_v12 = vld [vmem:[%s15202_s4 + $0xa0] sm:$0xff] }
 0x50f   : >> { %v7284_v28 = vmul.f32 %v9119_v48, %v15310_v54  ;;  %v8437_v50 = vrot.slane %v15354_v44, %v11594_v58  ;;  %v7268_v23 = vmul.f32 %v7254_v46, %v7231_v21  ;;  %v7267_v61 = vmul.f32 %v7254_v46, %v7227_v22 }
 0x510   : >> { %v7153_v19 = vadd.f32 %v7145_v34, %v7130_v43  ;;  %v7138_v18 = vrot.slane %v7137_v15, 1  ;;  %8229 = vbcast.lane.b32.xlu1 %v8223_v8, 264  ;;  %8225 = vbcast.lane.b32.xlu0 %v8223_v8, 256  ;;  %v7160_v37 = vsel %vm6910_vm10, %v7159_v11, %v7151_v26  ;;  %v7286_v21 = vmul.f32 %v9121_v7, %v15318_v41  ;;  %v15407_v11 = vld [vmem:[%s15153_s13 + $0x14] sm:$0xf] }
 0x511   : >> { %v15388_v43 = vadd.f32 %v7284_v28, %v7266_v49  ;;  %v7285_v22 = vmul.f32 %v9120_v12, %v15320_v59  ;;  %v7288_v44 = vmul.f32 %v9123_v56, %v15336_v6  ;;  %v8054_v48 = vrot.slane %v15407_v11, %v15130_v2  ;;  %v15422_v6 = vld [vmem:[%s15153_s13 + $0x18] sm:$0xf]  ;;  %v15428_v28 = vld [vmem:[%s15153_s13 + $0x1c] sm:$0xf] }
 0x512   : >> { %v7139_v17 = vadd.f32 %v7138_v18, %v7137_v15  ;;  %v7242_v62 = vpop.permute.xlu1 %7241  ;;  %v7238_v1 = vpop.permute.xlu0 %7237  ;;  %v7161_v16 = vrot.slane %v7153_v19, 6  ;;  %v15390_v15 = vadd.f32 %v7283_v30, %v7265_v42  ;;  %v15396_v18 = vadd.f32 %v7286_v21, %v7268_v23 }
 0x513   : >> { %v7270_v41 = vmul.f32 %v7258_v31, %v7242_v62  ;;  %v7269_v27 = vmul.f32 %v7258_v31, %v7238_v1  ;;  %v7287_v62 = vmul.f32 %v9122_v13, %v15338_v20 }
 0x514   : >> { %v7154_v55 = vadd.f32 %v7146_v33, %v7139_v17  ;;  %8454 = vbcast.lane.b32.xlu1 %v8448_v29, 264  ;;  %8450 = vbcast.lane.b32.xlu0 %v8448_v29, 256  ;;  %v7162_v34 = vsel %vm6913_vm11, %v7161_v16, %v7160_v37  ;;  %v15398_v29 = vadd.f32 %v7285_v22, %v7267_v61 }
 0x515   : >> { %v15419_v40 = vadd.f32 %v7287_v62, %v7269_v27 }
 0x516   : >> { %v7163_v39 = vrot.slane %v7154_v55, 5  ;;  %v7309_v4 = vpop.permute.xlu1 %7308  ;;  %v7305_v3 = vpop.permute.xlu0 %7304 }
 0x517   : >> { %v7344_v36 = vmul.f32 %v7309_v4, %v15369_v35  ;;  %v7343_v57 = vmul.f32 %v7305_v3, %v15371_v51 }
 0x518   : >> { %v7164_v8 = vsel %vm6916_vm12, %v7163_v39, %v7162_v34  ;;  %8465 = vbcast.lane.b32.xlu1 %v8459_v32, 264  ;;  %8461 = vbcast.lane.b32.xlu0 %v8459_v32, 256  ;;  %v15417_v32 = vadd.f32 %v7288_v44, %v7270_v41  ;;  %v9129_v39 = vld [vmem:[%s15248_s22 + $0x8] sm:$0xf] }
 0x519   : >> { %9106 = vst.msk [vmem:[%s15295_s9 + $0x4] sm:$0xf] %vm6591_vm14, %v7164_v8  ;;  %v7352_v54 = vsel %vm492_vm0, %v7344_v36, 0.0  ;;  %v7351_v14 = vsel %vm492_vm0, %v7343_v57, 0.0  ;;  %v8301_v57 = vrot.slane %v15422_v6, %v15130_v2 }
 0x51a   : >> { %v7353_v38 = vadd.f32 %v7352_v54, %v7351_v14  ;;  %v7320_v0 = vpop.permute.xlu1 %7319  ;;  %v7316_v33 = vpop.permute.xlu0 %7315  ;;  %v9136_v54 = vld.sshfl [vmem:[%s15190_s21 + $0xc] sm:$0x33 pattern:$0x75316420] }
 0x51b   : >> { %v7346_v63 = vmul.f32 %v7320_v0, %v15388_v43  ;;  %v7345_v9 = vmul.f32 %v7316_v33, %v15390_v15  ;;  %v8548_v0 = vrot.slane %v15428_v28, %v15130_v2  ;;  %v8065_v2 = vrot.slane %v15407_v11, %v15144_v24 }
 0x51c   : >> { %v7354_v19 = vrot.slane %v7353_v38, 4  ;;  %8443 = vbcast.lane.b32.xlu1 %v8437_v50, 264  ;;  %8439 = vbcast.lane.b32.xlu0 %v8437_v50, 256 }
 0x51d   : >> { %v7361_v59 = vsel %vm492_vm0, %v7346_v63, 0.0  ;;  %v7360_v52 = vsel %vm492_vm0, %v7345_v9, 0.0  ;;  %v7434_v9 = vrot.slane %v9136_v54, %v11597_v60 }
 0x51e   : >> { %v7362_v17 = vadd.f32 %v7361_v59, %v7360_v52  ;;  %v7331_v46 = vpop.permute.xlu1 %7330  ;;  %v7327_v16 = vpop.permute.xlu0 %7326  ;;  %v7355_v1 = vadd.f32 %v7354_v19, %v7353_v38  ;;  %v7389_v38 = vmul.f32 %v9129_v39, %v16232_v45  ;;  %v7427_v19 = vcombine.high %v9136_v54, %v9136_v54 }
 0x51f   : >> { %v7348_v53 = vmul.f32 %v7331_v46, %v15396_v18  ;;  %v7347_v47 = vmul.f32 %v7327_v16, %v15398_v29  ;;  %v8312_v39 = vrot.slane %v15422_v6, %v15144_v24 }
 0x520   : >> { %v7363_v31 = vrot.slane %v7362_v17, 4  ;;  %8476 = vbcast.lane.b32.xlu1 %v8470_v25, 264  ;;  %8472 = vbcast.lane.b32.xlu0 %v8470_v25, 256  ;;  %v7356_v50 = vrot.slane %v7355_v1, 2  ;;  %v7391_v25 = vrot.slane %v7389_v38, 1  ;;  %v7392_v52 = vrot.slane %v7389_v38, 2 }
 0x521   : >> { %v7370_v26 = vsel %vm492_vm0, %v7348_v53, 0.0  ;;  %v7369_v55 = vsel %vm492_vm0, %v7347_v47, 0.0  ;;  %v7493_v53 = vrot.slane %v7434_v9, %v11594_v58  ;;  %v7441_v47 = vrot.slane %v7427_v19, %v11597_v60 }
 0x522   : >> { %v7364_v49 = vadd.f32 %v7363_v31, %v7362_v17  ;;  %v7371_v20 = vadd.f32 %v7370_v26, %v7369_v55  ;;  %v7342_v42 = vpop.permute.xlu1 %7341  ;;  %v7338_v37 = vpop.permute.xlu0 %7337  ;;  %v7357_v33 = vadd.f32 %v7356_v50, %v7355_v1  ;;  %v7393_v55 = vrot.slane %v7389_v38, 3 }
 0x523   : >> { %v7350_v4 = vmul.f32 %v7342_v42, %v15417_v32  ;;  %v7349_v3 = vmul.f32 %v7338_v37, %v15419_v40 }
 0x524   : >> { %v7365_v34 = vrot.slane %v7364_v49, 2  ;;  %v7372_v36 = vrot.slane %v7371_v20, 4  ;;  %8060 = vbcast.lane.b32.xlu1 %v8054_v48, 264  ;;  %8056 = vbcast.lane.b32.xlu0 %v8054_v48, 256  ;;  %v7358_v17 = vrot.slane %v7357_v33, 1  ;;  %v7442_v48 = vcombine.high %v7434_v9, %v7434_v9 }
 0x525   : >> { %v7379_v30 = vsel %vm492_vm0, %v7350_v4, 0.0  ;;  %v7378_v7 = vsel %vm492_vm0, %v7349_v3, 0.0  ;;  %v9143_v4 = vld [vmem:[%s15202_s4 + $0xc8] sm:$0xff]  ;;  %v9142_v3 = vld [vmem:[%s15202_s4 + $0xc0] sm:$0xff] }
 0x526   : >> { %v7366_v12 = vadd.f32 %v7365_v34, %v7364_v49  ;;  %v7373_v8 = vadd.f32 %v7372_v36, %v7371_v20  ;;  %v7380_v23 = vadd.f32 %v7379_v30, %v7378_v7  ;;  %v7456_v61 = vpop.permute.xlu1 %7455  ;;  %v7452_v14 = vpop.permute.xlu0 %7451  ;;  %v7443_v49 = vcombine.high %v7441_v47, %v7441_v47 }
 0x527   : >> { %v7359_v20 = vadd.f32 %v7358_v17, %v7357_v33  ;;  %v7511_v50 = vmul.f32 %v7493_v53, %v7456_v61  ;;  %v7510_v34 = vmul.f32 %v7493_v53, %v7452_v14  ;;  %v7497_v36 = vrot.slane %v7441_v47, %v11594_v58 }
 0x528   : >> { %v7367_v21 = vrot.slane %v7366_v12, 1  ;;  %v7374_v22 = vrot.slane %v7373_v8, 2  ;;  %v7381_v63 = vrot.slane %v7380_v23, 4  ;;  %8307 = vbcast.lane.b32.xlu1 %v8301_v57, 264  ;;  %8303 = vbcast.lane.b32.xlu0 %v8301_v57, 256  ;;  %v7501_v7 = vrot.slane %v7442_v48, %v11594_v58 }
 0x529   : >> { %v7505_v54 = vrot.slane %v7443_v49, %v11594_v58  ;;  %v7528_v33 = vmul.f32 %v9142_v3, %v15371_v51  ;;  %v8559_v14 = vrot.slane %v15428_v28, %v15144_v24  ;;  %v8043_v24 = vrot.slane %v15407_v11, %v11594_v58  ;;  %v9149_v3 = vld [vmem:[%s15202_s4 + $0xf8] sm:$0xff] }
 0x52a   : >> { %v7368_v56 = vadd.f32 %v7367_v21, %v7366_v12  ;;  %v7375_v13 = vadd.f32 %v7374_v22, %v7373_v8  ;;  %v7382_v41 = vadd.f32 %v7381_v63, %v7380_v23  ;;  %v7467_v27 = vpop.permute.xlu1 %7466  ;;  %v7463_v59 = vpop.permute.xlu0 %7462  ;;  %v9145_v21 = vld [vmem:[%s15202_s4 + $0xd8] sm:$0xff]  ;;  %v7398_v22 = vadd.f32 %v7389_v38, %v7359_v20  ;;  %v9144_v63 = vld [vmem:[%s15202_s4 + $0xd0] sm:$0xff] }
 0x52b   : >> { %v7513_v9 = vmul.f32 %v7497_v36, %v7467_v27  ;;  %v7512_v19 = vmul.f32 %v7497_v36, %v7463_v59  ;;  %v7530_v17 = vmul.f32 %v9144_v63, %v15390_v15 }
 0x52c   : >> { %v7376_v46 = vrot.slane %v7375_v13, 1  ;;  %v7383_v16 = vrot.slane %v7382_v41, 2  ;;  %8554 = vbcast.lane.b32.xlu1 %v8548_v0, 264  ;;  %8550 = vbcast.lane.b32.xlu0 %v8548_v0, 256  ;;  %v7399_v44 = vadd.f32 %v7391_v25, %v7368_v56  ;;  %v7529_v0 = vmul.f32 %v9143_v4, %v15369_v35 }
 0x52d   : >> { %v15458_v56 = vadd.f32 %v7528_v33, %v7510_v34  ;;  %v8076_v4 = vrot.slane %v15407_v11, %v15148_v5  ;;  %v7535_v33 = vmul.f32 %v9149_v3, %v15417_v32 }
 0x52e   : >> { %v7377_v62 = vadd.f32 %v7376_v46, %v7375_v13  ;;  %v7384_v1 = vadd.f32 %v7383_v16, %v7382_v41  ;;  %v7478_v31 = vpop.permute.xlu1 %7477  ;;  %v7474_v26 = vpop.permute.xlu0 %7473  ;;  %v7406_v57 = vrot.slane %v7399_v44, 7  ;;  %v15456_v25 = vadd.f32 %v7529_v0, %v7511_v50  ;;  %v9147_v46 = vld [vmem:[%s15202_s4 + $0xe8] sm:$0xff]  ;;  %v9146_v16 = vld [vmem:[%s15202_s4 + $0xe0] sm:$0xff]  ;;  %v9148_v50 = vld [vmem:[%s15202_s4 + $0xf0] sm:$0xff] }
 0x52f   : >> { %v7531_v41 = vmul.f32 %v9145_v21, %v15388_v43  ;;  %v7515_v53 = vmul.f32 %v7501_v7, %v7478_v31  ;;  %v7514_v47 = vmul.f32 %v7501_v7, %v7474_v26  ;;  %v7533_v31 = vmul.f32 %v9147_v46, %v15396_v18 }
 0x530   : >> { %v7400_v42 = vadd.f32 %v7392_v52, %v7377_v62  ;;  %v7385_v37 = vrot.slane %v7384_v1, 1  ;;  %8071 = vbcast.lane.b32.xlu1 %v8065_v2, 264  ;;  %8067 = vbcast.lane.b32.xlu0 %v8065_v2, 256  ;;  %v7407_v35 = vsel %vm6910_vm10, %v7406_v57, %v7398_v22  ;;  %v7532_v26 = vmul.f32 %v9146_v16, %v15398_v29 }
 0x531   : >> { %v15475_v62 = vadd.f32 %v7531_v41, %v7513_v9  ;;  %v7534_v11 = vmul.f32 %v9148_v50, %v15419_v40  ;;  %v9155_v40 = vld [vmem:[%s15248_s22 + $0xc] sm:$0xf] }
 0x532   : >> { %v7386_v30 = vadd.f32 %v7385_v37, %v7384_v1  ;;  %v7489_v12 = vpop.permute.xlu1 %7488  ;;  %v7485_v8 = vpop.permute.xlu0 %7484  ;;  %v7408_v23 = vrot.slane %v7400_v42, 6  ;;  %v15477_v1 = vadd.f32 %v7530_v17, %v7512_v19  ;;  %v15483_v37 = vadd.f32 %v7533_v31, %v7515_v53 }
 0x533   : >> { %v7517_v34 = vmul.f32 %v7505_v54, %v7489_v12  ;;  %v7516_v18 = vmul.f32 %v7505_v54, %v7485_v8  ;;  %v8290_v12 = vrot.slane %v15422_v6, %v11594_v58 }
 0x534   : >> { %v7401_v61 = vadd.f32 %v7393_v55, %v7386_v30  ;;  %8318 = vbcast.lane.b32.xlu1 %v8312_v39, 264  ;;  %8314 = vbcast.lane.b32.xlu0 %v8312_v39, 256  ;;  %v7409_v52 = vsel %vm6913_vm11, %v7408_v23, %v7407_v35  ;;  %v15485_v39 = vadd.f32 %v7532_v26, %v7514_v47 }
 0x535   : >> { %v7636_v47 = vmul.f32 %v9155_v40, %v16232_v45 }
 0x536   : >> { %v7410_v51 = vrot.slane %v7401_v61, 5  ;;  %v7556_v38 = vpop.permute.xlu1 %7555  ;;  %v7552_v13 = vpop.permute.xlu0 %7551  ;;  %v15501_v61 = vadd.f32 %v7535_v33, %v7517_v34 }
 0x537   : >> { %v7591_v27 = vmul.f32 %v7556_v38, %v15456_v25  ;;  %v7590_v59 = vmul.f32 %v7552_v13, %v15458_v56  ;;  %v7638_v26 = vrot.slane %v7636_v47, 1  ;;  %v7639_v50 = vrot.slane %v7636_v47, 2 }
 0x538   : >> { %v7411_v2 = vsel %vm6916_vm12, %v7410_v51, %v7409_v52  ;;  %8565 = vbcast.lane.b32.xlu1 %v8559_v14, 264  ;;  %8561 = vbcast.lane.b32.xlu0 %v8559_v14, 256  ;;  %v15503_v14 = vadd.f32 %v7534_v11, %v7516_v18 }
 0x539   : >> { %9132 = vst.msk [vmem:[%s15295_s9 + $0x8] sm:$0xf] %vm6591_vm14, %v7411_v2  ;;  %v7599_v43 = vsel %vm492_vm0, %v7591_v27, 0.0  ;;  %v7598_v44 = vsel %vm492_vm0, %v7590_v59, 0.0 }
 0x53a   : >> { %v7600_v15 = vadd.f32 %v7599_v43, %v7598_v44  ;;  %v7567_v48 = vpop.permute.xlu1 %7566  ;;  %v7563_v55 = vpop.permute.xlu0 %7562  ;;  %v9162_v2 = vld.sshfl [vmem:[%s15190_s21 + $0x10] sm:$0x33 pattern:$0x75316420]  ;;  %v8537_v43 = vrot.slane %v15428_v28, %v11594_v58 }
 0x53b   : >> { %v7593_v49 = vmul.f32 %v7567_v48, %v15475_v62  ;;  %v7592_v20 = vmul.f32 %v7563_v55, %v15477_v1  ;;  %v7674_v31 = vcombine.high %v9162_v2, %v9162_v2 }
 0x53c   : >> { %v7601_v42 = vrot.slane %v7600_v15, 4  ;;  %8049 = vbcast.lane.b32.xlu1 %v8043_v24, 264  ;;  %8045 = vbcast.lane.b32.xlu0 %v8043_v24, 256  ;;  %v8323_v24 = vrot.slane %v15422_v6, %v15148_v5  ;;  %v7681_v6 = vrot.slane %v9162_v2, %v11597_v60 }
 0x53d   : >> { %v7608_v29 = vsel %vm492_vm0, %v7593_v49, 0.0  ;;  %v7607_v36 = vsel %vm492_vm0, %v7592_v20, 0.0 }
 0x53e   : >> { %v7609_v57 = vadd.f32 %v7608_v29, %v7607_v36  ;;  %v7578_v30 = vpop.permute.xlu1 %7577  ;;  %v7574_v7 = vpop.permute.xlu0 %7573  ;;  %v7602_v21 = vadd.f32 %v7601_v42, %v7600_v15  ;;  %v8570_v36 = vrot.slane %v15428_v28, %v15148_v5  ;;  %v9168_v5 = vld [vmem:[%s15202_s4 + $0x100] sm:$0xff] }
 0x53f   : >> { %v7595_v23 = vmul.f32 %v7578_v30, %v15483_v37  ;;  %v7594_v0 = vmul.f32 %v7574_v7, %v15485_v39  ;;  %v7688_v30 = vrot.slane %v7674_v31, %v11597_v60 }
 0x540   : >> { %v7610_v22 = vrot.slane %v7609_v57, 4  ;;  %8082 = vbcast.lane.b32.xlu1 %v8076_v4, 264  ;;  %8078 = vbcast.lane.b32.xlu0 %v8076_v4, 256  ;;  %v7603_v38 = vrot.slane %v7602_v21, 2 }
 0x541   : >> { %v7617_v8 = vsel %vm492_vm0, %v7595_v23, 0.0  ;;  %v7616_v54 = vsel %vm492_vm0, %v7594_v0, 0.0 }
 0x542   : >> { %v7611_v63 = vadd.f32 %v7610_v22, %v7609_v57  ;;  %v7618_v9 = vadd.f32 %v7617_v8, %v7616_v54  ;;  %v7589_v32 = vpop.permute.xlu1 %7588  ;;  %v7585_v19 = vpop.permute.xlu0 %7584  ;;  %v7604_v44 = vadd.f32 %v7603_v38, %v7602_v21  ;;  %v7740_v57 = vrot.slane %v7681_v6, %v11594_v58 }
 0x543   : >> { %v7597_v35 = vmul.f32 %v7589_v32, %v15501_v61  ;;  %v7596_v51 = vmul.f32 %v7585_v19, %v15503_v14  ;;  %v7689_v21 = vcombine.high %v7681_v6, %v7681_v6  ;;  %v7640_v8 = vrot.slane %v7636_v47, 3 }
 0x544   : >> { %v7612_v13 = vrot.slane %v7611_v63, 2  ;;  %v7619_v41 = vrot.slane %v7618_v9, 4  ;;  %8296 = vbcast.lane.b32.xlu1 %v8290_v12, 264  ;;  %8292 = vbcast.lane.b32.xlu0 %v8290_v12, 256  ;;  %v7605_v34 = vrot.slane %v7604_v44, 1  ;;  %v7744_v32 = vrot.slane %v7688_v30, %v11594_v58 }
 0x545   : >> { %v7626_v52 = vsel %vm492_vm0, %v7597_v35, 0.0  ;;  %v7625_v27 = vsel %vm492_vm0, %v7596_v51, 0.0 }
 0x546   : >> { %v7613_v59 = vadd.f32 %v7612_v13, %v7611_v63  ;;  %v7620_v17 = vadd.f32 %v7619_v41, %v7618_v9  ;;  %v7627_v46 = vadd.f32 %v7626_v52, %v7625_v27  ;;  %v7703_v16 = vpop.permute.xlu1 %7702  ;;  %v7699_v53 = vpop.permute.xlu0 %7698  ;;  %v7606_v22 = vadd.f32 %v7605_v34, %v7604_v44  ;;  %v9169_v63 = vld [vmem:[%s15202_s4 + $0x108] sm:$0xff] }
 0x547   : >> { %v7758_v28 = vmul.f32 %v7740_v57, %v7703_v16  ;;  %v7757_v9 = vmul.f32 %v7740_v57, %v7699_v53  ;;  %v7776_v13 = vmul.f32 %v9169_v63, %v15456_v25  ;;  %v7775_v41 = vmul.f32 %v9168_v5, %v15458_v56 }
 0x548   : >> { %v7614_v15 = vrot.slane %v7613_v59, 1  ;;  %v7621_v48 = vrot.slane %v7620_v17, 2  ;;  %v7628_v55 = vrot.slane %v7627_v46, 4  ;;  %8329 = vbcast.lane.b32.xlu1 %v8323_v24, 264  ;;  %8325 = vbcast.lane.b32.xlu0 %v8323_v24, 256  ;;  %v9171_v24 = vld [vmem:[%s15202_s4 + $0x118] sm:$0xff]  ;;  %v7645_v52 = vadd.f32 %v7636_v47, %v7606_v22 }
 0x549   : >> { %v15529_v53 = vadd.f32 %v7776_v13, %v7758_v28  ;;  %v7778_v47 = vmul.f32 %v9171_v24, %v15475_v62  ;;  %v9174_v22 = vld [vmem:[%s15202_s4 + $0x130] sm:$0xff] }
 0x54a   : >> { %v7615_v49 = vadd.f32 %v7614_v15, %v7613_v59  ;;  %v7622_v20 = vadd.f32 %v7621_v48, %v7620_v17  ;;  %v7629_v42 = vadd.f32 %v7628_v55, %v7627_v46  ;;  %v7714_v4 = vpop.permute.xlu1 %7713  ;;  %v7710_v3 = vpop.permute.xlu0 %7709  ;;  %v7748_v59 = vrot.slane %v7689_v21, %v11594_v58  ;;  %v9170_v46 = vld [vmem:[%s15202_s4 + $0x110] sm:$0xff]  ;;  %v9175_v21 = vld [vmem:[%s15202_s4 + $0x138] sm:$0xff] }
 0x54b   : >> { %v7690_v17 = vcombine.high %v7688_v30, %v7688_v30  ;;  %v7760_v16 = vmul.f32 %v7744_v32, %v7714_v4  ;;  %v7759_v2 = vmul.f32 %v7744_v32, %v7710_v3  ;;  %v7777_v31 = vmul.f32 %v9170_v46, %v15477_v1  ;;  %v9181_v46 = vld [vmem:[%s15248_s22 + $0x10] sm:$0xf] }
 0x54c   : >> { %v7623_v18 = vrot.slane %v7622_v20, 1  ;;  %v7630_v29 = vrot.slane %v7629_v42, 2  ;;  %8543 = vbcast.lane.b32.xlu1 %v8537_v43, 264  ;;  %8539 = vbcast.lane.b32.xlu0 %v8537_v43, 256  ;;  %v7646_v7 = vadd.f32 %v7638_v26, %v7615_v49  ;;  %v15531_v43 = vadd.f32 %v7775_v41, %v7757_v9  ;;  %v9173_v26 = vld [vmem:[%s15202_s4 + $0x128] sm:$0xff]  ;;  %v9172_v49 = vld [vmem:[%s15202_s4 + $0x120] sm:$0xff] }
 0x54d   : >> { %v7752_v3 = vrot.slane %v7690_v17, %v11594_v58  ;;  %v15547_v34 = vadd.f32 %v7778_v47, %v7760_v16  ;;  %v7780_v57 = vmul.f32 %v9173_v26, %v15483_v37  ;;  %v7779_v30 = vmul.f32 %v9172_v49, %v15485_v39 }
 0x54e   : >> { %v7624_v23 = vadd.f32 %v7623_v18, %v7622_v20  ;;  %v7631_v0 = vadd.f32 %v7630_v29, %v7629_v42  ;;  %v7725_v33 = vpop.permute.xlu1 %7724  ;;  %v7721_v11 = vpop.permute.xlu0 %7720  ;;  %v7653_v19 = vrot.slane %v7646_v7, 7  ;;  %v15549_v18 = vadd.f32 %v7777_v31, %v7759_v2 }
 0x54f   : >> { %v7762_v42 = vmul.f32 %v7748_v59, %v7725_v33  ;;  %v7761_v4 = vmul.f32 %v7748_v59, %v7721_v11  ;;  %v7782_v32 = vmul.f32 %v9175_v21, %v15501_v61 }
 0x550   : >> { %v7647_v12 = vadd.f32 %v7639_v50, %v7624_v23  ;;  %v7632_v54 = vrot.slane %v7631_v0, 1  ;;  %8576 = vbcast.lane.b32.xlu1 %v8570_v36, 264  ;;  %8572 = vbcast.lane.b32.xlu0 %v8570_v36, 256  ;;  %v7654_v25 = vsel %vm6910_vm10, %v7653_v19, %v7645_v52  ;;  %v7781_v19 = vmul.f32 %v9174_v22, %v15503_v14 }
 0x551   : >> { %v15555_v33 = vadd.f32 %v7780_v57, %v7762_v42  ;;  %v15557_v11 = vadd.f32 %v7779_v30, %v7761_v4 }
 0x552   : >> { %v7633_v40 = vadd.f32 %v7632_v54, %v7631_v0  ;;  %v7736_v35 = vpop.permute.xlu1 %7735  ;;  %v7732_v51 = vpop.permute.xlu0 %7731  ;;  %v7655_v38 = vrot.slane %v7647_v12, 6 }
 0x553   : >> { %v7764_v12 = vmul.f32 %v7752_v3, %v7736_v35 }
 0x554   : >> { %v7648_v27 = vadd.f32 %v7640_v8, %v7633_v40  ;;  %v7656_v48 = vsel %vm6913_vm11, %v7655_v38, %v7654_v25  ;;  %v7763_v8 = vmul.f32 %v7752_v3, %v7732_v51 }
 0x555   : >> { %v15569_v13 = vadd.f32 %v7782_v32, %v7764_v12 }
 0x556   : >> { %v7657_v44 = vrot.slane %v7648_v27, 5  ;;  %v7803_v56 = vpop.permute.xlu1 %7802  ;;  %v7799_v15 = vpop.permute.xlu0 %7798  ;;  %v15571_v41 = vadd.f32 %v7781_v19, %v7763_v8 }
 0x557   : >> { %v7838_v55 = vmul.f32 %v7803_v56, %v15529_v53  ;;  %v7837_v6 = vmul.f32 %v7799_v15, %v15531_v43 }
 0x558   : >> { %v7658_v20 = vsel %vm6916_vm12, %v7657_v44, %v7656_v48 }
 0x559   : >> { %9158 = vst.msk [vmem:[%s15295_s9 + $0xc] sm:$0xf] %vm6591_vm14, %v7658_v20  ;;  %v7846_v62 = vsel %vm492_vm0, %v7838_v55, 0.0  ;;  %v7845_v50 = vsel %vm492_vm0, %v7837_v6, 0.0  ;;  %v7883_v6 = vmul.f32 %v9181_v46, %v16232_v45 }
 0x55a   : >> { %v7847_v1 = vadd.f32 %v7846_v62, %v7845_v50  ;;  %v7814_v29 = vpop.permute.xlu1 %7813  ;;  %v7810_v36 = vpop.permute.xlu0 %7809  ;;  %v9188_v50 = vld.sshfl [vmem:[%s15190_s21 + $0x14] sm:$0x33 pattern:$0x75316420] }
 0x55b   : >> { %v7840_v7 = vmul.f32 %v7814_v29, %v15547_v34  ;;  %v7839_v23 = vmul.f32 %v7810_v36, %v15549_v18  ;;  %v7885_v42 = vrot.slane %v7883_v6, 1  ;;  %v7886_v57 = vrot.slane %v7883_v6, 2 }
 0x55c   : >> { %v7848_v0 = vrot.slane %v7847_v1, 4  ;;  %v7928_v19 = vrot.slane %v9188_v50, %v11597_v60 }
 0x55d   : >> { %v7855_v54 = vsel %vm492_vm0, %v7840_v7, 0.0  ;;  %v7854_v63 = vsel %vm492_vm0, %v7839_v23, 0.0  ;;  %v7921_v23 = vcombine.high %v9188_v50, %v9188_v50 }
 0x55e   : >> { %v7856_v37 = vadd.f32 %v7855_v54, %v7854_v63  ;;  %v7825_v5 = vpop.permute.xlu1 %7824  ;;  %v7821_v39 = vpop.permute.xlu0 %7820  ;;  %v7849_v40 = vadd.f32 %v7848_v0, %v7847_v1  ;;  %v9214_v54 = vld.sshfl [vmem:[%s15190_s21 + $0x18] sm:$0x33 pattern:$0x75316420] }
 0x55f   : >> { %v7842_v28 = vmul.f32 %v7825_v5, %v15555_v33  ;;  %v7841_v9 = vmul.f32 %v7821_v39, %v15557_v11  ;;  %v7887_v5 = vrot.slane %v7883_v6, 3 }
 0x560   : >> { %v7857_v38 = vrot.slane %v7856_v37, 4  ;;  %v7850_v14 = vrot.slane %v7849_v40, 2 }
 0x561   : >> { %v7864_v35 = vsel %vm492_vm0, %v7842_v28, 0.0  ;;  %v7863_v51 = vsel %vm492_vm0, %v7841_v9, 0.0  ;;  %v7935_v28 = vrot.slane %v7921_v23, %v11597_v60 }
 0x562   : >> { %v7858_v24 = vadd.f32 %v7857_v38, %v7856_v37  ;;  %v7865_v52 = vadd.f32 %v7864_v35, %v7863_v51  ;;  %v7836_v27 = vpop.permute.xlu1 %7835  ;;  %v7832_v59 = vpop.permute.xlu0 %7831  ;;  %v7851_v31 = vadd.f32 %v7850_v14, %v7849_v40  ;;  %v8168_v35 = vcombine.high %v9214_v54, %v9214_v54 }
 0x563   : >> { %v7844_v17 = vmul.f32 %v7836_v27, %v15569_v13  ;;  %v7843_v61 = vmul.f32 %v7832_v59, %v15571_v41  ;;  %v7936_v27 = vcombine.high %v7928_v19, %v7928_v19  ;;  %v7991_v59 = vrot.slane %v7935_v28, %v11594_v58 }
 0x564   : >> { %v7859_v16 = vrot.slane %v7858_v24, 2  ;;  %v7866_v2 = vrot.slane %v7865_v52, 4  ;;  %v7852_v36 = vrot.slane %v7851_v31, 1  ;;  %v8182_v14 = vrot.slane %v8168_v35, %v11597_v60  ;;  %v9194_v35 = vld [vmem:[%s15202_s4 + $0x140] sm:$0xff] }
 0x565   : >> { %v7873_v25 = vsel %vm492_vm0, %v7844_v17, 0.0  ;;  %v7872_v44 = vsel %vm492_vm0, %v7843_v61, 0.0 }
 0x566   : >> { %v7860_v56 = vadd.f32 %v7859_v16, %v7858_v24  ;;  %v7867_v15 = vadd.f32 %v7866_v2, %v7865_v52  ;;  %v7874_v47 = vadd.f32 %v7873_v25, %v7872_v44  ;;  %v7957_v48 = vpop.permute.xlu1 %7956  ;;  %v15578_v55 = vpop.permute.xlu0 %7945  ;;  %v7853_v63 = vadd.f32 %v7852_v36, %v7851_v31 }
 0x567   : >> { %v8175_v2 = vrot.slane %v9214_v54, %v11597_v60  ;;  %v8006_v31 = vmul.f32 %v7991_v59, %v7957_v48  ;;  %v7987_v48 = vrot.slane %v7928_v19, %v11594_v58  ;;  %v9195_v19 = vld [vmem:[%s15202_s4 + $0x148] sm:$0xff] }
 0x568   : >> { %v7861_v26 = vrot.slane %v7860_v56, 1  ;;  %v7868_v49 = vrot.slane %v7867_v15, 2  ;;  %v7875_v20 = vrot.slane %v7874_v47, 4  ;;  %v7892_v24 = vadd.f32 %v7883_v6, %v7853_v63  ;;  %v9196_v6 = vld [vmem:[%s15202_s4 + $0x150] sm:$0xff] }
 0x56a   : >> { %v7862_v4 = vadd.f32 %v7861_v26, %v7860_v56  ;;  %v7869_v3 = vadd.f32 %v7868_v49, %v7867_v15  ;;  %v7876_v62 = vadd.f32 %v7875_v20, %v7874_v47  ;;  %v7968_v1 = vpop.permute.xlu1 %7967  ;;  %v7961_v29 = vpop.permute.xlu0 %7960  ;;  %v7995_v56 = vrot.slane %v7936_v27, %v11594_v58  ;;  %v9240_v15 = vld.sshfl [vmem:[%s15190_s21 + $0x1c] sm:$0x33 pattern:$0x75316420] }
 0x56b   : >> { %v9197_v47 = vld [vmem:[%s15202_s4 + $0x158] sm:$0xff]  ;;  %v8007_v26 = vmul.f32 %v7991_v59, %v7961_v29  ;;  %v7937_v49 = vcombine.high %v7935_v28, %v7935_v28  ;;  %v8238_v20 = vrot.slane %v8182_v14, %v11594_v58  ;;  %v15605_v50 = vrot.slane %v9240_v15, %v11597_v60 }
 0x56c   : >> { %v7870_v30 = vrot.slane %v7869_v3, 1  ;;  %v7877_v7 = vrot.slane %v7876_v62, 2  ;;  %v7893_v0 = vadd.f32 %v7885_v42, %v7862_v4  ;;  %v8183_v4 = vcombine.high %v8175_v2, %v8175_v2 }
 0x56d   : >> { %v8025_v36 = vmul.f32 %v9197_v47, %v15547_v34  ;;  %v8008_v29 = vmul.f32 %v7995_v56, %v7968_v1  ;;  %v7999_v54 = vrot.slane %v7937_v49, %v11594_v58  ;;  %v9248_v49 = vld [vmem:[%s15202_s4 + $0x1d0] sm:$0xff] }
 0x56e   : >> { %v7871_v21 = vadd.f32 %v7870_v30, %v7869_v3  ;;  %v7878_v22 = vadd.f32 %v7877_v7, %v7876_v62  ;;  %v15582_v12 = vpop.permute.xlu1 %7949  ;;  %v7972_v8 = vpop.permute.xlu0 %7971  ;;  %v7900_v9 = vrot.slane %v7893_v0, 7  ;;  %v8415_v62 = vcombine.high %v9240_v15, %v9240_v15  ;;  %v9199_v30 = vld [vmem:[%s15202_s4 + $0x168] sm:$0xff]  ;;  %v9198_v7 = vld [vmem:[%s15202_s4 + $0x160] sm:$0xff] }
 0x56f   : >> { %v8009_v23 = vmul.f32 %v7995_v56, %v7972_v8  ;;  %v8184_v0 = vcombine.high %v8182_v14, %v8182_v14  ;;  %v8242_v63 = vrot.slane %v8183_v4, %v11594_v58  ;;  %v8026_v1 = vmul.f32 %v9198_v7, %v15557_v11  ;;  %v9201_v56 = vld [vmem:[%s15202_s4 + $0x178] sm:$0xff] }
 0x570   : >> { %v7894_v37 = vadd.f32 %v7886_v57, %v7871_v21  ;;  %v7879_v39 = vrot.slane %v7878_v22, 1  ;;  %v7901_v17 = vsel %vm6910_vm10, %v7900_v9, %v7892_v24  ;;  %v8024_v57 = vmul.f32 %v9196_v6, %v15549_v18  ;;  %v9223_v18 = vld [vmem:[%s15202_s4 + $0x198] sm:$0xff] }
 0x571   : >> { %v15612_v21 = vadd.f32 %v8025_v36, %v8007_v26  ;;  %v15623_v9 = vrot.slane %v8415_v62, %v11597_v60  ;;  %v8005_v24 = vmul.f32 %v7987_v48, %v15582_v12  ;;  %v15633_v11 = vadd.f32 %v8026_v1, %v8008_v29  ;;  %v9249_v26 = vld [vmem:[%s15202_s4 + $0x1d8] sm:$0xff] }
 0x572   : >> { %v7880_v32 = vadd.f32 %v7879_v39, %v7878_v22  ;;  %v15587_v40 = vpop.permute.xlu1 %7982  ;;  %v15589_v38 = vpop.permute.xlu0 %7978  ;;  %v7902_v51 = vrot.slane %v7894_v37, 6  ;;  %v15614_v22 = vadd.f32 %v8024_v57, %v8006_v31  ;;  %v8027_v39 = vmul.f32 %v9199_v30, %v15555_v33  ;;  %v9221_v57 = vld [vmem:[%s15202_s4 + $0x188] sm:$0xff]  ;;  %v9220_v30 = vld [vmem:[%s15202_s4 + $0x180] sm:$0xff] }
 0x573   : >> { %v8246_v27 = vrot.slane %v8184_v0, %v11594_v58  ;;  %v8272_v59 = vmul.f32 %v9223_v18, %v15612_v21  ;;  %v8485_v15 = vrot.slane %v15623_v9, %v11594_v58  ;;  %v8011_v4 = vmul.f32 %v7999_v54, %v15587_v40 }
 0x574   : >> { %v7895_v52 = vadd.f32 %v7887_v5, %v7880_v32  ;;  %v7903_v25 = vsel %vm6913_vm11, %v7902_v51, %v7901_v17  ;;  %v9222_v5 = vld [vmem:[%s15202_s4 + $0x190] sm:$0xff]  ;;  %v8430_v32 = vcombine.high %v15605_v50, %v15605_v50  ;;  %v8004_v51 = vmul.f32 %v7987_v48, %v15578_v55  ;;  %v9224_v55 = vld [vmem:[%s15202_s4 + $0x1a0] sm:$0xff] }
 0x575   : >> { %v15631_v33 = vadd.f32 %v8027_v39, %v8009_v23  ;;  %v8271_v17 = vmul.f32 %v9222_v5, %v15614_v22  ;;  %v8029_v62 = vmul.f32 %v9201_v56, %v15569_v13  ;;  %v9250_v13 = vld [vmem:[%s15202_s4 + $0x1e0] sm:$0xff] }
 0x576   : >> { %v7904_v61 = vrot.slane %v7895_v52, 5  ;;  %v8208_v46 = vpop.permute.xlu1 %8207  ;;  %v8204_v16 = vpop.permute.xlu0 %8203  ;;  %v8234_v52 = vrot.slane %v8175_v2, %v11594_v58  ;;  %v9200_v2 = vld [vmem:[%s15202_s4 + $0x170] sm:$0xff]  ;;  %v8489_v47 = vrot.slane %v8430_v32, %v11594_v58 }
 0x577   : >> { %v8254_v8 = vmul.f32 %v8238_v20, %v8208_v46  ;;  %v8253_v28 = vmul.f32 %v8238_v20, %v8204_v16  ;;  %v8028_v36 = vmul.f32 %v9200_v2, %v15571_v41  ;;  %v8481_v41 = vrot.slane %v15605_v50, %v11594_v58 }
 0x578   : >> { %v7905_v44 = vsel %vm6916_vm12, %v7904_v61, %v7903_v25  ;;  %v9225_v61 = vld [vmem:[%s15202_s4 + $0x1a8] sm:$0xff]  ;;  %v8023_v25 = vmul.f32 %v9195_v19, %v15529_v53  ;;  %v8273_v53 = vmul.f32 %v9224_v55, %v15633_v11 }
 0x579   : >> { %9184 = vst.msk [vmem:[%s15295_s9 + $0x10] sm:$0xf] %vm6591_vm14, %v7905_v44  ;;  %v8022_v44 = vmul.f32 %v9194_v35, %v15531_v43  ;;  %v15648_v6 = vadd.f32 %v8272_v59, %v8254_v8  ;;  %v15650_v31 = vadd.f32 %v8271_v17, %v8253_v28  ;;  %v8274_v20 = vmul.f32 %v9225_v61, %v15631_v33  ;;  %v9226_v59 = vld [vmem:[%s15202_s4 + $0x1b0] sm:$0xff] }
 0x57a   : >> { %v8219_v42 = vpop.permute.xlu1 %8218  ;;  %v8215_v3 = vpop.permute.xlu0 %8214  ;;  %v15656_v43 = vadd.f32 %v8023_v25, %v8005_v24  ;;  %v15684_v28 = vadd.f32 %v8029_v62, %v8011_v4  ;;  %v9246_v25 = vld [vmem:[%s15202_s4 + $0x1c0] sm:$0xff]  ;;  %v9252_v62 = vld [vmem:[%s15202_s4 + $0x1f0] sm:$0xff] }
 0x57b   : >> { %v8256_v46 = vmul.f32 %v8242_v63, %v8219_v42  ;;  %v8255_v14 = vmul.f32 %v8242_v63, %v8215_v3  ;;  %v15658_v42 = vadd.f32 %v8022_v44, %v8004_v51  ;;  %v8010_v3 = vmul.f32 %v7999_v54, %v15589_v38  ;;  %v9251_v54 = vld [vmem:[%s15202_s4 + $0x1e8] sm:$0xff] }
 0x57c   : >> { %v8519_v5 = vmul.f32 %v9249_v26, %v15648_v6  ;;  %v8518_v38 = vmul.f32 %v9248_v49, %v15650_v31 }
 0x57d   : >> { %v15666_v0 = vadd.f32 %v8274_v20, %v8256_v46  ;;  %v15668_v63 = vadd.f32 %v8273_v53, %v8255_v14  ;;  %v8269_v39 = vmul.f32 %v9220_v30, %v15658_v42  ;;  %v15686_v32 = vadd.f32 %v8028_v36, %v8010_v3  ;;  %v9247_v14 = vld [vmem:[%s15202_s4 + $0x1c8] sm:$0xff]  ;;  %v9253_v3 = vld [vmem:[%s15202_s4 + $0x1f8] sm:$0xff] }
 0x57e   : >> { %v8197_v34 = vpop.permute.xlu1 %8196  ;;  %v8193_v37 = vpop.permute.xlu0 %8192 }
 0x57f   : >> { %v8252_v7 = vmul.f32 %v8234_v52, %v8197_v34  ;;  %v8251_v48 = vmul.f32 %v8234_v52, %v8193_v37  ;;  %v8431_v34 = vcombine.high %v15623_v9, %v15623_v9  ;;  %v8270_v37 = vmul.f32 %v9221_v57, %v15656_v43  ;;  %v9227_v52 = vld [vmem:[%s15202_s4 + $0x1b8] sm:$0xff] }
 0x580   : >> { %v8521_v50 = vmul.f32 %v9251_v54, %v15666_v0  ;;  %v8520_v9 = vmul.f32 %v9250_v13, %v15668_v63  ;;  %v8276_v2 = vmul.f32 %v9227_v52, %v15684_v28 }
 0x581   : >> { %v15690_v51 = vadd.f32 %v8270_v37, %v8252_v7  ;;  %v15692_v24 = vadd.f32 %v8269_v39, %v8251_v48 }
 0x582   : >> { %v8230_v12 = vpop.permute.xlu1 %8229  ;;  %v8226_v16 = vpop.permute.xlu0 %8225 }
 0x583   : >> { %v8258_v17 = vmul.f32 %v8246_v27, %v8230_v12  ;;  %v8257_v61 = vmul.f32 %v8246_v27, %v8226_v16  ;;  %v8275_v27 = vmul.f32 %v9226_v59, %v15686_v32  ;;  %v8516_v26 = vmul.f32 %v9246_v25, %v15692_v24 }
 0x585   : >> { %v15715_v53 = vadd.f32 %v8276_v2, %v8258_v17  ;;  %v15717_v4 = vadd.f32 %v8275_v27, %v8257_v61 }
 0x586   : >> { %v8455_v29 = vpop.permute.xlu1 %8454  ;;  %v8451_v23 = vpop.permute.xlu0 %8450 }
 0x587   : >> { %v8501_v18 = vmul.f32 %v8485_v15, %v8455_v29  ;;  %v8500_v40 = vmul.f32 %v8485_v15, %v8451_v23  ;;  %v8493_v15 = vrot.slane %v8431_v34, %v11594_v58  ;;  %v8523_v23 = vmul.f32 %v9253_v3, %v15715_v53 }
 0x589   : >> { %v15680_v1 = vadd.f32 %v8519_v5, %v8501_v18  ;;  %v15682_v8 = vadd.f32 %v8518_v38, %v8500_v40  ;;  %v8522_v18 = vmul.f32 %v9252_v62, %v15717_v4 }
 0x58a   : >> { %v8466_v19 = vpop.permute.xlu1 %8465  ;;  %v8462_v35 = vpop.permute.xlu0 %8461 }
 0x58b   : >> { %v8503_v55 = vmul.f32 %v8489_v47, %v8466_v19  ;;  %v8502_v46 = vmul.f32 %v8489_v47, %v8462_v35  ;;  %8653 = vst.msk [vmem:[#allocation2 + $0x18] sm:$0xff] %vm492_vm0, %v15680_v1  ;;  %8652 = vst.msk [vmem:[#allocation2 + $0x10] sm:$0xff] %vm492_vm0, %v15682_v8  ;;  %v8517_v47 = vmul.f32 %v9247_v14, %v15690_v51 }
 0x58d   : >> { %v15702_v44 = vadd.f32 %v8521_v50, %v8503_v55  ;;  %v15704_v56 = vadd.f32 %v8520_v9, %v8502_v46 }
 0x58e   : >> { %v8444_v12 = vpop.permute.xlu1 %8443  ;;  %v8440_v16 = vpop.permute.xlu0 %8439 }
 0x58f   : >> { %v8499_v49 = vmul.f32 %v8481_v41, %v8444_v12  ;;  %v8498_v20 = vmul.f32 %v8481_v41, %v8440_v16  ;;  %8655 = vst.msk [vmem:[#allocation2 + $0x28] sm:$0xff] %vm492_vm0, %v15702_v44  ;;  %8654 = vst.msk [vmem:[#allocation2 + $0x20] sm:$0xff] %vm492_vm0, %v15704_v56 }
 0x591   : >> { %v15721_v36 = vadd.f32 %v8517_v47, %v8499_v49  ;;  %v15723_v57 = vadd.f32 %v8516_v26, %v8498_v20 }
 0x592   : >> { %v8477_v30 = vpop.permute.xlu1 %8476  ;;  %v8473_v7 = vpop.permute.xlu0 %8472 }
 0x593   : >> { %v8505_v48 = vmul.f32 %v8493_v15, %v8477_v30  ;;  %v8504_v29 = vmul.f32 %v8493_v15, %v8473_v7  ;;  %8651 = vst.msk [vmem:[#allocation2 + $0x8] sm:$0xff] %vm492_vm0, %v15721_v36  ;;  %8650 = vst.msk [vmem:[#allocation2] sm:$0xff] %vm492_vm0, %v15723_v57 }
 0x595   : >> { %v15731_v40 = vadd.f32 %v8523_v23, %v8505_v48  ;;  %v15733_v5 = vadd.f32 %v8522_v18, %v8504_v29  ;;  %v9207_v29 = vld [vmem:[%s15248_s22 + $0x14] sm:$0xf]  ;;  %v9233_v18 = vld [vmem:[%s15248_s22 + $0x18] sm:$0xf] }
 0x596   : >> { %v8061_v38 = vpop.permute.xlu1 %8060  ;;  %v8057_v54 = vpop.permute.xlu0 %8056 }
 0x597   : >> { %v8087_v13 = vmul.f32 %v8061_v38, %v15612_v21  ;;  %v8086_v41 = vmul.f32 %v8057_v54, %v15614_v22  ;;  %8657 = vst.msk [vmem:[#allocation2 + $0x38] sm:$0xff] %vm492_vm0, %v15731_v40  ;;  %8656 = vst.msk [vmem:[#allocation2 + $0x30] sm:$0xff] %vm492_vm0, %v15733_v5 }
 0x599   : >> { %v8102_v34 = vsel %vm492_vm0, %v8087_v13, 0.0  ;;  %v8101_v37 = vsel %vm492_vm0, %v8086_v41, 0.0  ;;  %v15764_v41 = vmul.f32 %v9207_v29, %v16232_v45 }
 0x59a   : >> { %v8308_v39 = vpop.permute.xlu1 %8307  ;;  %v8304_v19 = vpop.permute.xlu0 %8303  ;;  %v8103_v35 = vadd.f32 %v8102_v34, %v8101_v37  ;;  %v15767_v34 = vmul.f32 %v9233_v18, %v16232_v45 }
 0x59b   : >> { %v8334_v50 = vmul.f32 %v8308_v39, %v15648_v6  ;;  %v8333_v9 = vmul.f32 %v8304_v19, %v15650_v31  ;;  %v8134_v18 = vrot.slane %v15764_v41, 3 }
 0x59c   : >> { %v8104_v22 = vrot.slane %v8103_v35, 4 }
 0x59d   : >> { %v8349_v59 = vsel %vm492_vm0, %v8334_v50, 0.0  ;;  %v8348_v17 = vsel %vm492_vm0, %v8333_v9, 0.0 }
 0x59e   : >> { %v8555_v21 = vpop.permute.xlu1 %8554  ;;  %v8551_v52 = vpop.permute.xlu0 %8550  ;;  %v8105_v46 = vadd.f32 %v8104_v22, %v8103_v35  ;;  %v8350_v2 = vadd.f32 %v8349_v59, %v8348_v17  ;;  %v9259_v22 = vld [vmem:[%s15248_s22 + $0x1c] sm:$0xf] }
 0x59f   : >> { %v8581_v27 = vmul.f32 %v8555_v21, %v15680_v1  ;;  %v8580_v6 = vmul.f32 %v8551_v52, %v15682_v8 }
 0x5a0   : >> { %v8106_v26 = vrot.slane %v8105_v46, 2  ;;  %v8351_v20 = vrot.slane %v8350_v2, 4 }
 0x5a1   : >> { %v8596_v1 = vsel %vm492_vm0, %v8581_v27, 0.0  ;;  %v8595_v8 = vsel %vm492_vm0, %v8580_v6, 0.0 }
 0x5a2   : >> { %v8072_v61 = vpop.permute.xlu1 %8071  ;;  %v8068_v55 = vpop.permute.xlu0 %8067  ;;  %v8107_v23 = vadd.f32 %v8106_v26, %v8105_v46  ;;  %v8597_v38 = vadd.f32 %v8596_v1, %v8595_v8  ;;  %v8352_v54 = vadd.f32 %v8351_v20, %v8350_v2  ;;  %v8379_v46 = vrot.slane %v15767_v34, 1 }
 0x5a3   : >> { %v8089_v14 = vmul.f32 %v8072_v61, %v15631_v33  ;;  %v8088_v25 = vmul.f32 %v8068_v55, %v15633_v11  ;;  %v8132_v55 = vrot.slane %v15764_v41, 1  ;;  %v8380_v1 = vrot.slane %v15767_v34, 2 }
 0x5a4   : >> { %v8108_v35 = vrot.slane %v8107_v23, 1  ;;  %v8353_v52 = vrot.slane %v8352_v54, 2 }
 0x5a5   : >> { %v8111_v31 = vsel %vm492_vm0, %v8089_v14, 0.0  ;;  %v8110_v12 = vsel %vm492_vm0, %v8088_v25, 0.0 }
 0x5a6   : >> { %v8112_v16 = vadd.f32 %v8111_v31, %v8110_v12  ;;  %v8319_v15 = vpop.permute.xlu1 %8318  ;;  %v8315_v47 = vpop.permute.xlu0 %8314  ;;  %v8109_v2 = vadd.f32 %v8108_v35, %v8107_v23  ;;  %v15781_v12 = vmul.f32 %v9259_v22, %v16232_v45  ;;  %v8354_v26 = vadd.f32 %v8353_v52, %v8352_v54 }
 0x5a7   : >> { %v8336_v49 = vmul.f32 %v8319_v15, %v15666_v0  ;;  %v8335_v33 = vmul.f32 %v8315_v47, %v15668_v63  ;;  %v8133_v15 = vrot.slane %v15764_v41, 2 }
 0x5a8   : >> { %v8113_v11 = vrot.slane %v8112_v16, 4 }
 0x5a9   : >> { %v8358_v62 = vsel %vm492_vm0, %v8336_v49, 0.0  ;;  %v8357_v30 = vsel %vm492_vm0, %v8335_v33, 0.0 }
 0x5aa   : >> { %v8114_v3 = vadd.f32 %v8113_v11, %v8112_v16  ;;  %v8566_v7 = vpop.permute.xlu1 %8565  ;;  %v8562_v48 = vpop.permute.xlu0 %8561  ;;  %v8359_v13 = vadd.f32 %v8358_v62, %v8357_v30  ;;  %v8140_v62 = vadd.f32 %v8132_v55, %v8109_v2 }
 0x5ab   : >> { %v8583_v0 = vmul.f32 %v8566_v7, %v15702_v44  ;;  %v8582_v63 = vmul.f32 %v8562_v48, %v15704_v56  ;;  %v8598_v44 = vrot.slane %v8597_v38, 4 }
 0x5ac   : >> { %v8115_v37 = vrot.slane %v8114_v3, 2  ;;  %v8360_v59 = vrot.slane %v8359_v13, 4 }
 0x5ad   : >> { %v8605_v21 = vsel %vm492_vm0, %v8583_v0, 0.0  ;;  %v8604_v56 = vsel %vm492_vm0, %v8582_v63, 0.0  ;;  %v8599_v16 = vadd.f32 %v8598_v44, %v8597_v38  ;;  %v8355_v0 = vrot.slane %v8354_v26, 1 }
 0x5ae   : >> { %v8050_v39 = vpop.permute.xlu1 %8049  ;;  %v8046_v19 = vpop.permute.xlu0 %8045  ;;  %v8116_v14 = vadd.f32 %v8115_v37, %v8114_v3  ;;  %v8606_v27 = vadd.f32 %v8605_v21, %v8604_v56  ;;  %v8361_v49 = vadd.f32 %v8360_v59, %v8359_v13 }
 0x5af   : >> { %v8085_v50 = vmul.f32 %v8050_v39, %v15656_v43  ;;  %v8084_v9 = vmul.f32 %v8046_v19, %v15658_v42  ;;  %v8600_v29 = vrot.slane %v8599_v16, 2 }
 0x5b0   : >> { %v8117_v20 = vrot.slane %v8116_v14, 1  ;;  %v8607_v30 = vrot.slane %v8606_v27, 4  ;;  %v8362_v63 = vrot.slane %v8361_v49, 2 }
 0x5b1   : >> { %v8093_v17 = vsel %vm492_vm0, %v8085_v50, 0.0  ;;  %v8092_v61 = vsel %vm492_vm0, %v8084_v9, 0.0  ;;  %v8601_v56 = vadd.f32 %v8600_v29, %v8599_v16 }
 0x5b2   : >> { %v8094_v43 = vadd.f32 %v8093_v17, %v8092_v61  ;;  %v8083_v25 = vpop.permute.xlu1 %8082  ;;  %v8079_v42 = vpop.permute.xlu0 %8078  ;;  %v8118_v37 = vadd.f32 %v8117_v20, %v8116_v14  ;;  %v8608_v44 = vadd.f32 %v8607_v30, %v8606_v27  ;;  %v8356_v17 = vadd.f32 %v8355_v0, %v8354_v26 }
 0x5b3   : >> { %v8091_v6 = vmul.f32 %v8083_v25, %v15684_v28  ;;  %v8090_v31 = vmul.f32 %v8079_v42, %v15686_v32  ;;  %v8363_v61 = vadd.f32 %v8362_v63, %v8361_v49 }
 0x5b4   : >> { %v8095_v47 = vrot.slane %v8094_v43, 4 }
 0x5b5   : >> { %v8120_v33 = vsel %vm492_vm0, %v8091_v6, 0.0  ;;  %v8119_v11 = vsel %vm492_vm0, %v8090_v31, 0.0  ;;  %v8609_v31 = vrot.slane %v8608_v44, 2 }
 0x5b6   : >> { %v8096_v8 = vadd.f32 %v8095_v47, %v8094_v43  ;;  %v8121_v28 = vadd.f32 %v8120_v33, %v8119_v11  ;;  %v8297_v3 = vpop.permute.xlu1 %8296  ;;  %v8293_v32 = vpop.permute.xlu0 %8292  ;;  %v8141_v43 = vadd.f32 %v8133_v15, %v8118_v37  ;;  %v8602_v47 = vrot.slane %v8601_v56, 1 }
 0x5b7   : >> { %v8332_v7 = vmul.f32 %v8297_v3, %v15690_v51  ;;  %v8331_v48 = vmul.f32 %v8293_v32, %v15692_v24  ;;  %v8147_v51 = vrot.slane %v8140_v62, 7  ;;  %v8364_v11 = vrot.slane %v8363_v61, 1 }
 0x5b8   : >> { %v8097_v23 = vrot.slane %v8096_v8, 2  ;;  %v8122_v38 = vrot.slane %v8121_v28, 4 }
 0x5b9   : >> { %v8340_v54 = vsel %vm492_vm0, %v8332_v7, 0.0  ;;  %v8339_v13 = vsel %vm492_vm0, %v8331_v48, 0.0  ;;  %v8365_v63 = vadd.f32 %v8364_v11, %v8363_v61  ;;  %v8603_v61 = vadd.f32 %v8602_v47, %v8601_v56 }
 0x5ba   : >> { %v8098_v39 = vadd.f32 %v8097_v23, %v8096_v8  ;;  %v8123_v19 = vadd.f32 %v8122_v38, %v8121_v28  ;;  %v8341_v35 = vadd.f32 %v8340_v54, %v8339_v13  ;;  %v8330_v50 = vpop.permute.xlu1 %8329  ;;  %v8326_v9 = vpop.permute.xlu0 %8325  ;;  %v8149_v28 = vrot.slane %v8141_v43, 6 }
 0x5bb   : >> { %v8338_v24 = vmul.f32 %v8330_v50, %v15715_v53  ;;  %v8337_v21 = vmul.f32 %v8326_v9, %v15717_v4 }
 0x5bc   : >> { %v8099_v52 = vrot.slane %v8098_v39, 1  ;;  %v8124_v22 = vrot.slane %v8123_v19, 2  ;;  %v8342_v59 = vrot.slane %v8341_v35, 4 }
 0x5bd   : >> { %v8367_v55 = vsel %vm492_vm0, %v8338_v24, 0.0  ;;  %v8366_v14 = vsel %vm492_vm0, %v8337_v21, 0.0 }
 0x5be   : >> { %v8100_v25 = vadd.f32 %v8099_v52, %v8098_v39  ;;  %v8125_v42 = vadd.f32 %v8124_v22, %v8123_v19  ;;  %v8343_v2 = vadd.f32 %v8342_v59, %v8341_v35  ;;  %v8544_v6 = vpop.permute.xlu1 %8543  ;;  %v8540_v27 = vpop.permute.xlu0 %8539  ;;  %v8368_v53 = vadd.f32 %v8367_v55, %v8366_v14 }
 0x5bf   : >> { %v8579_v4 = vmul.f32 %v8544_v6, %v15721_v36  ;;  %v8578_v16 = vmul.f32 %v8540_v27, %v15723_v57  ;;  %v8610_v36 = vadd.f32 %v8609_v31, %v8608_v44  ;;  %v8381_v22 = vrot.slane %v15767_v34, 3 }
 0x5c0   : >> { %v8139_v26 = vadd.f32 %v15764_v41, %v8100_v25  ;;  %v8126_v49 = vrot.slane %v8125_v42, 1  ;;  %v8344_v33 = vrot.slane %v8343_v2, 2  ;;  %v8369_v20 = vrot.slane %v8368_v53, 4 }
 0x5c1   : >> { %v8587_v15 = vsel %vm492_vm0, %v8579_v4, 0.0  ;;  %v8586_v8 = vsel %vm492_vm0, %v8578_v16, 0.0  ;;  %v8611_v21 = vrot.slane %v8610_v36, 1 }
 0x5c2   : >> { %v8127_v3 = vadd.f32 %v8126_v49, %v8125_v42  ;;  %v8345_v32 = vadd.f32 %v8344_v33, %v8343_v2  ;;  %v8588_v62 = vadd.f32 %v8587_v15, %v8586_v8  ;;  %v8577_v30 = vpop.permute.xlu1 %8576  ;;  %v8573_v7 = vpop.permute.xlu0 %8572  ;;  %v8370_v48 = vadd.f32 %v8369_v20, %v8368_v53 }
 0x5c3   : >> { %v8585_v57 = vmul.f32 %v8577_v30, %v15731_v40  ;;  %v8584_v41 = vmul.f32 %v8573_v7, %v15733_v5  ;;  %v8148_v29 = vsel %vm6910_vm10, %v8147_v51, %v8139_v26  ;;  %v8387_v40 = vadd.f32 %v8379_v46, %v8356_v17 }
 0x5c4   : >> { %v8142_v23 = vadd.f32 %v8134_v18, %v8127_v3  ;;  %v8346_v38 = vrot.slane %v8345_v32, 1  ;;  %v8589_v0 = vrot.slane %v8588_v62, 4  ;;  %v8371_v54 = vrot.slane %v8370_v48, 2 }
 0x5c5   : >> { %v8614_v13 = vsel %vm492_vm0, %v8585_v57, 0.0  ;;  %v8613_v37 = vsel %vm492_vm0, %v8584_v41, 0.0  ;;  %v8150_v5 = vsel %vm6913_vm11, %v8149_v28, %v8148_v29  ;;  %v8626_v18 = vrot.slane %v15781_v12, 1 }
 0x5c6   : >> { %v8151_v39 = vrot.slane %v8142_v23, 5  ;;  %v8347_v19 = vadd.f32 %v8346_v38, %v8345_v32  ;;  %v8590_v35 = vadd.f32 %v8589_v0, %v8588_v62  ;;  %v8615_v50 = vadd.f32 %v8614_v13, %v8613_v37 }
 0x5c7   : >> { %v8372_v9 = vadd.f32 %v8371_v54, %v8370_v48  ;;  %v8388_v46 = vadd.f32 %v8380_v1, %v8365_v63  ;;  %v8394_v14 = vrot.slane %v8387_v40, 7  ;;  %v8627_v2 = vrot.slane %v15781_v12, 2 }
 0x5c8   : >> { %v8152_v51 = vsel %vm6916_vm12, %v8151_v39, %v8150_v5  ;;  %v8591_v44 = vrot.slane %v8590_v35, 2  ;;  %v8616_v24 = vrot.slane %v8615_v50, 4  ;;  %v8386_v52 = vadd.f32 %v15767_v34, %v8347_v19 }
 0x5c9   : >> { %9210 = vst.msk [vmem:[%s15295_s9 + $0x14] sm:$0xf] %vm6591_vm14, %v8152_v51  ;;  %v8373_v59 = vrot.slane %v8372_v9, 1  ;;  %v8612_v6 = vadd.f32 %v8611_v21, %v8610_v36  ;;  %v8634_v53 = vadd.f32 %v8626_v18, %v8603_v61  ;;  %v8396_v4 = vrot.slane %v8388_v46, 6 }
 0x5ca   : >> { %v8592_v17 = vadd.f32 %v8591_v44, %v8590_v35  ;;  %v8617_v55 = vadd.f32 %v8616_v24, %v8615_v50  ;;  %v8395_v27 = vsel %vm6910_vm10, %v8394_v14, %v8386_v52  ;;  %v8628_v26 = vrot.slane %v15781_v12, 3 }
 0x5cb   : >> { %v8374_v43 = vadd.f32 %v8373_v59, %v8372_v9  ;;  %v8397_v34 = vsel %vm6913_vm11, %v8396_v4, %v8395_v27  ;;  %v8635_v33 = vadd.f32 %v8627_v2, %v8612_v6  ;;  %v8641_v20 = vrot.slane %v8634_v53, 7 }
 0x5cc   : >> { %v8593_v25 = vrot.slane %v8592_v17, 1  ;;  %v8618_v42 = vrot.slane %v8617_v55, 2 }
 0x5cd   : >> { %v8389_v31 = vadd.f32 %v8381_v22, %v8374_v43  ;;  %v8643_v3 = vrot.slane %v8635_v33, 6 }
 0x5ce   : >> { %v8594_v16 = vadd.f32 %v8593_v25, %v8592_v17  ;;  %v8619_v56 = vadd.f32 %v8618_v42, %v8617_v55 }
 0x5cf   : >> { %v8398_v47 = vrot.slane %v8389_v31, 5 }
 0x5d0   : >> { %v8633_v1 = vadd.f32 %v15781_v12, %v8594_v16  ;;  %v8620_v49 = vrot.slane %v8619_v56, 1 }
 0x5d1   : >> { %v8399_v11 = vsel %vm6916_vm12, %v8398_v47, %v8397_v34 }
 0x5d2   : >> { %9236 = vst.msk [vmem:[%s15295_s9 + $0x18] sm:$0xf] %vm6591_vm14, %v8399_v11  ;;  %v8621_v15 = vadd.f32 %v8620_v49, %v8619_v56  ;;  %v8642_v8 = vsel %vm6910_vm10, %v8641_v20, %v8633_v1 }
 0x5d3   : >> { %v8644_v62 = vsel %vm6913_vm11, %v8643_v3, %v8642_v8  ;;  %6661 = sbr.rel (!%p6659_p7) target bundleno = 1103 (0x44f), region = 201 }
 0x5d4   : >> { %v8636_v28 = vadd.f32 %v8628_v26, %v8621_v15 }
 0x5d6   : >> { %v8645_v32 = vrot.slane %v8636_v28, 5 }
 0x5d8   : >> { %v8646_v30 = vsel %vm6916_vm12, %v8645_v32, %v8644_v62 }
 0x5d9   : >> { %9262 = vst.msk [vmem:[%s15295_s9 + $0x1c] sm:$0xf] %vm6591_vm14, %v8646_v30 }
 0x5da   : > { %11000 = shalt.err (!%p10997_p11)
}
 0x5db   : > { %s11001_s7 = scalar_lea.hbm %s15837_s5, 4096  ;;  %s11005_s28 = scalar_lea.hbm %s16235_s14, 8192 }
 0x5dc   : > { %p11002_p6 = scmp.ne.s32.totalorder %s15837_s5, %s11001_s7  ;;  %p11006_p1 = scmp.lt.u32.totalorder %s15837_s5, %s16235_s14 }
 0x5dd   : > { %p11007_p2 = scmp.lt.u32.totalorder %s11005_s28, %s11001_s7  ;;  %p11009_p8 = scmp.lt.u32.totalorder %s11001_s7, %s15837_s5 }
 0x5de   : > { %p11003_p4 = pnand %p11002_p6, %p16236_p10 }
 0x5df   : > { %p11008_p7 = por %p11007_p2, %p11006_p1 }
 0x5e0   : > { %p11004_p0 = pneg %p11003_p4 }
 0x5e1   : > { %p11010_p5 = por %p11009_p8, %p11008_p7 }
 0x5e3   : > { %p11011_p9 = pnand %p11010_p5, %p11004_p0 }
 0x5e5   : > { %11014 = shalt.err (!%p11011_p9)
}
 0x5e6   : > { %s11109_s15 = smov 64   ;;  %s11110_s4 = smov 4  }
 0x5e7   : > { %9337 = dma.vmem_to_hbm [thread:$0]  (%p16236_p10), %s15841_s19, 4096, %s15837_s5, %s8659_s10, %s11109_s15, %s11109_s15, %s11110_s4  }
 0x5e8 PF: > { %s16237_s22 = sld [smem:[#allocation24_spill]]  ;;  %s16238_s9 = sld [smem:[#allocation28_spill]] }
 0x5e9   : > { %p16240_p3 = scmp.ge.s32.totalorder %s11089_s29, 2 }
 0x5ee   : > { %s8689_s20 = sand.u32 1, %s16237_s22   ;;  %p16239_p13 = scmp.ne.s32.totalorder %s16238_s9, 0 }
 0x5ef   : > { %s8690_s17 = scalar_lea.sflag [#allocation7], %s8689_s20 }
 0x5f0   : > { %p9363_p12 = pnand %p16240_p3, %p16239_p13 }
 0x5f2   : > { %11064 = dma.done.wait (!%p9363_p12), %s8690_s17, 4096  }
 0x5f3   : > { %11066 = vsyncadd (!%p9363_p12), %s8690_s17, 4294963200  ;;  %s30_s29 = sadd.s32 1, %s11089_s29   ;;  %s16241_s12 = sld [smem:[#allocation30_spill]] }
 0x5f4   : > { %p27_p11 = scmp.ge.s32.totalorder %s30_s29, 4   ;;  %s16242_s27 = sld [smem:[#allocation26_spill]] }
 0x5f5   : > { %s16243_s28 = sld [smem:[#allocation29_spill]]  ;;  %s16244_s24 = smov %s11073_s25 }
 0x5f6   : > { %s16245_s25 = smov %s11077_s26  ;;  %29 = sbr.rel (!%p27_p11) target bundleno = 16 (0x10), region = 212 }
 0x5f9   : > { %s16246_s26 = smov %s16241_s12 }
 0x5fd   :  { %8695 = vsyncpa [#allocation6], 1 }
 0x5fe   :  { %8697 = vsyncpa [#allocation6 + $0x1], 1 }
 0x5ff   :  { %8698 = vsyncpa [#allocation9], 1 }
 0x600   :  { %8700 = vsyncpa [#allocation9 + $0x1], 1 }
 0x601   :  { %8701 = vsyncpa [#allocation12], 1 }
 0x602   :  { %8703 = vsyncpa [#allocation12 + $0x1], 1 }
 0x603   :  { %8704 = vsyncpa [#allocation15], 1 }
 0x604   :  { %8705 = vsyncpa [#allocation7], 1 }
 0x605   :  { %8707 = vsyncpa [#allocation7 + $0x1], 1 }

</bundles_post_ra>
